<compile_context>
chip_gen: v6e
topology: v6e:2x2x1
jax: 0.10.0
libtpu: 0.0.40
codegen_flags: <defaults>
</compile_context>

<pallas_src>
import functools

import jax
import jax.numpy as jnp
from jax.experimental import pallas as pl
from jax.experimental.pallas import tpu as pltpu

BN_EPS = 1e-5
LANE = 128


def _round_up(n, m):
    return ((n + m - 1) // m) * m


def _mlp_kernel(x_ref,
                w1_ref, g1_ref, be1_ref,
                w2_ref, g2_ref, be2_ref,
                w3_ref, g3_ref, be3_ref,
                wc_ref, bc_ref,
                out_ref):
    """Fused forward pass; everything resident in VMEM (no grid: single invocation)."""

    def linear_bn_relu(h, w_ref, g_ref, be_ref):
        # Linear on the MXU (bf16 x bf16 -> f32 accumulation). Hidden-layer bias is
        # omitted: with training-mode BN it is exactly cancelled by the mean subtraction.
        h = jnp.dot(h.astype(jnp.bfloat16), w_ref[...],
                    preferred_element_type=jnp.float32)
        # Training-mode BatchNorm1d folded into one scale/shift FMA, fused with ReLU.
        mean = jnp.mean(h, axis=0, keepdims=True)
        var = jnp.mean((h - mean) * (h - mean), axis=0, keepdims=True)
        scale = g_ref[...] * jax.lax.rsqrt(var + BN_EPS)
        shift = be_ref[...] - mean * scale
        return jnp.maximum(h * scale + shift, 0.0)

    h = x_ref[...].astype(jnp.float32)
    h = linear_bn_relu(h, w1_ref, g1_ref, be1_ref)
    h = linear_bn_relu(h, w2_ref, g2_ref, be2_ref)
    h = linear_bn_relu(h, w3_ref, g3_ref, be3_ref)
    # Classifier Linear on the lane-dense padded width.
    out_ref[...] = (jnp.dot(h.astype(jnp.bfloat16), wc_ref[...],
                            preferred_element_type=jnp.float32)
                    + bc_ref[...]).astype(out_ref.dtype)


def init_params(key, sizes):
    """PyTorch-default-like init. Linear weights stored pre-transposed as [in, out].

    Linear: weight/bias ~ U(-1/sqrt(fan_in), 1/sqrt(fan_in)). BatchNorm1d: gamma=1, beta=0.
    """
    params = []
    keys = jax.random.split(key, 2 * len(sizes))
    for i, (fan_in, fan_out) in enumerate(sizes):
        bound = 1.0 / (fan_in ** 0.5)
        w = jax.random.uniform(keys[2 * i], (fan_in, fan_out),
                               minval=-bound, maxval=bound, dtype=jnp.float32)
        b = jax.random.uniform(keys[2 * i + 1], (1, fan_out),
                               minval=-bound, maxval=bound, dtype=jnp.float32)
        if i < len(sizes) - 1:  # hidden layers also carry BN params
            g = jnp.ones((1, fan_out), dtype=jnp.float32)
            be = jnp.zeros((1, fan_out), dtype=jnp.float32)
            params.append((w, b, g, be))
        else:
            params.append((w, b))
    return params


def prepare_params(params):
    """One-time wrapper-side weight prep (do once, reuse across inference calls):
       * cast weights to bf16 (halves HBM traffic for this DMA-bound kernel),
       * drop hidden-layer biases (exactly cancelled by training-mode BN),
       * zero-pad first-layer K to a multiple of 128 (lane-dense input, aligned K),
       * pad the classifier to a lane-dense multiple of 128 output columns."""
    (w1, _b1, g1, be1), (w2, _b2, g2, be2), (w3, _b3, g3, be3), (wc, bc) = params

    d_in = int(w1.shape[0])
    d_in_pad = _round_up(d_in, LANE)
    w1_p = jnp.zeros((d_in_pad, w1.shape[1]), w1.dtype).at[:d_in, :].set(w1)

    n_classes = int(wc.shape[1])
    n_pad = max(LANE, _round_up(n_classes, LANE))
    wc_p = jnp.zeros((wc.shape[0], n_pad), wc.dtype).at[:, :n_classes].set(wc)
    bc_p = jnp.zeros((1, n_pad), bc.dtype).at[:, :n_classes].set(bc)

    flat = (w1_p.astype(jnp.bfloat16), g1, be1,
            w2.astype(jnp.bfloat16), g2, be2,
            w3.astype(jnp.bfloat16), g3, be3,
            wc_p.astype(jnp.bfloat16), bc_p)
    return flat, n_classes, d_in


@functools.partial(jax.jit, static_argnames=("n_classes",))
def net_forward_prepared(x, flat_params, *, n_classes):
    B = x.shape[0]
    d_in_pad = flat_params[0].shape[0]
    n_pad = flat_params[-1].shape[1]

    # Zero-pad the input features to the padded K (lane-dense x; result unchanged).
    if x.shape[1] != d_in_pad:
        x = jnp.pad(x, ((0, 0), (0, d_in_pad - x.shape[1])))

    flat_args = (x,) + tuple(flat_params)

    # No grid: every array is one full block, resident in VMEM for the single invocation.
    vmem_spec = pl.BlockSpec(memory_space=pltpu.MemorySpace.VMEM)
    in_specs = [vmem_spec] * len(flat_args)
    out_spec = pl.BlockSpec(memory_space=pltpu.MemorySpace.VMEM)

    io_bytes = int(sum(a.size * a.dtype.itemsize for a in flat_args)) + B * n_pad * 4
    h1 = flat_params[0].shape[1]
    h2 = flat_params[3].shape[1]
    h3 = flat_params[6].shape[1]
    flops = 2 * B * (d_in_pad * h1 + h1 * h2 + h2 * h3 + h3 * n_pad)
    # vmem_limit sized to the real footprint (double-buffered I/O + headroom);
    # stays well under v7x's 64 MiB physical VMEM per TensorCore.
    vmem_limit = int(min(64 * 1024 * 1024,
                         max(24 * 1024 * 1024, 2 * io_bytes + (4 << 20))))

    out_padded = pl.pallas_call(
        _mlp_kernel,
        out_shape=jax.ShapeDtypeStruct((B, n_pad), jnp.float32),
        in_specs=in_specs,
        out_specs=out_spec,
        compiler_params=pltpu.CompilerParams(vmem_limit_bytes=vmem_limit),
        cost_estimate=pl.CostEstimate(flops=flops,
                                      transcendentals=h1 + h2 + h3,
                                      bytes_accessed=io_bytes),
    )(*flat_args)
    return out_padded[:, :n_classes]


def net_forward(x, params):
    """Convenience wrapper: prep + forward. For repeated inference, call
    prepare_params once and reuse its result with net_forward_prepared."""
    flat, n_classes, _d_in = prepare_params(params)
    return net_forward_prepared(x, flat, n_classes=n_classes)


def net_forward_ref(x, params):
    """Plain-JAX f32 reference (exact PyTorch training-mode forward semantics)."""
    h = x.astype(jnp.float32)
    for (w, b, g, be) in params[:-1]:
        h = h @ w + b
        mean = jnp.mean(h, axis=0, keepdims=True)
        var = jnp.mean((h - mean) ** 2, axis=0, keepdims=True)
        h = (h - mean) / jnp.sqrt(var + BN_EPS)
        h = h * g + be
        h = jnp.maximum(h, 0.0)
    wc, bc = params[-1]
    return h @ wc + bc


def _quantize_weights_like_kernel(params):
    """Same bf16 weight rounding the kernel sees, expressed back in f32 (biases kept)."""
    q = []
    for (w, b, g, be) in params[:-1]:
        q.append((w.astype(jnp.bfloat16).astype(jnp.float32), b, g, be))
    wc, bc = params[-1]
    q.append((wc.astype(jnp.bfloat16).astype(jnp.float32), bc))
    return q


if __name__ == "__main__":
    # Module default: sizes=[[784, 1024], [1024, 1024], [1024, 1024], [1024, 10]]
    sizes = [(784, 1024), (1024, 1024), (1024, 1024), (1024, 10)]
    batch = 8  # small test batch; kernel handles larger B identically (better DMA amortization)

    key = jax.random.PRNGKey(0)
    k_params, k_x = jax.random.split(key)
    params = init_params(k_params, sizes)
    x = jax.random.normal(k_x, (batch, sizes[0][0]), dtype=jnp.float32)

    flat, n_classes, _d_in = prepare_params(params)   # one-time weight prep
    out = net_forward_prepared(x, flat, n_classes=n_classes)
    out = jax.block_until_ready(out)
    assert out.shape == (batch, sizes[-1][1])

    # Kernel-math check: identical bf16-rounded weights, f32 reference math (also
    # validates bias cancellation under training-mode BN and the folded BN/ReLU).
    ref_q = net_forward_ref(x, _quantize_weights_like_kernel(params))
    assert jnp.allclose(out, ref_q, atol=5e-2, rtol=5e-2), "mismatch vs bf16-weight reference"

    # End-to-end check vs the original f32 semantics (only bf16 quantization noise).
    ref_f32 = net_forward_ref(x, params)
    assert jnp.allclose(out, ref_f32, atol=1e-1, rtol=1e-1), "mismatch vs f32 reference"

    # TODO(synk): the optional (loss, x) branch in the PyTorch forward uses an undefined
    # global `labels` with nn.CrossEntropyLoss; only the y=None inference path is kernelized.
    print("KERNEL_OK")
</pallas_src>

<mosaic_0001>
module attributes {stable_mosaic.version = 11 : i64} {
  func.func @_mlp_kernel(%arg0: memref<8x896xf32, #tpu.memory_space<vmem>>, %arg1: memref<896x1024xbf16, #tpu.memory_space<vmem>>, %arg2: memref<1x1024xf32, #tpu.memory_space<vmem>>, %arg3: memref<1x1024xf32, #tpu.memory_space<vmem>>, %arg4: memref<1024x1024xbf16, #tpu.memory_space<vmem>>, %arg5: memref<1x1024xf32, #tpu.memory_space<vmem>>, %arg6: memref<1x1024xf32, #tpu.memory_space<vmem>>, %arg7: memref<1024x1024xbf16, #tpu.memory_space<vmem>>, %arg8: memref<1x1024xf32, #tpu.memory_space<vmem>>, %arg9: memref<1x1024xf32, #tpu.memory_space<vmem>>, %arg10: memref<1024x128xbf16, #tpu.memory_space<vmem>>, %arg11: memref<1x128xf32, #tpu.memory_space<vmem>>, %arg12: memref<8x128xf32, #tpu.memory_space<vmem>>) attributes {dimension_semantics = [], scalar_prefetch = 0 : i64, scratch_operands = 0 : i64, tpu.core_type = #tpu.core_type<tc>} {
    %c0 = arith.constant 0 : index
    %c0_0 = arith.constant 0 : index
    %0 = vector.load %arg0[%c0, %c0_0] : memref<8x896xf32, #tpu.memory_space<vmem>>, vector<8x896xf32>
    %1 = arith.truncf %0 : vector<8x896xf32> to vector<8x896xbf16>
    %c0_1 = arith.constant 0 : index
    %c0_2 = arith.constant 0 : index
    %2 = vector.load %arg1[%c0_1, %c0_2] : memref<896x1024xbf16, #tpu.memory_space<vmem>>, vector<896x1024xbf16>
    %cst = arith.constant dense<0.000000e+00> : vector<8x1024xf32>
    %3 = tpu.matmul %1, %2, %cst {dimension_numbers = #tpu.dot_dimension_numbers<[1], [0], [0], [1], [0, 0, 1, 1], [], []>} : vector<8x896xbf16>, vector<896x1024xbf16>, vector<8x1024xf32> -> vector<8x1024xf32>
    %cst_3 = arith.constant dense<0.000000e+00> : vector<1024xf32>
    %4 = vector.multi_reduction <add>, %3, %cst_3 [0] : vector<8x1024xf32> to vector<1024xf32>
    %5 = vector.shape_cast %4 : vector<1024xf32> to vector<1x1024xf32>
    %cst_4 = arith.constant 8.000000e+00 : f32
    %6 = vector.broadcast %cst_4 : f32 to vector<1x1024xf32>
    %7 = arith.divf %5, %6 : vector<1x1024xf32>
    %8 = vector.broadcast %7 : vector<1x1024xf32> to vector<8x1024xf32>
    %9 = arith.subf %3, %8 : vector<8x1024xf32>
    %10 = vector.broadcast %7 : vector<1x1024xf32> to vector<8x1024xf32>
    %11 = arith.subf %3, %10 : vector<8x1024xf32>
    %12 = arith.mulf %9, %11 : vector<8x1024xf32>
    %cst_5 = arith.constant dense<0.000000e+00> : vector<1024xf32>
    %13 = vector.multi_reduction <add>, %12, %cst_5 [0] : vector<8x1024xf32> to vector<1024xf32>
    %14 = vector.shape_cast %13 : vector<1024xf32> to vector<1x1024xf32>
    %cst_6 = arith.constant 8.000000e+00 : f32
    %15 = vector.broadcast %cst_6 : f32 to vector<1x1024xf32>
    %16 = arith.divf %14, %15 : vector<1x1024xf32>
    %c0_7 = arith.constant 0 : index
    %c0_8 = arith.constant 0 : index
    %17 = vector.load %arg2[%c0_7, %c0_8] : memref<1x1024xf32, #tpu.memory_space<vmem>>, vector<1x1024xf32>
    %cst_9 = arith.constant 9.99999974E-6 : f32
    %18 = vector.broadcast %cst_9 : f32 to vector<1x1024xf32>
    %19 = arith.addf %16, %18 : vector<1x1024xf32>
    %20 = math.rsqrt %19 : vector<1x1024xf32>
    %21 = arith.mulf %17, %20 : vector<1x1024xf32>
    %c0_10 = arith.constant 0 : index
    %c0_11 = arith.constant 0 : index
    %22 = vector.load %arg3[%c0_10, %c0_11] : memref<1x1024xf32, #tpu.memory_space<vmem>>, vector<1x1024xf32>
    %23 = arith.mulf %7, %21 : vector<1x1024xf32>
    %24 = arith.subf %22, %23 : vector<1x1024xf32>
    %25 = vector.broadcast %21 : vector<1x1024xf32> to vector<8x1024xf32>
    %26 = arith.mulf %3, %25 : vector<8x1024xf32>
    %27 = vector.broadcast %24 : vector<1x1024xf32> to vector<8x1024xf32>
    %28 = arith.addf %26, %27 : vector<8x1024xf32>
    %cst_12 = arith.constant 0.000000e+00 : f32
    %29 = vector.broadcast %cst_12 : f32 to vector<8x1024xf32>
    %30 = arith.maximumf %28, %29 : vector<8x1024xf32>
    %31 = arith.truncf %30 : vector<8x1024xf32> to vector<8x1024xbf16>
    %c0_13 = arith.constant 0 : index
    %c0_14 = arith.constant 0 : index
    %32 = vector.load %arg4[%c0_13, %c0_14] : memref<1024x1024xbf16, #tpu.memory_space<vmem>>, vector<1024x1024xbf16>
    %cst_15 = arith.constant dense<0.000000e+00> : vector<8x1024xf32>
    %33 = tpu.matmul %31, %32, %cst_15 {dimension_numbers = #tpu.dot_dimension_numbers<[1], [0], [0], [1], [0, 0, 1, 1], [], []>} : vector<8x1024xbf16>, vector<1024x1024xbf16>, vector<8x1024xf32> -> vector<8x1024xf32>
    %cst_16 = arith.constant dense<0.000000e+00> : vector<1024xf32>
    %34 = vector.multi_reduction <add>, %33, %cst_16 [0] : vector<8x1024xf32> to vector<1024xf32>
    %35 = vector.shape_cast %34 : vector<1024xf32> to vector<1x1024xf32>
    %cst_17 = arith.constant 8.000000e+00 : f32
    %36 = vector.broadcast %cst_17 : f32 to vector<1x1024xf32>
    %37 = arith.divf %35, %36 : vector<1x1024xf32>
    %38 = vector.broadcast %37 : vector<1x1024xf32> to vector<8x1024xf32>
    %39 = arith.subf %33, %38 : vector<8x1024xf32>
    %40 = vector.broadcast %37 : vector<1x1024xf32> to vector<8x1024xf32>
    %41 = arith.subf %33, %40 : vector<8x1024xf32>
    %42 = arith.mulf %39, %41 : vector<8x1024xf32>
    %cst_18 = arith.constant dense<0.000000e+00> : vector<1024xf32>
    %43 = vector.multi_reduction <add>, %42, %cst_18 [0] : vector<8x1024xf32> to vector<1024xf32>
    %44 = vector.shape_cast %43 : vector<1024xf32> to vector<1x1024xf32>
    %cst_19 = arith.constant 8.000000e+00 : f32
    %45 = vector.broadcast %cst_19 : f32 to vector<1x1024xf32>
    %46 = arith.divf %44, %45 : vector<1x1024xf32>
    %c0_20 = arith.constant 0 : index
    %c0_21 = arith.constant 0 : index
    %47 = vector.load %arg5[%c0_20, %c0_21] : memref<1x1024xf32, #tpu.memory_space<vmem>>, vector<1x1024xf32>
    %cst_22 = arith.constant 9.99999974E-6 : f32
    %48 = vector.broadcast %cst_22 : f32 to vector<1x1024xf32>
    %49 = arith.addf %46, %48 : vector<1x1024xf32>
    %50 = math.rsqrt %49 : vector<1x1024xf32>
    %51 = arith.mulf %47, %50 : vector<1x1024xf32>
    %c0_23 = arith.constant 0 : index
    %c0_24 = arith.constant 0 : index
    %52 = vector.load %arg6[%c0_23, %c0_24] : memref<1x1024xf32, #tpu.memory_space<vmem>>, vector<1x1024xf32>
    %53 = arith.mulf %37, %51 : vector<1x1024xf32>
    %54 = arith.subf %52, %53 : vector<1x1024xf32>
    %55 = vector.broadcast %51 : vector<1x1024xf32> to vector<8x1024xf32>
    %56 = arith.mulf %33, %55 : vector<8x1024xf32>
    %57 = vector.broadcast %54 : vector<1x1024xf32> to vector<8x1024xf32>
    %58 = arith.addf %56, %57 : vector<8x1024xf32>
    %cst_25 = arith.constant 0.000000e+00 : f32
    %59 = vector.broadcast %cst_25 : f32 to vector<8x1024xf32>
    %60 = arith.maximumf %58, %59 : vector<8x1024xf32>
    %61 = arith.truncf %60 : vector<8x1024xf32> to vector<8x1024xbf16>
    %c0_26 = arith.constant 0 : index
    %c0_27 = arith.constant 0 : index
    %62 = vector.load %arg7[%c0_26, %c0_27] : memref<1024x1024xbf16, #tpu.memory_space<vmem>>, vector<1024x1024xbf16>
    %cst_28 = arith.constant dense<0.000000e+00> : vector<8x1024xf32>
    %63 = tpu.matmul %61, %62, %cst_28 {dimension_numbers = #tpu.dot_dimension_numbers<[1], [0], [0], [1], [0, 0, 1, 1], [], []>} : vector<8x1024xbf16>, vector<1024x1024xbf16>, vector<8x1024xf32> -> vector<8x1024xf32>
    %cst_29 = arith.constant dense<0.000000e+00> : vector<1024xf32>
    %64 = vector.multi_reduction <add>, %63, %cst_29 [0] : vector<8x1024xf32> to vector<1024xf32>
    %65 = vector.shape_cast %64 : vector<1024xf32> to vector<1x1024xf32>
    %cst_30 = arith.constant 8.000000e+00 : f32
    %66 = vector.broadcast %cst_30 : f32 to vector<1x1024xf32>
    %67 = arith.divf %65, %66 : vector<1x1024xf32>
    %68 = vector.broadcast %67 : vector<1x1024xf32> to vector<8x1024xf32>
    %69 = arith.subf %63, %68 : vector<8x1024xf32>
    %70 = vector.broadcast %67 : vector<1x1024xf32> to vector<8x1024xf32>
    %71 = arith.subf %63, %70 : vector<8x1024xf32>
    %72 = arith.mulf %69, %71 : vector<8x1024xf32>
    %cst_31 = arith.constant dense<0.000000e+00> : vector<1024xf32>
    %73 = vector.multi_reduction <add>, %72, %cst_31 [0] : vector<8x1024xf32> to vector<1024xf32>
    %74 = vector.shape_cast %73 : vector<1024xf32> to vector<1x1024xf32>
    %cst_32 = arith.constant 8.000000e+00 : f32
    %75 = vector.broadcast %cst_32 : f32 to vector<1x1024xf32>
    %76 = arith.divf %74, %75 : vector<1x1024xf32>
    %c0_33 = arith.constant 0 : index
    %c0_34 = arith.constant 0 : index
    %77 = vector.load %arg8[%c0_33, %c0_34] : memref<1x1024xf32, #tpu.memory_space<vmem>>, vector<1x1024xf32>
    %cst_35 = arith.constant 9.99999974E-6 : f32
    %78 = vector.broadcast %cst_35 : f32 to vector<1x1024xf32>
    %79 = arith.addf %76, %78 : vector<1x1024xf32>
    %80 = math.rsqrt %79 : vector<1x1024xf32>
    %81 = arith.mulf %77, %80 : vector<1x1024xf32>
    %c0_36 = arith.constant 0 : index
    %c0_37 = arith.constant 0 : index
    %82 = vector.load %arg9[%c0_36, %c0_37] : memref<1x1024xf32, #tpu.memory_space<vmem>>, vector<1x1024xf32>
    %83 = arith.mulf %67, %81 : vector<1x1024xf32>
    %84 = arith.subf %82, %83 : vector<1x1024xf32>
    %85 = vector.broadcast %81 : vector<1x1024xf32> to vector<8x1024xf32>
    %86 = arith.mulf %63, %85 : vector<8x1024xf32>
    %87 = vector.broadcast %84 : vector<1x1024xf32> to vector<8x1024xf32>
    %88 = arith.addf %86, %87 : vector<8x1024xf32>
    %cst_38 = arith.constant 0.000000e+00 : f32
    %89 = vector.broadcast %cst_38 : f32 to vector<8x1024xf32>
    %90 = arith.maximumf %88, %89 : vector<8x1024xf32>
    %91 = arith.truncf %90 : vector<8x1024xf32> to vector<8x1024xbf16>
    %c0_39 = arith.constant 0 : index
    %c0_40 = arith.constant 0 : index
    %92 = vector.load %arg10[%c0_39, %c0_40] : memref<1024x128xbf16, #tpu.memory_space<vmem>>, vector<1024x128xbf16>
    %cst_41 = arith.constant dense<0.000000e+00> : vector<8x128xf32>
    %93 = tpu.matmul %91, %92, %cst_41 {dimension_numbers = #tpu.dot_dimension_numbers<[1], [0], [0], [1], [0, 0, 1, 1], [], []>} : vector<8x1024xbf16>, vector<1024x128xbf16>, vector<8x128xf32> -> vector<8x128xf32>
    %c0_42 = arith.constant 0 : index
    %c0_43 = arith.constant 0 : index
    %94 = vector.load %arg11[%c0_42, %c0_43] : memref<1x128xf32, #tpu.memory_space<vmem>>, vector<1x128xf32>
    %95 = vector.broadcast %94 : vector<1x128xf32> to vector<8x128xf32>
    %96 = arith.addf %93, %95 : vector<8x128xf32>
    %c0_44 = arith.constant 0 : index
    %c0_45 = arith.constant 0 : index
    %97 = vector.load %arg12[%c0_44, %c0_45] : memref<8x128xf32, #tpu.memory_space<vmem>>, vector<8x128xf32>
    tpu.vector_store %arg12[%c0_44, %c0_45], %96 {strides = array<i32>} : memref<8x128xf32, #tpu.memory_space<vmem>>, vector<8x128xf32>,
    return
  }
}

</mosaic_0001>

<bundles_post_ra>
// kernel: net_forward_prepared.1
= control target key start
LH: loop header
LB: loop body
LE: loop exit
PB: predicated region body
PF: predicated region fallthrough
CT: control target
= control target key end

     0   :  { %17 = vsyncpa [#allocation3], 0  ;;  %s15639_s0 = inlined_call_operand.vmem [shape: f32[8,896], index: 0, kind: input, shape index: {}]   ;;  %s15640_s1 = inlined_call_operand.hbm [shape: bf16[896,1024], index: 1, kind: input, shape index: {}]   ;;  %s15641_s2 = inlined_call_operand.hbm [shape: f32[1,1024], index: 2, kind: input, shape index: {}]   ;;  %s15642_s3 = inlined_call_operand.hbm [shape: f32[1,1024], index: 3, kind: input, shape index: {}]   ;;  %s15643_s4 = inlined_call_operand.hbm [shape: bf16[1024,1024], index: 4, kind: input, shape index: {}]   ;;  %s15644_s5 = inlined_call_operand.hbm [shape: f32[1,1024], index: 5, kind: input, shape index: {}]   ;;  %s15645_s6 = inlined_call_operand.hbm [shape: f32[1,1024], index: 6, kind: input, shape index: {}]   ;;  %s15646_s7 = inlined_call_operand.hbm [shape: bf16[1024,1024], index: 7, kind: input, shape index: {}]   ;;  %s15647_s8 = inlined_call_operand.hbm [shape: f32[1,1024], index: 8, kind: input, shape index: {}]   ;;  %s15648_s9 = inlined_call_operand.hbm [shape: f32[1,1024], index: 9, kind: input, shape index: {}]   ;;  %s15649_s10 = inlined_call_operand.hbm [shape: bf16[1024,128], index: 10, kind: input, shape index: {}]   ;;  %s15650_s11 = inlined_call_operand.hbm [shape: f32[1,128], index: 11, kind: input, shape index: {}]   ;;  %s15651_s12 = inlined_call_operand.hbm [shape: f32[8,128], index: 12, kind: output, shape index: {}]  }
   0x1   :  { %18 = vsyncpa [#allocation6], 0 }
   0x2   :  { %19 = vsyncpa [#allocation9], 0 }
   0x3   :  { %20 = vsyncpa [#allocation12], 0 }
   0x4   :  { %21 = vsyncpa [#allocation15], 0 }
   0x5   :  { %22 = vsyncpa [#allocation18], 0 }
   0x6   :  { %23 = vsyncpa [#allocation4], 0  ;;  %s14860_s21 = smov [#allocation5]  }
   0x7   :  { %s44_s22 = sshll.u32 %s14860_s21, 4  ;;  %s45_s22 = int_to_ptr.vmem [resolvable:$true] %s44_s22 }
   0x8   :  { %s14614_s23 = scalar_lea.vmem %s45_s22, 128  ;;  %p14619_p1 = scmp.lt.s32.totalorder %s45_s22, %s45_s22 }
   0x9   :  { %p14615_p0 = scmp.ne.s32.totalorder %s45_s22, %s14614_s23  ;;  %p14620_p2 = scmp.lt.s32.totalorder %s14614_s23, %s14614_s23 }
   0xb   :  { %p14621_p3 = por %p14620_p2, %p14619_p1 }
   0xd   :  { %p14622_p4 = pnand %p14621_p3, %p14615_p0 }
   0xf   :  { %14625 = shalt.err (!%p14622_p4)
}
  0x10   :  { %47 = dma.hbm_to_vmem [thread:$0]  %s15641_s2, 128, %s45_s22, [#allocation6]  }
  0x11   :  { %s14861_s26 = smov [#allocation8]   ;;  %s14862_s28 = smov [#allocation11]  }
  0x12   :  { %s63_s27 = sshll.u32 %s14861_s26, 4  ;;  %s86_s29 = sshll.u32 %s14862_s28, 4  ;;  %s64_s27 = int_to_ptr.vmem [resolvable:$true] %s63_s27  ;;  %s87_s29 = int_to_ptr.vmem [resolvable:$true] %s86_s29 }
  0x13   :  { %s14634_s30 = scalar_lea.vmem %s64_s27, 65536  ;;  %p14639_p6 = scmp.lt.s32.totalorder %s64_s27, %s64_s27 }
  0x14   :  { %p14635_p5 = scmp.ne.s32.totalorder %s64_s27, %s14634_s30  ;;  %p14640_p7 = scmp.lt.s32.totalorder %s14634_s30, %s14634_s30 }
  0x16   :  { %p14641_p8 = por %p14640_p7, %p14639_p6 }
  0x18   :  { %p14642_p9 = pnand %p14641_p8, %p14635_p5 }
  0x1a   :  { %14645 = shalt.err (!%p14642_p9)
}
  0x1b   :  { %s14863_s13 = smov 512   ;;  %s14864_s14 = smov 32  }
  0x1c   :  { %69 = dma.hbm_to_vmem [thread:$0]  %s15643_s4, 65536, %s64_s27, [#allocation9], %s14863_s13, %s14863_s13, %s14864_s14  }
  0x1d   :  { %s14654_s2 = scalar_lea.vmem %s87_s29, 128  ;;  %p14659_p11 = scmp.lt.s32.totalorder %s87_s29, %s87_s29 }
  0x1e   :  { %p14655_p10 = scmp.ne.s32.totalorder %s87_s29, %s14654_s2  ;;  %p14660_p12 = scmp.lt.s32.totalorder %s14654_s2, %s14654_s2 }
  0x20   :  { %p14661_p13 = por %p14660_p12, %p14659_p11 }
  0x22   :  { %p14662_p0 = pnand %p14661_p13, %p14655_p10 }
  0x24   :  { %14665 = shalt.err (!%p14662_p0)
}
  0x25   :  { %89 = dma.hbm_to_vmem [thread:$0]  %s15645_s6, 128, %s87_s29, [#allocation12]  }
  0x26   :  { %s14865_s19 = smov [#allocation14]   ;;  %s14866_s21 = smov [#allocation17]  }
  0x27   :  { %s108_s20 = sshll.u32 %s14865_s19, 4  ;;  %s127_s22 = sshll.u32 %s14866_s21, 4  ;;  %s109_s20 = int_to_ptr.vmem [resolvable:$true] %s108_s20  ;;  %s128_s22 = int_to_ptr.vmem [resolvable:$true] %s127_s22 }
  0x28   :  { %s14674_s23 = scalar_lea.vmem %s109_s20, 128  ;;  %p14679_p2 = scmp.lt.s32.totalorder %s109_s20, %s109_s20 }
  0x29   :  { %p14675_p1 = scmp.ne.s32.totalorder %s109_s20, %s14674_s23  ;;  %p14680_p3 = scmp.lt.s32.totalorder %s14674_s23, %s14674_s23 }
  0x2b   :  { %p14681_p4 = por %p14680_p3, %p14679_p2 }
  0x2d   :  { %p14682_p5 = pnand %p14681_p4, %p14675_p1 }
  0x2f   :  { %14685 = shalt.err (!%p14682_p5)
}
  0x30   :  { %111 = dma.hbm_to_vmem [thread:$0]  %s15647_s8, 128, %s109_s20, [#allocation15]  }
  0x31   :  { %s14694_s25 = scalar_lea.vmem %s128_s22, 8192  ;;  %p14699_p7 = scmp.lt.s32.totalorder %s128_s22, %s128_s22 }
  0x32   :  { %p14695_p6 = scmp.ne.s32.totalorder %s128_s22, %s14694_s25  ;;  %p14700_p8 = scmp.lt.s32.totalorder %s14694_s25, %s14694_s25 }
  0x34   :  { %p14701_p9 = por %p14700_p8, %p14699_p7 }
  0x36   :  { %p14702_p10 = pnand %p14701_p9, %p14695_p6 }
  0x38   :  { %14705 = shalt.err (!%p14702_p10)
}
  0x39   :  { %s14867_s6 = smov 64   ;;  %s14868_s26 = smov 4  }
  0x3a   :  { %133 = dma.hbm_to_vmem [thread:$0]  %s15649_s10, 8192, %s128_s22, [#allocation18], %s14867_s6, %s14867_s6, %s14868_s26  }
  0x3b   :  { %s14869_s29 = smov [#allocation2]   ;;  %s14870_s15 = smov [#allocation7]  }
  0x3c   :  { %s31_s30 = sshll.u32 %s14869_s29, 4  ;;  %s54_s16 = sshll.u32 %s14870_s15, 4  ;;  %s32_s30 = int_to_ptr.vmem [resolvable:$true] %s31_s30  ;;  %s55_s16 = int_to_ptr.vmem [resolvable:$true] %s54_s16 }
  0x3d   :  { %s14714_s8 = scalar_lea.vmem %s32_s30, 57344  ;;  %p14719_p12 = scmp.lt.s32.totalorder %s32_s30, %s32_s30 }
  0x3e   :  { %p14715_p11 = scmp.ne.s32.totalorder %s32_s30, %s14714_s8  ;;  %p14720_p13 = scmp.lt.s32.totalorder %s14714_s8, %s14714_s8 }
  0x40   :  { %p14721_p0 = por %p14720_p13, %p14719_p12 }
  0x42   :  { %p14722_p1 = pnand %p14721_p0, %p14715_p11 }
  0x44   :  { %14725 = shalt.err (!%p14722_p1)
}
  0x45   :  { %37 = dma.hbm_to_vmem [thread:$0]  %s15640_s1, 57344, %s32_s30, [#allocation3], %s14863_s13, %s14863_s13, %s14864_s14  }
  0x46   :  { %s14734_s10 = scalar_lea.vmem %s55_s16, 128  ;;  %p14739_p3 = scmp.lt.s32.totalorder %s55_s16, %s55_s16 }
  0x47   :  { %p14735_p2 = scmp.ne.s32.totalorder %s55_s16, %s14734_s10  ;;  %p14740_p4 = scmp.lt.s32.totalorder %s14734_s10, %s14734_s10 }
  0x49   :  { %p14741_p5 = por %p14740_p4, %p14739_p3 }
  0x4b   :  { %p14742_p6 = pnand %p14741_p5, %p14735_p2 }
  0x4d   :  { %14745 = shalt.err (!%p14742_p6)
}
  0x4e   :  { %57 = dma.hbm_to_vmem [thread:$0]  %s15642_s3, 128, %s55_s16, [#allocation6]  }
  0x4f   :  { %s14871_s20 = smov [#allocation10]   ;;  %s14872_s22 = smov [#allocation13]  }
  0x50   :  { %s76_s21 = sshll.u32 %s14871_s20, 4  ;;  %s95_s23 = sshll.u32 %s14872_s22, 4  ;;  %s77_s21 = int_to_ptr.vmem [resolvable:$true] %s76_s21  ;;  %s96_s23 = int_to_ptr.vmem [resolvable:$true] %s95_s23 }
  0x51   :  { %s14754_s4 = scalar_lea.vmem %s77_s21, 128  ;;  %p14759_p8 = scmp.lt.s32.totalorder %s77_s21, %s77_s21 }
  0x52   :  { %p14755_p7 = scmp.ne.s32.totalorder %s77_s21, %s14754_s4  ;;  %p14760_p9 = scmp.lt.s32.totalorder %s14754_s4, %s14754_s4 }
  0x54   :  { %p14761_p10 = por %p14760_p9, %p14759_p8 }
  0x56   :  { %p14762_p11 = pnand %p14761_p10, %p14755_p7 }
  0x58   :  { %14765 = shalt.err (!%p14762_p11)
}
  0x59   :  { %79 = dma.hbm_to_vmem [thread:$0]  %s15644_s5, 128, %s77_s21, [#allocation9]  }
  0x5a   :  { %s14774_s25 = scalar_lea.vmem %s96_s23, 65536  ;;  %p14779_p13 = scmp.lt.s32.totalorder %s96_s23, %s96_s23 }
  0x5b   :  { %p14775_p12 = scmp.ne.s32.totalorder %s96_s23, %s14774_s25  ;;  %p14780_p0 = scmp.lt.s32.totalorder %s14774_s25, %s14774_s25 }
  0x5d   :  { %p14781_p1 = por %p14780_p0, %p14779_p13 }
  0x5f   :  { %p14782_p2 = pnand %p14781_p1, %p14775_p12 }
  0x61   :  { %14785 = shalt.err (!%p14782_p2)
}
  0x62   :  { %101 = dma.hbm_to_vmem [thread:$0]  %s15646_s7, 65536, %s96_s23, [#allocation12], %s14863_s13, %s14863_s13, %s14864_s14  }
  0x63   :  { %s14873_s26 = smov [#allocation16]   ;;  %s14874_s28 = smov [#allocation19]  }
  0x64   :  { %s118_s27 = sshll.u32 %s14873_s26, 4  ;;  %s140_s5 = sshll.u32 %s14874_s28, 4  ;;  %s119_s27 = int_to_ptr.vmem [resolvable:$true] %s118_s27  ;;  %s141_s5 = int_to_ptr.vmem [resolvable:$true] %s140_s5 }
  0x65   :  { %s14794_s29 = scalar_lea.vmem %s119_s27, 128  ;;  %p14799_p4 = scmp.lt.s32.totalorder %s119_s27, %s119_s27 }
  0x66   :  { %p14795_p3 = scmp.ne.s32.totalorder %s119_s27, %s14794_s29  ;;  %p14800_p5 = scmp.lt.s32.totalorder %s14794_s29, %s14794_s29 }
  0x68   :  { %p14801_p6 = por %p14800_p5, %p14799_p4 }
  0x6a   :  { %p14802_p7 = pnand %p14801_p6, %p14795_p3 }
  0x6c   :  { %14805 = shalt.err (!%p14802_p7)
}
  0x6d   :  { %121 = dma.hbm_to_vmem [thread:$0]  %s15648_s9, 128, %s119_s27, [#allocation15]  }
  0x6e   :  { %s14814_s16 = scalar_lea.vmem %s141_s5, 16  ;;  %s14818_s7 = scalar_lea.vmem %s141_s5, 32 }
  0x6f   :  { %p14815_p8 = scmp.ne.s32.totalorder %s141_s5, %s14814_s16  ;;  %p14819_p9 = scmp.lt.s32.totalorder %s141_s5, %s141_s5 }
  0x70   :  { %p14820_p10 = scmp.lt.s32.totalorder %s14818_s7, %s14814_s16 }
  0x72   :  { %p14821_p11 = por %p14820_p10, %p14819_p9 }
  0x74   :  { %p14822_p12 = pnand %p14821_p11, %p14815_p8 }
  0x76   :  { %14825 = shalt.err (!%p14822_p12)
}
  0x77   :  { %143 = dma.hbm_to_vmem [thread:$0]  %s15650_s11, 16, %s141_s5, [#allocation18]  }
  0x78   :  { %14846 = dma.done.wait [#allocation3], 57344  }
  0x79   :  { %14847 = vsyncadd [#allocation3], 4294909952 }
  0x7a   :  { %14848 = dma.done.wait [#allocation6], 256  }
  0x7b   :  { %14849 = vsyncadd [#allocation6], 4294967040 }
  0x7c   :  { %14850 = dma.done.wait [#allocation9], 65664  }
  0x7d   :  { %14851 = vsyncadd [#allocation9], 4294901632 }
  0x7e   :  { %14852 = dma.done.wait [#allocation12], 65664  }
  0x7f   :  { %14853 = vsyncadd [#allocation12], 4294901632 }
  0x80   :  { %14854 = dma.done.wait [#allocation15], 256  }
  0x81   :  { %14855 = vsyncadd [#allocation15], 4294967040 }
  0x82   :  { %14856 = dma.done.wait [#allocation18], 8208  }
  0x83   :  { %14857 = vsyncadd [#allocation18], 4294959088  ;;  %v248_v0 = vld [vmem:[#allocation2 + $0x1c0] sm:$0xff]  ;;  %v179_v53 = vld [vmem:[%s15639_s0 + $0x8] sm:$0xff] }
  0x84   :  { %v252_v1 = vld [vmem:[#allocation2 + $0x1e0] sm:$0xff]  ;;  %v181_v54 = vld [vmem:[%s15639_s0 + $0x18] sm:$0xff]  ;;  %v14991_v58 = vpack.c.bf16 %v179_v53, %v179_v53 }
  0x85   :  { %v376_v2 = vld [vmem:[#allocation2 + $0x5c0] sm:$0xff]  ;;  %v12908_v3 = vcombine.high %v248_v0, %v252_v1  ;;  %v12907_v5 = vcombine.low %v248_v0, %v252_v1  ;;  %v14993_v59 = vpack.c.bf16 %v181_v54, %v181_v54 }
  0x86   :  { %v380_v4 = vld [vmem:[#allocation2 + $0x5e0] sm:$0xff]  ;;  %2912 = vmatprep.mubr.bf16.mxu0 %v14991_v58 }
  0x87   :  { %v240_v6 = vld [vmem:[#allocation2 + $0x180] sm:$0xff]  ;;  %v13036_v8 = vcombine.high %v376_v2, %v380_v4  ;;  %v13035_v9 = vcombine.low %v376_v2, %v380_v4  ;;  %2880 = vmatprep.subr.bf16.mxu0 %v12908_v3  ;;  %2953 = vmatprep.mubr.bf16.mxu1 %v14993_v59 }
  0x88   :  { %v244_v7 = vld [vmem:[#allocation2 + $0x1a0] sm:$0xff]  ;;  %2881 = vmatpush1.bf16.msra.mxu0 %v12907_v5 }
  0x89   :  { %v12900_v10 = vcombine.high %v240_v6, %v244_v7  ;;  %v368_v11 = vld [vmem:[#allocation2 + $0x580] sm:$0xff]  ;;  %2921 = vmatprep.subr.bf16.mxu1 %v13036_v8  ;;  %v12899_v18 = vcombine.low %v240_v6, %v244_v7 }
  0x8a   :  { %v372_v12 = vld [vmem:[#allocation2 + $0x5a0] sm:$0xff]  ;;  %2922 = vmatpush1.bf16.msra.mxu1 %v13035_v9 }
  0x8b   :  { %v232_v13 = vld [vmem:[#allocation2 + $0x140] sm:$0xff]  ;;  %v13028_v14 = vcombine.high %v368_v11, %v372_v12  ;;  %2882 = vmatprep.subr.bf16.mxu0 %v12900_v10  ;;  %v13027_v19 = vcombine.low %v368_v11, %v372_v12 }
  0x8c   :  { %v236_v15 = vld [vmem:[#allocation2 + $0x160] sm:$0xff]  ;;  %2883 = vmatpush1.bf16.msra.mxu0 %v12899_v18 }
  0x8d   :  { %v360_v16 = vld [vmem:[#allocation2 + $0x540] sm:$0xff]  ;;  %v12892_v20 = vcombine.high %v232_v13, %v236_v15  ;;  %2923 = vmatprep.subr.bf16.mxu1 %v13028_v14  ;;  %v12891_v26 = vcombine.low %v232_v13, %v236_v15 }
  0x8e   :  { %v364_v17 = vld [vmem:[#allocation2 + $0x560] sm:$0xff]  ;;  %2924 = vmatpush1.bf16.msra.mxu1 %v13027_v19 }
  0x8f   :  { %v13020_v21 = vcombine.high %v360_v16, %v364_v17  ;;  %v224_v22 = vld [vmem:[#allocation2 + $0x100] sm:$0xff]  ;;  %2884 = vmatprep.subr.bf16.mxu0 %v12892_v20  ;;  %v13019_v27 = vcombine.low %v360_v16, %v364_v17 }
  0x90   :  { %v228_v23 = vld [vmem:[#allocation2 + $0x120] sm:$0xff]  ;;  %2885 = vmatpush1.bf16.msra.mxu0 %v12891_v26 }
  0x91   :  { %v352_v24 = vld [vmem:[#allocation2 + $0x500] sm:$0xff]  ;;  %v12884_v28 = vcombine.high %v224_v22, %v228_v23  ;;  %2925 = vmatprep.subr.bf16.mxu1 %v13020_v21  ;;  %v12883_v34 = vcombine.low %v224_v22, %v228_v23 }
  0x92   :  { %v356_v25 = vld [vmem:[#allocation2 + $0x520] sm:$0xff]  ;;  %2926 = vmatpush1.bf16.msra.mxu1 %v13019_v27 }
  0x93   :  { %v13012_v29 = vcombine.high %v352_v24, %v356_v25  ;;  %v216_v30 = vld [vmem:[#allocation2 + $0xc0] sm:$0xff]  ;;  %2886 = vmatprep.subr.bf16.mxu0 %v12884_v28  ;;  %v13011_v35 = vcombine.low %v352_v24, %v356_v25 }
  0x94   :  { %v220_v31 = vld [vmem:[#allocation2 + $0xe0] sm:$0xff]  ;;  %2887 = vmatpush1.bf16.msra.mxu0 %v12883_v34 }
  0x95   :  { %v344_v32 = vld [vmem:[#allocation2 + $0x4c0] sm:$0xff]  ;;  %v12876_v36 = vcombine.high %v216_v30, %v220_v31  ;;  %2927 = vmatprep.subr.bf16.mxu1 %v13012_v29  ;;  %v12875_v42 = vcombine.low %v216_v30, %v220_v31 }
  0x96   :  { %v348_v33 = vld [vmem:[#allocation2 + $0x4e0] sm:$0xff]  ;;  %2928 = vmatpush1.bf16.msra.mxu1 %v13011_v35 }
  0x97   :  { %v13004_v37 = vcombine.high %v344_v32, %v348_v33  ;;  %v208_v38 = vld [vmem:[#allocation2 + $0x80] sm:$0xff]  ;;  %2888 = vmatprep.subr.bf16.mxu0 %v12876_v36  ;;  %v13003_v43 = vcombine.low %v344_v32, %v348_v33 }
  0x98   :  { %v212_v39 = vld [vmem:[#allocation2 + $0xa0] sm:$0xff]  ;;  %2889 = vmatpush1.bf16.msra.mxu0 %v12875_v42 }
  0x99   :  { %v336_v40 = vld [vmem:[#allocation2 + $0x480] sm:$0xff]  ;;  %v12868_v44 = vcombine.high %v208_v38, %v212_v39  ;;  %2929 = vmatprep.subr.bf16.mxu1 %v13004_v37  ;;  %v12867_v50 = vcombine.low %v208_v38, %v212_v39 }
  0x9a   :  { %v340_v41 = vld [vmem:[#allocation2 + $0x4a0] sm:$0xff]  ;;  %2930 = vmatpush1.bf16.msra.mxu1 %v13003_v43 }
  0x9b   :  { %v12996_v45 = vcombine.high %v336_v40, %v340_v41  ;;  %v200_v46 = vld [vmem:[#allocation2 + $0x40] sm:$0xff]  ;;  %2890 = vmatprep.subr.bf16.mxu0 %v12868_v44  ;;  %v12995_v51 = vcombine.low %v336_v40, %v340_v41 }
  0x9c   :  { %v204_v47 = vld [vmem:[#allocation2 + $0x60] sm:$0xff]  ;;  %2891 = vmatpush1.bf16.msra.mxu0 %v12867_v50 }
  0x9d   :  { %v328_v48 = vld [vmem:[#allocation2 + $0x440] sm:$0xff]  ;;  %v12860_v52 = vcombine.high %v200_v46, %v204_v47  ;;  %2931 = vmatprep.subr.bf16.mxu1 %v12996_v45  ;;  %v12859_v62 = vcombine.low %v200_v46, %v204_v47 }
  0x9e   :  { %v332_v49 = vld [vmem:[#allocation2 + $0x460] sm:$0xff]  ;;  %2932 = vmatpush1.bf16.msra.mxu1 %v12995_v51 }
  0x9f   :  { %v12988_v55 = vcombine.high %v328_v48, %v332_v49  ;;  %v192_v56 = vld [vmem:[#allocation2] sm:$0xff]  ;;  %2892 = vmatprep.subr.bf16.mxu0 %v12860_v52  ;;  %v12987_v63 = vcombine.low %v328_v48, %v332_v49 }
  0xa0   :  { %v196_v57 = vld [vmem:[#allocation2 + $0x20] sm:$0xff]  ;;  %2893 = vmatpush1.bf16.msra.mxu0 %v12859_v62 }
  0xa1   :  { %v320_v60 = vld [vmem:[#allocation2 + $0x400] sm:$0xff]  ;;  %v12852_v0 = vcombine.high %v192_v56, %v196_v57  ;;  %2933 = vmatprep.subr.bf16.mxu1 %v12988_v55  ;;  %v12851_v6 = vcombine.low %v192_v56, %v196_v57 }
  0xa2   :  { %v324_v61 = vld [vmem:[#allocation2 + $0x420] sm:$0xff]  ;;  %2934 = vmatpush1.bf16.msra.mxu1 %v12987_v63 }
  0xa3   :  { %v12980_v1 = vcombine.high %v320_v60, %v324_v61  ;;  %v312_v2 = vld [vmem:[#allocation2 + $0x3c0] sm:$0xff]  ;;  %2894 = vmatprep.subr.bf16.mxu0 %v12852_v0  ;;  %v12979_v7 = vcombine.low %v320_v60, %v324_v61 }
  0xa4   :  { %v316_v3 = vld [vmem:[#allocation2 + $0x3e0] sm:$0xff]  ;;  %2895 = vmatpush1.bf16.msra.mxu0 %v12851_v6 }
  0xa5   :  { %v440_v4 = vld [vmem:[#allocation2 + $0x7c0] sm:$0xff]  ;;  %v12972_v8 = vcombine.high %v312_v2, %v316_v3  ;;  %2935 = vmatprep.subr.bf16.mxu1 %v12980_v1  ;;  %v12971_v14 = vcombine.low %v312_v2, %v316_v3 }
  0xa6   :  { %v444_v5 = vld [vmem:[#allocation2 + $0x7e0] sm:$0xff]  ;;  %2936 = vmatpush1.bf16.msra.mxu1 %v12979_v7 }
  0xa7   :  { %v13100_v9 = vcombine.high %v440_v4, %v444_v5  ;;  %v304_v10 = vld [vmem:[#allocation2 + $0x380] sm:$0xff]  ;;  %2896 = vmatprep.subr.bf16.mxu0 %v12972_v8  ;;  %v13099_v15 = vcombine.low %v440_v4, %v444_v5 }
  0xa8   :  { %v308_v11 = vld [vmem:[#allocation2 + $0x3a0] sm:$0xff]  ;;  %2897 = vmatpush2.bf16.msra.mxu0 %v12971_v14 }
  0xa9   :  { %v432_v12 = vld [vmem:[#allocation2 + $0x780] sm:$0xff]  ;;  %v12964_v16 = vcombine.high %v304_v10, %v308_v11  ;;  %2937 = vmatprep.subr.bf16.mxu1 %v13100_v9  ;;  %v12963_v22 = vcombine.low %v304_v10, %v308_v11  ;;  %v180_v11 = vld [vmem:[%s15639_s0 + $0x10] sm:$0xff] }
  0xaa   :  { %v436_v13 = vld [vmem:[#allocation2 + $0x7a0] sm:$0xff]  ;;  %2938 = vmatpush2.bf16.msra.mxu1 %v13099_v15 }
  0xab   :  { %v13092_v17 = vcombine.high %v432_v12, %v436_v13  ;;  %v296_v18 = vld [vmem:[#allocation2 + $0x340] sm:$0xff]  ;;  %2898 = vmatprep.subr.bf16.mxu0 %v12964_v16  ;;  %v13091_v23 = vcombine.low %v432_v12, %v436_v13 }
  0xac   :  { %v300_v19 = vld [vmem:[#allocation2 + $0x360] sm:$0xff]  ;;  %2899 = vmatpush2.bf16.msra.mxu0 %v12963_v22 }
  0xad   :  { %v424_v20 = vld [vmem:[#allocation2 + $0x740] sm:$0xff]  ;;  %v12956_v24 = vcombine.high %v296_v18, %v300_v19  ;;  %2939 = vmatprep.subr.bf16.mxu1 %v13092_v17  ;;  %v12955_v30 = vcombine.low %v296_v18, %v300_v19  ;;  %v15005_v19 = vpack.c.bf16 %v180_v11, %v180_v11 }
  0xae   :  { %v428_v21 = vld [vmem:[#allocation2 + $0x760] sm:$0xff]  ;;  %2940 = vmatpush2.bf16.msra.mxu1 %v13091_v23 }
  0xaf   :  { %v13084_v25 = vcombine.high %v424_v20, %v428_v21  ;;  %v288_v26 = vld [vmem:[#allocation2 + $0x300] sm:$0xff]  ;;  %2900 = vmatprep.subr.bf16.mxu0 %v12956_v24  ;;  %v13083_v31 = vcombine.low %v424_v20, %v428_v21  ;;  %v183_v21 = vld [vmem:[%s15639_s0 + $0x28] sm:$0xff] }
  0xb0   :  { %v292_v27 = vld [vmem:[#allocation2 + $0x320] sm:$0xff]  ;;  %2901 = vmatpush2.bf16.msra.mxu0 %v12955_v30 }
  0xb1   :  { %v416_v28 = vld [vmem:[#allocation2 + $0x700] sm:$0xff]  ;;  %v12948_v32 = vcombine.high %v288_v26, %v292_v27  ;;  %2941 = vmatprep.subr.bf16.mxu1 %v13084_v25  ;;  %v12947_v38 = vcombine.low %v288_v26, %v292_v27 }
  0xb2   :  { %v420_v29 = vld [vmem:[#allocation2 + $0x720] sm:$0xff]  ;;  %2942 = vmatpush2.bf16.msra.mxu1 %v13083_v31 }
  0xb3   :  { %v13076_v33 = vcombine.high %v416_v28, %v420_v29  ;;  %v280_v34 = vld [vmem:[#allocation2 + $0x2c0] sm:$0xff]  ;;  %2902 = vmatprep.subr.bf16.mxu0 %v12948_v32  ;;  %v13075_v39 = vcombine.low %v416_v28, %v420_v29  ;;  %v15011_v29 = vpack.c.bf16 %v183_v21, %v183_v21 }
  0xb4   :  { %v284_v35 = vld [vmem:[#allocation2 + $0x2e0] sm:$0xff]  ;;  %2903 = vmatpush2.bf16.msra.mxu0 %v12947_v38  ;;  %v14875_v38 = vmov 0  }
  0xb5   :  { %v408_v36 = vld [vmem:[#allocation2 + $0x6c0] sm:$0xff]  ;;  %v12940_v40 = vcombine.high %v280_v34, %v284_v35  ;;  %2943 = vmatprep.subr.bf16.mxu1 %v13076_v33  ;;  %v12939_v46 = vcombine.low %v280_v34, %v284_v35 }
  0xb6   :  { %v412_v37 = vld [vmem:[#allocation2 + $0x6e0] sm:$0xff]  ;;  %2944 = vmatpush2.bf16.msra.mxu1 %v13075_v39 }
  0xb7   :  { %v13068_v41 = vcombine.high %v408_v36, %v412_v37  ;;  %v272_v42 = vld [vmem:[#allocation2 + $0x280] sm:$0xff]  ;;  %2904 = vmatprep.subr.bf16.mxu0 %v12940_v40  ;;  %v13067_v47 = vcombine.low %v408_v36, %v412_v37 }
  0xb8   :  { %v276_v43 = vld [vmem:[#allocation2 + $0x2a0] sm:$0xff]  ;;  %2905 = vmatpush2.bf16.msra.mxu0 %v12939_v46 }
  0xb9   :  { %v400_v44 = vld [vmem:[#allocation2 + $0x680] sm:$0xff]  ;;  %v12932_v48 = vcombine.high %v272_v42, %v276_v43  ;;  %2945 = vmatprep.subr.bf16.mxu1 %v13068_v41  ;;  %v12931_v54 = vcombine.low %v272_v42, %v276_v43 }
  0xba   :  { %v404_v45 = vld [vmem:[#allocation2 + $0x6a0] sm:$0xff]  ;;  %2946 = vmatpush2.bf16.msra.mxu1 %v13067_v47 }
  0xbb   :  { %v13060_v49 = vcombine.high %v400_v44, %v404_v45  ;;  %v264_v50 = vld [vmem:[#allocation2 + $0x240] sm:$0xff]  ;;  %2906 = vmatprep.subr.bf16.mxu0 %v12932_v48  ;;  %v13059_v55 = vcombine.low %v400_v44, %v404_v45 }
  0xbc   :  { %v268_v51 = vld [vmem:[#allocation2 + $0x260] sm:$0xff]  ;;  %2907 = vmatpush2.bf16.msra.mxu0 %v12931_v54 }
  0xbd   :  { %v392_v52 = vld [vmem:[#allocation2 + $0x640] sm:$0xff]  ;;  %v12924_v56 = vcombine.high %v264_v50, %v268_v51  ;;  %2947 = vmatprep.subr.bf16.mxu1 %v13060_v49  ;;  %v12923_v0 = vcombine.low %v264_v50, %v268_v51 }
  0xbe   :  { %v396_v53 = vld [vmem:[#allocation2 + $0x660] sm:$0xff]  ;;  %2948 = vmatpush2.bf16.msra.mxu1 %v13059_v55 }
  0xbf   :  { %v13052_v57 = vcombine.high %v392_v52, %v396_v53  ;;  %v256_v60 = vld [vmem:[#allocation2 + $0x200] sm:$0xff]  ;;  %2908 = vmatprep.subr.bf16.mxu0 %v12924_v56  ;;  %v13051_v1 = vcombine.low %v392_v52, %v396_v53 }
  0xc0   :  { %v260_v61 = vld [vmem:[#allocation2 + $0x220] sm:$0xff]  ;;  %2909 = vmatpush2.bf16.msra.mxu0 %v12923_v0 }
  0xc1   :  { %v384_v62 = vld [vmem:[#allocation2 + $0x600] sm:$0xff]  ;;  %v12916_v2 = vcombine.high %v256_v60, %v260_v61  ;;  %2949 = vmatprep.subr.bf16.mxu1 %v13052_v57  ;;  %v12915_v8 = vcombine.low %v256_v60, %v260_v61 }
  0xc2   :  { %v388_v63 = vld [vmem:[#allocation2 + $0x620] sm:$0xff]  ;;  %2950 = vmatpush2.bf16.msra.mxu1 %v13051_v1 }
  0xc3   :  { %v13044_v3 = vcombine.high %v384_v62, %v388_v63  ;;  %v504_v4 = vld [vmem:[#allocation2 + $0x9c0] sm:$0xff]  ;;  %2910 = vmatprep.subr.bf16.mxu0 %v12916_v2  ;;  %v13043_v10 = vcombine.low %v384_v62, %v388_v63 }
  0xc4   :  { %v508_v5 = vld [vmem:[#allocation2 + $0x9e0] sm:$0xff]  ;;  %2911 = vmatpush2.bf16.msra.mxu0 %v12915_v8 }
  0xc5   :  { %v632_v6 = vld [vmem:[#allocation2 + $0xdc0] sm:$0xff]  ;;  %v13164_v12 = vcombine.high %v504_v4, %v508_v5  ;;  %2951 = vmatprep.subr.bf16.mxu1 %v13044_v3  ;;  %v13163_v20 = vcombine.low %v504_v4, %v508_v5 }
  0xc6   :  { %v636_v7 = vld [vmem:[#allocation2 + $0xde0] sm:$0xff]  ;;  %2952 = vmatpush2.bf16.msra.mxu1 %v13043_v10 }
  0xc7   :  { %v178_v9 = vld [vmem:[%s15639_s0] sm:$0xff]  ;;  %v13292_v13 = vcombine.high %v632_v6, %v636_v7  ;;  %2962 = vmatprep.subr.bf16.mxu0 %v13164_v12  ;;  %v13291_v22 = vcombine.low %v632_v6, %v636_v7 }
  0xc8   :  { %v496_v14 = vld [vmem:[#allocation2 + $0x980] sm:$0xff]  ;;  %v15003_v16 = vpack.c.bf16 %v178_v9, %v178_v9 }
  0xc9   :  { %v500_v15 = vld [vmem:[#allocation2 + $0x9a0] sm:$0xff]  ;;  %3003 = vmatprep.subr.bf16.mxu1 %v13292_v13  ;;  %2954 = vmatmul.mubr.bf16.vlgmr.msra.gmra.mxu1 %v15005_v19 }
  0xca   :  { %v624_v17 = vld [vmem:[#allocation2 + $0xd80] sm:$0xff]  ;;  %v13156_v23 = vcombine.high %v496_v14, %v500_v15  ;;  %2913 = vmatmul.mubr.bf16.vlgmr.msra.gmra.mxu0 %v15003_v16  ;;  %v13155_v30 = vcombine.low %v496_v14, %v500_v15  ;;  %3004 = vmatpush1.bf16.msra.mxu1 %v13291_v22  ;;  %v249_v14 = vld [vmem:[#allocation2 + $0x1c8] sm:$0xff] }
  0xcb   :  { %v628_v18 = vld [vmem:[#allocation2 + $0xda0] sm:$0xff]  ;;  %2963 = vmatpush1.bf16.msra.mxu0 %v13163_v20  ;;  %3035 = vmatprep.mubr.bf16.mxu1 %v14875_v38 }
  0xcc   :  { %v13284_v24 = vcombine.high %v624_v17, %v628_v18  ;;  %v488_v25 = vld [vmem:[#allocation2 + $0x940] sm:$0xff]  ;;  %2964 = vmatprep.subr.bf16.mxu0 %v13156_v23  ;;  %v13283_v31 = vcombine.low %v624_v17, %v628_v18  ;;  %2994 = vmatprep.mubr.bf16.mxu0 %v15011_v29  ;;  %v253_v17 = vld [vmem:[#allocation2 + $0x1e8] sm:$0xff]  ;;  %v184_v18 = vld [vmem:[%s15639_s0 + $0x30] sm:$0xff] }
  0xcd   :  { %v492_v26 = vld [vmem:[#allocation2 + $0x960] sm:$0xff] }
  0xce   :  { %v616_v27 = vld [vmem:[#allocation2 + $0xd40] sm:$0xff]  ;;  %v13148_v32 = vcombine.high %v488_v25, %v492_v26  ;;  %3005 = vmatprep.subr.bf16.mxu1 %v13284_v24  ;;  %v13147_v39 = vcombine.low %v488_v25, %v492_v26  ;;  %v241_v25 = vld [vmem:[#allocation2 + $0x188] sm:$0xff]  ;;  %v12910_v26 = vcombine.high %v249_v14, %v253_v17 }
  0xcf   :  { %v620_v28 = vld [vmem:[#allocation2 + $0xd60] sm:$0xff]  ;;  %2965 = vmatpush1.bf16.msra.mxu0 %v13155_v30  ;;  %3006 = vmatpush1.bf16.msra.mxu1 %v13283_v31  ;;  %v15019_v30 = vpack.c.bf16 %v184_v18, %v184_v18  ;;  %v12909_v31 = vcombine.low %v249_v14, %v253_v17  ;;  %v193_v14 = vld [vmem:[#allocation2 + $0x8] sm:$0xff] }
  0xd0   :  { %v480_v33 = vld [vmem:[#allocation2 + $0x900] sm:$0xff]  ;;  %v13276_v36 = vcombine.high %v616_v27, %v620_v28  ;;  %2966 = vmatprep.subr.bf16.mxu0 %v13148_v32  ;;  %v13275_v40 = vcombine.low %v616_v27, %v620_v28  ;;  %v245_v27 = vld [vmem:[#allocation2 + $0x1a8] sm:$0xff] }
  0xd1   :  { %v484_v34 = vld [vmem:[#allocation2 + $0x920] sm:$0xff]  ;;  %v197_v17 = vld [vmem:[#allocation2 + $0x28] sm:$0xff] }
  0xd2   :  { %v608_v35 = vld [vmem:[#allocation2 + $0xd00] sm:$0xff]  ;;  %v13140_v41 = vcombine.high %v480_v33, %v484_v34  ;;  %3007 = vmatprep.subr.bf16.mxu1 %v13276_v36  ;;  %v13139_v47 = vcombine.low %v480_v33, %v484_v34  ;;  %v12902_v36 = vcombine.high %v241_v25, %v245_v27 }
  0xd3   :  { %v612_v37 = vld [vmem:[#allocation2 + $0xd20] sm:$0xff]  ;;  %2967 = vmatpush1.bf16.msra.mxu0 %v13147_v39  ;;  %3008 = vmatpush1.bf16.msra.mxu1 %v13275_v40  ;;  %v12901_v40 = vcombine.low %v241_v25, %v245_v27  ;;  %v12854_v25 = vcombine.high %v193_v14, %v197_v17  ;;  %v381_v27 = vld [vmem:[#allocation2 + $0x5e8] sm:$0xff] }
  0xd4   :  { %v472_v42 = vld [vmem:[#allocation2 + $0x8c0] sm:$0xff]  ;;  %v13268_v45 = vcombine.high %v608_v35, %v612_v37  ;;  %2968 = vmatprep.subr.bf16.mxu0 %v13140_v41  ;;  %v13267_v48 = vcombine.low %v608_v35, %v612_v37  ;;  %v233_v35 = vld [vmem:[#allocation2 + $0x148] sm:$0xff] }
  0xd5   :  { %v476_v43 = vld [vmem:[#allocation2 + $0x8e0] sm:$0xff]  ;;  %v237_v37 = vld [vmem:[#allocation2 + $0x168] sm:$0xff] }
  0xd6   :  { %v600_v44 = vld [vmem:[#allocation2 + $0xcc0] sm:$0xff]  ;;  %v13132_v49 = vcombine.high %v472_v42, %v476_v43  ;;  %3009 = vmatprep.subr.bf16.mxu1 %v13268_v45  ;;  %v13131_v55 = vcombine.low %v472_v42, %v476_v43  ;;  %v12894_v45 = vcombine.high %v233_v35, %v237_v37 }
  0xd7   :  { %v604_v46 = vld [vmem:[#allocation2 + $0xce0] sm:$0xff]  ;;  %2969 = vmatpush1.bf16.msra.mxu0 %v13139_v47  ;;  %3010 = vmatpush1.bf16.msra.mxu1 %v13267_v48  ;;  %v12893_v48 = vcombine.low %v233_v35, %v237_v37  ;;  %v369_v35 = vld [vmem:[#allocation2 + $0x588] sm:$0xff] }
  0xd8   :  { %v464_v50 = vld [vmem:[#allocation2 + $0x880] sm:$0xff]  ;;  %v13260_v53 = vcombine.high %v600_v44, %v604_v46  ;;  %2970 = vmatprep.subr.bf16.mxu0 %v13132_v49  ;;  %v13259_v56 = vcombine.low %v600_v44, %v604_v46  ;;  %v225_v44 = vld [vmem:[#allocation2 + $0x108] sm:$0xff] }
  0xd9   :  { %v468_v51 = vld [vmem:[#allocation2 + $0x8a0] sm:$0xff]  ;;  %v229_v46 = vld [vmem:[#allocation2 + $0x128] sm:$0xff] }
  0xda   :  { %v592_v52 = vld [vmem:[#allocation2 + $0xc80] sm:$0xff]  ;;  %v13124_v57 = vcombine.high %v464_v50, %v468_v51  ;;  %3011 = vmatprep.subr.bf16.mxu1 %v13260_v53  ;;  %v13123_v1 = vcombine.low %v464_v50, %v468_v51  ;;  %v12886_v53 = vcombine.high %v225_v44, %v229_v46  ;;  %v373_v37 = vld [vmem:[#allocation2 + $0x5a8] sm:$0xff] }
  0xdb   :  { %v596_v54 = vld [vmem:[#allocation2 + $0xca0] sm:$0xff]  ;;  %2971 = vmatpush1.bf16.msra.mxu0 %v13131_v55  ;;  %3012 = vmatpush1.bf16.msra.mxu1 %v13259_v56  ;;  %v12885_v56 = vcombine.low %v225_v44, %v229_v46  ;;  %v361_v44 = vld [vmem:[#allocation2 + $0x548] sm:$0xff] }
  0xdc   :  { %v456_v60 = vld [vmem:[#allocation2 + $0x840] sm:$0xff]  ;;  %v13252_v63 = vcombine.high %v592_v52, %v596_v54  ;;  %2972 = vmatprep.subr.bf16.mxu0 %v13124_v57  ;;  %v13251_v2 = vcombine.low %v592_v52, %v596_v54  ;;  %v217_v52 = vld [vmem:[#allocation2 + $0xc8] sm:$0xff] }
  0xdd   :  { %v460_v61 = vld [vmem:[#allocation2 + $0x860] sm:$0xff]  ;;  %v221_v54 = vld [vmem:[#allocation2 + $0xe8] sm:$0xff] }
  0xde   :  { %v584_v62 = vld [vmem:[#allocation2 + $0xc40] sm:$0xff]  ;;  %v13116_v3 = vcombine.high %v456_v60, %v460_v61  ;;  %3013 = vmatprep.subr.bf16.mxu1 %v13252_v63  ;;  %v13115_v9 = vcombine.low %v456_v60, %v460_v61  ;;  %v12878_v63 = vcombine.high %v217_v52, %v221_v54  ;;  %v365_v46 = vld [vmem:[#allocation2 + $0x568] sm:$0xff] }
  0xdf   :  { %v588_v0 = vld [vmem:[#allocation2 + $0xc60] sm:$0xff]  ;;  %2973 = vmatpush1.bf16.msra.mxu0 %v13123_v1  ;;  %3014 = vmatpush1.bf16.msra.mxu1 %v13251_v2  ;;  %v12877_v2 = vcombine.low %v217_v52, %v221_v54  ;;  %v353_v52 = vld [vmem:[#allocation2 + $0x508] sm:$0xff] }
  0xe0   :  { %v448_v4 = vld [vmem:[#allocation2 + $0x800] sm:$0xff]  ;;  %v13244_v7 = vcombine.high %v584_v62, %v588_v0  ;;  %2974 = vmatprep.subr.bf16.mxu0 %v13116_v3  ;;  %v13243_v10 = vcombine.low %v584_v62, %v588_v0  ;;  %v209_v62 = vld [vmem:[#allocation2 + $0x88] sm:$0xff] }
  0xe1   :  { %v452_v5 = vld [vmem:[#allocation2 + $0x820] sm:$0xff]  ;;  %v213_v0 = vld [vmem:[#allocation2 + $0xa8] sm:$0xff] }
  0xe2   :  { %v576_v6 = vld [vmem:[#allocation2 + $0xc00] sm:$0xff]  ;;  %v13108_v11 = vcombine.high %v448_v4, %v452_v5  ;;  %3015 = vmatprep.subr.bf16.mxu1 %v13244_v7  ;;  %v13107_v20 = vcombine.low %v448_v4, %v452_v5  ;;  %v12870_v7 = vcombine.high %v209_v62, %v213_v0  ;;  %v289_v54 = vld [vmem:[#allocation2 + $0x308] sm:$0xff] }
  0xe3   :  { %v580_v8 = vld [vmem:[#allocation2 + $0xc20] sm:$0xff]  ;;  %2975 = vmatpush1.bf16.msra.mxu0 %v13115_v9  ;;  %3016 = vmatpush1.bf16.msra.mxu1 %v13243_v10  ;;  %v12869_v10 = vcombine.low %v209_v62, %v213_v0  ;;  %v345_v62 = vld [vmem:[#allocation2 + $0x4c8] sm:$0xff] }
  0xe4   :  { %v568_v12 = vld [vmem:[#allocation2 + $0xbc0] sm:$0xff]  ;;  %v13236_v15 = vcombine.high %v576_v6, %v580_v8  ;;  %2976 = vmatprep.subr.bf16.mxu0 %v13108_v11  ;;  %v13235_v21 = vcombine.low %v576_v6, %v580_v8  ;;  %v201_v6 = vld [vmem:[#allocation2 + $0x48] sm:$0xff] }
  0xe5   :  { %v572_v13 = vld [vmem:[#allocation2 + $0xbe0] sm:$0xff]  ;;  %v205_v8 = vld [vmem:[#allocation2 + $0x68] sm:$0xff] }
  0xe6   :  { %v13228_v22 = vcombine.high %v568_v12, %v572_v13  ;;  %v560_v23 = vld [vmem:[#allocation2 + $0xb80] sm:$0xff]  ;;  %3017 = vmatprep.subr.bf16.mxu1 %v13236_v15  ;;  %v13227_v28 = vcombine.low %v568_v12, %v572_v13  ;;  %v12862_v15 = vcombine.high %v201_v6, %v205_v8  ;;  %v281_v0 = vld [vmem:[#allocation2 + $0x2c8] sm:$0xff] }
  0xe7   :  { %v564_v24 = vld [vmem:[#allocation2 + $0xba0] sm:$0xff]  ;;  %2977 = vmatpush1.bf16.msra.mxu0 %v13107_v20  ;;  %3018 = vmatpush1.bf16.msra.mxu1 %v13235_v21  ;;  %v12861_v20 = vcombine.low %v201_v6, %v205_v8  ;;  %v337_v6 = vld [vmem:[#allocation2 + $0x488] sm:$0xff] }
  0xe8   :  { %2978 = vmatprep.subr.bf16.mxu0 %v13228_v22  ;;  %v13220_v32 = vcombine.high %v560_v23, %v564_v24  ;;  %v552_v33 = vld [vmem:[#allocation2 + $0xb40] sm:$0xff]  ;;  %3044 = vmatprep.subr.bf16.mxu1 %v12910_v26  ;;  %v13219_v39 = vcombine.low %v560_v23, %v564_v24  ;;  %v313_v22 = vld [vmem:[#allocation2 + $0x3c8] sm:$0xff] }
  0xe9   :  { %v556_v34 = vld [vmem:[#allocation2 + $0xb60] sm:$0xff]  ;;  %v317_v23 = vld [vmem:[#allocation2 + $0x3e8] sm:$0xff] }
  0xea   :  { %3036 = vmatmul.mubr.bf16.vlgmr.msra.gmra.mxu1 %v15019_v30  ;;  %v13212_v41 = vcombine.high %v552_v33, %v556_v34  ;;  %v544_v42 = vld [vmem:[#allocation2 + $0xb00] sm:$0xff]  ;;  %v13211_v47 = vcombine.low %v552_v33, %v556_v34  ;;  %v377_v24 = vld [vmem:[#allocation2 + $0x5c8] sm:$0xff] }
  0xeb   :  { %2979 = vmatpush2.bf16.msra.mxu0 %v13227_v28  ;;  %3045 = vmatpush1.bf16.msra.mxu1 %v12909_v31  ;;  %v548_v43 = vld [vmem:[#allocation2 + $0xb20] sm:$0xff]  ;;  %v12853_v31 = vcombine.low %v193_v14, %v197_v17  ;;  %v305_v33 = vld [vmem:[#allocation2 + $0x388] sm:$0xff] }
  0xec   :  { %2980 = vmatprep.subr.bf16.mxu0 %v13220_v32  ;;  %3046 = vmatprep.subr.bf16.mxu1 %v12902_v36  ;;  %v13204_v49 = vcombine.high %v544_v42, %v548_v43  ;;  %v536_v50 = vld [vmem:[#allocation2 + $0xac0] sm:$0xff]  ;;  %v13203_v55 = vcombine.low %v544_v42, %v548_v43  ;;  %v13038_v32 = vcombine.high %v377_v24, %v381_v27  ;;  %v309_v34 = vld [vmem:[#allocation2 + $0x3a8] sm:$0xff] }
  0xed   :  { %3076 = vmatprep.mubr.bf16.mxu1 %v14991_v58  ;;  %v540_v51 = vld [vmem:[#allocation2 + $0xae0] sm:$0xff]  ;;  %v12974_v36 = vcombine.high %v313_v22, %v317_v23  ;;  %v13030_v42 = vcombine.high %v369_v35, %v373_v37  ;;  %v297_v43 = vld [vmem:[#allocation2 + $0x348] sm:$0xff] }
  0xee   :  { %v13196_v57 = vcombine.high %v536_v50, %v540_v51  ;;  %v528_v60 = vld [vmem:[#allocation2 + $0xa80] sm:$0xff]  ;;  %v13195_v1 = vcombine.low %v536_v50, %v540_v51  ;;  %v13022_v50 = vcombine.high %v361_v44, %v365_v46  ;;  %v273_v8 = vld [vmem:[#allocation2 + $0x288] sm:$0xff] }
  0xef   :  { %2981 = vmatpush2.bf16.msra.mxu0 %v13219_v39  ;;  %3047 = vmatpush1.bf16.msra.mxu1 %v12901_v40  ;;  %v532_v61 = vld [vmem:[#allocation2 + $0xaa0] sm:$0xff]  ;;  %v13037_v40 = vcombine.low %v377_v24, %v381_v27  ;;  %v329_v14 = vld [vmem:[#allocation2 + $0x448] sm:$0xff] }
  0xf0   :  { %2982 = vmatprep.subr.bf16.mxu0 %v13212_v41  ;;  %3048 = vmatprep.subr.bf16.mxu1 %v12894_v45  ;;  %v13188_v3 = vcombine.high %v528_v60, %v532_v61  ;;  %v520_v4 = vld [vmem:[#allocation2 + $0xa40] sm:$0xff]  ;;  %v13187_v9 = vcombine.low %v528_v60, %v532_v61  ;;  %v12973_v41 = vcombine.low %v313_v22, %v317_v23  ;;  %v265_v17 = vld [vmem:[#allocation2 + $0x248] sm:$0xff] }
  0xf1   :  { %v524_v5 = vld [vmem:[#allocation2 + $0xa60] sm:$0xff]  ;;  %v12966_v45 = vcombine.high %v305_v33, %v309_v34  ;;  %v321_v24 = vld [vmem:[#allocation2 + $0x408] sm:$0xff] }
  0xf2   :  { %v13180_v11 = vcombine.high %v520_v4, %v524_v5  ;;  %v512_v12 = vld [vmem:[#allocation2 + $0xa00] sm:$0xff]  ;;  %v13179_v18 = vcombine.low %v520_v4, %v524_v5  ;;  %v261_v27 = vld [vmem:[#allocation2 + $0x228] sm:$0xff] }
  0xf3   :  { %2983 = vmatpush2.bf16.msra.mxu0 %v13211_v47  ;;  %3049 = vmatpush1.bf16.msra.mxu1 %v12893_v48  ;;  %v516_v13 = vld [vmem:[#allocation2 + $0xa20] sm:$0xff]  ;;  %v301_v47 = vld [vmem:[#allocation2 + $0x368] sm:$0xff]  ;;  %v13029_v48 = vcombine.low %v369_v35, %v373_v37 }
  0xf4   :  { %2984 = vmatprep.subr.bf16.mxu0 %v13204_v49  ;;  %3050 = vmatprep.subr.bf16.mxu1 %v12886_v53  ;;  %v13172_v21 = vcombine.high %v512_v12, %v516_v13  ;;  %v182_v26 = vld [vmem:[%s15639_s0 + $0x20] sm:$0xff]  ;;  %v13171_v28 = vcombine.low %v512_v12, %v516_v13  ;;  %v12965_v49 = vcombine.low %v305_v33, %v309_v34  ;;  %v357_v53 = vld [vmem:[#allocation2 + $0x528] sm:$0xff]  ;;  %s14877_s0 = smov [#allocation20]  }
  0xf5   :  { %v15026_v39 = vpack.c.bf16 %v182_v26, %v182_v26  ;;  %v12958_v51 = vcombine.high %v297_v43, %v301_v47  ;;  %v13014_v60 = vcombine.high %v353_v52, %v357_v53  ;;  %v257_v26 = vld [vmem:[#allocation2 + $0x208] sm:$0xff]  ;;  %s12837_s24 = sshll.u32 %s14877_s0, 4  ;;  %s12838_s24 = int_to_ptr.vmem [resolvable:$true] %s12837_s24 }
  0xf6   :  { %v12918_v33 = vcombine.high %v257_v26, %v261_v27  ;;  %v441_v34 = vld [vmem:[#allocation2 + $0x7c8] sm:$0xff]  ;;  %s14826_s25 = scalar_lea.vmem %s12838_s24, 128  ;;  %p14831_p0 = scmp.lt.s32.totalorder %s12838_s24, %s12838_s24 }
  0xf7   :  { %2985 = vmatpush2.bf16.msra.mxu0 %v13203_v55  ;;  %3051 = vmatpush1.bf16.msra.mxu1 %v12885_v56  ;;  %v293_v55 = vld [vmem:[#allocation2 + $0x328] sm:$0xff]  ;;  %v13021_v56 = vcombine.low %v361_v44, %v365_v46  ;;  %p14827_p13 = scmp.ne.s32.totalorder %s12838_s24, %s14826_s25  ;;  %p14832_p1 = scmp.lt.s32.totalorder %s14826_s25, %s14826_s25 }
  0xf8   :  { %2986 = vmatprep.subr.bf16.mxu0 %v13196_v57  ;;  %3052 = vmatprep.subr.bf16.mxu1 %v12878_v63  ;;  %v12957_v57 = vcombine.low %v297_v43, %v301_v47  ;;  %v12950_v61 = vcombine.high %v289_v54, %v293_v55  ;;  %v349_v63 = vld [vmem:[#allocation2 + $0x4e8] sm:$0xff] }
  0xf9   :  { %v13006_v4 = vcombine.high %v345_v62, %v349_v63  ;;  %v445_v35 = vld [vmem:[#allocation2 + $0x7e8] sm:$0xff]  ;;  %p14833_p2 = por %p14832_p1, %p14831_p0 }
  0xfa   :  { %v509_v37 = vld [vmem:[#allocation2 + $0x9e8] sm:$0xff] }
  0xfb   :  { %2987 = vmatpush2.bf16.msra.mxu0 %v13195_v1  ;;  %3053 = vmatpush1.bf16.msra.mxu1 %v12877_v2  ;;  %v285_v1 = vld [vmem:[#allocation2 + $0x2e8] sm:$0xff]  ;;  %v13013_v2 = vcombine.low %v353_v52, %v357_v53  ;;  %p14834_p3 = pnand %p14833_p2, %p14827_p13 }
  0xfc   :  { %2988 = vmatprep.subr.bf16.mxu0 %v13188_v3  ;;  %3054 = vmatprep.subr.bf16.mxu1 %v12870_v7  ;;  %v12949_v3 = vcombine.low %v289_v54, %v293_v55  ;;  %v12942_v5 = vcombine.high %v281_v0, %v285_v1  ;;  %v341_v7 = vld [vmem:[#allocation2 + $0x4a8] sm:$0xff] }
  0xfd   :  { %v12998_v12 = vcombine.high %v337_v6, %v341_v7  ;;  %v433_v44 = vld [vmem:[#allocation2 + $0x788] sm:$0xff] }
  0xfe   :  { %v497_v46 = vld [vmem:[#allocation2 + $0x988] sm:$0xff] }
  0xff   :  { %2989 = vmatpush2.bf16.msra.mxu0 %v13187_v9  ;;  %3055 = vmatpush1.bf16.msra.mxu1 %v12869_v10  ;;  %v277_v9 = vld [vmem:[#allocation2 + $0x2a8] sm:$0xff]  ;;  %v13005_v10 = vcombine.low %v345_v62, %v349_v63 }
 0x100   :  { %2990 = vmatprep.subr.bf16.mxu0 %v13180_v11  ;;  %3056 = vmatprep.subr.bf16.mxu1 %v12862_v15  ;;  %v12941_v11 = vcombine.low %v281_v0, %v285_v1  ;;  %v12934_v13 = vcombine.high %v273_v8, %v277_v9  ;;  %v333_v15 = vld [vmem:[#allocation2 + $0x468] sm:$0xff] }
 0x101   :  { %v12990_v22 = vcombine.high %v329_v14, %v333_v15  ;;  %v501_v47 = vld [vmem:[#allocation2 + $0x9a8] sm:$0xff] }
 0x102   :  { %v425_v52 = vld [vmem:[#allocation2 + $0x748] sm:$0xff] }
 0x103   :  { %2991 = vmatpush2.bf16.msra.mxu0 %v13179_v18  ;;  %3057 = vmatpush1.bf16.msra.mxu1 %v12861_v20  ;;  %v269_v18 = vld [vmem:[#allocation2 + $0x268] sm:$0xff]  ;;  %v12997_v20 = vcombine.low %v337_v6, %v341_v7 }
 0x104   :  { %2992 = vmatprep.subr.bf16.mxu0 %v13172_v21  ;;  %3058 = vmatprep.subr.bf16.mxu1 %v12854_v25  ;;  %v12933_v21 = vcombine.low %v273_v8, %v277_v9  ;;  %v12926_v23 = vcombine.high %v265_v17, %v269_v18  ;;  %v325_v25 = vld [vmem:[#allocation2 + $0x428] sm:$0xff] }
 0x105   :  { %v429_v53 = vld [vmem:[#allocation2 + $0x768] sm:$0xff] }
 0x106   :  { %v489_v54 = vld [vmem:[#allocation2 + $0x948] sm:$0xff] }
 0x107   :  { %2993 = vmatpush2.bf16.msra.mxu0 %v13171_v28  ;;  %3059 = vmatpush1.bf16.msra.mxu1 %v12853_v31  ;;  %v12989_v28 = vcombine.low %v329_v14, %v333_v15  ;;  %v12925_v31 = vcombine.low %v265_v17, %v269_v18  ;;  %v493_v55 = vld [vmem:[#allocation2 + $0x968] sm:$0xff] }
 0x108   :  { %3085 = vmatprep.subr.bf16.mxu0 %v13038_v32  ;;  %3060 = vmatprep.subr.bf16.mxu1 %v12974_v36  ;;  %v12982_v32 = vcombine.high %v321_v24, %v325_v25  ;;  %v505_v36 = vld [vmem:[#allocation2 + $0x9c8] sm:$0xff] }
 0x109   :  { %v13166_v43 = vcombine.high %v505_v36, %v509_v37  ;;  %v417_v62 = vld [vmem:[#allocation2 + $0x708] sm:$0xff] }
 0x10a   :  { %2995 = vmatmul.mubr.bf16.vlgmr.msra.gmra.mxu0 %v15026_v39  ;;  %v421_v63 = vld [vmem:[#allocation2 + $0x728] sm:$0xff] }
 0x10b   :  { %3086 = vmatpush1.bf16.msra.mxu0 %v13037_v40  ;;  %3117 = vmatprep.mubr.bf16.mxu0 %v14993_v59  ;;  %v12981_v40 = vcombine.low %v321_v24, %v325_v25  ;;  %v481_v0 = vld [vmem:[#allocation2 + $0x908] sm:$0xff] }
 0x10c   :  { %3061 = vmatpush2.bf16.msra.mxu1 %v12973_v41  ;;  %3087 = vmatprep.subr.bf16.mxu0 %v13030_v42  ;;  %v12917_v41 = vcombine.low %v257_v26, %v261_v27  ;;  %v13102_v42 = vcombine.high %v441_v34, %v445_v35  ;;  %v485_v1 = vld [vmem:[#allocation2 + $0x928] sm:$0xff] }
 0x10d   :  { %3062 = vmatprep.subr.bf16.mxu1 %v12966_v45  ;;  %v437_v45 = vld [vmem:[#allocation2 + $0x7a8] sm:$0xff] }
 0x10e   :  { %v409_v6 = vld [vmem:[#allocation2 + $0x6c8] sm:$0xff] }
 0x10f   :  { %3088 = vmatpush1.bf16.msra.mxu0 %v13029_v48  ;;  %v13101_v48 = vcombine.low %v441_v34, %v445_v35  ;;  %v413_v7 = vld [vmem:[#allocation2 + $0x6e8] sm:$0xff] }
 0x110   :  { %3063 = vmatpush2.bf16.msra.mxu1 %v12965_v49  ;;  %3089 = vmatprep.subr.bf16.mxu0 %v13022_v50  ;;  %v13165_v49 = vcombine.low %v505_v36, %v509_v37  ;;  %v13094_v50 = vcombine.high %v433_v44, %v437_v45  ;;  %v473_v8 = vld [vmem:[#allocation2 + $0x8c8] sm:$0xff] }
 0x111   :  { %3064 = vmatprep.subr.bf16.mxu1 %v12958_v51  ;;  %v13158_v51 = vcombine.high %v497_v46, %v501_v47  ;;  %v477_v9 = vld [vmem:[#allocation2 + $0x8e8] sm:$0xff] }
 0x112   :  { %v401_v14 = vld [vmem:[#allocation2 + $0x688] sm:$0xff] }
 0x113   :  { %3090 = vmatpush1.bf16.msra.mxu0 %v13021_v56  ;;  %v13093_v56 = vcombine.low %v433_v44, %v437_v45  ;;  %v405_v15 = vld [vmem:[#allocation2 + $0x6a8] sm:$0xff] }
 0x114   :  { %3065 = vmatpush2.bf16.msra.mxu1 %v12957_v57  ;;  %3091 = vmatprep.subr.bf16.mxu0 %v13014_v60  ;;  %v13157_v57 = vcombine.low %v497_v46, %v501_v47  ;;  %v13086_v60 = vcombine.high %v425_v52, %v429_v53  ;;  %v465_v17 = vld [vmem:[#allocation2 + $0x888] sm:$0xff] }
 0x115   :  { %3066 = vmatprep.subr.bf16.mxu1 %v12950_v61  ;;  %v13150_v61 = vcombine.high %v489_v54, %v493_v55  ;;  %v469_v18 = vld [vmem:[#allocation2 + $0x8a8] sm:$0xff] }
 0x116   :  { %v393_v24 = vld [vmem:[#allocation2 + $0x648] sm:$0xff] }
 0x117   :  { %3092 = vmatpush1.bf16.msra.mxu0 %v13013_v2  ;;  %v13085_v2 = vcombine.low %v425_v52, %v429_v53  ;;  %v397_v25 = vld [vmem:[#allocation2 + $0x668] sm:$0xff] }
 0x118   :  { %3067 = vmatpush2.bf16.msra.mxu1 %v12949_v3  ;;  %3093 = vmatprep.subr.bf16.mxu0 %v13006_v4  ;;  %v13149_v3 = vcombine.low %v489_v54, %v493_v55  ;;  %v13078_v4 = vcombine.high %v417_v62, %v421_v63  ;;  %v457_v26 = vld [vmem:[#allocation2 + $0x848] sm:$0xff] }
 0x119   :  { %3068 = vmatprep.subr.bf16.mxu1 %v12942_v5  ;;  %v13142_v5 = vcombine.high %v481_v0, %v485_v1  ;;  %v461_v27 = vld [vmem:[#allocation2 + $0x868] sm:$0xff] }
 0x11a   :  { %v385_v34 = vld [vmem:[#allocation2 + $0x608] sm:$0xff] }
 0x11b   :  { %3094 = vmatpush1.bf16.msra.mxu0 %v13005_v10  ;;  %v13077_v10 = vcombine.low %v417_v62, %v421_v63  ;;  %v389_v35 = vld [vmem:[#allocation2 + $0x628] sm:$0xff] }
 0x11c   :  { %3069 = vmatpush2.bf16.msra.mxu1 %v12941_v11  ;;  %3095 = vmatprep.subr.bf16.mxu0 %v12998_v12  ;;  %v13141_v11 = vcombine.low %v481_v0, %v485_v1  ;;  %v13070_v12 = vcombine.high %v409_v6, %v413_v7  ;;  %v449_v36 = vld [vmem:[#allocation2 + $0x808] sm:$0xff] }
 0x11d   :  { %3070 = vmatprep.subr.bf16.mxu1 %v12934_v13  ;;  %v13134_v13 = vcombine.high %v473_v8, %v477_v9  ;;  %v453_v37 = vld [vmem:[#allocation2 + $0x828] sm:$0xff] }
 0x11e   :  { %v633_v44 = vld [vmem:[#allocation2 + $0xdc8] sm:$0xff] }
 0x11f   :  { %3096 = vmatpush1.bf16.msra.mxu0 %v12997_v20  ;;  %v13069_v20 = vcombine.low %v409_v6, %v413_v7  ;;  %v637_v45 = vld [vmem:[#allocation2 + $0xde8] sm:$0xff] }
 0x120   :  { %3071 = vmatpush2.bf16.msra.mxu1 %v12933_v21  ;;  %3097 = vmatprep.subr.bf16.mxu0 %v12990_v22  ;;  %v13133_v21 = vcombine.low %v473_v8, %v477_v9  ;;  %v13062_v22 = vcombine.high %v401_v14, %v405_v15  ;;  %v569_v46 = vld [vmem:[#allocation2 + $0xbc8] sm:$0xff] }
 0x121   :  { %3072 = vmatprep.subr.bf16.mxu1 %v12926_v23  ;;  %v13126_v23 = vcombine.high %v465_v17, %v469_v18  ;;  %v573_v47 = vld [vmem:[#allocation2 + $0xbe8] sm:$0xff] }
 0x122   :  { %v625_v52 = vld [vmem:[#allocation2 + $0xd88] sm:$0xff] }
 0x123   :  { %3098 = vmatpush1.bf16.msra.mxu0 %v12989_v28  ;;  %v13061_v28 = vcombine.low %v401_v14, %v405_v15  ;;  %v629_v53 = vld [vmem:[#allocation2 + $0xda8] sm:$0xff] }
 0x124   :  { %3073 = vmatpush2.bf16.msra.mxu1 %v12925_v31  ;;  %3099 = vmatprep.subr.bf16.mxu0 %v12982_v32  ;;  %v13125_v31 = vcombine.low %v465_v17, %v469_v18  ;;  %v13054_v32 = vcombine.high %v393_v24, %v397_v25  ;;  %v561_v54 = vld [vmem:[#allocation2 + $0xb88] sm:$0xff] }
 0x125   :  { %3074 = vmatprep.subr.bf16.mxu1 %v12918_v33  ;;  %v13118_v33 = vcombine.high %v457_v26, %v461_v27  ;;  %v565_v55 = vld [vmem:[#allocation2 + $0xba8] sm:$0xff] }
 0x126   :  { %v617_v62 = vld [vmem:[#allocation2 + $0xd48] sm:$0xff] }
 0x127   :  { %3100 = vmatpush1.bf16.msra.mxu0 %v12981_v40  ;;  %v13053_v40 = vcombine.low %v393_v24, %v397_v25  ;;  %v621_v63 = vld [vmem:[#allocation2 + $0xd68] sm:$0xff] }
 0x128   :  { %3075 = vmatpush2.bf16.msra.mxu1 %v12917_v41  ;;  %3101 = vmatprep.subr.bf16.mxu0 %v13102_v42  ;;  %v13117_v41 = vcombine.low %v457_v26, %v461_v27  ;;  %v13046_v42 = vcombine.high %v385_v34, %v389_v35  ;;  %v553_v0 = vld [vmem:[#allocation2 + $0xb48] sm:$0xff] }
 0x129   :  { %3126 = vmatprep.subr.bf16.mxu1 %v13166_v43  ;;  %v13110_v43 = vcombine.high %v449_v36, %v453_v37  ;;  %v557_v1 = vld [vmem:[#allocation2 + $0xb68] sm:$0xff] }
 0x12a   :  { %v609_v6 = vld [vmem:[#allocation2 + $0xd08] sm:$0xff] }
 0x12b   :  { %3077 = vmatmul.mubr.bf16.vlgmr.msra.gmra.mxu1 %v15003_v16  ;;  %3102 = vmatpush2.bf16.msra.mxu0 %v13101_v48  ;;  %v13045_v48 = vcombine.low %v385_v34, %v389_v35  ;;  %v613_v7 = vld [vmem:[#allocation2 + $0xd28] sm:$0xff] }
 0x12c   :  { %3127 = vmatpush1.bf16.msra.mxu1 %v13165_v49  ;;  %3103 = vmatprep.subr.bf16.mxu0 %v13094_v50  ;;  %v13109_v49 = vcombine.low %v449_v36, %v453_v37  ;;  %v13294_v50 = vcombine.high %v633_v44, %v637_v45  ;;  %v545_v8 = vld [vmem:[#allocation2 + $0xb08] sm:$0xff] }
 0x12d   :  { %3128 = vmatprep.subr.bf16.mxu1 %v13158_v51  ;;  %3158 = vmatprep.mubr.bf16.mxu1 %v15011_v29  ;;  %v13230_v51 = vcombine.high %v569_v46, %v573_v47  ;;  %v549_v9 = vld [vmem:[#allocation2 + $0xb28] sm:$0xff] }
 0x12e   :  { %v601_v14 = vld [vmem:[#allocation2 + $0xcc8] sm:$0xff] }
 0x12f   :  { %3104 = vmatpush2.bf16.msra.mxu0 %v13093_v56  ;;  %v13293_v56 = vcombine.low %v633_v44, %v637_v45  ;;  %v605_v15 = vld [vmem:[#allocation2 + $0xce8] sm:$0xff] }
 0x130   :  { %3129 = vmatpush1.bf16.msra.mxu1 %v13157_v57  ;;  %3105 = vmatprep.subr.bf16.mxu0 %v13086_v60  ;;  %v13229_v57 = vcombine.low %v569_v46, %v573_v47  ;;  %v13286_v60 = vcombine.high %v625_v52, %v629_v53  ;;  %v537_v17 = vld [vmem:[#allocation2 + $0xac8] sm:$0xff] }
 0x131   :  { %3130 = vmatprep.subr.bf16.mxu1 %v13150_v61  ;;  %v13222_v61 = vcombine.high %v561_v54, %v565_v55  ;;  %v541_v18 = vld [vmem:[#allocation2 + $0xae8] sm:$0xff] }
 0x132   :  { %v593_v24 = vld [vmem:[#allocation2 + $0xc88] sm:$0xff] }
 0x133   :  { %3106 = vmatpush2.bf16.msra.mxu0 %v13085_v2  ;;  %v13285_v2 = vcombine.low %v625_v52, %v629_v53  ;;  %v597_v25 = vld [vmem:[#allocation2 + $0xca8] sm:$0xff]  ;;  %v250_v52 = vld [vmem:[#allocation2 + $0x1d0] sm:$0xff] }
 0x134   :  { %3131 = vmatpush1.bf16.msra.mxu1 %v13149_v3  ;;  %3107 = vmatprep.subr.bf16.mxu0 %v13078_v4  ;;  %v13221_v3 = vcombine.low %v561_v54, %v565_v55  ;;  %v13278_v4 = vcombine.high %v617_v62, %v621_v63  ;;  %v529_v26 = vld [vmem:[#allocation2 + $0xa88] sm:$0xff]  ;;  %v254_v53 = vld [vmem:[#allocation2 + $0x1f0] sm:$0xff] }
 0x135   :  { %3132 = vmatprep.subr.bf16.mxu1 %v13142_v5  ;;  %v13214_v5 = vcombine.high %v553_v0, %v557_v1  ;;  %v533_v27 = vld [vmem:[#allocation2 + $0xaa8] sm:$0xff]  ;;  %v378_v54 = vld [vmem:[#allocation2 + $0x5d0] sm:$0xff] }
 0x136   :  { %v585_v34 = vld [vmem:[#allocation2 + $0xc48] sm:$0xff]  ;;  %v382_v55 = vld [vmem:[#allocation2 + $0x5f0] sm:$0xff] }
 0x137   :  { %3108 = vmatpush2.bf16.msra.mxu0 %v13077_v10  ;;  %v13277_v10 = vcombine.low %v617_v62, %v621_v63  ;;  %v589_v35 = vld [vmem:[#allocation2 + $0xc68] sm:$0xff]  ;;  %v242_v62 = vld [vmem:[#allocation2 + $0x190] sm:$0xff] }
 0x138   :  { %3133 = vmatpush1.bf16.msra.mxu1 %v13141_v11  ;;  %3109 = vmatprep.subr.bf16.mxu0 %v13070_v12  ;;  %v13213_v11 = vcombine.low %v553_v0, %v557_v1  ;;  %v13270_v12 = vcombine.high %v609_v6, %v613_v7  ;;  %v521_v36 = vld [vmem:[#allocation2 + $0xa48] sm:$0xff]  ;;  %v246_v63 = vld [vmem:[#allocation2 + $0x1b0] sm:$0xff] }
 0x139   :  { %3134 = vmatprep.subr.bf16.mxu1 %v13134_v13  ;;  %v13206_v13 = vcombine.high %v545_v8, %v549_v9  ;;  %v525_v37 = vld [vmem:[#allocation2 + $0xa68] sm:$0xff]  ;;  %v370_v0 = vld [vmem:[#allocation2 + $0x590] sm:$0xff] }
 0x13a   :  { %v577_v44 = vld [vmem:[#allocation2 + $0xc08] sm:$0xff]  ;;  %v374_v1 = vld [vmem:[#allocation2 + $0x5b0] sm:$0xff] }
 0x13b   :  { %3110 = vmatpush2.bf16.msra.mxu0 %v13069_v20  ;;  %v13269_v20 = vcombine.low %v609_v6, %v613_v7  ;;  %v581_v45 = vld [vmem:[#allocation2 + $0xc28] sm:$0xff]  ;;  %v234_v6 = vld [vmem:[#allocation2 + $0x150] sm:$0xff] }
 0x13c   :  { %3135 = vmatpush1.bf16.msra.mxu1 %v13133_v21  ;;  %3111 = vmatprep.subr.bf16.mxu0 %v13062_v22  ;;  %v13205_v21 = vcombine.low %v545_v8, %v549_v9  ;;  %v13262_v22 = vcombine.high %v601_v14, %v605_v15  ;;  %v513_v46 = vld [vmem:[#allocation2 + $0xa08] sm:$0xff]  ;;  %v238_v7 = vld [vmem:[#allocation2 + $0x170] sm:$0xff] }
 0x13d   :  { %3136 = vmatprep.subr.bf16.mxu1 %v13126_v23  ;;  %v13198_v23 = vcombine.high %v537_v17, %v541_v18  ;;  %v517_v47 = vld [vmem:[#allocation2 + $0xa28] sm:$0xff]  ;;  %v362_v8 = vld [vmem:[#allocation2 + $0x550] sm:$0xff] }
 0x13e   :  { %v366_v9 = vld [vmem:[#allocation2 + $0x570] sm:$0xff] }
 0x13f   :  { %3112 = vmatpush2.bf16.msra.mxu0 %v13061_v28  ;;  %v13261_v28 = vcombine.low %v601_v14, %v605_v15  ;;  %v226_v14 = vld [vmem:[#allocation2 + $0x110] sm:$0xff] }
 0x140   :  { %3137 = vmatpush1.bf16.msra.mxu1 %v13125_v31  ;;  %3113 = vmatprep.subr.bf16.mxu0 %v13054_v32  ;;  %v13197_v31 = vcombine.low %v537_v17, %v541_v18  ;;  %v13254_v32 = vcombine.high %v593_v24, %v597_v25  ;;  %v230_v15 = vld [vmem:[#allocation2 + $0x130] sm:$0xff] }
 0x141   :  { %3138 = vmatprep.subr.bf16.mxu1 %v13118_v33  ;;  %v13190_v33 = vcombine.high %v529_v26, %v533_v27  ;;  %v354_v17 = vld [vmem:[#allocation2 + $0x510] sm:$0xff] }
 0x142   :  { %v358_v18 = vld [vmem:[#allocation2 + $0x530] sm:$0xff] }
 0x143   :  { %3114 = vmatpush2.bf16.msra.mxu0 %v13053_v40  ;;  %v13253_v40 = vcombine.low %v593_v24, %v597_v25  ;;  %v218_v24 = vld [vmem:[#allocation2 + $0xd0] sm:$0xff] }
 0x144   :  { %3139 = vmatpush1.bf16.msra.mxu1 %v13117_v41  ;;  %3115 = vmatprep.subr.bf16.mxu0 %v13046_v42  ;;  %v13189_v41 = vcombine.low %v529_v26, %v533_v27  ;;  %v13246_v42 = vcombine.high %v585_v34, %v589_v35  ;;  %v222_v25 = vld [vmem:[#allocation2 + $0xf0] sm:$0xff] }
 0x145   :  { %3140 = vmatprep.subr.bf16.mxu1 %v13110_v43  ;;  %v13182_v43 = vcombine.high %v521_v36, %v525_v37  ;;  %v346_v26 = vld [vmem:[#allocation2 + $0x4d0] sm:$0xff] }
 0x146   :  { %v350_v27 = vld [vmem:[#allocation2 + $0x4f0] sm:$0xff] }
 0x147   :  { %3116 = vmatpush2.bf16.msra.mxu0 %v13045_v48  ;;  %v13245_v48 = vcombine.low %v585_v34, %v589_v35  ;;  %v210_v34 = vld [vmem:[#allocation2 + $0x90] sm:$0xff] }
 0x148   :  { %3141 = vmatpush1.bf16.msra.mxu1 %v13109_v49  ;;  %3167 = vmatprep.subr.bf16.mxu0 %v13294_v50  ;;  %v13181_v49 = vcombine.low %v521_v36, %v525_v37  ;;  %v13238_v50 = vcombine.high %v577_v44, %v581_v45  ;;  %v214_v35 = vld [vmem:[#allocation2 + $0xb0] sm:$0xff] }
 0x149   :  { %3142 = vmatprep.subr.bf16.mxu1 %v13230_v51  ;;  %v13174_v51 = vcombine.high %v513_v46, %v517_v47  ;;  %v338_v36 = vld [vmem:[#allocation2 + $0x490] sm:$0xff] }
 0x14a   :  { %3118 = vmatmul.mubr.bf16.vlgmr.msra.gmra.mxu0 %v15005_v19  ;;  %v342_v37 = vld [vmem:[#allocation2 + $0x4b0] sm:$0xff] }
 0x14b   :  { %3168 = vmatpush1.bf16.msra.mxu0 %v13293_v56  ;;  %3199 = vmatprep.mubr.bf16.mxu0 %v14875_v38  ;;  %v13237_v56 = vcombine.low %v577_v44, %v581_v45  ;;  %v202_v44 = vld [vmem:[#allocation2 + $0x50] sm:$0xff] }
 0x14c   :  { %3143 = vmatpush2.bf16.msra.mxu1 %v13229_v57  ;;  %3169 = vmatprep.subr.bf16.mxu0 %v13286_v60  ;;  %v13173_v57 = vcombine.low %v513_v46, %v517_v47  ;;  %v12912_v60 = vcombine.high %v250_v52, %v254_v53  ;;  %v206_v45 = vld [vmem:[#allocation2 + $0x70] sm:$0xff] }
 0x14d   :  { %3144 = vmatprep.subr.bf16.mxu1 %v13222_v61  ;;  %v13040_v61 = vcombine.high %v378_v54, %v382_v55  ;;  %v330_v46 = vld [vmem:[#allocation2 + $0x450] sm:$0xff] }
 0x14e   :  { %v334_v47 = vld [vmem:[#allocation2 + $0x470] sm:$0xff] }
 0x14f   :  { %3170 = vmatpush1.bf16.msra.mxu0 %v13285_v2  ;;  %v12911_v2 = vcombine.low %v250_v52, %v254_v53  ;;  %v194_v52 = vld [vmem:[#allocation2 + $0x10] sm:$0xff] }
 0x150   :  { %3145 = vmatpush2.bf16.msra.mxu1 %v13221_v3  ;;  %3171 = vmatprep.subr.bf16.mxu0 %v13278_v4  ;;  %v13039_v3 = vcombine.low %v378_v54, %v382_v55  ;;  %v12904_v4 = vcombine.high %v242_v62, %v246_v63  ;;  %v198_v53 = vld [vmem:[#allocation2 + $0x30] sm:$0xff] }
 0x151   :  { %3146 = vmatprep.subr.bf16.mxu1 %v13214_v5  ;;  %v13032_v5 = vcombine.high %v370_v0, %v374_v1  ;;  %v322_v54 = vld [vmem:[#allocation2 + $0x410] sm:$0xff] }
 0x152   :  { %v326_v55 = vld [vmem:[#allocation2 + $0x430] sm:$0xff] }
 0x153   :  { %3172 = vmatpush1.bf16.msra.mxu0 %v13277_v10  ;;  %v12903_v10 = vcombine.low %v242_v62, %v246_v63  ;;  %v314_v62 = vld [vmem:[#allocation2 + $0x3d0] sm:$0xff] }
 0x154   :  { %3147 = vmatpush2.bf16.msra.mxu1 %v13213_v11  ;;  %3173 = vmatprep.subr.bf16.mxu0 %v13270_v12  ;;  %v13031_v11 = vcombine.low %v370_v0, %v374_v1  ;;  %v12896_v12 = vcombine.high %v234_v6, %v238_v7  ;;  %v318_v63 = vld [vmem:[#allocation2 + $0x3f0] sm:$0xff] }
 0x155   :  { %3148 = vmatprep.subr.bf16.mxu1 %v13206_v13  ;;  %v13024_v13 = vcombine.high %v362_v8, %v366_v9  ;;  %v442_v0 = vld [vmem:[#allocation2 + $0x7d0] sm:$0xff] }
 0x156   :  { %v446_v1 = vld [vmem:[#allocation2 + $0x7f0] sm:$0xff] }
 0x157   :  { %3174 = vmatpush1.bf16.msra.mxu0 %v13269_v20  ;;  %v12895_v20 = vcombine.low %v234_v6, %v238_v7  ;;  %v306_v6 = vld [vmem:[#allocation2 + $0x390] sm:$0xff] }
 0x158   :  { %3149 = vmatpush2.bf16.msra.mxu1 %v13205_v21  ;;  %3175 = vmatprep.subr.bf16.mxu0 %v13262_v22  ;;  %v13023_v21 = vcombine.low %v362_v8, %v366_v9  ;;  %v12888_v22 = vcombine.high %v226_v14, %v230_v15  ;;  %v310_v7 = vld [vmem:[#allocation2 + $0x3b0] sm:$0xff] }
 0x159   :  { %3150 = vmatprep.subr.bf16.mxu1 %v13198_v23  ;;  %v13016_v23 = vcombine.high %v354_v17, %v358_v18  ;;  %v434_v8 = vld [vmem:[#allocation2 + $0x790] sm:$0xff] }
 0x15a   :  { %v438_v9 = vld [vmem:[#allocation2 + $0x7b0] sm:$0xff] }
 0x15b   :  { %3176 = vmatpush1.bf16.msra.mxu0 %v13261_v28  ;;  %v12887_v28 = vcombine.low %v226_v14, %v230_v15  ;;  %v298_v14 = vld [vmem:[#allocation2 + $0x350] sm:$0xff] }
 0x15c   :  { %3151 = vmatpush2.bf16.msra.mxu1 %v13197_v31  ;;  %3177 = vmatprep.subr.bf16.mxu0 %v13254_v32  ;;  %v13015_v31 = vcombine.low %v354_v17, %v358_v18  ;;  %v12880_v32 = vcombine.high %v218_v24, %v222_v25  ;;  %v302_v15 = vld [vmem:[#allocation2 + $0x370] sm:$0xff] }
 0x15d   :  { %3152 = vmatprep.subr.bf16.mxu1 %v13190_v33  ;;  %v13008_v33 = vcombine.high %v346_v26, %v350_v27  ;;  %v426_v18 = vld [vmem:[#allocation2 + $0x750] sm:$0xff] }
 0x15f   :  { %3178 = vmatpush1.bf16.msra.mxu0 %v13253_v40  ;;  %v12879_v40 = vcombine.low %v218_v24, %v222_v25  ;;  %v13095_v25 = vcombine.low %v434_v8, %v438_v9 }
 0x160   :  { %3153 = vmatpush2.bf16.msra.mxu1 %v13189_v41  ;;  %3179 = vmatprep.subr.bf16.mxu0 %v13246_v42  ;;  %v13007_v41 = vcombine.low %v346_v26, %v350_v27  ;;  %v12872_v42 = vcombine.high %v210_v34, %v214_v35  ;;  %v12960_v26 = vcombine.high %v298_v14, %v302_v15 }
 0x161   :  { %3154 = vmatprep.subr.bf16.mxu1 %v13182_v43  ;;  %v13000_v43 = vcombine.high %v338_v36, %v342_v37 }
 0x163   :  { %3180 = vmatpush1.bf16.msra.mxu0 %v13245_v48  ;;  %v12871_v48 = vcombine.low %v210_v34, %v214_v35  ;;  %v418_v35 = vld [vmem:[#allocation2 + $0x710] sm:$0xff] }
 0x164   :  { %3155 = vmatpush2.bf16.msra.mxu1 %v13181_v49  ;;  %3181 = vmatprep.subr.bf16.mxu0 %v13238_v50  ;;  %v12999_v49 = vcombine.low %v338_v36, %v342_v37  ;;  %v12864_v50 = vcombine.high %v202_v44, %v206_v45  ;;  %v422_v36 = vld [vmem:[#allocation2 + $0x730] sm:$0xff] }
 0x165   :  { %3156 = vmatprep.subr.bf16.mxu1 %v13174_v51  ;;  %v12992_v51 = vcombine.high %v330_v46, %v334_v47 }
 0x167   :  { %3182 = vmatpush1.bf16.msra.mxu0 %v13237_v56  ;;  %v12863_v56 = vcombine.low %v202_v44, %v206_v45  ;;  %v13080_v45 = vcombine.high %v418_v35, %v422_v36 }
 0x168   :  { %3157 = vmatpush2.bf16.msra.mxu1 %v13173_v57  ;;  %3208 = vmatprep.subr.bf16.mxu0 %v12912_v60  ;;  %v12991_v57 = vcombine.low %v330_v46, %v334_v47  ;;  %v12856_v60 = vcombine.high %v194_v52, %v198_v53  ;;  %v282_v46 = vld [vmem:[#allocation2 + $0x2d0] sm:$0xff] }
 0x169   :  { %3249 = vmatprep.subr.bf16.mxu1 %v13040_v61  ;;  %v12984_v61 = vcombine.high %v322_v54, %v326_v55  ;;  %v286_v47 = vld [vmem:[#allocation2 + $0x2f0] sm:$0xff] }
 0x16a   :  { %3200 = vmatmul.mubr.bf16.vlgmr.msra.gmra.mxu0 %v15019_v30 }
 0x16b   :  { %3159 = vmatmul.mubr.bf16.vlgmr.msra.gmra.mxu1 %v15026_v39  ;;  %3209 = vmatpush1.bf16.msra.mxu0 %v12911_v2  ;;  %v12855_v2 = vcombine.low %v194_v52, %v198_v53  ;;  %v12944_v52 = vcombine.high %v282_v46, %v286_v47 }
 0x16c   :  { %3250 = vmatpush1.bf16.msra.mxu1 %v13039_v3  ;;  %3210 = vmatprep.subr.bf16.mxu0 %v12904_v4  ;;  %v12983_v3 = vcombine.low %v322_v54, %v326_v55  ;;  %v12976_v4 = vcombine.high %v314_v62, %v318_v63  ;;  %v274_v54 = vld [vmem:[#allocation2 + $0x290] sm:$0xff] }
 0x16d   :  { %3251 = vmatprep.subr.bf16.mxu1 %v13032_v5  ;;  %3240 = vmatprep.mubr.bf16.mxu0 %v14991_v58  ;;  %v13104_v5 = vcombine.high %v442_v0, %v446_v1  ;;  %v278_v55 = vld [vmem:[#allocation2 + $0x2b0] sm:$0xff] }
 0x16e   :  { %3281 = vmatprep.mubr.bf16.mxu1 %v14993_v59 }
 0x16f   :  { %3211 = vmatpush1.bf16.msra.mxu0 %v12903_v10  ;;  %v12975_v10 = vcombine.low %v314_v62, %v318_v63  ;;  %v12936_v62 = vcombine.high %v274_v54, %v278_v55 }
 0x170   :  { %3252 = vmatpush1.bf16.msra.mxu1 %v13031_v11  ;;  %3212 = vmatprep.subr.bf16.mxu0 %v12896_v12  ;;  %v13103_v11 = vcombine.low %v442_v0, %v446_v1  ;;  %v12968_v12 = vcombine.high %v306_v6, %v310_v7  ;;  %v266_v0 = vld [vmem:[#allocation2 + $0x250] sm:$0xff] }
 0x171   :  { %3253 = vmatprep.subr.bf16.mxu1 %v13024_v13  ;;  %v13096_v13 = vcombine.high %v434_v8, %v438_v9  ;;  %v270_v1 = vld [vmem:[#allocation2 + $0x270] sm:$0xff] }
 0x172   :  { %v258_v8 = vld [vmem:[#allocation2 + $0x210] sm:$0xff] }
 0x173   :  { %3213 = vmatpush1.bf16.msra.mxu0 %v12895_v20  ;;  %v430_v20 = vld [vmem:[#allocation2 + $0x770] sm:$0xff] }
 0x174   :  { %3254 = vmatpush1.bf16.msra.mxu1 %v13023_v21  ;;  %3214 = vmatprep.subr.bf16.mxu0 %v12888_v22  ;;  %v12967_v22 = vcombine.low %v306_v6, %v310_v7  ;;  %v12928_v6 = vcombine.high %v266_v0, %v270_v1  ;;  %v262_v9 = vld [vmem:[#allocation2 + $0x230] sm:$0xff] }
 0x175   :  { %3255 = vmatprep.subr.bf16.mxu1 %v13016_v23 }
 0x177   :  { %3215 = vmatpush1.bf16.msra.mxu0 %v12887_v28  ;;  %v13088_v28 = vcombine.high %v426_v18, %v430_v20 }
 0x178   :  { %3256 = vmatpush1.bf16.msra.mxu1 %v13015_v31  ;;  %3216 = vmatprep.subr.bf16.mxu0 %v12880_v32  ;;  %v290_v31 = vld [vmem:[#allocation2 + $0x310] sm:$0xff] }
 0x179   :  { %3257 = vmatprep.subr.bf16.mxu1 %v13008_v33  ;;  %v294_v32 = vld [vmem:[#allocation2 + $0x330] sm:$0xff] }
 0x17b   :  { %3217 = vmatpush1.bf16.msra.mxu0 %v12879_v40  ;;  %v12959_v40 = vcombine.low %v298_v14, %v302_v15  ;;  %v12920_v14 = vcombine.high %v258_v8, %v262_v9 }
 0x17c   :  { %3258 = vmatpush1.bf16.msra.mxu1 %v13007_v41  ;;  %3218 = vmatprep.subr.bf16.mxu0 %v12872_v42  ;;  %v13087_v42 = vcombine.low %v426_v18, %v430_v20  ;;  %v510_v18 = vld [vmem:[#allocation2 + $0x9f0] sm:$0xff] }
 0x17d   :  { %3259 = vmatprep.subr.bf16.mxu1 %v13000_v43  ;;  %v12952_v43 = vcombine.high %v290_v31, %v294_v32  ;;  %v634_v20 = vld [vmem:[#allocation2 + $0xdd0] sm:$0xff] }
 0x17f   :  { %3219 = vmatpush1.bf16.msra.mxu0 %v12871_v48  ;;  %v410_v48 = vld [vmem:[#allocation2 + $0x6d0] sm:$0xff] }
 0x180   :  { %3260 = vmatpush1.bf16.msra.mxu1 %v12999_v49  ;;  %3220 = vmatprep.subr.bf16.mxu0 %v12864_v50  ;;  %v414_v49 = vld [vmem:[#allocation2 + $0x6f0] sm:$0xff]  ;;  %v12951_v50 = vcombine.low %v290_v31, %v294_v32 }
 0x181   :  { %3261 = vmatprep.subr.bf16.mxu1 %v12992_v51  ;;  %v13079_v51 = vcombine.low %v418_v35, %v422_v36  ;;  %v13072_v53 = vcombine.high %v410_v48, %v414_v49  ;;  %v626_v31 = vld [vmem:[#allocation2 + $0xd90] sm:$0xff] }
 0x182   :  { %v630_v32 = vld [vmem:[#allocation2 + $0xdb0] sm:$0xff] }
 0x183   :  { %3221 = vmatpush1.bf16.msra.mxu0 %v12863_v56  ;;  %v402_v56 = vld [vmem:[#allocation2 + $0x690] sm:$0xff] }
 0x184   :  { %3262 = vmatpush1.bf16.msra.mxu1 %v12991_v57  ;;  %3222 = vmatprep.subr.bf16.mxu0 %v12856_v60  ;;  %v406_v57 = vld [vmem:[#allocation2 + $0x6b0] sm:$0xff]  ;;  %v12943_v60 = vcombine.low %v282_v46, %v286_v47  ;;  %v13287_v46 = vcombine.low %v626_v31, %v630_v32 }
 0x185   :  { %3263 = vmatprep.subr.bf16.mxu1 %v12984_v61  ;;  %v13071_v61 = vcombine.low %v410_v48, %v414_v49  ;;  %v13064_v63 = vcombine.high %v402_v56, %v406_v57 }
 0x187   :  { %3223 = vmatpush1.bf16.msra.mxu0 %v12855_v2  ;;  %v394_v2 = vld [vmem:[#allocation2 + $0x650] sm:$0xff] }
 0x188   :  { %3264 = vmatpush1.bf16.msra.mxu1 %v12983_v3  ;;  %3224 = vmatprep.subr.bf16.mxu0 %v12976_v4  ;;  %v398_v3 = vld [vmem:[#allocation2 + $0x670] sm:$0xff]  ;;  %v12935_v4 = vcombine.low %v274_v54, %v278_v55 }
 0x189   :  { %3265 = vmatprep.subr.bf16.mxu1 %v13104_v5  ;;  %v2955_v21 = vpop.f32.mrf.mxu1  ;;  %v13063_v5 = vcombine.low %v402_v56, %v406_v57  ;;  %v13056_v7 = vcombine.high %v394_v2, %v398_v3 }
 0x18a   :  { %v2914_v17 = vpop.f32.mrf.mxu0 }
 0x18b   :  { %3225 = vmatpush2.bf16.msra.mxu0 %v12975_v10  ;;  %v15038_v23 = vadd.f32 %v2955_v21, %v2914_v17  ;;  %v2957_v27 = vpop.f32.mrf.mxu1  ;;  %v386_v10 = vld [vmem:[#allocation2 + $0x610] sm:$0xff] }
 0x18c   :  { %3266 = vmatpush2.bf16.msra.mxu1 %v13103_v11  ;;  %v2916_v24 = vpop.f32.mrf.mxu0  ;;  %3226 = vmatprep.subr.bf16.mxu0 %v12968_v12  ;;  %v390_v11 = vld [vmem:[#allocation2 + $0x630] sm:$0xff]  ;;  %v12927_v12 = vcombine.low %v266_v0, %v270_v1 }
 0x18d   :  { %3267 = vmatprep.subr.bf16.mxu1 %v13096_v13  ;;  %v15040_v33 = vadd.f32 %v2957_v27, %v2916_v24  ;;  %v2959_v37 = vpop.f32.mrf.mxu1  ;;  %v13055_v13 = vcombine.low %v394_v2, %v398_v3  ;;  %v13048_v15 = vcombine.high %v386_v10, %v390_v11  ;;  %v506_v17 = vld [vmem:[#allocation2 + $0x9d0] sm:$0xff]  ;;  %v13047_v24 = vcombine.low %v386_v10, %v390_v11 }
 0x18e   :  { %v2918_v34 = vpop.f32.mrf.mxu0  ;;  %v638_v21 = vld [vmem:[#allocation2 + $0xdf0] sm:$0xff]  ;;  %v13288_v37 = vcombine.high %v626_v31, %v630_v32 }
 0x18f   :  { %3227 = vmatpush2.bf16.msra.mxu0 %v12967_v22  ;;  %v2960_v44 = vpop.f32.mrf.mxu1  ;;  %v12919_v22 = vcombine.low %v258_v8, %v262_v9  ;;  %v498_v27 = vld [vmem:[#allocation2 + $0x990] sm:$0xff]  ;;  %v13167_v34 = vcombine.low %v506_v17, %v510_v18  ;;  %v13295_v35 = vcombine.low %v634_v20, %v638_v21 }
 0x190   :  { %3268 = vmatpush2.bf16.msra.mxu1 %v13095_v25  ;;  %v2919_v41 = vpop.f32.mrf.mxu0  ;;  %3228 = vmatprep.subr.bf16.mxu0 %v12960_v26  ;;  %v13168_v25 = vcombine.high %v506_v17, %v510_v18  ;;  %v13296_v26 = vcombine.high %v634_v20, %v638_v21  ;;  %v602_v0 = vld [vmem:[#allocation2 + $0xcd0] sm:$0xff] }
 0x191   :  { %3269 = vmatprep.subr.bf16.mxu1 %v13088_v28  ;;  %v502_v28 = vld [vmem:[#allocation2 + $0x9b0] sm:$0xff] }
 0x192   :  { %v13160_v36 = vcombine.high %v498_v27, %v502_v28  ;;  %v494_v41 = vld [vmem:[#allocation2 + $0x970] sm:$0xff] }
 0x193   :  { %3229 = vmatpush2.bf16.msra.mxu0 %v12959_v40  ;;  %v490_v40 = vld [vmem:[#allocation2 + $0x950] sm:$0xff] }
 0x194   :  { %3270 = vmatpush2.bf16.msra.mxu1 %v13087_v42  ;;  %3230 = vmatprep.subr.bf16.mxu0 %v12952_v43  ;;  %v618_v42 = vld [vmem:[#allocation2 + $0xd50] sm:$0xff]  ;;  %v13152_v47 = vcombine.high %v490_v40, %v494_v41  ;;  %v13151_v55 = vcombine.low %v490_v40, %v494_v41  ;;  %v251_v40 = vld [vmem:[#allocation2 + $0x1d8] sm:$0xff] }
 0x195   :  { %3271 = vmatprep.subr.bf16.mxu1 %v13080_v45  ;;  %v622_v43 = vld [vmem:[#allocation2 + $0xd70] sm:$0xff]  ;;  %v13159_v45 = vcombine.low %v498_v27, %v502_v28  ;;  %v255_v41 = vld [vmem:[#allocation2 + $0x1f8] sm:$0xff] }
 0x196   :  { %v13280_v49 = vcombine.high %v618_v42, %v622_v43  ;;  %v13279_v56 = vcombine.low %v618_v42, %v622_v43  ;;  %v606_v1 = vld [vmem:[#allocation2 + $0xcf0] sm:$0xff] }
 0x197   :  { %3231 = vmatpush2.bf16.msra.mxu0 %v12951_v50  ;;  %v482_v50 = vld [vmem:[#allocation2 + $0x910] sm:$0xff]  ;;  %v13263_v11 = vcombine.low %v602_v0, %v606_v1 }
 0x198   :  { %3272 = vmatpush2.bf16.msra.mxu1 %v13079_v51  ;;  %3232 = vmatprep.subr.bf16.mxu0 %v12944_v52  ;;  %v486_v51 = vld [vmem:[#allocation2 + $0x930] sm:$0xff] }
 0x199   :  { %3273 = vmatprep.subr.bf16.mxu1 %v13072_v53  ;;  %v610_v52 = vld [vmem:[#allocation2 + $0xd10] sm:$0xff]  ;;  %v13144_v57 = vcombine.high %v482_v50, %v486_v51  ;;  %v13143_v2 = vcombine.low %v482_v50, %v486_v51  ;;  %v243_v50 = vld [vmem:[#allocation2 + $0x198] sm:$0xff] }
 0x19a   :  { %v614_v53 = vld [vmem:[#allocation2 + $0xd30] sm:$0xff]  ;;  %v247_v51 = vld [vmem:[#allocation2 + $0x1b8] sm:$0xff] }
 0x19b   :  { %3233 = vmatpush2.bf16.msra.mxu0 %v12943_v60  ;;  %v13271_v3 = vcombine.low %v610_v52, %v614_v53  ;;  %v594_v8 = vld [vmem:[#allocation2 + $0xc90] sm:$0xff] }
 0x19c   :  { %3274 = vmatpush2.bf16.msra.mxu1 %v13071_v61  ;;  %3234 = vmatprep.subr.bf16.mxu0 %v12936_v62  ;;  %v13272_v61 = vcombine.high %v610_v52, %v614_v53  ;;  %v474_v62 = vld [vmem:[#allocation2 + $0x8d0] sm:$0xff]  ;;  %v12913_v53 = vcombine.low %v251_v40, %v255_v41 }
 0x19d   :  { %3275 = vmatprep.subr.bf16.mxu1 %v13064_v63  ;;  %v478_v63 = vld [vmem:[#allocation2 + $0x8f0] sm:$0xff] }
 0x19e   :  { %v598_v9 = vld [vmem:[#allocation2 + $0xcb0] sm:$0xff]  ;;  %v13135_v10 = vcombine.low %v474_v62, %v478_v63 }
 0x19f   :  { %3235 = vmatpush2.bf16.msra.mxu0 %v12935_v4  ;;  %v13136_v4 = vcombine.high %v474_v62, %v478_v63  ;;  %v586_v17 = vld [vmem:[#allocation2 + $0xc50] sm:$0xff]  ;;  %v13255_v21 = vcombine.low %v594_v8, %v598_v9  ;;  %v239_v62 = vld [vmem:[#allocation2 + $0x178] sm:$0xff] }
 0x1a0   :  { %3276 = vmatpush2.bf16.msra.mxu1 %v13063_v5  ;;  %3236 = vmatprep.subr.bf16.mxu0 %v12928_v6  ;;  %v13264_v5 = vcombine.high %v602_v0, %v606_v1  ;;  %v466_v6 = vld [vmem:[#allocation2 + $0x890] sm:$0xff] }
 0x1a1   :  { %3277 = vmatprep.subr.bf16.mxu1 %v13056_v7  ;;  %v470_v7 = vld [vmem:[#allocation2 + $0x8b0] sm:$0xff] }
 0x1a2   :  { %v590_v18 = vld [vmem:[#allocation2 + $0xc70] sm:$0xff]  ;;  %v13127_v20 = vcombine.low %v466_v6, %v470_v7 }
 0x1a3   :  { %3237 = vmatpush2.bf16.msra.mxu0 %v12927_v12  ;;  %v13128_v12 = vcombine.high %v466_v6, %v470_v7  ;;  %v578_v27 = vld [vmem:[#allocation2 + $0xc10] sm:$0xff]  ;;  %v13247_v32 = vcombine.low %v586_v17, %v590_v18 }
 0x1a4   :  { %3278 = vmatpush2.bf16.msra.mxu1 %v13055_v13  ;;  %3238 = vmatprep.subr.bf16.mxu0 %v12920_v14  ;;  %v13256_v13 = vcombine.high %v594_v8, %v598_v9  ;;  %v458_v14 = vld [vmem:[#allocation2 + $0x850] sm:$0xff]  ;;  %v227_v9 = vld [vmem:[#allocation2 + $0x118] sm:$0xff] }
 0x1a5   :  { %3279 = vmatprep.subr.bf16.mxu1 %v13048_v15  ;;  %v462_v15 = vld [vmem:[#allocation2 + $0x870] sm:$0xff] }
 0x1a6   :  { %v582_v28 = vld [vmem:[#allocation2 + $0xc30] sm:$0xff]  ;;  %v13119_v31 = vcombine.low %v458_v14, %v462_v15 }
 0x1a7   :  { %3239 = vmatpush2.bf16.msra.mxu0 %v12919_v22  ;;  %v13120_v22 = vcombine.high %v458_v14, %v462_v15  ;;  %v13239_v43 = vcombine.low %v578_v27, %v582_v28  ;;  %v546_v7 = vld [vmem:[#allocation2 + $0xb10] sm:$0xff] }
 0x1a8   :  { %3280 = vmatpush2.bf16.msra.mxu1 %v13047_v24  ;;  %3290 = vmatprep.subr.bf16.mxu0 %v13168_v25  ;;  %v13248_v24 = vcombine.high %v586_v17, %v590_v18  ;;  %v450_v25 = vld [vmem:[#allocation2 + $0x810] sm:$0xff]  ;;  %v219_v18 = vld [vmem:[#allocation2 + $0xd8] sm:$0xff] }
 0x1a9   :  { %3331 = vmatprep.subr.bf16.mxu1 %v13296_v26  ;;  %v454_v26 = vld [vmem:[#allocation2 + $0x830] sm:$0xff] }
 0x1aa   :  { %3241 = vmatmul.mubr.bf16.vlgmr.msra.gmra.mxu0 %v15003_v16  ;;  %v15043_v44 = vpop.f32.mrf.mxu1  ;;  %v13111_v42 = vcombine.low %v450_v25, %v454_v26  ;;  %v550_v8 = vld [vmem:[#allocation2 + $0xb30] sm:$0xff] }
 0x1ab   :  { %3282 = vmatmul.mubr.bf16.vlgmr.msra.gmra.mxu1 %v15005_v19  ;;  %3291 = vmatpush1.bf16.msra.mxu0 %v13167_v34  ;;  %v13112_v34 = vcombine.high %v450_v25, %v454_v26  ;;  %v13208_v14 = vcombine.high %v546_v7, %v550_v8  ;;  %v538_v15 = vld [vmem:[#allocation2 + $0xad0] sm:$0xff]  ;;  %v211_v26 = vld [vmem:[#allocation2 + $0x98] sm:$0xff] }
 0x1ac   :  { %3332 = vmatpush1.bf16.msra.mxu1 %v13295_v35  ;;  %3292 = vmatprep.subr.bf16.mxu0 %v13160_v36  ;;  %v15046_v48 = vpop.f32.mrf.mxu1  ;;  %v13240_v35 = vcombine.high %v578_v27, %v582_v28  ;;  %v570_v36 = vld [vmem:[#allocation2 + $0xbd0] sm:$0xff]  ;;  %v215_v27 = vld [vmem:[#allocation2 + $0xb8] sm:$0xff] }
 0x1ad   :  { %3333 = vmatprep.subr.bf16.mxu1 %v13288_v37  ;;  %3363 = vmatprep.mubr.bf16.mxu1 %v14875_v38  ;;  %v574_v37 = vld [vmem:[#allocation2 + $0xbf0] sm:$0xff] }
 0x1ae   :  { %3322 = vmatprep.mubr.bf16.mxu0 %v15011_v29  ;;  %v3041_v54 = vpop.f32.mrf.mxu1  ;;  %v13231_v52 = vcombine.low %v570_v36, %v574_v37  ;;  %v542_v17 = vld [vmem:[#allocation2 + $0xaf0] sm:$0xff] }
 0x1af   :  { %3293 = vmatpush1.bf16.msra.mxu0 %v13159_v45  ;;  %v13232_v45 = vcombine.high %v570_v36, %v574_v37  ;;  %v534_v25 = vld [vmem:[#allocation2 + $0xab0] sm:$0xff]  ;;  %v13199_v28 = vcombine.low %v538_v15, %v542_v17  ;;  %v203_v37 = vld [vmem:[#allocation2 + $0x58] sm:$0xff] }
 0x1b0   :  { %3334 = vmatpush1.bf16.msra.mxu1 %v13287_v46  ;;  %3294 = vmatprep.subr.bf16.mxu0 %v13152_v47  ;;  %v3042_v60 = vpop.f32.mrf.mxu1  ;;  %v12914_v46 = vcombine.high %v251_v40, %v255_v41  ;;  %v562_v47 = vld [vmem:[#allocation2 + $0xb90] sm:$0xff]  ;;  %v207_v40 = vld [vmem:[#allocation2 + $0x78] sm:$0xff] }
 0x1b1   :  { %3335 = vmatprep.subr.bf16.mxu1 %v13280_v49  ;;  %v566_v49 = vld [vmem:[#allocation2 + $0xbb0] sm:$0xff] }
 0x1b2   :  { %v13224_v54 = vcombine.high %v562_v47, %v566_v49  ;;  %v13223_v0 = vcombine.low %v562_v47, %v566_v49  ;;  %v526_v36 = vld [vmem:[#allocation2 + $0xa70] sm:$0xff]  ;;  %v195_v49 = vld [vmem:[#allocation2 + $0x18] sm:$0xff] }
 0x1b3   :  { %3295 = vmatpush1.bf16.msra.mxu0 %v13151_v55  ;;  %v12906_v55 = vcombine.high %v243_v50, %v247_v51  ;;  %v518_v47 = vld [vmem:[#allocation2 + $0xa30] sm:$0xff] }
 0x1b4   :  { %3336 = vmatpush1.bf16.msra.mxu1 %v13279_v56  ;;  %3296 = vmatprep.subr.bf16.mxu0 %v13144_v57  ;;  %v554_v56 = vld [vmem:[#allocation2 + $0xb50] sm:$0xff] }
 0x1b5   :  { %3337 = vmatprep.subr.bf16.mxu1 %v13272_v61  ;;  %v558_v57 = vld [vmem:[#allocation2 + $0xb70] sm:$0xff]  ;;  %v235_v61 = vld [vmem:[#allocation2 + $0x158] sm:$0xff] }
 0x1b6   :  { %v12898_v6 = vcombine.high %v235_v61, %v239_v62 }
 0x1b7   :  { %3297 = vmatpush1.bf16.msra.mxu0 %v13143_v2  ;;  %v12905_v2 = vcombine.low %v243_v50, %v247_v51  ;;  %v199_v50 = vld [vmem:[#allocation2 + $0x38] sm:$0xff] }
 0x1b8   :  { %3338 = vmatpush1.bf16.msra.mxu1 %v13271_v3  ;;  %3298 = vmatprep.subr.bf16.mxu0 %v13136_v4  ;;  %v13216_v3 = vcombine.high %v554_v56, %v558_v57 }
 0x1b9   :  { %3339 = vmatprep.subr.bf16.mxu1 %v13264_v5 }
 0x1bb   :  { %3299 = vmatpush1.bf16.msra.mxu0 %v13135_v10  ;;  %v231_v10 = vld [vmem:[#allocation2 + $0x138] sm:$0xff] }
 0x1bc   :  { %3340 = vmatpush1.bf16.msra.mxu1 %v13263_v11  ;;  %3300 = vmatprep.subr.bf16.mxu0 %v13128_v12  ;;  %v13215_v12 = vcombine.low %v554_v56, %v558_v57  ;;  %v383_v56 = vld [vmem:[#allocation2 + $0x5f8] sm:$0xff] }
 0x1bd   :  { %3341 = vmatprep.subr.bf16.mxu1 %v13256_v13  ;;  %v315_v57 = vld [vmem:[#allocation2 + $0x3d8] sm:$0xff] }
 0x1bf   :  { %3301 = vmatpush1.bf16.msra.mxu0 %v13127_v20  ;;  %v223_v20 = vld [vmem:[#allocation2 + $0xf8] sm:$0xff] }
 0x1c0   :  { %3342 = vmatpush1.bf16.msra.mxu1 %v13255_v21  ;;  %3302 = vmatprep.subr.bf16.mxu0 %v13120_v22  ;;  %v12889_v21 = vcombine.low %v227_v9, %v231_v10  ;;  %v12882_v22 = vcombine.high %v219_v18, %v223_v20 }
 0x1c1   :  { %3343 = vmatprep.subr.bf16.mxu1 %v13248_v24  ;;  %v530_v24 = vld [vmem:[#allocation2 + $0xa90] sm:$0xff] }
 0x1c2   :  { %v13191_v41 = vcombine.low %v530_v24, %v534_v25 }
 0x1c3   :  { %3303 = vmatpush1.bf16.msra.mxu0 %v13119_v31  ;;  %v12881_v31 = vcombine.low %v219_v18, %v223_v20  ;;  %v355_v20 = vld [vmem:[#allocation2 + $0x518] sm:$0xff] }
 0x1c4   :  { %3344 = vmatpush1.bf16.msra.mxu1 %v13247_v32  ;;  %3304 = vmatprep.subr.bf16.mxu0 %v13112_v34  ;;  %v13192_v32 = vcombine.high %v530_v24, %v534_v25  ;;  %v12874_v34 = vcombine.high %v211_v26, %v215_v27 }
 0x1c5   :  { %3345 = vmatprep.subr.bf16.mxu1 %v13240_v35  ;;  %v522_v35 = vld [vmem:[#allocation2 + $0xa50] sm:$0xff] }
 0x1c6   :  { %v13183_v51 = vcombine.low %v522_v35, %v526_v36 }
 0x1c7   :  { %3305 = vmatpush1.bf16.msra.mxu0 %v13111_v42  ;;  %v12873_v42 = vcombine.low %v211_v26, %v215_v27 }
 0x1c8   :  { %3346 = vmatpush1.bf16.msra.mxu1 %v13239_v43  ;;  %3306 = vmatprep.subr.bf16.mxu0 %v13232_v45  ;;  %v13184_v43 = vcombine.high %v522_v35, %v526_v36  ;;  %v12866_v45 = vcombine.high %v203_v37, %v207_v40 }
 0x1c9   :  { %3372 = vmatprep.subr.bf16.mxu1 %v12914_v46  ;;  %v514_v46 = vld [vmem:[#allocation2 + $0xa10] sm:$0xff] }
 0x1ca   :  { %v2996_v60 = vpop.f32.mrf.mxu0 }
 0x1cb   :  { %v2997_v63 = vadd.f32 %v2996_v60, %v15038_v23  ;;  %3364 = vmatmul.mubr.bf16.vlgmr.msra.gmra.mxu1 %v15019_v30  ;;  %3307 = vmatpush2.bf16.msra.mxu0 %v13231_v52  ;;  %v12865_v52 = vcombine.low %v203_v37, %v207_v40  ;;  %v319_v60 = vld [vmem:[#allocation2 + $0x3f8] sm:$0xff] }
 0x1cc   :  { %3373 = vmatpush1.bf16.msra.mxu1 %v12913_v53  ;;  %v2998_v1 = vpop.f32.mrf.mxu0  ;;  %3308 = vmatprep.subr.bf16.mxu0 %v13224_v54  ;;  %v13176_v53 = vcombine.high %v514_v46, %v518_v47  ;;  %v12858_v54 = vcombine.high %v195_v49, %v199_v50 }
 0x1cd   :  { %v15053_v4 = vadd.f32 %v15043_v44, %v2997_v63  ;;  %v2999_v5 = vadd.f32 %v2998_v1, %v15040_v33  ;;  %3374 = vmatprep.subr.bf16.mxu1 %v12906_v55  ;;  %3404 = vmatprep.mubr.bf16.mxu1 %v14991_v58  ;;  %v12897_v44 = vcombine.low %v235_v61, %v239_v62  ;;  %v379_v55 = vld [vmem:[#allocation2 + $0x5d8] sm:$0xff] }
 0x1ce   :  { %v3000_v23 = vpop.f32.mrf.mxu0  ;;  %v12890_v33 = vcombine.high %v227_v9, %v231_v10  ;;  %v13207_v58 = vcombine.low %v546_v7, %v550_v8  ;;  %v13175_v61 = vcombine.low %v514_v46, %v518_v47  ;;  %v12857_v62 = vcombine.low %v195_v49, %v199_v50  ;;  %v371_v1 = vld [vmem:[#allocation2 + $0x598] sm:$0xff] }
 0x1cf   :  { %v15058_v11 = vadd.f32 %v15046_v48, %v2999_v5  ;;  %3309 = vmatpush2.bf16.msra.mxu0 %v13223_v0  ;;  %v13200_v48 = vcombine.high %v538_v15, %v542_v17  ;;  %v13042_v63 = vcombine.high %v379_v55, %v383_v56  ;;  %v12978_v0 = vcombine.high %v315_v57, %v319_v60  ;;  %v311_v5 = vld [vmem:[#allocation2 + $0x3b8] sm:$0xff] }
 0x1d0   :  { %3375 = vmatpush1.bf16.msra.mxu1 %v12905_v2  ;;  %v3001_v13 = vpop.f32.mrf.mxu0  ;;  %3310 = vmatprep.subr.bf16.mxu0 %v13216_v3  ;;  %v375_v2 = vld [vmem:[#allocation2 + $0x5b8] sm:$0xff]  ;;  %v12977_v7 = vcombine.low %v315_v57, %v319_v60 }
 0x1d1   :  { %3376 = vmatprep.subr.bf16.mxu1 %v12898_v6  ;;  %v307_v3 = vld [vmem:[#allocation2 + $0x398] sm:$0xff]  ;;  %v13041_v6 = vcombine.low %v379_v55, %v383_v56  ;;  %v13034_v8 = vcombine.high %v371_v1, %v375_v2 }
 0x1d2   :  { %v12970_v23 = vcombine.high %v307_v3, %v311_v5  ;;  %v363_v9 = vld [vmem:[#allocation2 + $0x558] sm:$0xff] }
 0x1d3   :  { %3311 = vmatpush2.bf16.msra.mxu0 %v13215_v12  ;;  %v367_v10 = vld [vmem:[#allocation2 + $0x578] sm:$0xff] }
 0x1d4   :  { %3377 = vmatpush1.bf16.msra.mxu1 %v12897_v44  ;;  %3312 = vmatprep.subr.bf16.mxu0 %v13208_v14  ;;  %v299_v12 = vld [vmem:[#allocation2 + $0x358] sm:$0xff]  ;;  %v13033_v14 = vcombine.low %v371_v1, %v375_v2  ;;  %v13026_v15 = vcombine.high %v363_v9, %v367_v10  ;;  %v13025_v24 = vcombine.low %v363_v9, %v367_v10 }
 0x1d5   :  { %3378 = vmatprep.subr.bf16.mxu1 %v12890_v33  ;;  %v303_v13 = vld [vmem:[#allocation2 + $0x378] sm:$0xff]  ;;  %v12969_v33 = vcombine.low %v307_v3, %v311_v5 }
 0x1d6   :  { %v12962_v18 = vcombine.high %v299_v12, %v303_v13  ;;  %v12961_v25 = vcombine.low %v299_v12, %v303_v13 }
 0x1d7   :  { %3313 = vmatpush2.bf16.msra.mxu0 %v13207_v58  ;;  %v359_v58 = vld [vmem:[#allocation2 + $0x538] sm:$0xff] }
 0x1d8   :  { %3379 = vmatpush1.bf16.msra.mxu1 %v12889_v21  ;;  %3314 = vmatprep.subr.bf16.mxu0 %v13200_v48  ;;  %v291_v21 = vld [vmem:[#allocation2 + $0x318] sm:$0xff]  ;;  %v13018_v26 = vcombine.high %v355_v20, %v359_v58  ;;  %v13017_v35 = vcombine.low %v355_v20, %v359_v58 }
 0x1d9   :  { %3380 = vmatprep.subr.bf16.mxu1 %v12882_v22  ;;  %v295_v48 = vld [vmem:[#allocation2 + $0x338] sm:$0xff] }
 0x1da   :  { %v12954_v27 = vcombine.high %v291_v21, %v295_v48  ;;  %v12953_v36 = vcombine.low %v291_v21, %v295_v48 }
 0x1db   :  { %3315 = vmatpush2.bf16.msra.mxu0 %v13199_v28  ;;  %v347_v28 = vld [vmem:[#allocation2 + $0x4d8] sm:$0xff] }
 0x1dc   :  { %3381 = vmatpush1.bf16.msra.mxu1 %v12881_v31  ;;  %3316 = vmatprep.subr.bf16.mxu0 %v13192_v32  ;;  %v351_v31 = vld [vmem:[#allocation2 + $0x4f8] sm:$0xff] }
 0x1dd   :  { %3382 = vmatprep.subr.bf16.mxu1 %v12874_v34  ;;  %v283_v32 = vld [vmem:[#allocation2 + $0x2d8] sm:$0xff]  ;;  %v13010_v37 = vcombine.high %v347_v28, %v351_v31  ;;  %v13009_v46 = vcombine.low %v347_v28, %v351_v31 }
 0x1de   :  { %v287_v34 = vld [vmem:[#allocation2 + $0x2f8] sm:$0xff] }
 0x1df   :  { %3317 = vmatpush2.bf16.msra.mxu0 %v13191_v41  ;;  %v12946_v40 = vcombine.high %v283_v32, %v287_v34  ;;  %v339_v41 = vld [vmem:[#allocation2 + $0x498] sm:$0xff]  ;;  %v12945_v47 = vcombine.low %v283_v32, %v287_v34 }
 0x1e0   :  { %3383 = vmatpush1.bf16.msra.mxu1 %v12873_v42  ;;  %3318 = vmatprep.subr.bf16.mxu0 %v13184_v43  ;;  %v343_v42 = vld [vmem:[#allocation2 + $0x4b8] sm:$0xff] }
 0x1e1   :  { %3384 = vmatprep.subr.bf16.mxu1 %v12866_v45  ;;  %v275_v43 = vld [vmem:[#allocation2 + $0x298] sm:$0xff]  ;;  %v13002_v49 = vcombine.high %v339_v41, %v343_v42  ;;  %v13001_v55 = vcombine.low %v339_v41, %v343_v42 }
 0x1e2   :  { %v279_v45 = vld [vmem:[#allocation2 + $0x2b8] sm:$0xff] }
 0x1e3   :  { %3319 = vmatpush2.bf16.msra.mxu0 %v13183_v51  ;;  %v12938_v50 = vcombine.high %v275_v43, %v279_v45  ;;  %v331_v51 = vld [vmem:[#allocation2 + $0x458] sm:$0xff]  ;;  %v12937_v56 = vcombine.low %v275_v43, %v279_v45 }
 0x1e4   :  { %3385 = vmatpush1.bf16.msra.mxu1 %v12865_v52  ;;  %3320 = vmatprep.subr.bf16.mxu0 %v13176_v53  ;;  %v335_v52 = vld [vmem:[#allocation2 + $0x478] sm:$0xff] }
 0x1e5   :  { %3386 = vmatprep.subr.bf16.mxu1 %v12858_v54  ;;  %v267_v53 = vld [vmem:[#allocation2 + $0x258] sm:$0xff]  ;;  %v12994_v57 = vcombine.high %v331_v51, %v335_v52  ;;  %v12993_v1 = vcombine.low %v331_v51, %v335_v52 }
 0x1e6   :  { %v271_v54 = vld [vmem:[#allocation2 + $0x278] sm:$0xff] }
 0x1e7   :  { %3321 = vmatpush2.bf16.msra.mxu0 %v13175_v61  ;;  %v12930_v60 = vcombine.high %v267_v53, %v271_v54  ;;  %v323_v61 = vld [vmem:[#allocation2 + $0x418] sm:$0xff]  ;;  %v12929_v2 = vcombine.low %v267_v53, %v271_v54 }
 0x1e8   :  { %3387 = vmatpush1.bf16.msra.mxu1 %v12857_v62  ;;  %3413 = vmatprep.subr.bf16.mxu0 %v13042_v63  ;;  %v327_v62 = vld [vmem:[#allocation2 + $0x438] sm:$0xff] }
 0x1e9   :  { %3388 = vmatprep.subr.bf16.mxu1 %v12978_v0  ;;  %v259_v63 = vld [vmem:[#allocation2 + $0x218] sm:$0xff]  ;;  %v12986_v3 = vcombine.high %v323_v61, %v327_v62  ;;  %v12985_v9 = vcombine.low %v323_v61, %v327_v62 }
 0x1ea   :  { %3323 = vmatmul.mubr.bf16.vlgmr.msra.gmra.mxu0 %v15026_v39  ;;  %v263_v0 = vld [vmem:[#allocation2 + $0x238] sm:$0xff] }
 0x1eb   :  { %v15061_v44 = vpop.f32.mrf.mxu1  ;;  %3414 = vmatpush1.bf16.msra.mxu0 %v13041_v6  ;;  %3445 = vmatprep.mubr.bf16.mxu0 %v14993_v59  ;;  %v12922_v5 = vcombine.high %v259_v63, %v263_v0  ;;  %v443_v6 = vld [vmem:[#allocation2 + $0x7d8] sm:$0xff]  ;;  %v12921_v10 = vcombine.low %v259_v63, %v263_v0 }
 0x1ec   :  { %3389 = vmatpush2.bf16.msra.mxu1 %v12977_v7  ;;  %3415 = vmatprep.subr.bf16.mxu0 %v13034_v8  ;;  %v447_v7 = vld [vmem:[#allocation2 + $0x7f8] sm:$0xff] }
 0x1ed   :  { %v15064_v17 = vpop.f32.mrf.mxu1  ;;  %3390 = vmatprep.subr.bf16.mxu1 %v12970_v23  ;;  %v507_v8 = vld [vmem:[#allocation2 + $0x9d8] sm:$0xff]  ;;  %v13106_v12 = vcombine.high %v443_v6, %v447_v7  ;;  %v13105_v20 = vcombine.low %v443_v6, %v447_v7 }
 0x1ee   :  { %v511_v23 = vld [vmem:[#allocation2 + $0x9f8] sm:$0xff] }
 0x1ef   :  { %v3082_v22 = vpop.f32.mrf.mxu1  ;;  %3416 = vmatpush1.bf16.msra.mxu0 %v13033_v14  ;;  %v13170_v13 = vcombine.high %v507_v8, %v511_v23  ;;  %v435_v14 = vld [vmem:[#allocation2 + $0x798] sm:$0xff]  ;;  %v13169_v58 = vcombine.low %v507_v8, %v511_v23 }
 0x1f0   :  { %3391 = vmatpush2.bf16.msra.mxu1 %v12969_v33  ;;  %3417 = vmatprep.subr.bf16.mxu0 %v13026_v15  ;;  %v439_v33 = vld [vmem:[#allocation2 + $0x7b8] sm:$0xff] }
 0x1f1   :  { %v3083_v59 = vpop.f32.mrf.mxu1  ;;  %3392 = vmatprep.subr.bf16.mxu1 %v12962_v18  ;;  %v499_v15 = vld [vmem:[#allocation2 + $0x998] sm:$0xff]  ;;  %v13098_v21 = vcombine.high %v435_v14, %v439_v33  ;;  %v13097_v28 = vcombine.low %v435_v14, %v439_v33 }
 0x1f2   :  { %v503_v18 = vld [vmem:[#allocation2 + $0x9b8] sm:$0xff] }
 0x1f3   :  { %3418 = vmatpush1.bf16.msra.mxu0 %v13025_v24  ;;  %v13162_v48 = vcombine.high %v499_v15, %v503_v18  ;;  %v427_v22 = vld [vmem:[#allocation2 + $0x758] sm:$0xff]  ;;  %v13161_v32 = vcombine.low %v499_v15, %v503_v18 }
 0x1f4   :  { %3393 = vmatpush2.bf16.msra.mxu1 %v12961_v25  ;;  %3419 = vmatprep.subr.bf16.mxu0 %v13018_v26  ;;  %v431_v24 = vld [vmem:[#allocation2 + $0x778] sm:$0xff] }
 0x1f5   :  { %3394 = vmatprep.subr.bf16.mxu1 %v12954_v27  ;;  %v491_v26 = vld [vmem:[#allocation2 + $0x958] sm:$0xff]  ;;  %v13090_v34 = vcombine.high %v427_v22, %v431_v24 }
 0x1f6   :  { %v495_v59 = vld [vmem:[#allocation2 + $0x978] sm:$0xff] }
 0x1f7   :  { %3420 = vmatpush1.bf16.msra.mxu0 %v13017_v35  ;;  %v483_v41 = vld [vmem:[#allocation2 + $0x918] sm:$0xff]  ;;  %v13153_v45 = vcombine.low %v491_v26, %v495_v59 }
 0x1f8   :  { %3395 = vmatpush2.bf16.msra.mxu1 %v12953_v36  ;;  %3421 = vmatprep.subr.bf16.mxu0 %v13010_v37  ;;  %v13154_v36 = vcombine.high %v491_v26, %v495_v59  ;;  %v419_v37 = vld [vmem:[#allocation2 + $0x718] sm:$0xff] }
 0x1f9   :  { %3396 = vmatprep.subr.bf16.mxu1 %v12946_v40  ;;  %v423_v40 = vld [vmem:[#allocation2 + $0x738] sm:$0xff] }
 0x1fa   :  { %v487_v42 = vld [vmem:[#allocation2 + $0x938] sm:$0xff]  ;;  %v13081_v52 = vcombine.low %v419_v37, %v423_v40 }
 0x1fb   :  { %3422 = vmatpush1.bf16.msra.mxu0 %v13009_v46  ;;  %v13082_v46 = vcombine.high %v419_v37, %v423_v40  ;;  %v479_v51 = vld [vmem:[#allocation2 + $0x8f8] sm:$0xff] }
 0x1fc   :  { %3397 = vmatpush2.bf16.msra.mxu1 %v12945_v47  ;;  %3423 = vmatprep.subr.bf16.mxu0 %v13002_v49  ;;  %v13146_v47 = vcombine.high %v483_v41, %v487_v42  ;;  %v415_v49 = vld [vmem:[#allocation2 + $0x6f8] sm:$0xff] }
 0x1fd   :  { %3398 = vmatprep.subr.bf16.mxu1 %v12938_v50  ;;  %v475_v50 = vld [vmem:[#allocation2 + $0x8d8] sm:$0xff] }
 0x1fe   :  { %v13138_v54 = vcombine.high %v475_v50, %v479_v51  ;;  %v13137_v62 = vcombine.low %v475_v50, %v479_v51  ;;  %v627_v59 = vld [vmem:[#allocation2 + $0xd98] sm:$0xff] }
 0x1ff   :  { %3424 = vmatpush1.bf16.msra.mxu0 %v13001_v55  ;;  %v403_v55 = vld [vmem:[#allocation2 + $0x698] sm:$0xff] }
 0x200   :  { %3399 = vmatpush2.bf16.msra.mxu1 %v12937_v56  ;;  %3425 = vmatprep.subr.bf16.mxu0 %v12994_v57  ;;  %v407_v56 = vld [vmem:[#allocation2 + $0x6b8] sm:$0xff] }
 0x201   :  { %3400 = vmatprep.subr.bf16.mxu1 %v12930_v60  ;;  %v467_v57 = vld [vmem:[#allocation2 + $0x898] sm:$0xff]  ;;  %v13066_v63 = vcombine.high %v403_v55, %v407_v56  ;;  %v13065_v6 = vcombine.low %v403_v55, %v407_v56 }
 0x202   :  { %v471_v60 = vld [vmem:[#allocation2 + $0x8b8] sm:$0xff] }
 0x203   :  { %3426 = vmatpush1.bf16.msra.mxu0 %v12993_v1  ;;  %v13130_v0 = vcombine.high %v467_v57, %v471_v60  ;;  %v395_v1 = vld [vmem:[#allocation2 + $0x658] sm:$0xff]  ;;  %v13129_v7 = vcombine.low %v467_v57, %v471_v60 }
 0x204   :  { %3401 = vmatpush2.bf16.msra.mxu1 %v12929_v2  ;;  %3427 = vmatprep.subr.bf16.mxu0 %v12986_v3  ;;  %v399_v2 = vld [vmem:[#allocation2 + $0x678] sm:$0xff] }
 0x205   :  { %3402 = vmatprep.subr.bf16.mxu1 %v12922_v5  ;;  %v459_v3 = vld [vmem:[#allocation2 + $0x858] sm:$0xff]  ;;  %v13058_v8 = vcombine.high %v395_v1, %v399_v2  ;;  %v13057_v14 = vcombine.low %v395_v1, %v399_v2 }
 0x206   :  { %v463_v5 = vld [vmem:[#allocation2 + $0x878] sm:$0xff] }
 0x207   :  { %3428 = vmatpush1.bf16.msra.mxu0 %v12985_v9  ;;  %v13122_v23 = vcombine.high %v459_v3, %v463_v5  ;;  %v387_v9 = vld [vmem:[#allocation2 + $0x618] sm:$0xff]  ;;  %v13121_v33 = vcombine.low %v459_v3, %v463_v5 }
 0x208   :  { %3403 = vmatpush2.bf16.msra.mxu1 %v12921_v10  ;;  %3429 = vmatprep.subr.bf16.mxu0 %v13106_v12  ;;  %v391_v10 = vld [vmem:[#allocation2 + $0x638] sm:$0xff] }
 0x209   :  { %3454 = vmatprep.subr.bf16.mxu1 %v13170_v13  ;;  %v451_v12 = vld [vmem:[#allocation2 + $0x818] sm:$0xff]  ;;  %v13050_v15 = vcombine.high %v387_v9, %v391_v10 }
 0x20a   :  { %v3119_v25 = vpop.f32.mrf.mxu0  ;;  %v455_v13 = vld [vmem:[#allocation2 + $0x838] sm:$0xff] }
 0x20b   :  { %v15067_v27 = vadd.f32 %v3119_v25, %v15061_v44  ;;  %3405 = vmatmul.mubr.bf16.vlgmr.msra.gmra.mxu1 %v15003_v16  ;;  %3430 = vmatpush2.bf16.msra.mxu0 %v13105_v20  ;;  %v13089_v16 = vcombine.low %v427_v22, %v431_v24  ;;  %v13114_v18 = vcombine.high %v451_v12, %v455_v13  ;;  %v635_v20 = vld [vmem:[#allocation2 + $0xdd8] sm:$0xff] }
 0x20c   :  { %3455 = vmatpush1.bf16.msra.mxu1 %v13169_v58  ;;  %v3121_v31 = vpop.f32.mrf.mxu0  ;;  %3431 = vmatprep.subr.bf16.mxu0 %v13098_v21  ;;  %v639_v58 = vld [vmem:[#allocation2 + $0xdf8] sm:$0xff]  ;;  %v13049_v22 = vcombine.low %v387_v9, %v391_v10  ;;  %v13113_v24 = vcombine.low %v451_v12, %v455_v13 }
 0x20d   :  { %v15071_v35 = vadd.f32 %v3121_v31, %v15064_v17  ;;  %3456 = vmatprep.subr.bf16.mxu1 %v13162_v48  ;;  %3486 = vmatprep.mubr.bf16.mxu1 %v15011_v29  ;;  %v411_v17 = vld [vmem:[#allocation2 + $0x6d8] sm:$0xff]  ;;  %v13145_v29 = vcombine.low %v483_v41, %v487_v42  ;;  %v13298_v25 = vcombine.high %v635_v20, %v639_v58 }
 0x20e   :  { %v3123_v44 = vpop.f32.mrf.mxu0  ;;  %v13074_v53 = vcombine.high %v411_v17, %v415_v49  ;;  %v13073_v61 = vcombine.low %v411_v17, %v415_v49  ;;  %v571_v21 = vld [vmem:[#allocation2 + $0xbd8] sm:$0xff] }
 0x20f   :  { %3432 = vmatpush2.bf16.msra.mxu0 %v13097_v28  ;;  %v575_v48 = vld [vmem:[#allocation2 + $0xbf8] sm:$0xff] }
 0x210   :  { %3457 = vmatpush1.bf16.msra.mxu1 %v13161_v32  ;;  %v3124_v43 = vpop.f32.mrf.mxu0  ;;  %3433 = vmatprep.subr.bf16.mxu0 %v13090_v34  ;;  %v13234_v26 = vcombine.high %v571_v21, %v575_v48  ;;  %v631_v28 = vld [vmem:[#allocation2 + $0xdb8] sm:$0xff]  ;;  %v13297_v34 = vcombine.low %v635_v20, %v639_v58 }
 0x211   :  { %3458 = vmatprep.subr.bf16.mxu1 %v13154_v36  ;;  %v563_v31 = vld [vmem:[#allocation2 + $0xb98] sm:$0xff]  ;;  %v13233_v36 = vcombine.low %v571_v21, %v575_v48  ;;  %v13290_v37 = vcombine.high %v627_v59, %v631_v28 }
 0x212   :  { %v567_v32 = vld [vmem:[#allocation2 + $0xbb8] sm:$0xff] }
 0x213   :  { %3434 = vmatpush2.bf16.msra.mxu0 %v13089_v16  ;;  %v13226_v40 = vcombine.high %v563_v31, %v567_v32  ;;  %v619_v44 = vld [vmem:[#allocation2 + $0xd58] sm:$0xff]  ;;  %v13225_v49 = vcombine.low %v563_v31, %v567_v32 }
 0x214   :  { %3459 = vmatpush1.bf16.msra.mxu1 %v13153_v45  ;;  %3435 = vmatprep.subr.bf16.mxu0 %v13082_v46  ;;  %v623_v41 = vld [vmem:[#allocation2 + $0xd78] sm:$0xff]  ;;  %v13289_v46 = vcombine.low %v627_v59, %v631_v28 }
 0x215   :  { %3460 = vmatprep.subr.bf16.mxu1 %v13146_v47  ;;  %v555_v16 = vld [vmem:[#allocation2 + $0xb58] sm:$0xff]  ;;  %v13282_v50 = vcombine.high %v619_v44, %v623_v41 }
 0x216   :  { %v559_v43 = vld [vmem:[#allocation2 + $0xb78] sm:$0xff] }
 0x217   :  { %3436 = vmatpush2.bf16.msra.mxu0 %v13081_v52  ;;  %v13218_v52 = vcombine.high %v555_v16, %v559_v43  ;;  %v547_v56 = vld [vmem:[#allocation2 + $0xb18] sm:$0xff] }
 0x218   :  { %3461 = vmatpush1.bf16.msra.mxu1 %v13145_v29  ;;  %3437 = vmatprep.subr.bf16.mxu0 %v13074_v53  ;;  %v611_v29 = vld [vmem:[#allocation2 + $0xd18] sm:$0xff] }
 0x219   :  { %3462 = vmatprep.subr.bf16.mxu1 %v13138_v54  ;;  %v615_v53 = vld [vmem:[#allocation2 + $0xd38] sm:$0xff] }
 0x21a   :  { %v551_v57 = vld [vmem:[#allocation2 + $0xb38] sm:$0xff] }
 0x21b   :  { %3438 = vmatpush2.bf16.msra.mxu0 %v13073_v61  ;;  %v13210_v1 = vcombine.high %v547_v56, %v551_v57  ;;  %v603_v2 = vld [vmem:[#allocation2 + $0xcd8] sm:$0xff] }
 0x21c   :  { %3463 = vmatpush1.bf16.msra.mxu1 %v13137_v62  ;;  %3439 = vmatprep.subr.bf16.mxu0 %v13066_v63  ;;  %v13217_v62 = vcombine.low %v555_v16, %v559_v43  ;;  %v13274_v63 = vcombine.high %v611_v29, %v615_v53  ;;  %v607_v3 = vld [vmem:[#allocation2 + $0xcf8] sm:$0xff] }
 0x21d   :  { %3464 = vmatprep.subr.bf16.mxu1 %v13130_v0  ;;  %v539_v5 = vld [vmem:[#allocation2 + $0xad8] sm:$0xff] }
 0x21e   :  { %v595_v9 = vld [vmem:[#allocation2 + $0xc98] sm:$0xff] }
 0x21f   :  { %3440 = vmatpush2.bf16.msra.mxu0 %v13065_v6  ;;  %v13273_v6 = vcombine.low %v611_v29, %v615_v53  ;;  %v599_v10 = vld [vmem:[#allocation2 + $0xcb8] sm:$0xff] }
 0x220   :  { %3465 = vmatpush1.bf16.msra.mxu1 %v13129_v7  ;;  %3441 = vmatprep.subr.bf16.mxu0 %v13058_v8  ;;  %v13209_v7 = vcombine.low %v547_v56, %v551_v57  ;;  %v13266_v8 = vcombine.high %v603_v2, %v607_v3  ;;  %v531_v12 = vld [vmem:[#allocation2 + $0xa98] sm:$0xff]  ;;  %v3983_v56 = vld [vmem:[#allocation8 + $0x1e0] sm:$0xff] }
 0x221   :  { %3466 = vmatprep.subr.bf16.mxu1 %v13122_v23  ;;  %v535_v13 = vld [vmem:[#allocation2 + $0xab8] sm:$0xff]  ;;  %v4107_v57 = vld [vmem:[#allocation8 + $0x5c0] sm:$0xff] }
 0x222   :  { %v587_v20 = vld [vmem:[#allocation2 + $0xc58] sm:$0xff] }
 0x223   :  { %3442 = vmatpush2.bf16.msra.mxu0 %v13057_v14  ;;  %v13265_v14 = vcombine.low %v603_v2, %v607_v3  ;;  %v591_v58 = vld [vmem:[#allocation2 + $0xc78] sm:$0xff]  ;;  %v4103_v2 = vld [vmem:[#allocation8 + $0x5a0] sm:$0xff] }
 0x224   :  { %3467 = vmatpush1.bf16.msra.mxu1 %v13121_v33  ;;  %3443 = vmatprep.subr.bf16.mxu0 %v13050_v15  ;;  %v13258_v15 = vcombine.high %v595_v9, %v599_v10  ;;  %v523_v21 = vld [vmem:[#allocation2 + $0xa58] sm:$0xff] }
 0x225   :  { %3468 = vmatprep.subr.bf16.mxu1 %v13114_v18  ;;  %v13194_v18 = vcombine.high %v531_v12, %v535_v13  ;;  %v527_v48 = vld [vmem:[#allocation2 + $0xa78] sm:$0xff] }
 0x226   :  { %v579_v59 = vld [vmem:[#allocation2 + $0xc18] sm:$0xff] }
 0x227   :  { %3444 = vmatpush2.bf16.msra.mxu0 %v13049_v22  ;;  %v13257_v22 = vcombine.low %v595_v9, %v599_v10  ;;  %v583_v28 = vld [vmem:[#allocation2 + $0xc38] sm:$0xff]  ;;  %v3967_v9 = vld [vmem:[#allocation8 + $0x160] sm:$0xff] }
 0x228   :  { %3469 = vmatpush1.bf16.msra.mxu1 %v13113_v24  ;;  %3495 = vmatprep.subr.bf16.mxu0 %v13298_v25  ;;  %v13193_v24 = vcombine.low %v531_v12, %v535_v13  ;;  %v13250_v25 = vcombine.high %v587_v20, %v591_v58  ;;  %v515_v31 = vld [vmem:[#allocation2 + $0xa18] sm:$0xff]  ;;  %v4091_v10 = vld [vmem:[#allocation8 + $0x540] sm:$0xff] }
 0x229   :  { %3470 = vmatprep.subr.bf16.mxu1 %v13234_v26  ;;  %v13186_v26 = vcombine.high %v523_v21, %v527_v48  ;;  %v519_v32 = vld [vmem:[#allocation2 + $0xa38] sm:$0xff] }
 0x22a   :  { %v3201_v42 = vpop.f32.mrf.mxu0  ;;  %3446 = vmatmul.mubr.bf16.vlgmr.msra.gmra.mxu0 %v15005_v19 }
 0x22b   :  { %v3160_v45 = vpop.f32.mrf.mxu1  ;;  %3496 = vmatpush1.bf16.msra.mxu0 %v13297_v34  ;;  %3527 = vmatprep.mubr.bf16.mxu0 %v14875_v38  ;;  %v13249_v34 = vcombine.low %v587_v20, %v591_v58 }
 0x22c   :  { %v3161_v47 = vadd.f32 %v3160_v45, %v15067_v27  ;;  %3471 = vmatpush2.bf16.msra.mxu1 %v13233_v36  ;;  %v3203_v17 = vpop.f32.mrf.mxu0  ;;  %3497 = vmatprep.subr.bf16.mxu0 %v13290_v37  ;;  %v13281_v27 = vcombine.low %v619_v44, %v623_v41  ;;  %v13185_v36 = vcombine.low %v523_v21, %v527_v48 }
 0x22d   :  { %v3162_v51 = vpop.f32.mrf.mxu1  ;;  %3472 = vmatprep.subr.bf16.mxu1 %v13226_v40  ;;  %v13242_v37 = vcombine.high %v579_v59, %v583_v28  ;;  %v13178_v40 = vcombine.high %v515_v31, %v519_v32  ;;  %v13241_v44 = vcombine.low %v579_v59, %v583_v28  ;;  %v13177_v41 = vcombine.low %v515_v31, %v519_v32  ;;  %v4087_v59 = vld [vmem:[#allocation8 + $0x520] sm:$0xff] }
 0x22e   :  { %v15077_v19 = vadd.f32 %v3201_v42, %v3161_v47  ;;  %v3163_v54 = vadd.f32 %v3162_v51, %v15071_v35  ;;  %v3205_v55 = vpop.f32.mrf.mxu0  ;;  %v543_v35 = vld [vmem:[#allocation2 + $0xaf8] sm:$0xff] }
 0x22f   :  { %v3164_v38 = vpop.f32.mrf.mxu1  ;;  %3498 = vmatpush1.bf16.msra.mxu0 %v13289_v46  ;;  %v13202_v23 = vcombine.high %v539_v5, %v543_v35  ;;  %v13201_v33 = vcombine.low %v539_v5, %v543_v35  ;;  %v3979_v55 = vld [vmem:[#allocation8 + $0x1c0] sm:$0xff] }
 0x230   :  { %v15080_v60 = vadd.f32 %v3203_v17, %v3163_v54  ;;  %3473 = vmatpush2.bf16.msra.mxu1 %v13225_v49  ;;  %v3206_v61 = vpop.f32.mrf.mxu0  ;;  %3499 = vmatprep.subr.bf16.mxu0 %v13282_v50  ;;  %v4111_v38 = vld [vmem:[#allocation8 + $0x5e0] sm:$0xff] }
 0x231   :  { %v3165_v0 = vpop.f32.mrf.mxu1  ;;  %3474 = vmatprep.subr.bf16.mxu1 %v13218_v52  ;;  %v13484_v61 = vcombine.high %v4107_v57, %v4111_v38 }
 0x232   :  { %v4099_v0 = vld [vmem:[#allocation8 + $0x580] sm:$0xff] }
 0x233   :  { %3500 = vmatpush1.bf16.msra.mxu0 %v13281_v27  ;;  %v13483_v27 = vcombine.low %v4107_v57, %v4111_v38  ;;  %v13475_v35 = vcombine.low %v4099_v0, %v4103_v2  ;;  %v3923_v38 = vld [vmem:[#allocation8] sm:$0xff] }
 0x234   :  { %3475 = vmatpush2.bf16.msra.mxu1 %v13217_v62  ;;  %3501 = vmatprep.subr.bf16.mxu0 %v13274_v63  ;;  %v3971_v62 = vld [vmem:[#allocation8 + $0x180] sm:$0xff] }
 0x235   :  { %3476 = vmatprep.subr.bf16.mxu1 %v13210_v1  ;;  %v3975_v63 = vld [vmem:[#allocation8 + $0x1a0] sm:$0xff] }
 0x236   :  { %v13348_v1 = vcombine.high %v3971_v62, %v3975_v63  ;;  %v13347_v5 = vcombine.low %v3971_v62, %v3975_v63  ;;  %v4055_v62 = vld [vmem:[#allocation8 + $0x420] sm:$0xff] }
 0x237   :  { %3502 = vmatpush1.bf16.msra.mxu0 %v13273_v6  ;;  %v13476_v6 = vcombine.high %v4099_v0, %v4103_v2  ;;  %v4043_v2 = vld [vmem:[#allocation8 + $0x3c0] sm:$0xff] }
 0x238   :  { %3477 = vmatpush2.bf16.msra.mxu1 %v13209_v7  ;;  %3503 = vmatprep.subr.bf16.mxu0 %v13266_v8 }
 0x239   :  { %3478 = vmatprep.subr.bf16.mxu1 %v13202_v23  ;;  %v3963_v23 = vld [vmem:[#allocation8 + $0x140] sm:$0xff] }
 0x23b   :  { %3504 = vmatpush1.bf16.msra.mxu0 %v13265_v14  ;;  %v13340_v14 = vcombine.high %v3963_v23, %v3967_v9 }
 0x23c   :  { %3479 = vmatpush2.bf16.msra.mxu1 %v13201_v33  ;;  %3505 = vmatprep.subr.bf16.mxu0 %v13258_v15  ;;  %v4095_v33 = vld [vmem:[#allocation8 + $0x560] sm:$0xff] }
 0x23d   :  { %3480 = vmatprep.subr.bf16.mxu1 %v13194_v18  ;;  %v13339_v18 = vcombine.low %v3963_v23, %v3967_v9  ;;  %v13467_v20 = vcombine.low %v4091_v10, %v4095_v33  ;;  %v13468_v58 = vcombine.high %v4091_v10, %v4095_v33  ;;  %v4035_v9 = vld [vmem:[#allocation8 + $0x380] sm:$0xff] }
 0x23e   :  { %v4039_v10 = vld [vmem:[#allocation8 + $0x3a0] sm:$0xff] }
 0x23f   :  { %3506 = vmatpush1.bf16.msra.mxu0 %v13257_v22  ;;  %v3955_v22 = vld [vmem:[#allocation8 + $0x100] sm:$0xff] }
 0x240   :  { %3481 = vmatpush2.bf16.msra.mxu1 %v13193_v24  ;;  %3507 = vmatprep.subr.bf16.mxu0 %v13250_v25  ;;  %v3959_v24 = vld [vmem:[#allocation8 + $0x120] sm:$0xff] }
 0x241   :  { %3482 = vmatprep.subr.bf16.mxu1 %v13186_v26  ;;  %v4083_v25 = vld [vmem:[#allocation8 + $0x500] sm:$0xff]  ;;  %v13332_v26 = vcombine.high %v3955_v22, %v3959_v24  ;;  %v13331_v28 = vcombine.low %v3955_v22, %v3959_v24 }
 0x242   :  { %v13459_v31 = vcombine.low %v4083_v25, %v4087_v59  ;;  %v13460_v32 = vcombine.high %v4083_v25, %v4087_v59  ;;  %v4167_v33 = vld [vmem:[#allocation8 + $0x7a0] sm:$0xff] }
 0x243   :  { %3508 = vmatpush1.bf16.msra.mxu0 %v13249_v34  ;;  %v3947_v34 = vld [vmem:[#allocation8 + $0xc0] sm:$0xff] }
 0x244   :  { %3483 = vmatpush2.bf16.msra.mxu1 %v13185_v36  ;;  %3509 = vmatprep.subr.bf16.mxu0 %v13242_v37  ;;  %v3951_v36 = vld [vmem:[#allocation8 + $0xe0] sm:$0xff] }
 0x245   :  { %3484 = vmatprep.subr.bf16.mxu1 %v13178_v40  ;;  %v4075_v37 = vld [vmem:[#allocation8 + $0x4c0] sm:$0xff]  ;;  %v13324_v40 = vcombine.high %v3947_v34, %v3951_v36 }
 0x246   :  { %v4031_v22 = vld [vmem:[#allocation8 + $0x360] sm:$0xff] }
 0x247   :  { %3510 = vmatpush1.bf16.msra.mxu0 %v13241_v44  ;;  %v4079_v44 = vld [vmem:[#allocation8 + $0x4e0] sm:$0xff] }
 0x248   :  { %3485 = vmatpush2.bf16.msra.mxu1 %v13177_v41  ;;  %v13323_v41 = vcombine.low %v3947_v34, %v3951_v36  ;;  %v4159_v59 = vld [vmem:[#allocation8 + $0x760] sm:$0xff] }
 0x249   :  { %7036 = vmatprep.subr.bf16.mxu1 %v13484_v61  ;;  %v4019_v36 = vld [vmem:[#allocation8 + $0x300] sm:$0xff] }
 0x24a   :  { %3528 = vmatmul.mubr.bf16.vlgmr.msra.gmra.mxu0 %v15019_v30  ;;  %v13356_v30 = vcombine.high %v3979_v55, %v3983_v56 }
 0x24b   :  { %3487 = vmatmul.mubr.bf16.vlgmr.msra.gmra.mxu1 %v15026_v39  ;;  %v13355_v39 = vcombine.low %v3979_v55, %v3983_v56  ;;  %v4063_v55 = vld [vmem:[#allocation8 + $0x460] sm:$0xff] }
 0x24c   :  { %6995 = vmatprep.subr.bf16.mxu0 %v13356_v30  ;;  %7037 = vmatpush1.bf16.msra.mxu1 %v13483_v27  ;;  %v4051_v27 = vld [vmem:[#allocation8 + $0x400] sm:$0xff] }
 0x24d   :  { %6996 = vmatpush1.bf16.msra.mxu0 %v13355_v39  ;;  %7038 = vmatprep.subr.bf16.mxu1 %v13476_v6  ;;  %v3927_v39 = vld [vmem:[#allocation8 + $0x20] sm:$0xff]  ;;  %v13427_v0 = vcombine.low %v4051_v27, %v4055_v62 }
 0x24e   :  { %6997 = vmatprep.subr.bf16.mxu0 %v13348_v1  ;;  %v13300_v61 = vcombine.high %v3923_v38, %v3927_v39  ;;  %v13299_v63 = vcombine.low %v3923_v38, %v3927_v39  ;;  %v13428_v1 = vcombine.high %v4051_v27, %v4055_v62  ;;  %v4175_v6 = vld [vmem:[#allocation8 + $0x7e0] sm:$0xff] }
 0x24f   :  { %v3995_v38 = vld [vmem:[#allocation8 + $0x240] sm:$0xff] }
 0x250   :  { %7039 = vmatpush1.bf16.msra.mxu1 %v13475_v35  ;;  %v3999_v39 = vld [vmem:[#allocation8 + $0x260] sm:$0xff] }
 0x251   :  { %6998 = vmatpush1.bf16.msra.mxu0 %v13347_v5  ;;  %7040 = vmatprep.subr.bf16.mxu1 %v13468_v58  ;;  %v4171_v5 = vld [vmem:[#allocation8 + $0x7c0] sm:$0xff]  ;;  %v13372_v62 = vcombine.high %v3995_v38, %v3999_v39 }
 0x252   :  { %6999 = vmatprep.subr.bf16.mxu0 %v13340_v14  ;;  %v13548_v23 = vcombine.high %v4171_v5, %v4175_v6  ;;  %v13412_v14 = vcombine.high %v4035_v9, %v4039_v10 }
 0x254   :  { %7041 = vmatpush1.bf16.msra.mxu1 %v13467_v20 }
 0x255   :  { %7000 = vmatpush1.bf16.msra.mxu0 %v13339_v18  ;;  %7042 = vmatprep.subr.bf16.mxu1 %v13460_v32 }
 0x256   :  { %7001 = vmatprep.subr.bf16.mxu0 %v13332_v26  ;;  %v4155_v26 = vld [vmem:[#allocation8 + $0x740] sm:$0xff] }
 0x257   :  { %v13532_v32 = vcombine.high %v4155_v26, %v4159_v59 }
 0x258   :  { %7043 = vmatpush1.bf16.msra.mxu1 %v13459_v31  ;;  %v13531_v31 = vcombine.low %v4155_v26, %v4159_v59  ;;  %v3542_v26 = vrot.slane %v15058_v11, 4  ;;  %v3548_v59 = vrot.slane %v15077_v19, 4 }
 0x259   :  { %7002 = vmatpush1.bf16.msra.mxu0 %v13331_v28 }
 0x25a   :  { %7003 = vmatprep.subr.bf16.mxu0 %v13324_v40  ;;  %v4147_v40 = vld [vmem:[#allocation8 + $0x700] sm:$0xff] }
 0x25d   :  { %7004 = vmatpush1.bf16.msra.mxu0 %v13323_v41 }
 0x26a   :  { %v3242_v42 = vpop.f32.mrf.mxu0 }
 0x26b   :  { %v3283_v16 = vpop.f32.mrf.mxu1 }
 0x26c   :  { %v3284_v43 = vadd.f32 %v3283_v16, %v3242_v42  ;;  %v3244_v45 = vpop.f32.mrf.mxu0  ;;  %v13451_v42 = vcombine.low %v4075_v37, %v4079_v44  ;;  %v13452_v16 = vcombine.high %v4075_v37, %v4079_v44  ;;  %v4023_v37 = vld [vmem:[#allocation8 + $0x320] sm:$0xff] }
 0x26d   :  { %v3285_v46 = vpop.f32.mrf.mxu1  ;;  %v13396_v41 = vcombine.high %v4019_v36, %v4023_v37 }
 0x26e   :  { %v3286_v47 = vadd.f32 %v3285_v46, %v3244_v45  ;;  %v3246_v17 = vpop.f32.mrf.mxu0  ;;  %7044 = vmatprep.subr.bf16.mxu1 %v13452_v16  ;;  %v3943_v45 = vld [vmem:[#allocation8 + $0xa0] sm:$0xff]  ;;  %v13395_v16 = vcombine.low %v4019_v36, %v4023_v37  ;;  %v3543_v37 = vadd.f32 %v3542_v26, %v15058_v11 }
 0x26f   :  { %v3287_v49 = vpop.f32.mrf.mxu1  ;;  %v4067_v46 = vld [vmem:[#allocation8 + $0x480] sm:$0xff]  ;;  %7045 = vmatpush1.bf16.msra.mxu1 %v13451_v42 }
 0x270   :  { %v3247_v50 = vpop.f32.mrf.mxu0  ;;  %v4071_v17 = vld [vmem:[#allocation8 + $0x4a0] sm:$0xff] }
 0x271   :  { %v3288_v51 = vpop.f32.mrf.mxu1  ;;  %v13443_v50 = vcombine.low %v4067_v46, %v4071_v17  ;;  %v4151_v42 = vld [vmem:[#allocation8 + $0x720] sm:$0xff] }
 0x272   :  { %v13444_v51 = vcombine.high %v4067_v46, %v4071_v17  ;;  %v4011_v46 = vld [vmem:[#allocation8 + $0x2c0] sm:$0xff] }
 0x273   :  { %v4139_v17 = vld [vmem:[#allocation8 + $0x6c0] sm:$0xff] }
 0x274   :  { %7046 = vmatprep.subr.bf16.mxu1 %v13444_v51 }
 0x275   :  { %7047 = vmatpush1.bf16.msra.mxu1 %v13443_v50  ;;  %v4143_v50 = vld [vmem:[#allocation8 + $0x6e0] sm:$0xff] }
 0x28b   :  { %v3365_v52 = vpop.f32.mrf.mxu1 }
 0x28d   :  { %v3367_v29 = vpop.f32.mrf.mxu1 }
 0x28f   :  { %v3369_v53 = vpop.f32.mrf.mxu1 }
 0x290   :  { %v4059_v53 = vld [vmem:[#allocation8 + $0x440] sm:$0xff] }
 0x291   :  { %v3370_v54 = vpop.f32.mrf.mxu1  ;;  %v13435_v57 = vcombine.low %v4059_v53, %v4063_v55  ;;  %v13436_v30 = vcombine.high %v4059_v53, %v4063_v55  ;;  %v4003_v53 = vld [vmem:[#allocation8 + $0x280] sm:$0xff] }
 0x292   :  { %v4131_v55 = vld [vmem:[#allocation8 + $0x680] sm:$0xff] }
 0x293   :  { %7048 = vmatprep.subr.bf16.mxu1 %v13436_v30  ;;  %v4135_v30 = vld [vmem:[#allocation8 + $0x6a0] sm:$0xff] }
 0x294   :  { %7049 = vmatpush1.bf16.msra.mxu1 %v13435_v57  ;;  %v13507_v27 = vcombine.low %v4131_v55, %v4135_v30 }
 0x295   :  { %7050 = vmatprep.subr.bf16.mxu1 %v13428_v1  ;;  %v3987_v1 = vld [vmem:[#allocation8 + $0x200] sm:$0xff] }
 0x298   :  { %7051 = vmatpush1.bf16.msra.mxu1 %v13427_v0  ;;  %v4127_v0 = vld [vmem:[#allocation8 + $0x660] sm:$0xff] }
 0x299   :  { %7052 = vmatprep.subr.bf16.mxu1 %v13548_v23 }
 0x2aa   :  { %v3324_v3 = vpop.f32.mrf.mxu0 }
 0x2ab   :  { %v3325_v7 = vadd.f32 %v3324_v3, %v3284_v43  ;;  %v3939_v43 = vld [vmem:[#allocation8 + $0x80] sm:$0xff] }
 0x2ac   :  { %v3326_v8 = vpop.f32.mrf.mxu0  ;;  %v13315_v49 = vcombine.low %v3939_v43, %v3943_v45  ;;  %v4047_v3 = vld [vmem:[#allocation8 + $0x3e0] sm:$0xff] }
 0x2ad   :  { %v15084_v12 = vadd.f32 %v3365_v52, %v3325_v7  ;;  %v3327_v13 = vadd.f32 %v3326_v8, %v3286_v47  ;;  %v13316_v47 = vcombine.high %v3939_v43, %v3943_v45  ;;  %v3931_v52 = vld [vmem:[#allocation8 + $0x40] sm:$0xff]  ;;  %v13420_v35 = vcombine.high %v4043_v2, %v4047_v3 }
 0x2ae   :  { %v3328_v15 = vpop.f32.mrf.mxu0  ;;  %v13419_v7 = vcombine.low %v4043_v2, %v4047_v3  ;;  %v13547_v8 = vcombine.low %v4171_v5, %v4175_v6  ;;  %v13523_v43 = vcombine.low %v4147_v40, %v4151_v42  ;;  %v13524_v45 = vcombine.high %v4147_v40, %v4151_v42  ;;  %v3991_v3 = vld [vmem:[#allocation8 + $0x220] sm:$0xff] }
 0x2af   :  { %v15086_v21 = vadd.f32 %v3367_v29, %v3327_v13  ;;  %7005 = vmatprep.subr.bf16.mxu0 %v13316_v47  ;;  %v3935_v29 = vld [vmem:[#allocation8 + $0x60] sm:$0xff]  ;;  %v13411_v15 = vcombine.low %v4035_v9, %v4039_v10  ;;  %v13371_v6 = vcombine.low %v3995_v38, %v3999_v39  ;;  %v13363_v9 = vcombine.low %v3987_v1, %v3991_v3 }
 0x2b0   :  { %v3329_v48 = vpop.f32.mrf.mxu0  ;;  %7006 = vmatpush1.bf16.msra.mxu0 %v13315_v49  ;;  %v13308_v54 = vcombine.high %v3931_v52, %v3935_v29  ;;  %v13307_v56 = vcombine.low %v3931_v52, %v3935_v29  ;;  %v4163_v13 = vld [vmem:[#allocation8 + $0x780] sm:$0xff]  ;;  %7053 = vmatpush2.bf16.msra.mxu1 %v13547_v8  ;;  %v13515_v52 = vcombine.low %v4139_v17, %v4143_v50 }
 0x2b1   :  { %v13539_v18 = vcombine.low %v4163_v13, %v4167_v33  ;;  %v13540_v20 = vcombine.high %v4163_v13, %v4167_v33  ;;  %v4027_v48 = vld [vmem:[#allocation8 + $0x340] sm:$0xff]  ;;  %v13516_v29 = vcombine.high %v4139_v17, %v4143_v50  ;;  %v13364_v8 = vcombine.high %v3987_v1, %v3991_v3 }
 0x2b2   :  { %7007 = vmatprep.subr.bf16.mxu0 %v13308_v54  ;;  %v13404_v25 = vcombine.high %v4027_v48, %v4031_v22  ;;  %v13403_v28 = vcombine.low %v4027_v48, %v4031_v22  ;;  %v4015_v47 = vld [vmem:[#allocation8 + $0x2e0] sm:$0xff]  ;;  %v3549_v40 = vadd.f32 %v3548_v59, %v15077_v19 }
 0x2b3   :  { %7054 = vmatprep.subr.bf16.mxu1 %v13540_v20  ;;  %v13388_v49 = vcombine.high %v4011_v46, %v4015_v47  ;;  %v13387_v51 = vcombine.low %v4011_v46, %v4015_v47  ;;  %v4007_v54 = vld [vmem:[#allocation8 + $0x2a0] sm:$0xff]  ;;  %v3554_v20 = vrot.slane %v15080_v60, 4  ;;  %v3544_v46 = vrot.slane %v3543_v37, 2 }
 0x2b4   :  { %7008 = vmatpush1.bf16.msra.mxu0 %v13307_v56  ;;  %7055 = vmatpush2.bf16.msra.mxu1 %v13539_v18  ;;  %v13379_v56 = vcombine.low %v4003_v53, %v4007_v54  ;;  %v13380_v57 = vcombine.high %v4003_v53, %v4007_v54  ;;  %v4115_v5 = vld [vmem:[#allocation8 + $0x600] sm:$0xff]  ;;  %v3550_v47 = vrot.slane %v3549_v40, 2 }
 0x2b5   :  { %7009 = vmatprep.subr.bf16.mxu0 %v13300_v61  ;;  %7056 = vmatprep.subr.bf16.mxu1 %v13532_v32  ;;  %v13508_v61 = vcombine.high %v4131_v55, %v4135_v30  ;;  %v15092_v13 = vld [vmem:[#allocation8 + $0x9c0] sm:$0xff]  ;;  %v3555_v32 = vadd.f32 %v3554_v20, %v15080_v60 }
 0x2b6   :  { %v15096_v33 = vld [vmem:[#allocation8 + $0xdc0] sm:$0xff] }
 0x2b7   :  { %v15100_v18 = vld [vmem:[#allocation8 + $0xde0] sm:$0xff] }
 0x2b8   :  { %7010 = vmatpush1.bf16.msra.mxu0 %v13299_v63  ;;  %7057 = vmatpush2.bf16.msra.mxu1 %v13531_v31  ;;  %v4123_v63 = vld [vmem:[#allocation8 + $0x640] sm:$0xff]  ;;  %v13739_v22 = vcombine.low %v15096_v33, %v15100_v18  ;;  %v3536_v31 = vrot.slane %v15053_v4, 4 }
 0x2b9   :  { %7011 = vmatprep.subr.bf16.mxu0 %v13420_v35  ;;  %7058 = vmatprep.subr.bf16.mxu1 %v13524_v45  ;;  %v13500_v2 = vcombine.high %v4123_v63, %v4127_v0  ;;  %v4119_v35 = vld [vmem:[#allocation8 + $0x620] sm:$0xff] }
 0x2ba   :  { %v13492_v23 = vcombine.high %v4115_v5, %v4119_v35  ;;  %v13491_v10 = vcombine.low %v4115_v5, %v4119_v35  ;;  %v3537_v42 = vadd.f32 %v3536_v31, %v15053_v4 }
 0x2bc   :  { %7012 = vmatpush2.bf16.msra.mxu0 %v13419_v7  ;;  %7059 = vmatpush2.bf16.msra.mxu1 %v13523_v43  ;;  %v13499_v7 = vcombine.low %v4123_v63, %v4127_v0 }
 0x2bd   :  { %7013 = vmatprep.subr.bf16.mxu0 %v13412_v14  ;;  %7060 = vmatprep.subr.bf16.mxu1 %v13516_v29  ;;  %v15094_v14 = vld [vmem:[#allocation8 + $0x9e0] sm:$0xff]  ;;  %v3551_v29 = vadd.f32 %v3550_v47, %v3549_v40 }
 0x2be   :  { %v13611_v48 = vcombine.low %v15092_v13, %v15094_v14 }
 0x2bf   :  { %v3552_v30 = vrot.slane %v3551_v29, 1 }
 0x2c0   :  { %7014 = vmatpush2.bf16.msra.mxu0 %v13411_v15  ;;  %7061 = vmatpush2.bf16.msra.mxu1 %v13515_v52  ;;  %v13612_v15 = vcombine.high %v15092_v13, %v15094_v14  ;;  %v3545_v52 = vadd.f32 %v3544_v46, %v3543_v37 }
 0x2c1   :  { %7015 = vmatprep.subr.bf16.mxu0 %v13404_v25  ;;  %7062 = vmatprep.subr.bf16.mxu1 %v13508_v61  ;;  %v13740_v25 = vcombine.high %v15096_v33, %v15100_v18  ;;  %v3553_v63 = vadd.f32 %v3552_v30, %v3551_v29 }
 0x2c3   :  { %v15124_v35 = vmul.f32 0.125, %v3553_v63 }
 0x2c4   :  { %7016 = vmatpush2.bf16.msra.mxu0 %v13403_v28  ;;  %7063 = vmatpush2.bf16.msra.mxu1 %v13507_v27 }
 0x2c5   :  { %7017 = vmatprep.subr.bf16.mxu0 %v13396_v41  ;;  %7064 = vmatprep.subr.bf16.mxu1 %v13500_v2 }
 0x2c8   :  { %7018 = vmatpush2.bf16.msra.mxu0 %v13395_v16  ;;  %7065 = vmatpush2.bf16.msra.mxu1 %v13499_v7  ;;  %v3556_v16 = vrot.slane %v3555_v32, 2 }
 0x2c9   :  { %7019 = vmatprep.subr.bf16.mxu0 %v13388_v49  ;;  %7066 = vmatprep.subr.bf16.mxu1 %v13492_v23  ;;  %v3538_v49 = vrot.slane %v3537_v42, 2 }
 0x2ca   :  { %v3557_v50 = vadd.f32 %v3556_v16, %v3555_v32 }
 0x2cb   :  { %v15088_v58 = vpop.f32.mrf.mxu1  ;;  %v3539_v54 = vadd.f32 %v3538_v49, %v3537_v42 }
 0x2cc   :  { %7020 = vmatpush2.bf16.msra.mxu0 %v13387_v51  ;;  %7067 = vmatpush2.bf16.msra.mxu1 %v13491_v10  ;;  %v3558_v55 = vrot.slane %v3557_v50, 1  ;;  %v3595_v10 = vsub.f32 %v15077_v19, %v15124_v35 }
 0x2cd   :  { %v15090_v24 = vpop.f32.mrf.mxu1  ;;  %7021 = vmatprep.subr.bf16.mxu0 %v13380_v57  ;;  %7118 = vmatprep.subr.bf16.mxu1 %v13740_v25  ;;  %v3546_v57 = vrot.slane %v3545_v52, 1  ;;  %v3540_v39 = vrot.slane %v3539_v54, 1 }
 0x2ce   :  { %v3559_v27 = vadd.f32 %v3558_v55, %v3557_v50  ;;  %v3603_v31 = vmul.f32 %v3595_v10, %v3595_v10 }
 0x2cf   :  { %v3410_v34 = vpop.f32.mrf.mxu1  ;;  %v3541_v1 = vadd.f32 %v3540_v39, %v3539_v54 }
 0x2d0   :  { %7022 = vmatpush2.bf16.msra.mxu0 %v13379_v56  ;;  %v3566_v34 = vrot.slane %v15086_v21, 4  ;;  %v15120_v2 = vmul.f32 0.125, %v3559_v27 }
 0x2d1   :  { %v3411_v44 = vpop.f32.mrf.mxu1  ;;  %7023 = vmatprep.subr.bf16.mxu0 %v13372_v62  ;;  %v3547_v62 = vadd.f32 %v3546_v57, %v3545_v52  ;;  %v15126_v7 = vmul.f32 0.125, %v3541_v1 }
 0x2d2   :  { %v3560_v44 = vrot.slane %v15084_v12, 4  ;;  %v3567_v43 = vadd.f32 %v3566_v34, %v15086_v21 }
 0x2d3   :  { %v15122_v5 = vmul.f32 0.125, %v3547_v62  ;;  %v3593_v20 = vsub.f32 %v15053_v4, %v15126_v7 }
 0x2d4   :  { %7024 = vmatpush2.bf16.msra.mxu0 %v13371_v6  ;;  %v3561_v17 = vadd.f32 %v3560_v44, %v15084_v12  ;;  %v3568_v51 = vrot.slane %v3567_v43, 2 }
 0x2d5   :  { %7025 = vmatprep.subr.bf16.mxu0 %v13364_v8  ;;  %v3596_v8 = vsub.f32 %v15080_v60, %v15120_v2  ;;  %v3601_v40 = vmul.f32 %v3593_v20, %v3593_v20 }
 0x2d6   :  { %v3562_v53 = vrot.slane %v3561_v17, 2  ;;  %v3569_v56 = vadd.f32 %v3568_v51, %v3567_v43 }
 0x2d7   :  { %v3604_v25 = vmul.f32 %v3596_v8, %v3596_v8  ;;  %v3609_v29 = vrot.slane %v3601_v40, 4 }
 0x2d8   :  { %7026 = vmatpush2.bf16.msra.mxu0 %v13363_v9  ;;  %v3563_v38 = vadd.f32 %v3562_v53, %v3561_v17  ;;  %v3570_v61 = vrot.slane %v3569_v56, 1  ;;  %v3594_v9 = vsub.f32 %v15058_v11, %v15122_v5  ;;  %v3621_v17 = vrot.slane %v3603_v31, 4 }
 0x2d9   :  { %7077 = vmatprep.subr.bf16.mxu0 %v13612_v15  ;;  %v3610_v27 = vadd.f32 %v3609_v29, %v3601_v40 }
 0x2da   :  { %v3564_v0 = vrot.slane %v3563_v38, 1  ;;  %v3571_v3 = vadd.f32 %v3570_v61, %v3569_v56  ;;  %v3602_v59 = vmul.f32 %v3594_v9, %v3594_v9  ;;  %v3622_v57 = vadd.f32 %v3621_v17, %v3603_v31 }
 0x2db   :  { %v3611_v10 = vrot.slane %v3610_v27, 2 }
 0x2dc   :  { %v3565_v6 = vadd.f32 %v3564_v0, %v3563_v38  ;;  %v15130_v23 = vmul.f32 0.125, %v3571_v3  ;;  %v3615_v46 = vrot.slane %v3602_v59, 4  ;;  %v3623_v3 = vrot.slane %v3622_v57, 2 }
 0x2de   :  { %v15136_v15 = vmul.f32 0.125, %v3565_v6  ;;  %v3598_v26 = vsub.f32 %v15086_v21, %v15130_v23 }
 0x2e0   :  { %v3597_v32 = vsub.f32 %v15084_v12, %v15136_v15  ;;  %v3606_v42 = vmul.f32 %v3598_v26, %v3598_v26 }
 0x2e2   :  { %v3605_v49 = vmul.f32 %v3597_v32, %v3597_v32  ;;  %v3624_v32 = vadd.f32 %v3623_v3, %v3622_v57 }
 0x2e4   :  { %v3633_v30 = vrot.slane %v3605_v49, 4 }
 0x2e6   :  { %v3634_v6 = vadd.f32 %v3633_v30, %v3605_v49 }
 0x2ea   :  { %v3447_v28 = vpop.f32.mrf.mxu0 }
 0x2eb   :  { %v3448_v34 = vadd.f32 %v3447_v28, %v15088_v58  ;;  %v3639_v28 = vrot.slane %v3606_v42, 4 }
 0x2ec   :  { %v3449_v36 = vpop.f32.mrf.mxu0 }
 0x2ed   :  { %v3450_v16 = vadd.f32 %v3449_v36, %v15090_v24  ;;  %v3616_v24 = vadd.f32 %v3615_v46, %v3602_v59  ;;  %v3640_v62 = vadd.f32 %v3639_v28, %v3606_v42  ;;  %v3625_v46 = vrot.slane %v3624_v32, 1 }
 0x2ee   :  { %v3451_v41 = vpop.f32.mrf.mxu0 }
 0x2ef   :  { %v3627_v41 = vrot.slane %v3604_v25, 4  ;;  %v3617_v1 = vrot.slane %v3616_v24, 2 }
 0x2f0   :  { %v3452_v45 = vpop.f32.mrf.mxu0 }
 0x2f1   :  { %v3628_v58 = vadd.f32 %v3627_v41, %v3604_v25  ;;  %v3641_v25 = vrot.slane %v3640_v62, 2  ;;  %v3618_v31 = vadd.f32 %v3617_v1, %v3616_v24 }
 0x2f3   :  { %v3629_v61 = vrot.slane %v3628_v58, 2  ;;  %v3642_v42 = vadd.f32 %v3641_v25, %v3640_v62 }
 0x2f5   :  { %v3630_v20 = vadd.f32 %v3629_v61, %v3628_v58  ;;  %v3643_v29 = vrot.slane %v3642_v42, 1 }
 0x2f7   :  { %v3631_v41 = vrot.slane %v3630_v20, 1 }
 0x30a   :  { %v3529_v37 = vpop.f32.mrf.mxu0 }
 0x30b   :  { %v3488_v44 = vpop.f32.mrf.mxu1 }
 0x30c   :  { %v3489_v43 = vadd.f32 %v3488_v44, %v3448_v34  ;;  %v3531_v45 = vpop.f32.mrf.mxu0  ;;  %v3635_v34 = vrot.slane %v3634_v6, 2  ;;  %v3612_v44 = vadd.f32 %v3611_v10, %v3610_v27 }
 0x30d   :  { %v3490_v47 = vpop.f32.mrf.mxu1 }
 0x30e   :  { %v15146_v50 = vadd.f32 %v3529_v37, %v3489_v43  ;;  %v3491_v51 = vadd.f32 %v3490_v47, %v3450_v16  ;;  %v3533_v52 = vpop.f32.mrf.mxu0  ;;  %v3636_v47 = vadd.f32 %v3635_v34, %v3634_v6 }
 0x30f   :  { %v3492_v53 = vpop.f32.mrf.mxu1  ;;  %v3632_v52 = vadd.f32 %v3631_v41, %v3630_v20 }
 0x310   :  { %v3572_v54 = vrot.slane %v15146_v50, 4  ;;  %v15149_v55 = vadd.f32 %v3531_v45, %v3491_v51  ;;  %v3534_v56 = vpop.f32.mrf.mxu0  ;;  %v3619_v45 = vrot.slane %v3618_v31, 1  ;;  %v3613_v51 = vrot.slane %v3612_v44, 1 }
 0x311   :  { %v3493_v36 = vpop.f32.mrf.mxu1  ;;  %v3637_v56 = vrot.slane %v3636_v47, 1  ;;  %v3660_v30 = vmul.f32 0.125, %v3632_v52 }
 0x312   :  { %v3573_v38 = vadd.f32 %v3572_v54, %v15146_v50  ;;  %v3578_v39 = vrot.slane %v15149_v55, 4  ;;  %v3620_v28 = vadd.f32 %v3619_v45, %v3618_v31  ;;  %v3626_v54 = vadd.f32 %v3625_v46, %v3624_v32 }
 0x313   :  { %v3614_v57 = vadd.f32 %v3613_v51, %v3612_v44  ;;  %v3669_v6 = vadd.f32 1e-05, %v3660_v30  ;;  %v3697_v51 = vlaneseq }
 0x314   :  { %v3574_v63 = vrot.slane %v3573_v38, 2  ;;  %v3579_v0 = vadd.f32 %v3578_v39, %v15149_v55  ;;  %v3658_v61 = vmul.f32 0.125, %v3620_v28  ;;  %v3659_v62 = vmul.f32 0.125, %v3626_v54 }
 0x315   :  { %v3657_v3 = vmul.f32 0.125, %v3614_v57  ;;  %14558 = vrsqrt.f32 %v3669_v6 }
 0x316   :  { %v3575_v8 = vadd.f32 %v3574_v63, %v3573_v38  ;;  %v3580_v9 = vrot.slane %v3579_v0, 2  ;;  %v3644_v38 = vadd.f32 %v3643_v29, %v3642_v42  ;;  %v3638_v63 = vadd.f32 %v3637_v56, %v3636_v47 }
 0x317   :  { %v3667_v20 = vadd.f32 1e-05, %v3658_v61  ;;  %v3668_v25 = vadd.f32 1e-05, %v3659_v62  ;;  %v3666_v32 = vadd.f32 1e-05, %v3657_v3 }
 0x318   :  { %v3576_v26 = vrot.slane %v3575_v8, 1  ;;  %v3581_v59 = vadd.f32 %v3580_v9, %v3579_v0  ;;  %v14876_v47 = vmov 1966171168  }
 0x319   :  { %14560 = vrsqrt.f32 %v3667_v20 }
 0x31a   :  { %v3577_v37 = vadd.f32 %v3576_v26, %v3575_v8  ;;  %v3582_v40 = vrot.slane %v3581_v59, 1  ;;  %v3662_v8 = vmul.f32 0.125, %v3644_v38  ;;  %v3661_v26 = vmul.f32 0.125, %v3638_v63 }
 0x31b   :  { %14562 = vrsqrt.f32 %v3668_v25 }
 0x31c   :  { %v15154_v16 = vmul.f32 0.125, %v3577_v37  ;;  %v3583_v43 = vadd.f32 %v3582_v40, %v3581_v59  ;;  %v3671_v34 = vadd.f32 1e-05, %v3662_v8  ;;  %v3670_v44 = vadd.f32 1e-05, %v3661_v26 }
 0x31d   :  { %14564 = vrsqrt.f32 %v3666_v32 }
 0x31e   :  { %v3599_v17 = vsub.f32 %v15146_v50, %v15154_v16  ;;  %v15158_v49 = vmul.f32 0.125, %v3583_v43  ;;  %14566 = vrsqrt.f32 %v3671_v34 }
 0x31f   :  { %14568 = vrsqrt.f32 %v3670_v44 }
 0x320   :  { %v3607_v53 = vmul.f32 %v3599_v17, %v3599_v17  ;;  %v3600_v58 = vsub.f32 %v15149_v55, %v15158_v49  ;;  %v3695_v17 = vunpack.c.l.s4 %v14876_v47 }
 0x322   :  { %v3645_v24 = vrot.slane %v3607_v53, 4  ;;  %v3608_v36 = vmul.f32 %v3600_v58, %v3600_v58  ;;  %v14559_v52 = vpop.eup %14558  ;;  %v3698_v58 = vshrl.u32 %v3697_v51, 7 }
 0x324   :  { %v3646_v39 = vadd.f32 %v3645_v24, %v3607_v53  ;;  %v3651_v27 = vrot.slane %v3608_v36, 4  ;;  %v3696_v53 = vunpack.c.0.s8 %v3695_v17  ;;  %v15170_v20 = vsub.s32 4, %v3698_v58 }
 0x325   :  { %v15172_v26 = vsub.s32 5, %v3698_v58  ;;  %v15178_v32 = vsub.s32 0, %v3698_v58  ;;  %v15180_v34 = vsub.s32 1, %v3698_v58 }
 0x326   :  { %v3647_v0 = vrot.slane %v3646_v39, 2  ;;  %v3652_v1 = vadd.f32 %v3651_v27, %v3608_v36  ;;  %v14561_v29 = vpop.eup %14560  ;;  %v15162_v57 = vsub.s32 %v3696_v53, %v3698_v58 }
 0x328   :  { %v3648_v9 = vadd.f32 %v3647_v0, %v3646_v39  ;;  %v3653_v10 = vrot.slane %v3652_v1, 2  ;;  %v14563_v28 = vpop.eup %14562 }
 0x329   :  { %v3691_v56 = vcombine.low %v14563_v28, %v14559_v52 }
 0x32a   :  { %v3649_v59 = vrot.slane %v3648_v9, 1  ;;  %v3654_v31 = vadd.f32 %v3653_v10, %v3652_v1  ;;  %v14565_v54 = vpop.eup %14564  ;;  %v3665_v10 = vld [vmem:[#allocation5] sm:$0xff] }
 0x32b   :  { %v14567_v24 = vpop.eup %14566  ;;  %v3690_v36 = vcombine.low %v14565_v54, %v14561_v29  ;;  %v3707_v39 = vrot.slane %v3691_v56, %v15162_v57 }
 0x32c   :  { %v3650_v37 = vadd.f32 %v3649_v59, %v3648_v9  ;;  %v3655_v40 = vrot.slane %v3654_v31, 1  ;;  %v14569_v30 = vpop.eup %14568  ;;  %v15174_v59 = vsub.s32 6, %v3698_v58 }
 0x32d   :  { %v3692_v27 = vcombine.low %v14569_v30, %v14567_v24  ;;  %v3700_v62 = vrot.slane %v3690_v36, %v15162_v57 }
 0x32e   :  { %v3663_v41 = vmul.f32 0.125, %v3650_v37  ;;  %v3656_v42 = vadd.f32 %v3655_v40, %v3654_v31  ;;  %v15176_v31 = vsub.s32 7, %v3698_v58  ;;  %v15182_v37 = vsub.s32 2, %v3698_v58 }
 0x32f   :  { %v3722_v0 = vcombine.low %v3700_v62, %v3707_v39  ;;  %v3714_v1 = vrot.slane %v3692_v27, %v15162_v57  ;;  %v15184_v40 = vsub.s32 3, %v3698_v58 }
 0x330   :  { %v3672_v43 = vadd.f32 1e-05, %v3663_v41  ;;  %v3664_v45 = vmul.f32 0.125, %v3656_v42 }
 0x331   :  { %v3730_v8 = vrot.slane %v3722_v0, %v15162_v57 }
 0x332   :  { %v3673_v46 = vadd.f32 1e-05, %v3664_v45  ;;  %14570 = vrsqrt.f32 %v3672_v43 }
 0x334   :  { %14572 = vrsqrt.f32 %v3673_v46 }
 0x33f   :  { %v14571_v38 = vpop.eup %14570 }
 0x341   :  { %v14573_v61 = vpop.eup %14572 }
 0x342   :  { %v3693_v63 = vcombine.low %v14571_v38, %v14573_v61  ;;  %v3741_v61 = vld [vmem:[#allocation7] sm:$0xff] }
 0x344   :  { %v3721_v3 = vrot.slane %v3693_v63, %v15162_v57 }
 0x346   :  { %v3723_v6 = vcombine.low %v3714_v1, %v3721_v3 }
 0x348   :  { %v3737_v9 = vrot.slane %v3723_v6, %v15162_v57 }
 0x34a   :  { %v3738_v25 = vcombine.low %v3730_v8, %v3737_v9 }
 0x34c   :  { %v3740_v44 = vmul.f32 %v3738_v25, %v3665_v10 }
 0x34e   :  { %v3762_v41 = vrot.slane %v3740_v44, %v15170_v20  ;;  %v3766_v42 = vrot.slane %v3740_v44, %v15172_v26  ;;  %v3770_v43 = vrot.slane %v3740_v44, %v15174_v59  ;;  %v3774_v45 = vrot.slane %v3740_v44, %v15176_v31 }
 0x34f   :  { %v3746_v46 = vrot.slane %v3740_v44, %v15178_v32  ;;  %v3750_v47 = vrot.slane %v3740_v44, %v15180_v34  ;;  %v3754_v17 = vrot.slane %v3740_v44, %v15182_v37  ;;  %v3758_v51 = vrot.slane %v3740_v44, %v15184_v40 }
 0x350   :  { %v3787_v52 = vmul.f32 %v3762_v41, %v15136_v15  ;;  %v3788_v29 = vmul.f32 %v3766_v42, %v15130_v23  ;;  %v3789_v53 = vmul.f32 %v3770_v43, %v15154_v16  ;;  %v3790_v58 = vmul.f32 %v3774_v45, %v15158_v49 }
 0x351   :  { %v3857_v28 = vmul.f32 %v3774_v45, %v15149_v55  ;;  %v3783_v54 = vmul.f32 %v3746_v46, %v15126_v7  ;;  %v3784_v56 = vmul.f32 %v3750_v47, %v15122_v5  ;;  %v3785_v24 = vmul.f32 %v3754_v17, %v15124_v35 }
 0x352   :  { %v3801_v36 = vcombine.low %v3787_v52, %v3788_v29  ;;  %v3802_v30 = vcombine.low %v3789_v53, %v3790_v58  ;;  %v3786_v38 = vmul.f32 %v3758_v51, %v15120_v2  ;;  %v3851_v2 = vmul.f32 %v3750_v47, %v15058_v11  ;;  %v4227_v53 = vld [vmem:[#allocation8 + $0x980] sm:$0xff] }
 0x353   :  { %v3799_v39 = vcombine.low %v3783_v54, %v3784_v56  ;;  %v3853_v0 = vmul.f32 %v3758_v51, %v15080_v60  ;;  %v3850_v1 = vmul.f32 %v3746_v46, %v15053_v4  ;;  %v3852_v3 = vmul.f32 %v3754_v17, %v15077_v19  ;;  %v4231_v56 = vld [vmem:[#allocation8 + $0x9a0] sm:$0xff] }
 0x354   :  { %v3823_v15 = vrot.slane %v3801_v36, %v15162_v57  ;;  %v3830_v23 = vrot.slane %v3802_v30, %v15162_v57  ;;  %v3800_v16 = vcombine.low %v3785_v24, %v3786_v38  ;;  %v3855_v6 = vmul.f32 %v3766_v42, %v15086_v21  ;;  %v4355_v24 = vld [vmem:[#allocation8 + $0xd80] sm:$0xff] }
 0x355   :  { %v3809_v49 = vrot.slane %v3799_v39, %v15162_v57  ;;  %v3854_v8 = vmul.f32 %v3762_v41, %v15084_v12  ;;  %v3856_v9 = vmul.f32 %v3770_v43, %v15146_v50  ;;  %v4359_v36 = vld [vmem:[#allocation8 + $0xda0] sm:$0xff] }
 0x356   :  { %v3832_v27 = vcombine.low %v3823_v15, %v3830_v23  ;;  %v3816_v55 = vrot.slane %v3800_v16, %v15162_v57  ;;  %v4219_v15 = vld [vmem:[#allocation8 + $0x940] sm:$0xff]  ;;  %v13604_v23 = vcombine.high %v4227_v53, %v4231_v56  ;;  %v13732_v16 = vcombine.high %v4355_v24, %v4359_v36 }
 0x358   :  { %v3846_v7 = vrot.slane %v3832_v27, %v15162_v57  ;;  %v3831_v5 = vcombine.low %v3809_v49, %v3816_v55  ;;  %v4223_v49 = vld [vmem:[#allocation8 + $0x960] sm:$0xff] }
 0x359   :  { %v4347_v27 = vld [vmem:[#allocation8 + $0xd40] sm:$0xff]  ;;  %v13595_v13 = vcombine.low %v4219_v15, %v4223_v49 }
 0x35a   :  { %v3839_v35 = vrot.slane %v3831_v5, %v15162_v57  ;;  %v4351_v55 = vld [vmem:[#allocation8 + $0xd60] sm:$0xff] }
 0x35b   :  { %v13723_v14 = vcombine.low %v4347_v27, %v4351_v55 }
 0x35c   :  { %v3847_v62 = vcombine.low %v3839_v35, %v3846_v7  ;;  %v13603_v35 = vcombine.low %v4227_v53, %v4231_v56  ;;  %v4307_v56 = vld [vmem:[#allocation8 + $0xc00] sm:$0xff] }
 0x35e   :  { %v3849_v63 = vsub.f32 %v3741_v61, %v3847_v62  ;;  %v13731_v61 = vcombine.low %v4355_v24, %v4359_v36  ;;  %v13596_v62 = vcombine.high %v4219_v15, %v4223_v49  ;;  %v4311_v24 = vld [vmem:[#allocation8 + $0xc20] sm:$0xff] }
 0x35f   :  { %v4299_v49 = vld [vmem:[#allocation8 + $0xbc0] sm:$0xff] }
 0x360   :  { %v3866_v10 = vrot.slane %v3849_v63, %v15180_v34  ;;  %v3874_v25 = vrot.slane %v3849_v63, %v15184_v40  ;;  %v3862_v44 = vrot.slane %v3849_v63, %v15178_v32  ;;  %v3870_v11 = vrot.slane %v3849_v63, %v15182_v37 }
 0x361   :  { %v3882_v60 = vrot.slane %v3849_v63, %v15172_v26  ;;  %v3890_v4 = vrot.slane %v3849_v63, %v15176_v31  ;;  %v3878_v19 = vrot.slane %v3849_v63, %v15170_v20  ;;  %v3886_v21 = vrot.slane %v3849_v63, %v15174_v59 }
 0x362   :  { %v3900_v42 = vadd.f32 %v3866_v10, %v3851_v2  ;;  %v3902_v12 = vadd.f32 %v3874_v25, %v3853_v0  ;;  %v3899_v41 = vadd.f32 %v3862_v44, %v3850_v1  ;;  %v3901_v50 = vadd.f32 %v3870_v11, %v3852_v3  ;;  %v4211_v2 = vld [vmem:[#allocation8 + $0x900] sm:$0xff] }
 0x363   :  { %v3904_v43 = vadd.f32 %v3882_v60, %v3855_v6  ;;  %v3906_v45 = vadd.f32 %v3890_v4, %v3857_v28  ;;  %v15224_v46 = vadd.f32 %v3878_v19, %v3854_v8  ;;  %v15226_v47 = vadd.f32 %v3886_v21, %v3856_v9  ;;  %v4215_v0 = vld [vmem:[#allocation8 + $0x920] sm:$0xff] }
 0x364   :  { %v3908_v17 = vmax.f32 %v3900_v42, 0.0  ;;  %v3910_v51 = vmax.f32 %v3902_v12, 0.0  ;;  %v3907_v52 = vmax.f32 %v3899_v41, 0.0  ;;  %v3909_v29 = vmax.f32 %v3901_v50, 0.0  ;;  %v4339_v1 = vld [vmem:[#allocation8 + $0xd00] sm:$0xff] }
 0x365   :  { %v3912_v58 = vmax.f32 %v3904_v43, 0.0  ;;  %v3914_v54 = vmax.f32 %v3906_v45, 0.0  ;;  %v13724_v63 = vcombine.high %v4347_v27, %v4351_v55  ;;  %v4343_v3 = vld [vmem:[#allocation8 + $0xd20] sm:$0xff]  ;;  %v13588_v33 = vcombine.high %v4211_v2, %v4215_v0 }
 0x366   :  { %v15228_v30 = vpack.c.bf16 %v3908_v17, %v3908_v17  ;;  %v15230_v38 = vpack.c.bf16 %v3910_v51, %v3910_v51  ;;  %v15232_v39 = vpack.c.bf16 %v3907_v52, %v3907_v52  ;;  %v15234_v28 = vpack.c.bf16 %v3909_v29, %v3909_v29  ;;  %v4331_v6 = vld [vmem:[#allocation8 + $0xcc0] sm:$0xff] }
 0x367   :  { %v15240_v7 = vpack.c.bf16 %v3912_v58, %v3912_v58  ;;  %v15242_v5 = vpack.c.bf16 %v3914_v54, %v3914_v54  ;;  %v13716_v18 = vcombine.high %v4339_v1, %v4343_v3  ;;  %v4335_v8 = vld [vmem:[#allocation8 + $0xce0] sm:$0xff]  ;;  %v13587_v9 = vcombine.low %v4211_v2, %v4215_v0 }
 0x368   :  { %7027 = vmatprep.mubr.bf16.mxu0 %v15228_v30  ;;  %7068 = vmatprep.mubr.bf16.mxu1 %v15230_v38  ;;  %v13715_v10 = vcombine.low %v4339_v1, %v4343_v3  ;;  %v13708_v44 = vcombine.high %v4331_v6, %v4335_v8  ;;  %v4195_v11 = vld [vmem:[#allocation8 + $0x880] sm:$0xff]  ;;  %v13707_v42 = vcombine.low %v4331_v6, %v4335_v8 }
 0x369   :  { %7028 = vmatmul.mubr.bf16.vlgmr.msra.gmra.mxu0 %v15232_v39  ;;  %7069 = vmatmul.mubr.bf16.vlgmr.msra.gmra.mxu1 %v15234_v28  ;;  %v4199_v60 = vld [vmem:[#allocation8 + $0x8a0] sm:$0xff] }
 0x36a   :  { %7078 = vmatpush1.bf16.msra.mxu0 %v13611_v48  ;;  %7119 = vmatpush1.bf16.msra.mxu1 %v13739_v22  ;;  %v4203_v48 = vld [vmem:[#allocation8 + $0x8c0] sm:$0xff]  ;;  %v13572_v12 = vcombine.high %v4195_v11, %v4199_v60  ;;  %v13571_v51 = vcombine.low %v4195_v11, %v4199_v60 }
 0x36b   :  { %7109 = vmatprep.mubr.bf16.mxu0 %v15240_v7  ;;  %7150 = vmatprep.mubr.bf16.mxu1 %v15242_v5  ;;  %v4207_v22 = vld [vmem:[#allocation8 + $0x8e0] sm:$0xff] }
 0x36c   :  { %7079 = vmatprep.subr.bf16.mxu0 %v13604_v23  ;;  %7120 = vmatprep.subr.bf16.mxu1 %v13732_v16  ;;  %v13580_v25 = vcombine.high %v4203_v48, %v4207_v22  ;;  %v4323_v4 = vld [vmem:[#allocation8 + $0xc80] sm:$0xff]  ;;  %v13579_v21 = vcombine.low %v4203_v48, %v4207_v22  ;;  %v13684_v16 = vcombine.high %v4307_v56, %v4311_v24 }
 0x36d   :  { %v4327_v19 = vld [vmem:[#allocation8 + $0xca0] sm:$0xff] }
 0x36e   :  { %7080 = vmatpush1.bf16.msra.mxu0 %v13603_v35  ;;  %7121 = vmatpush1.bf16.msra.mxu1 %v13731_v61  ;;  %v13700_v41 = vcombine.high %v4323_v4, %v4327_v19  ;;  %v4187_v50 = vld [vmem:[#allocation8 + $0x840] sm:$0xff]  ;;  %v13699_v52 = vcombine.low %v4323_v4, %v4327_v19 }
 0x36f   :  { %7081 = vmatprep.subr.bf16.mxu0 %v13596_v62  ;;  %7122 = vmatprep.subr.bf16.mxu1 %v13724_v63  ;;  %v4191_v43 = vld [vmem:[#allocation8 + $0x860] sm:$0xff]  ;;  %v13683_v62 = vcombine.low %v4307_v56, %v4311_v24 }
 0x370   :  { %v4315_v45 = vld [vmem:[#allocation8 + $0xc40] sm:$0xff]  ;;  %v13564_v29 = vcombine.high %v4187_v50, %v4191_v43  ;;  %v13563_v36 = vcombine.low %v4187_v50, %v4191_v43 }
 0x371   :  { %v4319_v17 = vld [vmem:[#allocation8 + $0xc60] sm:$0xff] }
 0x372   :  { %7082 = vmatpush1.bf16.msra.mxu0 %v13595_v13  ;;  %7123 = vmatpush1.bf16.msra.mxu1 %v13723_v14  ;;  %v13692_v53 = vcombine.high %v4315_v45, %v4319_v17  ;;  %v4179_v58 = vld [vmem:[#allocation8 + $0x800] sm:$0xff]  ;;  %v13691_v15 = vcombine.low %v4315_v45, %v4319_v17 }
 0x373   :  { %7083 = vmatprep.subr.bf16.mxu0 %v13588_v33  ;;  %7124 = vmatprep.subr.bf16.mxu1 %v13716_v18  ;;  %v4183_v54 = vld [vmem:[#allocation8 + $0x820] sm:$0xff] }
 0x374   :  { %v13556_v23 = vcombine.high %v4179_v58, %v4183_v54  ;;  %v4303_v27 = vld [vmem:[#allocation8 + $0xbe0] sm:$0xff]  ;;  %v13555_v61 = vcombine.low %v4179_v58, %v4183_v54 }
 0x375   :  { %v4427_v55 = vld [vmem:[#allocation8 + $0xfc0] sm:$0xff]  ;;  %v13676_v63 = vcombine.high %v4299_v49, %v4303_v27  ;;  %v13675_v14 = vcombine.low %v4299_v49, %v4303_v27 }
 0x376   :  { %7084 = vmatpush1.bf16.msra.mxu0 %v13587_v9  ;;  %7125 = vmatpush1.bf16.msra.mxu1 %v13715_v10  ;;  %v4431_v35 = vld [vmem:[#allocation8 + $0xfe0] sm:$0xff] }
 0x377   :  { %7085 = vmatprep.subr.bf16.mxu0 %v13580_v25  ;;  %7126 = vmatprep.subr.bf16.mxu1 %v13708_v44  ;;  %v13804_v2 = vcombine.high %v4427_v55, %v4431_v35  ;;  %v4291_v0 = vld [vmem:[#allocation8 + $0xb80] sm:$0xff]  ;;  %v13803_v33 = vcombine.low %v4427_v55, %v4431_v35 }
 0x378   :  { %v4295_v1 = vld [vmem:[#allocation8 + $0xba0] sm:$0xff] }
 0x379   :  { %v4419_v3 = vld [vmem:[#allocation8 + $0xf80] sm:$0xff]  ;;  %v13668_v18 = vcombine.high %v4291_v0, %v4295_v1  ;;  %v13667_v10 = vcombine.low %v4291_v0, %v4295_v1 }
 0x37a   :  { %7086 = vmatpush1.bf16.msra.mxu0 %v13579_v21  ;;  %7127 = vmatpush1.bf16.msra.mxu1 %v13707_v42  ;;  %v4423_v13 = vld [vmem:[#allocation8 + $0xfa0] sm:$0xff] }
 0x37b   :  { %7087 = vmatprep.subr.bf16.mxu0 %v13572_v12  ;;  %7128 = vmatprep.subr.bf16.mxu1 %v13700_v41  ;;  %v13796_v48 = vcombine.high %v4419_v3, %v4423_v13  ;;  %v4283_v22 = vld [vmem:[#allocation8 + $0xb40] sm:$0xff]  ;;  %v13795_v25 = vcombine.low %v4419_v3, %v4423_v13 }
 0x37c   :  { %v4287_v6 = vld [vmem:[#allocation8 + $0xb60] sm:$0xff] }
 0x37d   :  { %v4411_v8 = vld [vmem:[#allocation8 + $0xf40] sm:$0xff]  ;;  %v13660_v44 = vcombine.high %v4283_v22, %v4287_v6  ;;  %v13659_v42 = vcombine.low %v4283_v22, %v4287_v6  ;;  %v3980_v6 = vld [vmem:[#allocation8 + $0x1c8] sm:$0xff] }
 0x37e   :  { %7088 = vmatpush1.bf16.msra.mxu0 %v13571_v51  ;;  %7129 = vmatpush1.bf16.msra.mxu1 %v13699_v52  ;;  %v4415_v9 = vld [vmem:[#allocation8 + $0xf60] sm:$0xff] }
 0x37f   :  { %7089 = vmatprep.subr.bf16.mxu0 %v13564_v29  ;;  %7130 = vmatprep.subr.bf16.mxu1 %v13692_v53  ;;  %v13788_v11 = vcombine.high %v4411_v8, %v4415_v9  ;;  %v4275_v60 = vld [vmem:[#allocation8 + $0xb00] sm:$0xff]  ;;  %v13787_v12 = vcombine.low %v4411_v8, %v4415_v9  ;;  %v3984_v8 = vld [vmem:[#allocation8 + $0x1e8] sm:$0xff] }
 0x380   :  { %v4279_v4 = vld [vmem:[#allocation8 + $0xb20] sm:$0xff]  ;;  %v4108_v9 = vld [vmem:[#allocation8 + $0x5c8] sm:$0xff] }
 0x381   :  { %v4403_v19 = vld [vmem:[#allocation8 + $0xf00] sm:$0xff]  ;;  %v13652_v41 = vcombine.high %v4275_v60, %v4279_v4  ;;  %v13651_v52 = vcombine.low %v4275_v60, %v4279_v4  ;;  %v3913_v60 = vmax.f32 %v15226_v47, 0.0  ;;  %v13358_v4 = vcombine.high %v3980_v6, %v3984_v8  ;;  %v3968_v47 = vld [vmem:[#allocation8 + $0x168] sm:$0xff] }
 0x382   :  { %7090 = vmatpush1.bf16.msra.mxu0 %v13563_v36  ;;  %7131 = vmatpush1.bf16.msra.mxu1 %v13691_v15  ;;  %v4407_v21 = vld [vmem:[#allocation8 + $0xf20] sm:$0xff] }
 0x383   :  { %7091 = vmatprep.subr.bf16.mxu0 %v13556_v23  ;;  %7132 = vmatprep.subr.bf16.mxu1 %v13684_v16  ;;  %v13780_v50 = vcombine.high %v4403_v19, %v4407_v21  ;;  %v4267_v43 = vld [vmem:[#allocation8 + $0xac0] sm:$0xff]  ;;  %v13779_v29 = vcombine.low %v4403_v19, %v4407_v21  ;;  %v3972_v21 = vld [vmem:[#allocation8 + $0x188] sm:$0xff] }
 0x384   :  { %v4271_v45 = vld [vmem:[#allocation8 + $0xae0] sm:$0xff] }
 0x385   :  { %v4395_v17 = vld [vmem:[#allocation8 + $0xec0] sm:$0xff]  ;;  %v13644_v53 = vcombine.high %v4267_v43, %v4271_v45  ;;  %v13643_v15 = vcombine.low %v4267_v43, %v4271_v45  ;;  %v15256_v45 = vpack.c.bf16 %v3913_v60, %v3913_v60 }
 0x386   :  { %7092 = vmatpush1.bf16.msra.mxu0 %v13555_v61  ;;  %7133 = vmatpush1.bf16.msra.mxu1 %v13683_v62  ;;  %v4399_v51 = vld [vmem:[#allocation8 + $0xee0] sm:$0xff] }
 0x387   :  { %7093 = vmatprep.subr.bf16.mxu0 %v13676_v63  ;;  %7134 = vmatprep.subr.bf16.mxu1 %v13804_v2  ;;  %v13772_v58 = vcombine.high %v4395_v17, %v4399_v51  ;;  %v4259_v54 = vld [vmem:[#allocation8 + $0xa80] sm:$0xff]  ;;  %v13771_v23 = vcombine.low %v4395_v17, %v4399_v51 }
 0x388   :  { %v4263_v56 = vld [vmem:[#allocation8 + $0xaa0] sm:$0xff] }
 0x389   :  { %v4387_v24 = vld [vmem:[#allocation8 + $0xe80] sm:$0xff]  ;;  %v13636_v16 = vcombine.high %v4259_v54, %v4263_v56  ;;  %v13635_v62 = vcombine.low %v4259_v54, %v4263_v56 }
 0x38a   :  { %7094 = vmatpush2.bf16.msra.mxu0 %v13675_v14  ;;  %7135 = vmatpush2.bf16.msra.mxu1 %v13803_v33  ;;  %v4391_v36 = vld [vmem:[#allocation8 + $0xea0] sm:$0xff] }
 0x38b   :  { %7095 = vmatprep.subr.bf16.mxu0 %v13668_v18  ;;  %7136 = vmatprep.subr.bf16.mxu1 %v13796_v48  ;;  %v13764_v49 = vcombine.high %v4387_v24, %v4391_v36  ;;  %v4251_v27 = vld [vmem:[#allocation8 + $0xa40] sm:$0xff]  ;;  %v13763_v63 = vcombine.low %v4387_v24, %v4391_v36  ;;  %v3956_v36 = vld [vmem:[#allocation8 + $0x108] sm:$0xff] }
 0x38c   :  { %v4255_v55 = vld [vmem:[#allocation8 + $0xa60] sm:$0xff] }
 0x38d   :  { %v4379_v35 = vld [vmem:[#allocation8 + $0xe40] sm:$0xff]  ;;  %v13628_v2 = vcombine.high %v4251_v27, %v4255_v55  ;;  %v13627_v33 = vcombine.low %v4251_v27, %v4255_v55 }
 0x38e   :  { %7096 = vmatpush2.bf16.msra.mxu0 %v13667_v10  ;;  %7137 = vmatpush2.bf16.msra.mxu1 %v13795_v25  ;;  %v4383_v61 = vld [vmem:[#allocation8 + $0xe60] sm:$0xff]  ;;  %v4112_v10 = vld [vmem:[#allocation8 + $0x5e8] sm:$0xff] }
 0x38f   :  { %7097 = vmatprep.subr.bf16.mxu0 %v13660_v44  ;;  %7138 = vmatprep.subr.bf16.mxu1 %v13788_v11  ;;  %v13756_v0 = vcombine.high %v4379_v35, %v4383_v61  ;;  %v4243_v1 = vld [vmem:[#allocation8 + $0xa00] sm:$0xff]  ;;  %v13755_v18 = vcombine.low %v4379_v35, %v4383_v61  ;;  %v3911_v11 = vmax.f32 %v15224_v46, 0.0  ;;  %v13486_v19 = vcombine.high %v4108_v9, %v4112_v10  ;;  %v3948_v61 = vld [vmem:[#allocation8 + $0xc8] sm:$0xff] }
 0x390   :  { %v4247_v3 = vld [vmem:[#allocation8 + $0xa20] sm:$0xff]  ;;  %v13485_v17 = vcombine.low %v4108_v9, %v4112_v10  ;;  %v3932_v10 = vld [vmem:[#allocation8 + $0x48] sm:$0xff] }
 0x391   :  { %v4371_v13 = vld [vmem:[#allocation8 + $0xe00] sm:$0xff]  ;;  %v13620_v48 = vcombine.high %v4243_v1, %v4247_v3  ;;  %v13619_v25 = vcombine.low %v4243_v1, %v4247_v3  ;;  %v15254_v43 = vpack.c.bf16 %v3911_v11, %v3911_v11  ;;  %v4064_v11 = vld [vmem:[#allocation8 + $0x468] sm:$0xff] }
 0x392   :  { %7098 = vmatpush2.bf16.msra.mxu0 %v13659_v42  ;;  %7139 = vmatpush2.bf16.msra.mxu1 %v13787_v12  ;;  %v4375_v14 = vld [vmem:[#allocation8 + $0xe20] sm:$0xff]  ;;  %v3976_v42 = vld [vmem:[#allocation8 + $0x1a8] sm:$0xff] }
 0x393   :  { %7099 = vmatprep.subr.bf16.mxu0 %v13652_v41  ;;  %7140 = vmatprep.subr.bf16.mxu1 %v13780_v50  ;;  %v13748_v22 = vcombine.high %v4371_v13, %v4375_v14  ;;  %v13747_v44 = vcombine.low %v4371_v13, %v4375_v14  ;;  %v4100_v12 = vld [vmem:[#allocation8 + $0x588] sm:$0xff]  ;;  %v13357_v50 = vcombine.low %v3980_v6, %v3984_v8 }
 0x394   :  { %v4104_v41 = vld [vmem:[#allocation8 + $0x5a8] sm:$0xff]  ;;  %v13350_v51 = vcombine.high %v3972_v21, %v3976_v42 }
 0x395   :  { %v13478_v46 = vcombine.high %v4100_v12, %v4104_v41  ;;  %v13477_v54 = vcombine.low %v4100_v12, %v4104_v41  ;;  %v3940_v14 = vld [vmem:[#allocation8 + $0x88] sm:$0xff] }
 0x396   :  { %7100 = vmatpush2.bf16.msra.mxu0 %v13651_v52  ;;  %7141 = vmatpush2.bf16.msra.mxu1 %v13779_v29  ;;  %v3964_v52 = vld [vmem:[#allocation8 + $0x148] sm:$0xff] }
 0x397   :  { %7101 = vmatprep.subr.bf16.mxu0 %v13644_v53  ;;  %7142 = vmatprep.subr.bf16.mxu1 %v13772_v58  ;;  %v4092_v29 = vld [vmem:[#allocation8 + $0x548] sm:$0xff]  ;;  %v13349_v58 = vcombine.low %v3972_v21, %v3976_v42  ;;  %v13342_v56 = vcombine.high %v3964_v52, %v3968_v47 }
 0x398   :  { %v4096_v53 = vld [vmem:[#allocation8 + $0x568] sm:$0xff] }
 0x399   :  { %v13470_v24 = vcombine.high %v4092_v29, %v4096_v53  ;;  %v13469_v27 = vcombine.low %v4092_v29, %v4096_v53  ;;  %v3924_v42 = vld [vmem:[#allocation8 + $0x8] sm:$0xff] }
 0x39a   :  { %7102 = vmatpush2.bf16.msra.mxu0 %v13643_v15  ;;  %7143 = vmatpush2.bf16.msra.mxu1 %v13771_v23  ;;  %v3960_v15 = vld [vmem:[#allocation8 + $0x128] sm:$0xff] }
 0x39b   :  { %7103 = vmatprep.subr.bf16.mxu0 %v13636_v16  ;;  %7144 = vmatprep.subr.bf16.mxu1 %v13764_v49  ;;  %v4084_v23 = vld [vmem:[#allocation8 + $0x508] sm:$0xff]  ;;  %v13341_v49 = vcombine.low %v3964_v52, %v3968_v47  ;;  %v13334_v55 = vcombine.high %v3956_v36, %v3960_v15 }
 0x39c   :  { %v4088_v16 = vld [vmem:[#allocation8 + $0x528] sm:$0xff] }
 0x39d   :  { %v13462_v35 = vcombine.high %v4084_v23, %v4088_v16  ;;  %v13461_v1 = vcombine.low %v4084_v23, %v4088_v16  ;;  %v3928_v12 = vld [vmem:[#allocation8 + $0x28] sm:$0xff] }
 0x39e   :  { %7104 = vmatpush2.bf16.msra.mxu0 %v13635_v62  ;;  %7145 = vmatpush2.bf16.msra.mxu1 %v13763_v63  ;;  %v3952_v62 = vld [vmem:[#allocation8 + $0xe8] sm:$0xff] }
 0x39f   :  { %7105 = vmatprep.subr.bf16.mxu0 %v13628_v2  ;;  %7146 = vmatprep.subr.bf16.mxu1 %v13756_v0  ;;  %v4076_v63 = vld [vmem:[#allocation8 + $0x4c8] sm:$0xff]  ;;  %v13333_v0 = vcombine.low %v3956_v36, %v3960_v15  ;;  %v13326_v3 = vcombine.high %v3948_v61, %v3952_v62 }
 0x3a0   :  { %v4080_v2 = vld [vmem:[#allocation8 + $0x4e8] sm:$0xff] }
 0x3a1   :  { %v13454_v13 = vcombine.high %v4076_v63, %v4080_v2  ;;  %v13453_v6 = vcombine.low %v4076_v63, %v4080_v2  ;;  %v4052_v41 = vld [vmem:[#allocation8 + $0x408] sm:$0xff] }
 0x3a2   :  { %7106 = vmatpush2.bf16.msra.mxu0 %v13627_v33  ;;  %7147 = vmatpush2.bf16.msra.mxu1 %v13755_v18  ;;  %v3944_v33 = vld [vmem:[#allocation8 + $0xa8] sm:$0xff] }
 0x3a3   :  { %7107 = vmatprep.subr.bf16.mxu0 %v13620_v48  ;;  %7148 = vmatprep.subr.bf16.mxu1 %v13748_v22  ;;  %v4068_v18 = vld [vmem:[#allocation8 + $0x488] sm:$0xff]  ;;  %v13325_v22 = vcombine.low %v3948_v61, %v3952_v62  ;;  %v13318_v8 = vcombine.high %v3940_v14, %v3944_v33  ;;  %v13317_v60 = vcombine.low %v3940_v14, %v3944_v33 }
 0x3a4   :  { %v4072_v48 = vld [vmem:[#allocation8 + $0x4a8] sm:$0xff] }
 0x3a5   :  { %v13446_v9 = vcombine.high %v4068_v18, %v4072_v48  ;;  %v4044_v47 = vld [vmem:[#allocation8 + $0x3c8] sm:$0xff] }
 0x3a6   :  { %7108 = vmatpush2.bf16.msra.mxu0 %v13619_v25  ;;  %7149 = vmatpush2.bf16.msra.mxu1 %v13747_v44  ;;  %v3936_v25 = vld [vmem:[#allocation8 + $0x68] sm:$0xff] }
 0x3a7   :  { %7159 = vmatprep.subr.bf16.mxu0 %v13358_v4  ;;  %7200 = vmatprep.subr.bf16.mxu1 %v13486_v19  ;;  %v4060_v44 = vld [vmem:[#allocation8 + $0x448] sm:$0xff]  ;;  %v13445_v4 = vcombine.low %v4068_v18, %v4072_v48  ;;  %v13310_v19 = vcombine.high %v3932_v10, %v3936_v25 }
 0x3a8   :  { %v13438_v21 = vcombine.high %v4060_v44, %v4064_v11  ;;  %v4048_v29 = vld [vmem:[#allocation8 + $0x3e8] sm:$0xff] }
 0x3a9   :  { %7110 = vmatmul.mubr.bf16.vlgmr.msra.gmra.mxu0 %v15254_v43  ;;  %7151 = vmatmul.mubr.bf16.vlgmr.msra.gmra.mxu1 %v15256_v45  ;;  %v4172_v53 = vld [vmem:[#allocation8 + $0x7c8] sm:$0xff] }
 0x3aa   :  { %7160 = vmatpush1.bf16.msra.mxu0 %v13357_v50  ;;  %7191 = vmatprep.mubr.bf16.mxu0 %v15228_v30  ;;  %v4056_v50 = vld [vmem:[#allocation8 + $0x428] sm:$0xff] }
 0x3ab   :  { %7201 = vmatpush1.bf16.msra.mxu1 %v13485_v17  ;;  %7232 = vmatprep.mubr.bf16.mxu1 %v15230_v38  ;;  %v13309_v17 = vcombine.low %v3932_v10, %v3936_v25  ;;  %v13430_v52 = vcombine.high %v4052_v41, %v4056_v50  ;;  %v4036_v15 = vld [vmem:[#allocation8 + $0x388] sm:$0xff] }
 0x3ac   :  { %7161 = vmatprep.subr.bf16.mxu0 %v13350_v51  ;;  %7202 = vmatprep.subr.bf16.mxu1 %v13478_v46  ;;  %v13437_v51 = vcombine.low %v4060_v44, %v4064_v11  ;;  %v13302_v46 = vcombine.high %v3924_v42, %v3928_v12  ;;  %v4040_v23 = vld [vmem:[#allocation8 + $0x3a8] sm:$0xff] }
 0x3ad   :  { %v4164_v16 = vld [vmem:[#allocation8 + $0x788] sm:$0xff] }
 0x3ae   :  { %7162 = vmatpush1.bf16.msra.mxu0 %v13349_v58  ;;  %v4176_v58 = vld [vmem:[#allocation8 + $0x7e8] sm:$0xff] }
 0x3af   :  { %7203 = vmatpush1.bf16.msra.mxu1 %v13477_v54  ;;  %7163 = vmatprep.subr.bf16.mxu0 %v13342_v56  ;;  %v13301_v54 = vcombine.low %v3924_v42, %v3928_v12  ;;  %v13429_v56 = vcombine.low %v4052_v41, %v4056_v50  ;;  %v13550_v36 = vcombine.high %v4172_v53, %v4176_v58  ;;  %v4028_v62 = vld [vmem:[#allocation8 + $0x348] sm:$0xff] }
 0x3b0   :  { %7204 = vmatprep.subr.bf16.mxu1 %v13470_v24  ;;  %v13422_v24 = vcombine.high %v4044_v47, %v4048_v29  ;;  %v4032_v63 = vld [vmem:[#allocation8 + $0x368] sm:$0xff] }
 0x3b1   :  { %v4156_v2 = vld [vmem:[#allocation8 + $0x748] sm:$0xff] }
 0x3b2   :  { %7164 = vmatpush1.bf16.msra.mxu0 %v13341_v49  ;;  %v4168_v49 = vld [vmem:[#allocation8 + $0x7a8] sm:$0xff] }
 0x3b3   :  { %7205 = vmatpush1.bf16.msra.mxu1 %v13469_v27  ;;  %7165 = vmatprep.subr.bf16.mxu0 %v13334_v55  ;;  %v13421_v27 = vcombine.low %v4044_v47, %v4048_v29  ;;  %v13549_v55 = vcombine.low %v4172_v53, %v4176_v58  ;;  %v13542_v61 = vcombine.high %v4164_v16, %v4168_v49  ;;  %v4020_v33 = vld [vmem:[#allocation8 + $0x308] sm:$0xff] }
 0x3b4   :  { %7206 = vmatprep.subr.bf16.mxu1 %v13462_v35  ;;  %v13414_v35 = vcombine.high %v4036_v15, %v4040_v23  ;;  %v4024_v18 = vld [vmem:[#allocation8 + $0x328] sm:$0xff] }
 0x3b5   :  { %v4148_v48 = vld [vmem:[#allocation8 + $0x708] sm:$0xff] }
 0x3b6   :  { %7166 = vmatpush1.bf16.msra.mxu0 %v13333_v0  ;;  %v4160_v0 = vld [vmem:[#allocation8 + $0x768] sm:$0xff] }
 0x3b7   :  { %7207 = vmatpush1.bf16.msra.mxu1 %v13461_v1  ;;  %7167 = vmatprep.subr.bf16.mxu0 %v13326_v3  ;;  %v13413_v1 = vcombine.low %v4036_v15, %v4040_v23  ;;  %v13541_v3 = vcombine.low %v4164_v16, %v4168_v49  ;;  %v13534_v14 = vcombine.high %v4156_v2, %v4160_v0  ;;  %v4012_v25 = vld [vmem:[#allocation8 + $0x2c8] sm:$0xff] }
 0x3b8   :  { %7208 = vmatprep.subr.bf16.mxu1 %v13454_v13  ;;  %v13406_v13 = vcombine.high %v4028_v62, %v4032_v63  ;;  %v4016_v44 = vld [vmem:[#allocation8 + $0x2e8] sm:$0xff] }
 0x3b9   :  { %v4140_v11 = vld [vmem:[#allocation8 + $0x6c8] sm:$0xff] }
 0x3ba   :  { %7168 = vmatpush1.bf16.msra.mxu0 %v13325_v22  ;;  %v4152_v22 = vld [vmem:[#allocation8 + $0x728] sm:$0xff] }
 0x3bb   :  { %7209 = vmatpush1.bf16.msra.mxu1 %v13453_v6  ;;  %7169 = vmatprep.subr.bf16.mxu0 %v13318_v8  ;;  %v13405_v6 = vcombine.low %v4028_v62, %v4032_v63  ;;  %v13533_v8 = vcombine.low %v4156_v2, %v4160_v0  ;;  %v13526_v10 = vcombine.high %v4148_v48, %v4152_v22  ;;  %v4004_v12 = vld [vmem:[#allocation8 + $0x288] sm:$0xff] }
 0x3bc   :  { %7210 = vmatprep.subr.bf16.mxu1 %v13446_v9  ;;  %v13398_v9 = vcombine.high %v4020_v33, %v4024_v18  ;;  %v4008_v41 = vld [vmem:[#allocation8 + $0x2a8] sm:$0xff] }
 0x3bd   :  { %v4132_v50 = vld [vmem:[#allocation8 + $0x688] sm:$0xff] }
 0x3be   :  { %7170 = vmatpush1.bf16.msra.mxu0 %v13317_v60  ;;  %v4144_v60 = vld [vmem:[#allocation8 + $0x6e8] sm:$0xff] }
 0x3bf   :  { %7211 = vmatpush1.bf16.msra.mxu1 %v13445_v4  ;;  %7171 = vmatprep.subr.bf16.mxu0 %v13310_v19  ;;  %v13397_v4 = vcombine.low %v4020_v33, %v4024_v18  ;;  %v13525_v19 = vcombine.low %v4148_v48, %v4152_v22  ;;  %v13518_v42 = vcombine.high %v4140_v11, %v4144_v60  ;;  %v3996_v29 = vld [vmem:[#allocation8 + $0x248] sm:$0xff] }
 0x3c0   :  { %7212 = vmatprep.subr.bf16.mxu1 %v13438_v21  ;;  %v13390_v21 = vcombine.high %v4012_v25, %v4016_v44  ;;  %v4000_v53 = vld [vmem:[#allocation8 + $0x268] sm:$0xff] }
 0x3c1   :  { %v4124_v58 = vld [vmem:[#allocation8 + $0x648] sm:$0xff] }
 0x3c2   :  { %7172 = vmatpush1.bf16.msra.mxu0 %v13309_v17  ;;  %v4136_v17 = vld [vmem:[#allocation8 + $0x6a8] sm:$0xff] }
 0x3c3   :  { %7213 = vmatpush1.bf16.msra.mxu1 %v13437_v51  ;;  %7173 = vmatprep.subr.bf16.mxu0 %v13302_v46  ;;  %v13389_v51 = vcombine.low %v4012_v25, %v4016_v44  ;;  %v13517_v46 = vcombine.low %v4140_v11, %v4144_v60  ;;  %v13510_v47 = vcombine.high %v4132_v50, %v4136_v17  ;;  %v3988_v23 = vld [vmem:[#allocation8 + $0x208] sm:$0xff] }
 0x3c4   :  { %7214 = vmatprep.subr.bf16.mxu1 %v13430_v52  ;;  %v13382_v52 = vcombine.high %v4004_v12, %v4008_v41  ;;  %v3992_v16 = vld [vmem:[#allocation8 + $0x228] sm:$0xff] }
 0x3c5   :  { %v4116_v49 = vld [vmem:[#allocation8 + $0x608] sm:$0xff] }
 0x3c6   :  { %7174 = vmatpush1.bf16.msra.mxu0 %v13301_v54  ;;  %v4128_v54 = vld [vmem:[#allocation8 + $0x668] sm:$0xff] }
 0x3c7   :  { %7215 = vmatpush1.bf16.msra.mxu1 %v13429_v56  ;;  %7175 = vmatprep.subr.bf16.mxu0 %v13422_v24  ;;  %v13381_v56 = vcombine.low %v4004_v12, %v4008_v41  ;;  %v13509_v24 = vcombine.low %v4132_v50, %v4136_v17  ;;  %v13502_v15 = vcombine.high %v4124_v58, %v4128_v54  ;;  %v4236_v63 = vld [vmem:[#allocation8 + $0x9c8] sm:$0xff] }
 0x3c8   :  { %7216 = vmatprep.subr.bf16.mxu1 %v13550_v36  ;;  %v13374_v36 = vcombine.high %v3996_v29, %v4000_v53  ;;  %v4240_v2 = vld [vmem:[#allocation8 + $0x9e8] sm:$0xff] }
 0x3c9   :  { %v4364_v0 = vld [vmem:[#allocation8 + $0xdc8] sm:$0xff]  ;;  %v13613_v22 = vcombine.low %v4236_v63, %v4240_v2 }
 0x3ca   :  { %7176 = vmatpush2.bf16.msra.mxu0 %v13421_v27  ;;  %v4120_v27 = vld [vmem:[#allocation8 + $0x628] sm:$0xff] }
 0x3cb   :  { %7217 = vmatpush2.bf16.msra.mxu1 %v13549_v55  ;;  %7177 = vmatprep.subr.bf16.mxu0 %v13414_v35  ;;  %v13373_v55 = vcombine.low %v3996_v29, %v4000_v53  ;;  %v13501_v35 = vcombine.low %v4124_v58, %v4128_v54  ;;  %v13494_v62 = vcombine.high %v4116_v49, %v4120_v27  ;;  %v4228_v18 = vld [vmem:[#allocation8 + $0x988] sm:$0xff] }
 0x3cc   :  { %7218 = vmatprep.subr.bf16.mxu1 %v13542_v61  ;;  %v13366_v61 = vcombine.high %v3988_v23, %v3992_v16  ;;  %v4232_v48 = vld [vmem:[#allocation8 + $0x9a8] sm:$0xff] }
 0x3cd   :  { %v4220_v25 = vld [vmem:[#allocation8 + $0x948] sm:$0xff] }
 0x3ce   :  { %7178 = vmatpush2.bf16.msra.mxu0 %v13413_v1  ;;  %v4368_v1 = vld [vmem:[#allocation8 + $0xde8] sm:$0xff] }
 0x3cf   :  { %7219 = vmatpush2.bf16.msra.mxu1 %v13541_v3  ;;  %7179 = vmatprep.subr.bf16.mxu0 %v13406_v13  ;;  %v13365_v3 = vcombine.low %v3988_v23, %v3992_v16  ;;  %v13493_v13 = vcombine.low %v4116_v49, %v4120_v27  ;;  %v13742_v33 = vcombine.high %v4364_v0, %v4368_v1  ;;  %v4224_v44 = vld [vmem:[#allocation8 + $0x968] sm:$0xff] }
 0x3d0   :  { %7220 = vmatprep.subr.bf16.mxu1 %v13534_v14  ;;  %v13614_v14 = vcombine.high %v4236_v63, %v4240_v2  ;;  %v4348_v60 = vld [vmem:[#allocation8 + $0xd48] sm:$0xff] }
 0x3d1   :  { %v4212_v41 = vld [vmem:[#allocation8 + $0x908] sm:$0xff] }
 0x3d2   :  { %7180 = vmatpush2.bf16.msra.mxu0 %v13405_v6  ;;  %v4356_v6 = vld [vmem:[#allocation8 + $0xd88] sm:$0xff] }
 0x3d3   :  { %7221 = vmatpush2.bf16.msra.mxu1 %v13533_v8  ;;  %7181 = vmatprep.subr.bf16.mxu0 %v13398_v9  ;;  %v4360_v8 = vld [vmem:[#allocation8 + $0xda8] sm:$0xff]  ;;  %v13741_v9 = vcombine.low %v4364_v0, %v4368_v1 }
 0x3d4   :  { %7222 = vmatprep.subr.bf16.mxu1 %v13526_v10  ;;  %v13606_v10 = vcombine.high %v4228_v18, %v4232_v48  ;;  %v13734_v11 = vcombine.high %v4356_v6, %v4360_v8  ;;  %v4216_v50 = vld [vmem:[#allocation8 + $0x928] sm:$0xff] }
 0x3d5   :  { %v4340_v17 = vld [vmem:[#allocation8 + $0xd08] sm:$0xff] }
 0x3d6   :  { %7182 = vmatpush2.bf16.msra.mxu0 %v13397_v4  ;;  %v4352_v4 = vld [vmem:[#allocation8 + $0xd68] sm:$0xff] }
 0x3d7   :  { %7223 = vmatpush2.bf16.msra.mxu1 %v13525_v19  ;;  %7183 = vmatprep.subr.bf16.mxu0 %v13390_v21  ;;  %v13605_v19 = vcombine.low %v4228_v18, %v4232_v48  ;;  %v13733_v21 = vcombine.low %v4356_v6, %v4360_v8  ;;  %v13726_v12 = vcombine.high %v4348_v60, %v4352_v4  ;;  %v4204_v53 = vld [vmem:[#allocation8 + $0x8c8] sm:$0xff] }
 0x3d8   :  { %7224 = vmatprep.subr.bf16.mxu1 %v13518_v42  ;;  %v13598_v42 = vcombine.high %v4220_v25, %v4224_v44  ;;  %v4208_v58 = vld [vmem:[#allocation8 + $0x8e8] sm:$0xff] }
 0x3d9   :  { %v4332_v54 = vld [vmem:[#allocation8 + $0xcc8] sm:$0xff] }
 0x3da   :  { %7184 = vmatpush2.bf16.msra.mxu0 %v13389_v51  ;;  %v4344_v51 = vld [vmem:[#allocation8 + $0xd28] sm:$0xff] }
 0x3db   :  { %7225 = vmatpush2.bf16.msra.mxu1 %v13517_v46  ;;  %7185 = vmatprep.subr.bf16.mxu0 %v13382_v52  ;;  %v13597_v46 = vcombine.low %v4220_v25, %v4224_v44  ;;  %v13725_v52 = vcombine.low %v4348_v60, %v4352_v4  ;;  %v13718_v29 = vcombine.high %v4340_v17, %v4344_v51  ;;  %v4196_v16 = vld [vmem:[#allocation8 + $0x888] sm:$0xff] }
 0x3dc   :  { %7226 = vmatprep.subr.bf16.mxu1 %v13510_v47  ;;  %v13590_v47 = vcombine.high %v4212_v41, %v4216_v50  ;;  %v4200_v49 = vld [vmem:[#allocation8 + $0x8a8] sm:$0xff] }
 0x3dd   :  { %v4324_v27 = vld [vmem:[#allocation8 + $0xc88] sm:$0xff] }
 0x3de   :  { %7186 = vmatpush2.bf16.msra.mxu0 %v13381_v56  ;;  %v4336_v56 = vld [vmem:[#allocation8 + $0xce8] sm:$0xff] }
 0x3df   :  { %7227 = vmatpush2.bf16.msra.mxu1 %v13509_v24  ;;  %7187 = vmatprep.subr.bf16.mxu0 %v13374_v36  ;;  %v13589_v24 = vcombine.low %v4212_v41, %v4216_v50  ;;  %v13717_v36 = vcombine.low %v4340_v17, %v4344_v51  ;;  %v13710_v23 = vcombine.high %v4332_v54, %v4336_v56  ;;  %v4188_v2 = vld [vmem:[#allocation8 + $0x848] sm:$0xff] }
 0x3e0   :  { %7228 = vmatprep.subr.bf16.mxu1 %v13502_v15  ;;  %v13582_v15 = vcombine.high %v4204_v53, %v4208_v58  ;;  %v4192_v0 = vld [vmem:[#allocation8 + $0x868] sm:$0xff] }
 0x3e1   :  { %v4316_v1 = vld [vmem:[#allocation8 + $0xc48] sm:$0xff] }
 0x3e2   :  { %7188 = vmatpush2.bf16.msra.mxu0 %v13373_v55  ;;  %v4328_v55 = vld [vmem:[#allocation8 + $0xca8] sm:$0xff] }
 0x3e3   :  { %7229 = vmatpush2.bf16.msra.mxu1 %v13501_v35  ;;  %7189 = vmatprep.subr.bf16.mxu0 %v13366_v61  ;;  %v13581_v35 = vcombine.low %v4204_v53, %v4208_v58  ;;  %v13709_v61 = vcombine.low %v4332_v54, %v4336_v56  ;;  %v13702_v63 = vcombine.high %v4324_v27, %v4328_v55  ;;  %v4180_v48 = vld [vmem:[#allocation8 + $0x808] sm:$0xff] }
 0x3e4   :  { %7230 = vmatprep.subr.bf16.mxu1 %v13494_v62  ;;  %v13574_v62 = vcombine.high %v4196_v16, %v4200_v49  ;;  %v4308_v6 = vld [vmem:[#allocation8 + $0xc08] sm:$0xff] }
 0x3e5   :  { %v4312_v8 = vld [vmem:[#allocation8 + $0xc28] sm:$0xff] }
 0x3e6   :  { %7190 = vmatpush2.bf16.msra.mxu0 %v13365_v3  ;;  %v4320_v3 = vld [vmem:[#allocation8 + $0xc68] sm:$0xff]  ;;  %v13686_v44 = vcombine.high %v4308_v6, %v4312_v8 }
 0x3e7   :  { %7231 = vmatpush2.bf16.msra.mxu1 %v13493_v13  ;;  %7241 = vmatprep.subr.bf16.mxu0 %v13614_v14  ;;  %v13573_v13 = vcombine.low %v4196_v16, %v4200_v49  ;;  %v13701_v14 = vcombine.low %v4324_v27, %v4328_v55  ;;  %v13694_v18 = vcombine.high %v4316_v1, %v4320_v3  ;;  %v4304_v60 = vld [vmem:[#allocation8 + $0xbe8] sm:$0xff] }
 0x3e8   :  { %7282 = vmatprep.subr.bf16.mxu1 %v13742_v33  ;;  %v13566_v33 = vcombine.high %v4188_v2, %v4192_v0  ;;  %v4428_v4 = vld [vmem:[#allocation8 + $0xfc8] sm:$0xff] }
 0x3e9   :  { %7192 = vmatmul.mubr.bf16.vlgmr.msra.gmra.mxu0 %v15232_v39  ;;  %v4292_v50 = vld [vmem:[#allocation8 + $0xb88] sm:$0xff] }
 0x3ea   :  { %7233 = vmatmul.mubr.bf16.vlgmr.msra.gmra.mxu1 %v15234_v28  ;;  %7242 = vmatpush1.bf16.msra.mxu0 %v13613_v22  ;;  %v4184_v22 = vld [vmem:[#allocation8 + $0x828] sm:$0xff] }
 0x3eb   :  { %7273 = vmatprep.mubr.bf16.mxu0 %v15240_v7  ;;  %7283 = vmatpush1.bf16.msra.mxu1 %v13741_v9  ;;  %v13565_v9 = vcombine.low %v4188_v2, %v4192_v0  ;;  %v13558_v25 = vcombine.high %v4180_v48, %v4184_v22  ;;  %v4296_v17 = vld [vmem:[#allocation8 + $0xba8] sm:$0xff] }
 0x3ec   :  { %7314 = vmatprep.mubr.bf16.mxu1 %v15242_v5  ;;  %7243 = vmatprep.subr.bf16.mxu0 %v13606_v10  ;;  %v13693_v10 = vcombine.low %v4316_v1, %v4320_v3  ;;  %v4420_v51 = vld [vmem:[#allocation8 + $0xf88] sm:$0xff] }
 0x3ed   :  { %7284 = vmatprep.subr.bf16.mxu1 %v13734_v11  ;;  %v4300_v11 = vld [vmem:[#allocation8 + $0xbc8] sm:$0xff] }
 0x3ee   :  { %7244 = vmatpush1.bf16.msra.mxu0 %v13605_v19  ;;  %v4432_v19 = vld [vmem:[#allocation8 + $0xfe8] sm:$0xff] }
 0x3ef   :  { %7285 = vmatpush1.bf16.msra.mxu1 %v13733_v21  ;;  %7245 = vmatprep.subr.bf16.mxu0 %v13598_v42  ;;  %v13557_v21 = vcombine.low %v4180_v48, %v4184_v22  ;;  %v13685_v42 = vcombine.low %v4308_v6, %v4312_v8  ;;  %v13806_v41 = vcombine.high %v4428_v4, %v4432_v19  ;;  %v4284_v58 = vld [vmem:[#allocation8 + $0xb48] sm:$0xff] }
 0x3f0   :  { %7286 = vmatprep.subr.bf16.mxu1 %v13726_v12  ;;  %v13678_v12 = vcombine.high %v4300_v11, %v4304_v60  ;;  %v4288_v54 = vld [vmem:[#allocation8 + $0xb68] sm:$0xff] }
 0x3f1   :  { %v4412_v56 = vld [vmem:[#allocation8 + $0xf48] sm:$0xff] }
 0x3f2   :  { %7246 = vmatpush1.bf16.msra.mxu0 %v13597_v46  ;;  %v4424_v46 = vld [vmem:[#allocation8 + $0xfa8] sm:$0xff] }
 0x3f3   :  { %7287 = vmatpush1.bf16.msra.mxu1 %v13725_v52  ;;  %7247 = vmatprep.subr.bf16.mxu0 %v13590_v47  ;;  %v13677_v52 = vcombine.low %v4300_v11, %v4304_v60  ;;  %v13805_v47 = vcombine.low %v4428_v4, %v4432_v19  ;;  %v13798_v53 = vcombine.high %v4420_v51, %v4424_v46  ;;  %v4276_v49 = vld [vmem:[#allocation8 + $0xb08] sm:$0xff] }
 0x3f4   :  { %7288 = vmatprep.subr.bf16.mxu1 %v13718_v29  ;;  %v13670_v29 = vcombine.high %v4292_v50, %v4296_v17  ;;  %v4280_v27 = vld [vmem:[#allocation8 + $0xb28] sm:$0xff] }
 0x3f5   :  { %v4404_v55 = vld [vmem:[#allocation8 + $0xf08] sm:$0xff] }
 0x3f6   :  { %7248 = vmatpush1.bf16.msra.mxu0 %v13589_v24  ;;  %v4416_v24 = vld [vmem:[#allocation8 + $0xf68] sm:$0xff] }
 0x3f7   :  { %7289 = vmatpush1.bf16.msra.mxu1 %v13717_v36  ;;  %7249 = vmatprep.subr.bf16.mxu0 %v13582_v15  ;;  %v13669_v36 = vcombine.low %v4292_v50, %v4296_v17  ;;  %v13797_v15 = vcombine.low %v4420_v51, %v4424_v46  ;;  %v13790_v16 = vcombine.high %v4412_v56, %v4416_v24  ;;  %v4268_v0 = vld [vmem:[#allocation8 + $0xac8] sm:$0xff] }
 0x3f8   :  { %7290 = vmatprep.subr.bf16.mxu1 %v13710_v23  ;;  %v13662_v23 = vcombine.high %v4284_v58, %v4288_v54  ;;  %v4272_v1 = vld [vmem:[#allocation8 + $0xae8] sm:$0xff] }
 0x3f9   :  { %v4396_v3 = vld [vmem:[#allocation8 + $0xec8] sm:$0xff] }
 0x3fa   :  { %7250 = vmatpush1.bf16.msra.mxu0 %v13581_v35  ;;  %v4408_v35 = vld [vmem:[#allocation8 + $0xf28] sm:$0xff] }
 0x3fb   :  { %7291 = vmatpush1.bf16.msra.mxu1 %v13709_v61  ;;  %7251 = vmatprep.subr.bf16.mxu0 %v13574_v62  ;;  %v13661_v61 = vcombine.low %v4284_v58, %v4288_v54  ;;  %v13789_v62 = vcombine.low %v4412_v56, %v4416_v24  ;;  %v13782_v2 = vcombine.high %v4404_v55, %v4408_v35  ;;  %v4260_v22 = vld [vmem:[#allocation8 + $0xa88] sm:$0xff]  ;;  %v3981_v54 = vld [vmem:[#allocation8 + $0x1d0] sm:$0xff] }
 0x3fc   :  { %7292 = vmatprep.subr.bf16.mxu1 %v13702_v63  ;;  %v13654_v63 = vcombine.high %v4276_v49, %v4280_v27  ;;  %v4264_v6 = vld [vmem:[#allocation8 + $0xaa8] sm:$0xff]  ;;  %v3985_v56 = vld [vmem:[#allocation8 + $0x1f0] sm:$0xff] }
 0x3fd   :  { %v4388_v8 = vld [vmem:[#allocation8 + $0xe88] sm:$0xff]  ;;  %v4109_v24 = vld [vmem:[#allocation8 + $0x5d0] sm:$0xff] }
 0x3fe   :  { %7252 = vmatpush1.bf16.msra.mxu0 %v13573_v13  ;;  %v4400_v13 = vld [vmem:[#allocation8 + $0xee8] sm:$0xff] }
 0x3ff   :  { %7293 = vmatpush1.bf16.msra.mxu1 %v13701_v14  ;;  %7253 = vmatprep.subr.bf16.mxu0 %v13566_v33  ;;  %v13653_v14 = vcombine.low %v4276_v49, %v4280_v27  ;;  %v13781_v33 = vcombine.low %v4404_v55, %v4408_v35  ;;  %v13774_v48 = vcombine.high %v4396_v3, %v4400_v13  ;;  %v4252_v60 = vld [vmem:[#allocation8 + $0xa48] sm:$0xff]  ;;  %v3973_v27 = vld [vmem:[#allocation8 + $0x190] sm:$0xff] }
 0x400   :  { %7294 = vmatprep.subr.bf16.mxu1 %v13694_v18  ;;  %v13646_v18 = vcombine.high %v4268_v0, %v4272_v1  ;;  %v4256_v4 = vld [vmem:[#allocation8 + $0xa68] sm:$0xff]  ;;  %v3977_v55 = vld [vmem:[#allocation8 + $0x1b0] sm:$0xff]  ;;  %v13359_v35 = vcombine.low %v3981_v54, %v3985_v56 }
 0x401   :  { %v4380_v19 = vld [vmem:[#allocation8 + $0xe48] sm:$0xff] }
 0x402   :  { %7254 = vmatpush1.bf16.msra.mxu0 %v13565_v9  ;;  %v4392_v9 = vld [vmem:[#allocation8 + $0xea8] sm:$0xff] }
 0x403   :  { %7295 = vmatpush1.bf16.msra.mxu1 %v13693_v10  ;;  %7255 = vmatprep.subr.bf16.mxu0 %v13558_v25  ;;  %v13645_v10 = vcombine.low %v4268_v0, %v4272_v1  ;;  %v13773_v25 = vcombine.low %v4396_v3, %v4400_v13  ;;  %v13766_v11 = vcombine.high %v4388_v8, %v4392_v9  ;;  %v4244_v17 = vld [vmem:[#allocation8 + $0xa08] sm:$0xff]  ;;  %v3965_v0 = vld [vmem:[#allocation8 + $0x150] sm:$0xff] }
 0x404   :  { %7296 = vmatprep.subr.bf16.mxu1 %v13686_v44  ;;  %v13638_v44 = vcombine.high %v4260_v22, %v4264_v6  ;;  %v4248_v51 = vld [vmem:[#allocation8 + $0xa28] sm:$0xff]  ;;  %v3969_v1 = vld [vmem:[#allocation8 + $0x170] sm:$0xff] }
 0x405   :  { %v4372_v46 = vld [vmem:[#allocation8 + $0xe08] sm:$0xff] }
 0x406   :  { %7256 = vmatpush1.bf16.msra.mxu0 %v13557_v21  ;;  %v4384_v21 = vld [vmem:[#allocation8 + $0xe68] sm:$0xff] }
 0x407   :  { %7297 = vmatpush1.bf16.msra.mxu1 %v13685_v42  ;;  %7257 = vmatprep.subr.bf16.mxu0 %v13678_v12  ;;  %v13637_v42 = vcombine.low %v4260_v22, %v4264_v6  ;;  %v13765_v12 = vcombine.low %v4388_v8, %v4392_v9  ;;  %v13758_v50 = vcombine.high %v4380_v19, %v4384_v21 }
 0x408   :  { %7298 = vmatprep.subr.bf16.mxu1 %v13806_v41  ;;  %v13630_v41 = vcombine.high %v4252_v60, %v4256_v4  ;;  %v13351_v22 = vcombine.low %v3973_v27, %v3977_v55 }
 0x40a   :  { %7258 = vmatpush2.bf16.msra.mxu0 %v13677_v52  ;;  %v4376_v52 = vld [vmem:[#allocation8 + $0xe28] sm:$0xff] }
 0x40b   :  { %7299 = vmatpush2.bf16.msra.mxu1 %v13805_v47  ;;  %7259 = vmatprep.subr.bf16.mxu0 %v13670_v29  ;;  %v13629_v47 = vcombine.low %v4252_v60, %v4256_v4  ;;  %v13757_v29 = vcombine.low %v4380_v19, %v4384_v21  ;;  %v13750_v58 = vcombine.high %v4372_v46, %v4376_v52  ;;  %v3961_v60 = vld [vmem:[#allocation8 + $0x130] sm:$0xff] }
 0x40c   :  { %7300 = vmatprep.subr.bf16.mxu1 %v13798_v53  ;;  %v13622_v53 = vcombine.high %v4244_v17, %v4248_v51  ;;  %v4085_v21 = vld [vmem:[#allocation8 + $0x510] sm:$0xff] }
 0x40e   :  { %7260 = vmatpush2.bf16.msra.mxu0 %v13669_v36  ;;  %v4113_v36 = vld [vmem:[#allocation8 + $0x5f0] sm:$0xff] }
 0x40f   :  { %7301 = vmatpush2.bf16.msra.mxu1 %v13797_v15  ;;  %7261 = vmatprep.subr.bf16.mxu0 %v13662_v23  ;;  %v13621_v15 = vcombine.low %v4244_v17, %v4248_v51  ;;  %v13749_v23 = vcombine.low %v4372_v46, %v4376_v52  ;;  %v13488_v49 = vcombine.high %v4109_v24, %v4113_v36  ;;  %v3949_v52 = vld [vmem:[#allocation8 + $0xd0] sm:$0xff] }
 0x410   :  { %7302 = vmatprep.subr.bf16.mxu1 %v13790_v16  ;;  %v13360_v16 = vcombine.high %v3981_v54, %v3985_v56 }
 0x412   :  { %7262 = vmatpush2.bf16.msra.mxu0 %v13661_v61  ;;  %v4101_v61 = vld [vmem:[#allocation8 + $0x590] sm:$0xff] }
 0x413   :  { %7303 = vmatpush2.bf16.msra.mxu1 %v13789_v62  ;;  %7263 = vmatprep.subr.bf16.mxu0 %v13654_v63  ;;  %v4105_v62 = vld [vmem:[#allocation8 + $0x5b0] sm:$0xff]  ;;  %v13487_v63 = vcombine.low %v4109_v24, %v4113_v36 }
 0x414   :  { %7304 = vmatprep.subr.bf16.mxu1 %v13782_v2  ;;  %v13352_v2 = vcombine.high %v3973_v27, %v3977_v55  ;;  %v13479_v9 = vcombine.low %v4101_v61, %v4105_v62  ;;  %v3941_v36 = vld [vmem:[#allocation8 + $0x90] sm:$0xff] }
 0x416   :  { %7264 = vmatpush2.bf16.msra.mxu0 %v13653_v14  ;;  %v13480_v14 = vcombine.high %v4101_v61, %v4105_v62  ;;  %v3933_v61 = vld [vmem:[#allocation8 + $0x50] sm:$0xff] }
 0x417   :  { %7305 = vmatpush2.bf16.msra.mxu1 %v13781_v33  ;;  %7265 = vmatprep.subr.bf16.mxu0 %v13646_v18  ;;  %v4093_v33 = vld [vmem:[#allocation8 + $0x550] sm:$0xff] }
 0x418   :  { %7306 = vmatprep.subr.bf16.mxu1 %v13774_v48  ;;  %v4097_v18 = vld [vmem:[#allocation8 + $0x570] sm:$0xff] }
 0x419   :  { %v13471_v17 = vcombine.low %v4093_v33, %v4097_v18  ;;  %v3937_v62 = vld [vmem:[#allocation8 + $0x70] sm:$0xff] }
 0x41a   :  { %7266 = vmatpush2.bf16.msra.mxu0 %v13645_v10  ;;  %v13344_v10 = vcombine.high %v3965_v0, %v3969_v1 }
 0x41b   :  { %7307 = vmatpush2.bf16.msra.mxu1 %v13773_v25  ;;  %7267 = vmatprep.subr.bf16.mxu0 %v13638_v44  ;;  %v13472_v44 = vcombine.high %v4093_v33, %v4097_v18  ;;  %v3929_v33 = vld [vmem:[#allocation8 + $0x30] sm:$0xff] }
 0x41c   :  { %7308 = vmatprep.subr.bf16.mxu1 %v13766_v11  ;;  %v3957_v11 = vld [vmem:[#allocation8 + $0x110] sm:$0xff] }
 0x41d   :  { %v13336_v51 = vcombine.high %v3957_v11, %v3961_v60  ;;  %v4053_v18 = vld [vmem:[#allocation8 + $0x410] sm:$0xff] }
 0x41e   :  { %7268 = vmatpush2.bf16.msra.mxu0 %v13637_v42  ;;  %v4089_v42 = vld [vmem:[#allocation8 + $0x530] sm:$0xff] }
 0x41f   :  { %7309 = vmatpush2.bf16.msra.mxu1 %v13765_v12  ;;  %7269 = vmatprep.subr.bf16.mxu0 %v13630_v41  ;;  %v13343_v12 = vcombine.low %v3965_v0, %v3969_v1  ;;  %v13464_v46 = vcombine.high %v4085_v21, %v4089_v42  ;;  %v13463_v54 = vcombine.low %v4085_v21, %v4089_v42 }
 0x420   :  { %7310 = vmatprep.subr.bf16.mxu1 %v13758_v50 }
 0x422   :  { %7270 = vmatpush2.bf16.msra.mxu0 %v13629_v47  ;;  %v3953_v47 = vld [vmem:[#allocation8 + $0xf0] sm:$0xff] }
 0x423   :  { %7311 = vmatpush2.bf16.msra.mxu1 %v13757_v29  ;;  %7271 = vmatprep.subr.bf16.mxu0 %v13622_v53  ;;  %v4077_v29 = vld [vmem:[#allocation8 + $0x4d0] sm:$0xff]  ;;  %v13328_v56 = vcombine.high %v3949_v52, %v3953_v47 }
 0x424   :  { %7312 = vmatprep.subr.bf16.mxu1 %v13750_v58  ;;  %v4081_v53 = vld [vmem:[#allocation8 + $0x4f0] sm:$0xff]  ;;  %v13335_v58 = vcombine.low %v3957_v11, %v3961_v60 }
 0x425   :  { %v13456_v24 = vcombine.high %v4077_v29, %v4081_v53  ;;  %v13455_v27 = vcombine.low %v4077_v29, %v4081_v53  ;;  %v4049_v11 = vld [vmem:[#allocation8 + $0x3f0] sm:$0xff] }
 0x426   :  { %7272 = vmatpush2.bf16.msra.mxu0 %v13621_v15  ;;  %v3945_v15 = vld [vmem:[#allocation8 + $0xb0] sm:$0xff] }
 0x427   :  { %7313 = vmatpush2.bf16.msra.mxu1 %v13749_v23  ;;  %7323 = vmatprep.subr.bf16.mxu0 %v13360_v16  ;;  %v4069_v23 = vld [vmem:[#allocation8 + $0x490] sm:$0xff]  ;;  %v13320_v55 = vcombine.high %v3941_v36, %v3945_v15  ;;  %v13319_v0 = vcombine.low %v3941_v36, %v3945_v15 }
 0x428   :  { %7364 = vmatprep.subr.bf16.mxu1 %v13488_v49  ;;  %v4073_v16 = vld [vmem:[#allocation8 + $0x4b0] sm:$0xff]  ;;  %v13327_v49 = vcombine.low %v3949_v52, %v3953_v47 }
 0x429   :  { %7274 = vmatmul.mubr.bf16.vlgmr.msra.gmra.mxu0 %v15254_v43  ;;  %v7029_v3 = vpop.f32.mrf.mxu0  ;;  %v7070_v13 = vpop.f32.mrf.mxu1  ;;  %v13447_v1 = vcombine.low %v4069_v23, %v4073_v16  ;;  %v4173_v60 = vld [vmem:[#allocation8 + $0x7d0] sm:$0xff] }
 0x42a   :  { %7315 = vmatmul.mubr.bf16.vlgmr.msra.gmra.mxu1 %v15256_v45  ;;  %v15268_v48 = vadd.f32 %v7070_v13, %v7029_v3  ;;  %7324 = vmatpush1.bf16.msra.mxu0 %v13359_v35  ;;  %v13448_v35 = vcombine.high %v4069_v23, %v4073_v16  ;;  %v13312_v3 = vcombine.high %v3933_v61, %v3937_v62  ;;  %v4029_v53 = vld [vmem:[#allocation8 + $0x350] sm:$0xff] }
 0x42b   :  { %7355 = vmatprep.mubr.bf16.mxu0 %v15228_v30  ;;  %7365 = vmatpush1.bf16.msra.mxu1 %v13487_v63  ;;  %v7031_v6 = vpop.f32.mrf.mxu0  ;;  %v7072_v8 = vpop.f32.mrf.mxu1  ;;  %v4061_v63 = vld [vmem:[#allocation8 + $0x450] sm:$0xff] }
 0x42c   :  { %7396 = vmatprep.mubr.bf16.mxu1 %v15230_v38  ;;  %v15272_v25 = vadd.f32 %v7072_v8, %v7031_v6  ;;  %7325 = vmatprep.subr.bf16.mxu0 %v13352_v2  ;;  %v4065_v2 = vld [vmem:[#allocation8 + $0x470] sm:$0xff]  ;;  %v13311_v6 = vcombine.low %v3933_v61, %v3937_v62 }
 0x42d   :  { %7366 = vmatprep.subr.bf16.mxu1 %v13480_v14  ;;  %v7033_v4 = vpop.f32.mrf.mxu0  ;;  %v7074_v19 = vpop.f32.mrf.mxu1  ;;  %v13440_v13 = vcombine.high %v4061_v63, %v4065_v2  ;;  %v3925_v14 = vld [vmem:[#allocation8 + $0x10] sm:$0xff]  ;;  %v13439_v8 = vcombine.low %v4061_v63, %v4065_v2 }
 0x42e   :  { %7326 = vmatpush1.bf16.msra.mxu0 %v13351_v22  ;;  %v4057_v22 = vld [vmem:[#allocation8 + $0x430] sm:$0xff]  ;;  %v13303_v19 = vcombine.low %v3925_v14, %v3929_v33 }
 0x42f   :  { %7367 = vmatpush1.bf16.msra.mxu1 %v13479_v9  ;;  %v7034_v41 = vpop.f32.mrf.mxu0  ;;  %v7075_v50 = vpop.f32.mrf.mxu1  ;;  %7327 = vmatprep.subr.bf16.mxu0 %v13344_v10  ;;  %v13304_v9 = vcombine.high %v3925_v14, %v3929_v33  ;;  %v13432_v10 = vcombine.high %v4053_v18, %v4057_v22  ;;  %v4177_v4 = vld [vmem:[#allocation8 + $0x7f0] sm:$0xff]  ;;  %v13431_v21 = vcombine.low %v4053_v18, %v4057_v22 }
 0x430   :  { %7368 = vmatprep.subr.bf16.mxu1 %v13472_v44  ;;  %v4045_v44 = vld [vmem:[#allocation8 + $0x3d0] sm:$0xff]  ;;  %v13551_v52 = vcombine.low %v4173_v60, %v4177_v4 }
 0x431   :  { %v13424_v42 = vcombine.high %v4045_v44, %v4049_v11  ;;  %v4037_v41 = vld [vmem:[#allocation8 + $0x390] sm:$0xff] }
 0x432   :  { %7328 = vmatpush1.bf16.msra.mxu0 %v13343_v12  ;;  %v13552_v12 = vcombine.high %v4173_v60, %v4177_v4  ;;  %v4041_v50 = vld [vmem:[#allocation8 + $0x3b0] sm:$0xff] }
 0x433   :  { %7369 = vmatpush1.bf16.msra.mxu1 %v13471_v17  ;;  %7329 = vmatprep.subr.bf16.mxu0 %v13336_v51  ;;  %v4165_v17 = vld [vmem:[#allocation8 + $0x790] sm:$0xff]  ;;  %v13416_v47 = vcombine.high %v4037_v41, %v4041_v50 }
 0x434   :  { %7370 = vmatprep.subr.bf16.mxu1 %v13464_v46  ;;  %v4169_v51 = vld [vmem:[#allocation8 + $0x7b0] sm:$0xff]  ;;  %v13423_v46 = vcombine.low %v4045_v44, %v4049_v11 }
 0x435   :  { %v13544_v29 = vcombine.high %v4165_v17, %v4169_v51  ;;  %v13543_v36 = vcombine.low %v4165_v17, %v4169_v51  ;;  %v4021_v16 = vld [vmem:[#allocation8 + $0x310] sm:$0xff] }
 0x436   :  { %7330 = vmatpush1.bf16.msra.mxu0 %v13335_v58  ;;  %v4033_v58 = vld [vmem:[#allocation8 + $0x370] sm:$0xff] }
 0x437   :  { %7371 = vmatpush1.bf16.msra.mxu1 %v13463_v54  ;;  %7331 = vmatprep.subr.bf16.mxu0 %v13328_v56  ;;  %v4157_v54 = vld [vmem:[#allocation8 + $0x750] sm:$0xff]  ;;  %v13408_v15 = vcombine.high %v4029_v53, %v4033_v58 }
 0x438   :  { %7372 = vmatprep.subr.bf16.mxu1 %v13456_v24  ;;  %v4161_v56 = vld [vmem:[#allocation8 + $0x770] sm:$0xff]  ;;  %v13415_v24 = vcombine.low %v4037_v41, %v4041_v50 }
 0x439   :  { %v13536_v23 = vcombine.high %v4157_v54, %v4161_v56  ;;  %v13535_v61 = vcombine.low %v4157_v54, %v4161_v56  ;;  %v4013_v2 = vld [vmem:[#allocation8 + $0x2d0] sm:$0xff] }
 0x43a   :  { %7332 = vmatpush1.bf16.msra.mxu0 %v13327_v49  ;;  %v4025_v49 = vld [vmem:[#allocation8 + $0x330] sm:$0xff] }
 0x43b   :  { %7373 = vmatpush1.bf16.msra.mxu1 %v13455_v27  ;;  %7333 = vmatprep.subr.bf16.mxu0 %v13320_v55  ;;  %v4149_v27 = vld [vmem:[#allocation8 + $0x710] sm:$0xff]  ;;  %v13400_v62 = vcombine.high %v4021_v16, %v4025_v49 }
 0x43c   :  { %7374 = vmatprep.subr.bf16.mxu1 %v13448_v35  ;;  %v4153_v55 = vld [vmem:[#allocation8 + $0x730] sm:$0xff]  ;;  %v13407_v35 = vcombine.low %v4029_v53, %v4033_v58 }
 0x43d   :  { %v13528_v63 = vcombine.high %v4149_v27, %v4153_v55  ;;  %v13527_v14 = vcombine.low %v4149_v27, %v4153_v55  ;;  %v4005_v22 = vld [vmem:[#allocation8 + $0x290] sm:$0xff] }
 0x43e   :  { %7334 = vmatpush1.bf16.msra.mxu0 %v13319_v0  ;;  %v4017_v0 = vld [vmem:[#allocation8 + $0x2f0] sm:$0xff] }
 0x43f   :  { %7375 = vmatpush1.bf16.msra.mxu1 %v13447_v1  ;;  %7335 = vmatprep.subr.bf16.mxu0 %v13312_v3  ;;  %v4141_v1 = vld [vmem:[#allocation8 + $0x6d0] sm:$0xff]  ;;  %v13392_v33 = vcombine.high %v4013_v2, %v4017_v0 }
 0x440   :  { %7376 = vmatprep.subr.bf16.mxu1 %v13440_v13  ;;  %v4145_v3 = vld [vmem:[#allocation8 + $0x6f0] sm:$0xff]  ;;  %v13399_v13 = vcombine.low %v4021_v16, %v4025_v49 }
 0x441   :  { %v13520_v18 = vcombine.high %v4141_v1, %v4145_v3  ;;  %v13519_v44 = vcombine.low %v4141_v1, %v4145_v3  ;;  %v3997_v4 = vld [vmem:[#allocation8 + $0x250] sm:$0xff] }
 0x442   :  { %7336 = vmatpush1.bf16.msra.mxu0 %v13311_v6  ;;  %v4009_v6 = vld [vmem:[#allocation8 + $0x2b0] sm:$0xff] }
 0x443   :  { %7377 = vmatpush1.bf16.msra.mxu1 %v13439_v8  ;;  %7337 = vmatprep.subr.bf16.mxu0 %v13304_v9  ;;  %v4133_v8 = vld [vmem:[#allocation8 + $0x690] sm:$0xff]  ;;  %v13384_v11 = vcombine.high %v4005_v22, %v4009_v6 }
 0x444   :  { %7378 = vmatprep.subr.bf16.mxu1 %v13432_v10  ;;  %v4137_v9 = vld [vmem:[#allocation8 + $0x6b0] sm:$0xff]  ;;  %v13391_v10 = vcombine.low %v4013_v2, %v4017_v0 }
 0x445   :  { %v13512_v60 = vcombine.high %v4133_v8, %v4137_v9  ;;  %v13511_v41 = vcombine.low %v4133_v8, %v4137_v9  ;;  %v3989_v51 = vld [vmem:[#allocation8 + $0x210] sm:$0xff] }
 0x446   :  { %7338 = vmatpush1.bf16.msra.mxu0 %v13303_v19  ;;  %v4001_v19 = vld [vmem:[#allocation8 + $0x270] sm:$0xff] }
 0x447   :  { %7379 = vmatpush1.bf16.msra.mxu1 %v13431_v21  ;;  %7339 = vmatprep.subr.bf16.mxu0 %v13424_v42  ;;  %v4125_v21 = vld [vmem:[#allocation8 + $0x650] sm:$0xff]  ;;  %v13376_v50 = vcombine.high %v3997_v4, %v4001_v19 }
 0x448   :  { %7380 = vmatprep.subr.bf16.mxu1 %v13552_v12  ;;  %v4129_v42 = vld [vmem:[#allocation8 + $0x670] sm:$0xff]  ;;  %v13383_v12 = vcombine.low %v4005_v22, %v4009_v6 }
 0x449   :  { %v13504_v17 = vcombine.high %v4125_v21, %v4129_v42  ;;  %v13503_v53 = vcombine.low %v4125_v21, %v4129_v42  ;;  %v4237_v56 = vld [vmem:[#allocation8 + $0x9d0] sm:$0xff] }
 0x44a   :  { %7340 = vmatpush2.bf16.msra.mxu0 %v13423_v46  ;;  %v3993_v46 = vld [vmem:[#allocation8 + $0x230] sm:$0xff] }
 0x44b   :  { %7381 = vmatpush2.bf16.msra.mxu1 %v13551_v52  ;;  %7341 = vmatprep.subr.bf16.mxu0 %v13416_v47  ;;  %v4117_v52 = vld [vmem:[#allocation8 + $0x610] sm:$0xff]  ;;  %v13368_v58 = vcombine.high %v3989_v51, %v3993_v46 }
 0x44c   :  { %7382 = vmatprep.subr.bf16.mxu1 %v13544_v29  ;;  %v4121_v47 = vld [vmem:[#allocation8 + $0x630] sm:$0xff]  ;;  %v13375_v29 = vcombine.low %v3997_v4, %v4001_v19 }
 0x44d   :  { %v13496_v54 = vcombine.high %v4117_v52, %v4121_v47  ;;  %v13495_v16 = vcombine.low %v4117_v52, %v4121_v47  ;;  %v4229_v55 = vld [vmem:[#allocation8 + $0x990] sm:$0xff] }
 0x44e   :  { %7342 = vmatpush2.bf16.msra.mxu0 %v13415_v24  ;;  %v4241_v24 = vld [vmem:[#allocation8 + $0x9f0] sm:$0xff] }
 0x44f   :  { %7383 = vmatpush2.bf16.msra.mxu1 %v13543_v36  ;;  %7343 = vmatprep.subr.bf16.mxu0 %v13408_v15  ;;  %v4365_v36 = vld [vmem:[#allocation8 + $0xdd0] sm:$0xff]  ;;  %v13616_v49 = vcombine.high %v4237_v56, %v4241_v24 }
 0x450   :  { %7384 = vmatprep.subr.bf16.mxu1 %v13536_v23  ;;  %v4369_v15 = vld [vmem:[#allocation8 + $0xdf0] sm:$0xff]  ;;  %v13367_v23 = vcombine.low %v3989_v51, %v3993_v46 }
 0x451   :  { %v13744_v27 = vcombine.high %v4365_v36, %v4369_v15  ;;  %v13743_v2 = vcombine.low %v4365_v36, %v4369_v15  ;;  %v4221_v1 = vld [vmem:[#allocation8 + $0x950] sm:$0xff] }
 0x452   :  { %7344 = vmatpush2.bf16.msra.mxu0 %v13407_v35  ;;  %v4233_v35 = vld [vmem:[#allocation8 + $0x9b0] sm:$0xff] }
 0x453   :  { %7385 = vmatpush2.bf16.msra.mxu1 %v13535_v61  ;;  %7345 = vmatprep.subr.bf16.mxu0 %v13400_v62  ;;  %v13615_v61 = vcombine.low %v4237_v56, %v4241_v24  ;;  %v4357_v62 = vld [vmem:[#allocation8 + $0xd90] sm:$0xff]  ;;  %v13608_v0 = vcombine.high %v4229_v55, %v4233_v35  ;;  %v13607_v8 = vcombine.low %v4229_v55, %v4233_v35 }
 0x454   :  { %7386 = vmatprep.subr.bf16.mxu1 %v13528_v63  ;;  %v4361_v63 = vld [vmem:[#allocation8 + $0xdb0] sm:$0xff] }
 0x455   :  { %v4225_v3 = vld [vmem:[#allocation8 + $0x970] sm:$0xff] }
 0x456   :  { %7346 = vmatpush2.bf16.msra.mxu0 %v13399_v13  ;;  %v4353_v22 = vld [vmem:[#allocation8 + $0xd70] sm:$0xff]  ;;  %v13599_v51 = vcombine.low %v4221_v1, %v4225_v3 }
 0x457   :  { %7387 = vmatpush2.bf16.msra.mxu1 %v13527_v14  ;;  %7347 = vmatprep.subr.bf16.mxu0 %v13392_v33  ;;  %v13736_v33 = vcombine.high %v4357_v62, %v4361_v63  ;;  %v4217_v21 = vld [vmem:[#allocation8 + $0x930] sm:$0xff] }
 0x458   :  { %7388 = vmatprep.subr.bf16.mxu1 %v13520_v18  ;;  %v4349_v18 = vld [vmem:[#allocation8 + $0xd50] sm:$0xff] }
 0x459   :  { %v13728_v19 = vcombine.high %v4349_v18, %v4353_v22  ;;  %v13727_v47 = vcombine.low %v4349_v18, %v4353_v22  ;;  %v4337_v56 = vld [vmem:[#allocation8 + $0xcf0] sm:$0xff] }
 0x45a   :  { %7348 = vmatpush2.bf16.msra.mxu0 %v13391_v10  ;;  %v4329_v55 = vld [vmem:[#allocation8 + $0xcb0] sm:$0xff] }
 0x45b   :  { %7389 = vmatpush2.bf16.msra.mxu1 %v13519_v44  ;;  %7349 = vmatprep.subr.bf16.mxu0 %v13384_v11  ;;  %v13735_v44 = vcombine.low %v4357_v62, %v4361_v63  ;;  %v13600_v11 = vcombine.high %v4221_v1, %v4225_v3  ;;  %v4317_v1 = vld [vmem:[#allocation8 + $0xc50] sm:$0xff] }
 0x45c   :  { %7390 = vmatprep.subr.bf16.mxu1 %v13512_v60  ;;  %v4321_v3 = vld [vmem:[#allocation8 + $0xc70] sm:$0xff] }
 0x45d   :  { %v13696_v18 = vcombine.high %v4317_v1, %v4321_v3  ;;  %v4181_v22 = vld [vmem:[#allocation8 + $0x810] sm:$0xff] }
 0x45e   :  { %7350 = vmatpush2.bf16.msra.mxu0 %v13383_v12 }
 0x45f   :  { %7391 = vmatpush2.bf16.msra.mxu1 %v13511_v41  ;;  %7351 = vmatprep.subr.bf16.mxu0 %v13376_v50  ;;  %v4341_v41 = vld [vmem:[#allocation8 + $0xd10] sm:$0xff] }
 0x460   :  { %7392 = vmatprep.subr.bf16.mxu1 %v13504_v17  ;;  %v4345_v50 = vld [vmem:[#allocation8 + $0xd30] sm:$0xff] }
 0x461   :  { %v13719_v36 = vcombine.low %v4341_v41, %v4345_v50 }
 0x462   :  { %7352 = vmatpush2.bf16.msra.mxu0 %v13375_v29 }
 0x463   :  { %7393 = vmatpush2.bf16.msra.mxu1 %v13503_v53  ;;  %7353 = vmatprep.subr.bf16.mxu0 %v13368_v58  ;;  %v4205_v53 = vld [vmem:[#allocation8 + $0x8d0] sm:$0xff] }
 0x464   :  { %7394 = vmatprep.subr.bf16.mxu1 %v13496_v54  ;;  %v4209_v58 = vld [vmem:[#allocation8 + $0x8f0] sm:$0xff] }
 0x465   :  { %v4333_v54 = vld [vmem:[#allocation8 + $0xcd0] sm:$0xff]  ;;  %v13584_v15 = vcombine.high %v4205_v53, %v4209_v58  ;;  %v13583_v35 = vcombine.low %v4205_v53, %v4209_v58 }
 0x466   :  { %7354 = vmatpush2.bf16.msra.mxu0 %v13367_v23  ;;  %v13712_v23 = vcombine.high %v4333_v54, %v4337_v56 }
 0x467   :  { %7395 = vmatpush2.bf16.msra.mxu1 %v13495_v16  ;;  %7405 = vmatprep.subr.bf16.mxu0 %v13616_v49  ;;  %v4197_v16 = vld [vmem:[#allocation8 + $0x890] sm:$0xff] }
 0x468   :  { %7446 = vmatprep.subr.bf16.mxu1 %v13744_v27  ;;  %v4201_v49 = vld [vmem:[#allocation8 + $0x8b0] sm:$0xff] }
 0x469   :  { %v7111_v13 = vpop.f32.mrf.mxu0  ;;  %v7152_v14 = vpop.f32.mrf.mxu1  ;;  %7356 = vmatmul.mubr.bf16.vlgmr.msra.gmra.mxu0 %v15232_v39  ;;  %v4325_v27 = vld [vmem:[#allocation8 + $0xc90] sm:$0xff]  ;;  %v13576_v62 = vcombine.high %v4197_v16, %v4201_v49 }
 0x46a   :  { %v7112_v6 = vadd.f32 %v7111_v13, %v15268_v48  ;;  %7397 = vmatmul.mubr.bf16.vlgmr.msra.gmra.mxu1 %v15234_v28  ;;  %7406 = vmatpush1.bf16.msra.mxu0 %v13615_v61  ;;  %v4213_v48 = vld [vmem:[#allocation8 + $0x910] sm:$0xff]  ;;  %v13711_v61 = vcombine.low %v4333_v54, %v4337_v56  ;;  %v13704_v63 = vcombine.high %v4325_v27, %v4329_v55 }
 0x46b   :  { %7437 = vmatprep.mubr.bf16.mxu0 %v15240_v7  ;;  %7447 = vmatpush1.bf16.msra.mxu1 %v13743_v2  ;;  %v7113_v9 = vpop.f32.mrf.mxu0  ;;  %v7154_v10 = vpop.f32.mrf.mxu1  ;;  %v13592_v29 = vcombine.high %v4213_v48, %v4217_v21  ;;  %v13591_v24 = vcombine.low %v4213_v48, %v4217_v21  ;;  %v4189_v2 = vld [vmem:[#allocation8 + $0x850] sm:$0xff]  ;;  %v13575_v13 = vcombine.low %v4197_v16, %v4201_v49 }
 0x46c   :  { %v15278_v60 = vadd.f32 %v7152_v14, %v7112_v6  ;;  %7478 = vmatprep.mubr.bf16.mxu1 %v15242_v5  ;;  %v7114_v4 = vadd.f32 %v7113_v9, %v15272_v25  ;;  %7407 = vmatprep.subr.bf16.mxu0 %v13608_v0  ;;  %v13720_v25 = vcombine.high %v4341_v41, %v4345_v50  ;;  %v4193_v0 = vld [vmem:[#allocation8 + $0x870] sm:$0xff] }
 0x46d   :  { %v7115_v42 = vpop.f32.mrf.mxu0  ;;  %v7156_v12 = vpop.f32.mrf.mxu1  ;;  %7448 = vmatprep.subr.bf16.mxu1 %v13736_v33  ;;  %v13703_v14 = vcombine.low %v4325_v27, %v4329_v55  ;;  %v13568_v33 = vcombine.high %v4189_v2, %v4193_v0  ;;  %v4185_v6 = vld [vmem:[#allocation8 + $0x830] sm:$0xff] }
 0x46e   :  { %v15282_v17 = vadd.f32 %v7154_v10, %v7114_v4  ;;  %7408 = vmatpush1.bf16.msra.mxu0 %v13607_v8  ;;  %v4309_v8 = vld [vmem:[#allocation8 + $0xc10] sm:$0xff]  ;;  %v13567_v10 = vcombine.low %v4189_v2, %v4193_v0  ;;  %v13559_v12 = vcombine.low %v4181_v22, %v4185_v6 }
 0x46f   :  { %7449 = vmatpush1.bf16.msra.mxu1 %v13735_v44  ;;  %v7116_v46 = vpop.f32.mrf.mxu0  ;;  %v7157_v52 = vpop.f32.mrf.mxu1  ;;  %7409 = vmatprep.subr.bf16.mxu0 %v13600_v11  ;;  %v4313_v9 = vld [vmem:[#allocation8 + $0xc30] sm:$0xff]  ;;  %v13695_v44 = vcombine.low %v4317_v1, %v4321_v3  ;;  %v13560_v11 = vcombine.high %v4181_v22, %v4185_v6 }
 0x470   :  { %7450 = vmatprep.subr.bf16.mxu1 %v13728_v19  ;;  %v13688_v4 = vcombine.high %v4309_v8, %v4313_v9  ;;  %v4301_v19 = vld [vmem:[#allocation8 + $0xbd0] sm:$0xff]  ;;  %v13687_v41 = vcombine.low %v4309_v8, %v4313_v9 }
 0x471   :  { %v4305_v48 = vld [vmem:[#allocation8 + $0xbf0] sm:$0xff] }
 0x472   :  { %7410 = vmatpush1.bf16.msra.mxu0 %v13599_v51  ;;  %v4429_v21 = vld [vmem:[#allocation8 + $0xfd0] sm:$0xff]  ;;  %v13680_v50 = vcombine.high %v4301_v19, %v4305_v48 }
 0x473   :  { %7451 = vmatpush1.bf16.msra.mxu1 %v13727_v47  ;;  %7411 = vmatprep.subr.bf16.mxu0 %v13592_v29  ;;  %v4433_v42 = vld [vmem:[#allocation8 + $0xff0] sm:$0xff] }
 0x474   :  { %7452 = vmatprep.subr.bf16.mxu1 %v13720_v25  ;;  %v13808_v51 = vcombine.high %v4429_v21, %v4433_v42  ;;  %v4293_v46 = vld [vmem:[#allocation8 + $0xb90] sm:$0xff]  ;;  %v13679_v25 = vcombine.low %v4301_v19, %v4305_v48  ;;  %v13807_v53 = vcombine.low %v4429_v21, %v4433_v42 }
 0x475   :  { %v4297_v52 = vld [vmem:[#allocation8 + $0xbb0] sm:$0xff] }
 0x476   :  { %7412 = vmatpush1.bf16.msra.mxu0 %v13591_v24  ;;  %v4421_v47 = vld [vmem:[#allocation8 + $0xf90] sm:$0xff]  ;;  %v13672_v58 = vcombine.high %v4293_v46, %v4297_v52 }
 0x477   :  { %7453 = vmatpush1.bf16.msra.mxu1 %v13719_v36  ;;  %7413 = vmatprep.subr.bf16.mxu0 %v13584_v15  ;;  %v4425_v29 = vld [vmem:[#allocation8 + $0xfb0] sm:$0xff] }
 0x478   :  { %7454 = vmatprep.subr.bf16.mxu1 %v13712_v23  ;;  %v13800_v54 = vcombine.high %v4421_v47, %v4425_v29  ;;  %v4285_v56 = vld [vmem:[#allocation8 + $0xb50] sm:$0xff]  ;;  %v13671_v23 = vcombine.low %v4293_v46, %v4297_v52  ;;  %v13799_v16 = vcombine.low %v4421_v47, %v4425_v29 }
 0x479   :  { %v4289_v24 = vld [vmem:[#allocation8 + $0xb70] sm:$0xff] }
 0x47a   :  { %7414 = vmatpush1.bf16.msra.mxu0 %v13583_v35  ;;  %v4413_v36 = vld [vmem:[#allocation8 + $0xf50] sm:$0xff]  ;;  %v13664_v49 = vcombine.high %v4285_v56, %v4289_v24 }
 0x47b   :  { %7455 = vmatpush1.bf16.msra.mxu1 %v13711_v61  ;;  %7415 = vmatprep.subr.bf16.mxu0 %v13576_v62  ;;  %v4417_v15 = vld [vmem:[#allocation8 + $0xf70] sm:$0xff] }
 0x47c   :  { %7456 = vmatprep.subr.bf16.mxu1 %v13704_v63  ;;  %v13792_v27 = vcombine.high %v4413_v36, %v4417_v15  ;;  %v4277_v55 = vld [vmem:[#allocation8 + $0xb10] sm:$0xff]  ;;  %v13663_v63 = vcombine.low %v4285_v56, %v4289_v24  ;;  %v13791_v2 = vcombine.low %v4413_v36, %v4417_v15  ;;  %v3982_v15 = vld [vmem:[#allocation8 + $0x1d8] sm:$0xff] }
 0x47d   :  { %v4281_v35 = vld [vmem:[#allocation8 + $0xb30] sm:$0xff] }
 0x47e   :  { %7416 = vmatpush1.bf16.msra.mxu0 %v13575_v13  ;;  %v4405_v61 = vld [vmem:[#allocation8 + $0xf10] sm:$0xff]  ;;  %v13656_v0 = vcombine.high %v4277_v55, %v4281_v35 }
 0x47f   :  { %7457 = vmatpush1.bf16.msra.mxu1 %v13703_v14  ;;  %7417 = vmatprep.subr.bf16.mxu0 %v13568_v33  ;;  %v4409_v62 = vld [vmem:[#allocation8 + $0xf30] sm:$0xff] }
 0x480   :  { %7458 = vmatprep.subr.bf16.mxu1 %v13696_v18  ;;  %v13784_v1 = vcombine.high %v4405_v61, %v4409_v62  ;;  %v4269_v3 = vld [vmem:[#allocation8 + $0xad0] sm:$0xff]  ;;  %v13655_v18 = vcombine.low %v4277_v55, %v4281_v35  ;;  %v13783_v22 = vcombine.low %v4405_v61, %v4409_v62  ;;  %v3974_v62 = vld [vmem:[#allocation8 + $0x198] sm:$0xff] }
 0x481   :  { %v4273_v13 = vld [vmem:[#allocation8 + $0xaf0] sm:$0xff] }
 0x482   :  { %7418 = vmatpush1.bf16.msra.mxu0 %v13567_v10  ;;  %v4397_v14 = vld [vmem:[#allocation8 + $0xed0] sm:$0xff]  ;;  %v13648_v6 = vcombine.high %v4269_v3, %v4273_v13 }
 0x483   :  { %7459 = vmatpush1.bf16.msra.mxu1 %v13695_v44  ;;  %7419 = vmatprep.subr.bf16.mxu0 %v13560_v11  ;;  %v4401_v33 = vld [vmem:[#allocation8 + $0xef0] sm:$0xff] }
 0x484   :  { %7460 = vmatprep.subr.bf16.mxu1 %v13688_v4  ;;  %v13776_v8 = vcombine.high %v4397_v14, %v4401_v33  ;;  %v4261_v9 = vld [vmem:[#allocation8 + $0xa90] sm:$0xff]  ;;  %v13647_v4 = vcombine.low %v4269_v3, %v4273_v13  ;;  %v13775_v19 = vcombine.low %v4397_v14, %v4401_v33  ;;  %v3966_v14 = vld [vmem:[#allocation8 + $0x158] sm:$0xff] }
 0x485   :  { %v4265_v10 = vld [vmem:[#allocation8 + $0xab0] sm:$0xff]  ;;  %v3970_v33 = vld [vmem:[#allocation8 + $0x178] sm:$0xff] }
 0x486   :  { %7420 = vmatpush1.bf16.msra.mxu0 %v13559_v12  ;;  %v4389_v44 = vld [vmem:[#allocation8 + $0xe90] sm:$0xff]  ;;  %v13640_v48 = vcombine.high %v4261_v9, %v4265_v10 }
 0x487   :  { %7461 = vmatpush1.bf16.msra.mxu1 %v13687_v41  ;;  %7421 = vmatprep.subr.bf16.mxu0 %v13680_v50  ;;  %v4393_v11 = vld [vmem:[#allocation8 + $0xeb0] sm:$0xff] }
 0x488   :  { %7462 = vmatprep.subr.bf16.mxu1 %v13808_v51  ;;  %v13768_v21 = vcombine.high %v4389_v44, %v4393_v11  ;;  %v4253_v42 = vld [vmem:[#allocation8 + $0xa50] sm:$0xff]  ;;  %v13639_v51 = vcombine.low %v4261_v9, %v4265_v10  ;;  %v13767_v46 = vcombine.low %v4389_v44, %v4393_v11 }
 0x489   :  { %v4257_v12 = vld [vmem:[#allocation8 + $0xa70] sm:$0xff] }
 0x48a   :  { %7422 = vmatpush2.bf16.msra.mxu0 %v13679_v25  ;;  %v4381_v41 = vld [vmem:[#allocation8 + $0xe50] sm:$0xff]  ;;  %v13632_v52 = vcombine.high %v4253_v42, %v4257_v12 }
 0x48b   :  { %7463 = vmatpush2.bf16.msra.mxu1 %v13807_v53  ;;  %7423 = vmatprep.subr.bf16.mxu0 %v13672_v58  ;;  %v4385_v50 = vld [vmem:[#allocation8 + $0xe70] sm:$0xff] }
 0x48c   :  { %7464 = vmatprep.subr.bf16.mxu1 %v13800_v54  ;;  %v13760_v47 = vcombine.high %v4381_v41, %v4385_v50  ;;  %v4245_v29 = vld [vmem:[#allocation8 + $0xa10] sm:$0xff]  ;;  %v13631_v54 = vcombine.low %v4253_v42, %v4257_v12  ;;  %v13759_v56 = vcombine.low %v4381_v41, %v4385_v50  ;;  %v3958_v42 = vld [vmem:[#allocation8 + $0x118] sm:$0xff] }
 0x48d   :  { %v4249_v25 = vld [vmem:[#allocation8 + $0xa30] sm:$0xff]  ;;  %v3962_v12 = vld [vmem:[#allocation8 + $0x138] sm:$0xff] }
 0x48e   :  { %7424 = vmatpush2.bf16.msra.mxu0 %v13671_v23  ;;  %v4373_v53 = vld [vmem:[#allocation8 + $0xe10] sm:$0xff]  ;;  %v13624_v24 = vcombine.high %v4245_v29, %v4249_v25  ;;  %v3986_v23 = vld [vmem:[#allocation8 + $0x1f8] sm:$0xff] }
 0x48f   :  { %7465 = vmatpush2.bf16.msra.mxu1 %v13799_v16  ;;  %7425 = vmatprep.subr.bf16.mxu0 %v13664_v49  ;;  %v4377_v58 = vld [vmem:[#allocation8 + $0xe30] sm:$0xff]  ;;  %v4110_v16 = vld [vmem:[#allocation8 + $0x5d8] sm:$0xff]  ;;  %v13362_v35 = vcombine.high %v3982_v15, %v3986_v23 }
 0x490   :  { %7466 = vmatprep.subr.bf16.mxu1 %v13792_v27  ;;  %v13752_v36 = vcombine.high %v4373_v53, %v4377_v58  ;;  %v4114_v49 = vld [vmem:[#allocation8 + $0x5f8] sm:$0xff]  ;;  %v13623_v27 = vcombine.low %v4245_v29, %v4249_v25  ;;  %v13751_v55 = vcombine.low %v4373_v53, %v4377_v58  ;;  %v13338_v25 = vcombine.high %v3958_v42, %v3962_v12 }
 0x491   :  { %v13490_v61 = vcombine.high %v4110_v16, %v4114_v49  ;;  %v13489_v3 = vcombine.low %v4110_v16, %v4114_v49  ;;  %v3950_v58 = vld [vmem:[#allocation8 + $0xd8] sm:$0xff] }
 0x492   :  { %7426 = vmatpush2.bf16.msra.mxu0 %v13663_v63  ;;  %v3978_v63 = vld [vmem:[#allocation8 + $0x1b8] sm:$0xff] }
 0x493   :  { %7467 = vmatpush2.bf16.msra.mxu1 %v13791_v2  ;;  %7427 = vmatprep.subr.bf16.mxu0 %v13656_v0  ;;  %v13361_v2 = vcombine.low %v3982_v15, %v3986_v23  ;;  %v4102_v0 = vld [vmem:[#allocation8 + $0x598] sm:$0xff]  ;;  %v13354_v13 = vcombine.high %v3974_v62, %v3978_v63  ;;  %v13353_v10 = vcombine.low %v3974_v62, %v3978_v63 }
 0x494   :  { %7468 = vmatprep.subr.bf16.mxu1 %v13784_v1  ;;  %v4106_v1 = vld [vmem:[#allocation8 + $0x5b8] sm:$0xff] }
 0x495   :  { %v3942_v49 = vld [vmem:[#allocation8 + $0x98] sm:$0xff] }
 0x496   :  { %7428 = vmatpush2.bf16.msra.mxu0 %v13655_v18 }
 0x497   :  { %7469 = vmatpush2.bf16.msra.mxu1 %v13783_v22  ;;  %7429 = vmatprep.subr.bf16.mxu0 %v13648_v6  ;;  %v13482_v22 = vcombine.high %v4102_v0, %v4106_v1  ;;  %v4094_v6 = vld [vmem:[#allocation8 + $0x558] sm:$0xff] }
 0x498   :  { %7470 = vmatprep.subr.bf16.mxu1 %v13776_v8  ;;  %v4098_v8 = vld [vmem:[#allocation8 + $0x578] sm:$0xff] }
 0x499   :  { %v13473_v29 = vcombine.low %v4094_v6, %v4098_v8 }
 0x49a   :  { %7430 = vmatpush2.bf16.msra.mxu0 %v13647_v4  ;;  %v13481_v4 = vcombine.low %v4102_v0, %v4106_v1  ;;  %v3934_v0 = vld [vmem:[#allocation8 + $0x58] sm:$0xff] }
 0x49b   :  { %7471 = vmatpush2.bf16.msra.mxu1 %v13775_v19  ;;  %7431 = vmatprep.subr.bf16.mxu0 %v13640_v48  ;;  %v13346_v19 = vcombine.high %v3966_v14, %v3970_v33  ;;  %v3938_v1 = vld [vmem:[#allocation8 + $0x78] sm:$0xff] }
 0x49c   :  { %7472 = vmatprep.subr.bf16.mxu1 %v13768_v21  ;;  %v13474_v21 = vcombine.high %v4094_v6, %v4098_v8  ;;  %v3926_v6 = vld [vmem:[#allocation8 + $0x18] sm:$0xff] }
 0x49d   :  { %v3930_v8 = vld [vmem:[#allocation8 + $0x38] sm:$0xff] }
 0x49e   :  { %7432 = vmatpush2.bf16.msra.mxu0 %v13639_v51  ;;  %v4086_v51 = vld [vmem:[#allocation8 + $0x518] sm:$0xff] }
 0x49f   :  { %7473 = vmatpush2.bf16.msra.mxu1 %v13767_v46  ;;  %7433 = vmatprep.subr.bf16.mxu0 %v13632_v52  ;;  %v4090_v46 = vld [vmem:[#allocation8 + $0x538] sm:$0xff] }
 0x4a0   :  { %7474 = vmatprep.subr.bf16.mxu1 %v13760_v47  ;;  %v13466_v53 = vcombine.high %v4086_v51, %v4090_v46  ;;  %v13465_v15 = vcombine.low %v4086_v51, %v4090_v46  ;;  %v13305_v51 = vcombine.low %v3926_v6, %v3930_v8 }
 0x4a2   :  { %7434 = vmatpush2.bf16.msra.mxu0 %v13631_v54  ;;  %v3954_v54 = vld [vmem:[#allocation8 + $0xf8] sm:$0xff] }
 0x4a3   :  { %7475 = vmatpush2.bf16.msra.mxu1 %v13759_v56  ;;  %7435 = vmatprep.subr.bf16.mxu0 %v13624_v24  ;;  %v4078_v56 = vld [vmem:[#allocation8 + $0x4d8] sm:$0xff]  ;;  %v13330_v23 = vcombine.high %v3950_v58, %v3954_v54 }
 0x4a4   :  { %7476 = vmatprep.subr.bf16.mxu1 %v13752_v36  ;;  %v4082_v24 = vld [vmem:[#allocation8 + $0x4f8] sm:$0xff]  ;;  %v13337_v36 = vcombine.low %v3958_v42, %v3962_v12 }
 0x4a5   :  { %v13458_v16 = vcombine.high %v4078_v56, %v4082_v24  ;;  %v13457_v62 = vcombine.low %v4078_v56, %v4082_v24  ;;  %v4050_v42 = vld [vmem:[#allocation8 + $0x3f8] sm:$0xff] }
 0x4a6   :  { %7436 = vmatpush2.bf16.msra.mxu0 %v13623_v27  ;;  %v3946_v27 = vld [vmem:[#allocation8 + $0xb8] sm:$0xff] }
 0x4a7   :  { %7477 = vmatpush2.bf16.msra.mxu1 %v13751_v55  ;;  %7487 = vmatprep.subr.bf16.mxu0 %v13362_v35  ;;  %v4070_v55 = vld [vmem:[#allocation8 + $0x498] sm:$0xff]  ;;  %v13322_v63 = vcombine.high %v3942_v49, %v3946_v27 }
 0x4a8   :  { %7528 = vmatprep.subr.bf16.mxu1 %v13490_v61  ;;  %v4074_v35 = vld [vmem:[#allocation8 + $0x4b8] sm:$0xff]  ;;  %v13329_v61 = vcombine.low %v3950_v58, %v3954_v54 }
 0x4a9   :  { %v7193_v18 = vpop.f32.mrf.mxu0  ;;  %7438 = vmatmul.mubr.bf16.vlgmr.msra.gmra.mxu0 %v15254_v43  ;;  %v4174_v12 = vld [vmem:[#allocation8 + $0x7d8] sm:$0xff] }
 0x4aa   :  { %v7234_v9 = vpop.f32.mrf.mxu1  ;;  %7479 = vmatmul.mubr.bf16.vlgmr.msra.gmra.mxu1 %v15256_v45  ;;  %7488 = vmatpush1.bf16.msra.mxu0 %v13361_v2  ;;  %v13450_v2 = vcombine.high %v4070_v55, %v4074_v35  ;;  %v4030_v24 = vld [vmem:[#allocation8 + $0x358] sm:$0xff] }
 0x4ab   :  { %v15286_v44 = vadd.f32 %v7234_v9, %v7193_v18  ;;  %7519 = vmatprep.mubr.bf16.mxu0 %v15228_v30  ;;  %7529 = vmatpush1.bf16.msra.mxu1 %v13489_v3  ;;  %v7195_v11 = vpop.f32.mrf.mxu0  ;;  %v13345_v30 = vcombine.low %v3966_v14, %v3970_v33  ;;  %v4062_v3 = vld [vmem:[#allocation8 + $0x458] sm:$0xff]  ;;  %v13321_v14 = vcombine.low %v3942_v49, %v3946_v27 }
 0x4ac   :  { %7560 = vmatprep.mubr.bf16.mxu1 %v15230_v38  ;;  %v7236_v48 = vpop.f32.mrf.mxu1  ;;  %7489 = vmatprep.subr.bf16.mxu0 %v13354_v13  ;;  %v4066_v13 = vld [vmem:[#allocation8 + $0x478] sm:$0xff]  ;;  %v13449_v33 = vcombine.low %v4070_v55, %v4074_v35  ;;  %v13314_v18 = vcombine.high %v3934_v0, %v3938_v1 }
 0x4ad   :  { %v15290_v41 = vadd.f32 %v7236_v48, %v7195_v11  ;;  %v7197_v50 = vpop.f32.mrf.mxu0  ;;  %7530 = vmatprep.subr.bf16.mxu1 %v13482_v22  ;;  %v13442_v22 = vcombine.high %v4062_v3, %v4066_v13  ;;  %v4054_v9 = vld [vmem:[#allocation8 + $0x418] sm:$0xff]  ;;  %v13313_v11 = vcombine.low %v3934_v0, %v3938_v1 }
 0x4ae   :  { %v7238_v52 = vpop.f32.mrf.mxu1  ;;  %7490 = vmatpush1.bf16.msra.mxu0 %v13353_v10  ;;  %v4058_v10 = vld [vmem:[#allocation8 + $0x438] sm:$0xff] }
 0x4af   :  { %7531 = vmatpush1.bf16.msra.mxu1 %v13481_v4  ;;  %v7198_v47 = vpop.f32.mrf.mxu0  ;;  %7491 = vmatprep.subr.bf16.mxu0 %v13346_v19  ;;  %v13441_v4 = vcombine.low %v4062_v3, %v4066_v13  ;;  %v13306_v19 = vcombine.high %v3926_v6, %v3930_v8  ;;  %v13434_v48 = vcombine.high %v4054_v9, %v4058_v10  ;;  %v4178_v50 = vld [vmem:[#allocation8 + $0x7f8] sm:$0xff] }
 0x4b0   :  { %v7239_v38 = vpop.f32.mrf.mxu1  ;;  %7532 = vmatprep.subr.bf16.mxu1 %v13474_v21  ;;  %v4046_v21 = vld [vmem:[#allocation8 + $0x3d8] sm:$0xff]  ;;  %v13433_v46 = vcombine.low %v4054_v9, %v4058_v10  ;;  %v13553_v58 = vcombine.low %v4174_v12, %v4178_v50 }
 0x4b1   :  { %v13426_v52 = vcombine.high %v4046_v21, %v4050_v42  ;;  %v4038_v47 = vld [vmem:[#allocation8 + $0x398] sm:$0xff] }
 0x4b2   :  { %7492 = vmatpush1.bf16.msra.mxu0 %v13345_v30  ;;  %v13554_v30 = vcombine.high %v4174_v12, %v4178_v50  ;;  %v4170_v38 = vld [vmem:[#allocation8 + $0x7b8] sm:$0xff] }
 0x4b3   :  { %7533 = vmatpush1.bf16.msra.mxu1 %v13473_v29  ;;  %7493 = vmatprep.subr.bf16.mxu0 %v13338_v25  ;;  %v4042_v29 = vld [vmem:[#allocation8 + $0x3b8] sm:$0xff] }
 0x4b4   :  { %7534 = vmatprep.subr.bf16.mxu1 %v13466_v53  ;;  %v4166_v25 = vld [vmem:[#allocation8 + $0x798] sm:$0xff]  ;;  %v13425_v53 = vcombine.low %v4046_v21, %v4050_v42  ;;  %v13418_v54 = vcombine.high %v4038_v47, %v4042_v29 }
 0x4b5   :  { %v13546_v56 = vcombine.high %v4166_v25, %v4170_v38  ;;  %v13545_v49 = vcombine.low %v4166_v25, %v4170_v38  ;;  %v4022_v35 = vld [vmem:[#allocation8 + $0x318] sm:$0xff] }
 0x4b6   :  { %7494 = vmatpush1.bf16.msra.mxu0 %v13337_v36  ;;  %v4034_v36 = vld [vmem:[#allocation8 + $0x378] sm:$0xff] }
 0x4b7   :  { %7535 = vmatpush1.bf16.msra.mxu1 %v13465_v15  ;;  %7495 = vmatprep.subr.bf16.mxu0 %v13330_v23  ;;  %v4158_v15 = vld [vmem:[#allocation8 + $0x758] sm:$0xff]  ;;  %v13410_v27 = vcombine.high %v4030_v24, %v4034_v36 }
 0x4b8   :  { %7536 = vmatprep.subr.bf16.mxu1 %v13458_v16  ;;  %v4162_v23 = vld [vmem:[#allocation8 + $0x778] sm:$0xff]  ;;  %v13417_v16 = vcombine.low %v4038_v47, %v4042_v29 }
 0x4b9   :  { %v13538_v55 = vcombine.high %v4158_v15, %v4162_v23  ;;  %v13537_v0 = vcombine.low %v4158_v15, %v4162_v23  ;;  %v4014_v13 = vld [vmem:[#allocation8 + $0x2d8] sm:$0xff] }
 0x4ba   :  { %7496 = vmatpush1.bf16.msra.mxu0 %v13329_v61  ;;  %v4026_v61 = vld [vmem:[#allocation8 + $0x338] sm:$0xff] }
 0x4bb   :  { %7537 = vmatpush1.bf16.msra.mxu1 %v13457_v62  ;;  %7497 = vmatprep.subr.bf16.mxu0 %v13322_v63  ;;  %v4150_v62 = vld [vmem:[#allocation8 + $0x718] sm:$0xff]  ;;  %v13402_v1 = vcombine.high %v4022_v35, %v4026_v61 }
 0x4bc   :  { %7538 = vmatprep.subr.bf16.mxu1 %v13450_v2  ;;  %v4154_v63 = vld [vmem:[#allocation8 + $0x738] sm:$0xff]  ;;  %v13409_v2 = vcombine.low %v4030_v24, %v4034_v36 }
 0x4bd   :  { %v13530_v3 = vcombine.high %v4150_v62, %v4154_v63  ;;  %v13529_v6 = vcombine.low %v4150_v62, %v4154_v63  ;;  %v4006_v10 = vld [vmem:[#allocation8 + $0x298] sm:$0xff] }
 0x4be   :  { %7498 = vmatpush1.bf16.msra.mxu0 %v13321_v14  ;;  %v4018_v14 = vld [vmem:[#allocation8 + $0x2f8] sm:$0xff] }
 0x4bf   :  { %7539 = vmatpush1.bf16.msra.mxu1 %v13449_v33  ;;  %7499 = vmatprep.subr.bf16.mxu0 %v13314_v18  ;;  %v4142_v33 = vld [vmem:[#allocation8 + $0x6d8] sm:$0xff]  ;;  %v13394_v8 = vcombine.high %v4014_v13, %v4018_v14 }
 0x4c0   :  { %7540 = vmatprep.subr.bf16.mxu1 %v13442_v22  ;;  %v4146_v18 = vld [vmem:[#allocation8 + $0x6f8] sm:$0xff]  ;;  %v13401_v22 = vcombine.low %v4022_v35, %v4026_v61 }
 0x4c1   :  { %v13522_v9 = vcombine.high %v4142_v33, %v4146_v18  ;;  %v13521_v21 = vcombine.low %v4142_v33, %v4146_v18  ;;  %v3998_v50 = vld [vmem:[#allocation8 + $0x258] sm:$0xff] }
 0x4c2   :  { %7500 = vmatpush1.bf16.msra.mxu0 %v13313_v11  ;;  %v4010_v11 = vld [vmem:[#allocation8 + $0x2b8] sm:$0xff] }
 0x4c3   :  { %7541 = vmatpush1.bf16.msra.mxu1 %v13441_v4  ;;  %7501 = vmatprep.subr.bf16.mxu0 %v13306_v19  ;;  %v4134_v4 = vld [vmem:[#allocation8 + $0x698] sm:$0xff]  ;;  %v13386_v42 = vcombine.high %v4006_v10, %v4010_v11 }
 0x4c4   :  { %7542 = vmatprep.subr.bf16.mxu1 %v13434_v48  ;;  %v4138_v19 = vld [vmem:[#allocation8 + $0x6b8] sm:$0xff]  ;;  %v13393_v48 = vcombine.low %v4014_v13, %v4018_v14 }
 0x4c5   :  { %v13514_v12 = vcombine.high %v4134_v4, %v4138_v19  ;;  %v13513_v47 = vcombine.low %v4134_v4, %v4138_v19  ;;  %v3990_v38 = vld [vmem:[#allocation8 + $0x218] sm:$0xff] }
 0x4c6   :  { %7502 = vmatpush1.bf16.msra.mxu0 %v13305_v51  ;;  %v4002_v51 = vld [vmem:[#allocation8 + $0x278] sm:$0xff] }
 0x4c7   :  { %7543 = vmatpush1.bf16.msra.mxu1 %v13433_v46  ;;  %7503 = vmatprep.subr.bf16.mxu0 %v13426_v52  ;;  %v4126_v46 = vld [vmem:[#allocation8 + $0x658] sm:$0xff]  ;;  %v13378_v29 = vcombine.high %v3998_v50, %v4002_v51 }
 0x4c8   :  { %7544 = vmatprep.subr.bf16.mxu1 %v13554_v30  ;;  %v4130_v52 = vld [vmem:[#allocation8 + $0x678] sm:$0xff]  ;;  %v13385_v30 = vcombine.low %v4006_v10, %v4010_v11 }
 0x4c9   :  { %v13506_v25 = vcombine.high %v4126_v46, %v4130_v52  ;;  %v13505_v24 = vcombine.low %v4126_v46, %v4130_v52  ;;  %v4238_v23 = vld [vmem:[#allocation8 + $0x9d8] sm:$0xff] }
 0x4ca   :  { %7504 = vmatpush2.bf16.msra.mxu0 %v13425_v53  ;;  %v3994_v53 = vld [vmem:[#allocation8 + $0x238] sm:$0xff] }
 0x4cb   :  { %7545 = vmatpush2.bf16.msra.mxu1 %v13553_v58  ;;  %7505 = vmatprep.subr.bf16.mxu0 %v13418_v54  ;;  %v4118_v58 = vld [vmem:[#allocation8 + $0x618] sm:$0xff]  ;;  %v13370_v36 = vcombine.high %v3990_v38, %v3994_v53 }
 0x4cc   :  { %7546 = vmatprep.subr.bf16.mxu1 %v13546_v56  ;;  %v4122_v54 = vld [vmem:[#allocation8 + $0x638] sm:$0xff]  ;;  %v13377_v56 = vcombine.low %v3998_v50, %v4002_v51 }
 0x4cd   :  { %v13498_v15 = vcombine.high %v4118_v58, %v4122_v54  ;;  %v13497_v35 = vcombine.low %v4118_v58, %v4122_v54  ;;  %v4230_v63 = vld [vmem:[#allocation8 + $0x998] sm:$0xff] }
 0x4ce   :  { %7506 = vmatpush2.bf16.msra.mxu0 %v13417_v16  ;;  %v4242_v16 = vld [vmem:[#allocation8 + $0x9f8] sm:$0xff] }
 0x4cf   :  { %7547 = vmatpush2.bf16.msra.mxu1 %v13545_v49  ;;  %7507 = vmatprep.subr.bf16.mxu0 %v13410_v27  ;;  %v4366_v49 = vld [vmem:[#allocation8 + $0xdd8] sm:$0xff]  ;;  %v13618_v61 = vcombine.high %v4238_v23, %v4242_v16 }
 0x4d0   :  { %7548 = vmatprep.subr.bf16.mxu1 %v13538_v55  ;;  %v4370_v27 = vld [vmem:[#allocation8 + $0xdf8] sm:$0xff]  ;;  %v13369_v55 = vcombine.low %v3990_v38, %v3994_v53 }
 0x4d1   :  { %v13746_v62 = vcombine.high %v4366_v49, %v4370_v27  ;;  %v13745_v13 = vcombine.low %v4366_v49, %v4370_v27  ;;  %v4222_v33 = vld [vmem:[#allocation8 + $0x958] sm:$0xff] }
 0x4d2   :  { %7508 = vmatpush2.bf16.msra.mxu0 %v13409_v2  ;;  %v4234_v2 = vld [vmem:[#allocation8 + $0x9b8] sm:$0xff] }
 0x4d3   :  { %7549 = vmatpush2.bf16.msra.mxu1 %v13537_v0  ;;  %7509 = vmatprep.subr.bf16.mxu0 %v13402_v1  ;;  %v13617_v0 = vcombine.low %v4238_v23, %v4242_v16  ;;  %v4358_v1 = vld [vmem:[#allocation8 + $0xd98] sm:$0xff]  ;;  %v13610_v14 = vcombine.high %v4230_v63, %v4234_v2  ;;  %v13609_v4 = vcombine.low %v4230_v63, %v4234_v2 }
 0x4d4   :  { %7550 = vmatprep.subr.bf16.mxu1 %v13530_v3  ;;  %v4362_v3 = vld [vmem:[#allocation8 + $0xdb8] sm:$0xff] }
 0x4d5   :  { %v4226_v18 = vld [vmem:[#allocation8 + $0x978] sm:$0xff] }
 0x4d6   :  { %7510 = vmatpush2.bf16.msra.mxu0 %v13401_v22  ;;  %v4214_v50 = vld [vmem:[#allocation8 + $0x918] sm:$0xff] }
 0x4d7   :  { %7551 = vmatpush2.bf16.msra.mxu1 %v13529_v6  ;;  %7511 = vmatprep.subr.bf16.mxu0 %v13394_v8  ;;  %v13738_v6 = vcombine.high %v4358_v1, %v4362_v3  ;;  %v4350_v8 = vld [vmem:[#allocation8 + $0xd58] sm:$0xff] }
 0x4d8   :  { %7552 = vmatprep.subr.bf16.mxu1 %v13522_v9  ;;  %v4354_v9 = vld [vmem:[#allocation8 + $0xd78] sm:$0xff] }
 0x4d9   :  { %v4218_v51 = vld [vmem:[#allocation8 + $0x938] sm:$0xff] }
 0x4da   :  { %7512 = vmatpush2.bf16.msra.mxu0 %v13393_v48  ;;  %v13737_v48 = vcombine.low %v4358_v1, %v4362_v3  ;;  %v4342_v46 = vld [vmem:[#allocation8 + $0xd18] sm:$0xff] }
 0x4db   :  { %7553 = vmatpush2.bf16.msra.mxu1 %v13521_v21  ;;  %7513 = vmatprep.subr.bf16.mxu0 %v13386_v42  ;;  %v13602_v21 = vcombine.high %v4222_v33, %v4226_v18  ;;  %v4346_v52 = vld [vmem:[#allocation8 + $0xd38] sm:$0xff] }
 0x4dc   :  { %7554 = vmatprep.subr.bf16.mxu1 %v13514_v12  ;;  %v13722_v38 = vcombine.high %v4342_v46, %v4346_v52  ;;  %v4206_v53 = vld [vmem:[#allocation8 + $0x8d8] sm:$0xff] }
 0x4dd   :  { %v4210_v58 = vld [vmem:[#allocation8 + $0x8f8] sm:$0xff] }
 0x4de   :  { %7514 = vmatpush2.bf16.msra.mxu0 %v13385_v30  ;;  %v4334_v54 = vld [vmem:[#allocation8 + $0xcd8] sm:$0xff] }
 0x4df   :  { %7555 = vmatpush2.bf16.msra.mxu1 %v13513_v47  ;;  %7515 = vmatprep.subr.bf16.mxu0 %v13378_v29  ;;  %v13601_v47 = vcombine.low %v4222_v33, %v4226_v18  ;;  %v4198_v16 = vld [vmem:[#allocation8 + $0x898] sm:$0xff] }
 0x4e0   :  { %7556 = vmatprep.subr.bf16.mxu1 %v13506_v25  ;;  %v13594_v25 = vcombine.high %v4214_v50, %v4218_v51  ;;  %v4202_v49 = vld [vmem:[#allocation8 + $0x8b8] sm:$0xff] }
 0x4e1   :  { %v4326_v27 = vld [vmem:[#allocation8 + $0xc98] sm:$0xff] }
 0x4e2   :  { %7516 = vmatpush2.bf16.msra.mxu0 %v13377_v56  ;;  %v4338_v56 = vld [vmem:[#allocation8 + $0xcf8] sm:$0xff] }
 0x4e3   :  { %7557 = vmatpush2.bf16.msra.mxu1 %v13505_v24  ;;  %7517 = vmatprep.subr.bf16.mxu0 %v13370_v36  ;;  %v13593_v24 = vcombine.low %v4214_v50, %v4218_v51  ;;  %v13721_v36 = vcombine.low %v4342_v46, %v4346_v52  ;;  %v13714_v23 = vcombine.high %v4334_v54, %v4338_v56  ;;  %v4190_v2 = vld [vmem:[#allocation8 + $0x858] sm:$0xff] }
 0x4e4   :  { %7558 = vmatprep.subr.bf16.mxu1 %v13498_v15  ;;  %v13586_v15 = vcombine.high %v4206_v53, %v4210_v58  ;;  %v4318_v1 = vld [vmem:[#allocation8 + $0xc58] sm:$0xff] }
 0x4e5   :  { %v4322_v3 = vld [vmem:[#allocation8 + $0xc78] sm:$0xff] }
 0x4e6   :  { %7518 = vmatpush2.bf16.msra.mxu0 %v13369_v55  ;;  %v4330_v55 = vld [vmem:[#allocation8 + $0xcb8] sm:$0xff]  ;;  %v13698_v18 = vcombine.high %v4318_v1, %v4322_v3 }
 0x4e7   :  { %7559 = vmatpush2.bf16.msra.mxu1 %v13497_v35  ;;  %7569 = vmatprep.subr.bf16.mxu0 %v13618_v61  ;;  %v13585_v35 = vcombine.low %v4206_v53, %v4210_v58  ;;  %v13713_v61 = vcombine.low %v4334_v54, %v4338_v56  ;;  %v13706_v63 = vcombine.high %v4326_v27, %v4330_v55  ;;  %v4294_v46 = vld [vmem:[#allocation8 + $0xb98] sm:$0xff] }
 0x4e8   :  { %7610 = vmatprep.subr.bf16.mxu1 %v13746_v62  ;;  %v13578_v62 = vcombine.high %v4198_v16, %v4202_v49  ;;  %v4298_v52 = vld [vmem:[#allocation8 + $0xbb8] sm:$0xff] }
 0x4e9   :  { %v7275_v22 = vpop.f32.mrf.mxu0  ;;  %7520 = vmatmul.mubr.bf16.vlgmr.msra.gmra.mxu0 %v15232_v39  ;;  %v4290_v53 = vld [vmem:[#allocation8 + $0xb78] sm:$0xff]  ;;  %v13673_v56 = vcombine.low %v4294_v46, %v4298_v52 }
 0x4ea   :  { %v7276_v10 = vadd.f32 %v7275_v22, %v15286_v44  ;;  %v7316_v11 = vpop.f32.mrf.mxu1  ;;  %7561 = vmatmul.mubr.bf16.vlgmr.msra.gmra.mxu1 %v15234_v28  ;;  %7570 = vmatpush1.bf16.msra.mxu0 %v13617_v0  ;;  %v13730_v44 = vcombine.high %v4350_v8, %v4354_v9  ;;  %v4194_v0 = vld [vmem:[#allocation8 + $0x878] sm:$0xff] }
 0x4eb   :  { %7601 = vmatprep.mubr.bf16.mxu0 %v15240_v7  ;;  %7611 = vmatpush1.bf16.msra.mxu1 %v13745_v13  ;;  %v7277_v19 = vpop.f32.mrf.mxu0  ;;  %v13577_v13 = vcombine.low %v4198_v16, %v4202_v49  ;;  %v13570_v33 = vcombine.high %v4190_v2, %v4194_v0  ;;  %v4182_v22 = vld [vmem:[#allocation8 + $0x818] sm:$0xff] }
 0x4ec   :  { %v15296_v42 = vadd.f32 %v7316_v11, %v7276_v10  ;;  %7642 = vmatprep.mubr.bf16.mxu1 %v15242_v5  ;;  %v7278_v39 = vadd.f32 %v7277_v19, %v15290_v41  ;;  %v7318_v12 = vpop.f32.mrf.mxu1  ;;  %7571 = vmatprep.subr.bf16.mxu0 %v13610_v14  ;;  %v13729_v5 = vcombine.low %v4350_v8, %v4354_v9  ;;  %v4310_v8 = vld [vmem:[#allocation8 + $0xc18] sm:$0xff] }
 0x4ed   :  { %v7279_v28 = vpop.f32.mrf.mxu0  ;;  %7612 = vmatprep.subr.bf16.mxu1 %v13738_v6  ;;  %v13705_v14 = vcombine.low %v4326_v27, %v4330_v55  ;;  %v4186_v6 = vld [vmem:[#allocation8 + $0x838] sm:$0xff]  ;;  %v13569_v10 = vcombine.low %v4190_v2, %v4194_v0  ;;  %v13697_v11 = vcombine.low %v4318_v1, %v4322_v3 }
 0x4ee   :  { %v15300_v7 = vadd.f32 %v7318_v12, %v7278_v39  ;;  %v7320_v30 = vpop.f32.mrf.mxu1  ;;  %7572 = vmatpush1.bf16.msra.mxu0 %v13609_v4  ;;  %v4314_v9 = vld [vmem:[#allocation8 + $0xc38] sm:$0xff]  ;;  %v13562_v4 = vcombine.high %v4182_v22, %v4186_v6 }
 0x4ef   :  { %7613 = vmatpush1.bf16.msra.mxu1 %v13737_v48  ;;  %v7280_v29 = vpop.f32.mrf.mxu0  ;;  %7573 = vmatprep.subr.bf16.mxu0 %v13602_v21  ;;  %v13690_v19 = vcombine.high %v4310_v8, %v4314_v9  ;;  %v4302_v48 = vld [vmem:[#allocation8 + $0xbd8] sm:$0xff]  ;;  %v13689_v50 = vcombine.low %v4310_v8, %v4314_v9 }
 0x4f0   :  { %v7321_v41 = vpop.f32.mrf.mxu1  ;;  %7614 = vmatprep.subr.bf16.mxu1 %v13730_v44  ;;  %v4306_v21 = vld [vmem:[#allocation8 + $0xbf8] sm:$0xff]  ;;  %v13561_v44 = vcombine.low %v4182_v22, %v4186_v6 }
 0x4f1   :  { %v4430_v39 = vld [vmem:[#allocation8 + $0xfd8] sm:$0xff]  ;;  %v13682_v51 = vcombine.high %v4302_v48, %v4306_v21  ;;  %v13681_v29 = vcombine.low %v4302_v48, %v4306_v21 }
 0x4f2   :  { %7574 = vmatpush1.bf16.msra.mxu0 %v13601_v47  ;;  %v4434_v12 = vld [vmem:[#allocation8 + $0xff8] sm:$0xff] }
 0x4f3   :  { %7615 = vmatpush1.bf16.msra.mxu1 %v13729_v5  ;;  %7575 = vmatprep.subr.bf16.mxu0 %v13594_v25  ;;  %v13810_v28 = vcombine.high %v4430_v39, %v4434_v12  ;;  %v4422_v30 = vld [vmem:[#allocation8 + $0xf98] sm:$0xff]  ;;  %v13809_v5 = vcombine.low %v4430_v39, %v4434_v12  ;;  %v13674_v25 = vcombine.high %v4294_v46, %v4298_v52 }
 0x4f4   :  { %7616 = vmatprep.subr.bf16.mxu1 %v13722_v38  ;;  %v4426_v47 = vld [vmem:[#allocation8 + $0xfb8] sm:$0xff] }
 0x4f5   :  { %v13802_v41 = vcombine.high %v4422_v30, %v4426_v47  ;;  %v4286_v38 = vld [vmem:[#allocation8 + $0xb58] sm:$0xff] }
 0x4f6   :  { %7576 = vmatpush1.bf16.msra.mxu0 %v13593_v24  ;;  %v4414_v58 = vld [vmem:[#allocation8 + $0xf58] sm:$0xff]  ;;  %v13801_v24 = vcombine.low %v4422_v30, %v4426_v47  ;;  %v13665_v55 = vcombine.low %v4286_v38, %v4290_v53 }
 0x4f7   :  { %7617 = vmatpush1.bf16.msra.mxu1 %v13721_v36  ;;  %7577 = vmatprep.subr.bf16.mxu0 %v13586_v15  ;;  %v4418_v54 = vld [vmem:[#allocation8 + $0xf78] sm:$0xff]  ;;  %v13666_v36 = vcombine.high %v4286_v38, %v4290_v53 }
 0x4f8   :  { %7618 = vmatprep.subr.bf16.mxu1 %v13714_v23  ;;  %v13794_v15 = vcombine.high %v4414_v58, %v4418_v54  ;;  %v4278_v23 = vld [vmem:[#allocation8 + $0xb18] sm:$0xff] }
 0x4f9   :  { %v4282_v16 = vld [vmem:[#allocation8 + $0xb38] sm:$0xff] }
 0x4fa   :  { %7578 = vmatpush1.bf16.msra.mxu0 %v13585_v35  ;;  %v4406_v49 = vld [vmem:[#allocation8 + $0xf18] sm:$0xff]  ;;  %v13793_v35 = vcombine.low %v4414_v58, %v4418_v54  ;;  %v13657_v3 = vcombine.low %v4278_v23, %v4282_v16 }
 0x4fb   :  { %7619 = vmatpush1.bf16.msra.mxu1 %v13713_v61  ;;  %7579 = vmatprep.subr.bf16.mxu0 %v13578_v62  ;;  %v4410_v27 = vld [vmem:[#allocation8 + $0xf38] sm:$0xff]  ;;  %v13658_v61 = vcombine.high %v4278_v23, %v4282_v16 }
 0x4fc   :  { %7620 = vmatprep.subr.bf16.mxu1 %v13706_v63  ;;  %v13786_v62 = vcombine.high %v4406_v49, %v4410_v27  ;;  %v4270_v63 = vld [vmem:[#allocation8 + $0xad8] sm:$0xff] }
 0x4fd   :  { %v4274_v2 = vld [vmem:[#allocation8 + $0xaf8] sm:$0xff] }
 0x4fe   :  { %7580 = vmatpush1.bf16.msra.mxu0 %v13577_v13  ;;  %v4398_v0 = vld [vmem:[#allocation8 + $0xed8] sm:$0xff]  ;;  %v13785_v13 = vcombine.low %v4406_v49, %v4410_v27  ;;  %v13649_v9 = vcombine.low %v4270_v63, %v4274_v2 }
 0x4ff   :  { %7621 = vmatpush1.bf16.msra.mxu1 %v13705_v14  ;;  %7581 = vmatprep.subr.bf16.mxu0 %v13570_v33  ;;  %v4402_v1 = vld [vmem:[#allocation8 + $0xef8] sm:$0xff]  ;;  %v13650_v14 = vcombine.high %v4270_v63, %v4274_v2 }
 0x500   :  { %7622 = vmatprep.subr.bf16.mxu1 %v13698_v18  ;;  %v13778_v33 = vcombine.high %v4398_v0, %v4402_v1  ;;  %v4262_v18 = vld [vmem:[#allocation8 + $0xa98] sm:$0xff] }
 0x501   :  { %v4266_v22 = vld [vmem:[#allocation8 + $0xab8] sm:$0xff] }
 0x502   :  { %7582 = vmatpush1.bf16.msra.mxu0 %v13569_v10  ;;  %v4390_v6 = vld [vmem:[#allocation8 + $0xe98] sm:$0xff]  ;;  %v13777_v10 = vcombine.low %v4398_v0, %v4402_v1  ;;  %v13641_v12 = vcombine.low %v4262_v18, %v4266_v22 }
 0x503   :  { %7623 = vmatpush1.bf16.msra.mxu1 %v13697_v11  ;;  %7583 = vmatprep.subr.bf16.mxu0 %v13562_v4  ;;  %v4394_v8 = vld [vmem:[#allocation8 + $0xeb8] sm:$0xff]  ;;  %v13642_v11 = vcombine.high %v4262_v18, %v4266_v22  ;;  %v8225_v22 = vld [vmem:[#allocation13 + $0x5e0] sm:$0xff] }
 0x504   :  { %7624 = vmatprep.subr.bf16.mxu1 %v13690_v19  ;;  %v13770_v4 = vcombine.high %v4390_v6, %v4394_v8  ;;  %v4254_v19 = vld [vmem:[#allocation8 + $0xa58] sm:$0xff] }
 0x505   :  { %v4258_v48 = vld [vmem:[#allocation8 + $0xa78] sm:$0xff] }
 0x506   :  { %7584 = vmatpush1.bf16.msra.mxu0 %v13561_v44  ;;  %v4382_v21 = vld [vmem:[#allocation8 + $0xe58] sm:$0xff]  ;;  %v13769_v44 = vcombine.low %v4390_v6, %v4394_v8  ;;  %v13633_v47 = vcombine.low %v4254_v19, %v4258_v48 }
 0x507   :  { %7625 = vmatpush1.bf16.msra.mxu1 %v13689_v50  ;;  %7585 = vmatprep.subr.bf16.mxu0 %v13682_v51  ;;  %v4386_v39 = vld [vmem:[#allocation8 + $0xe78] sm:$0xff]  ;;  %v13634_v50 = vcombine.high %v4254_v19, %v4258_v48  ;;  %v8217_v48 = vld [vmem:[#allocation13 + $0x5a0] sm:$0xff] }
 0x508   :  { %7626 = vmatprep.subr.bf16.mxu1 %v13810_v28  ;;  %v13762_v51 = vcombine.high %v4382_v21, %v4386_v39  ;;  %v4246_v28 = vld [vmem:[#allocation8 + $0xa18] sm:$0xff] }
 0x509   :  { %v4250_v46 = vld [vmem:[#allocation8 + $0xa38] sm:$0xff] }
 0x50a   :  { %7586 = vmatpush2.bf16.msra.mxu0 %v13681_v29  ;;  %v4374_v52 = vld [vmem:[#allocation8 + $0xe18] sm:$0xff]  ;;  %v13761_v29 = vcombine.low %v4382_v21, %v4386_v39 }
 0x50b   :  { %7627 = vmatpush2.bf16.msra.mxu1 %v13809_v5  ;;  %7587 = vmatprep.subr.bf16.mxu0 %v13674_v25  ;;  %v4378_v30 = vld [vmem:[#allocation8 + $0xe38] sm:$0xff]  ;;  %v13626_v5 = vcombine.high %v4246_v28, %v4250_v46 }
 0x50c   :  { %7628 = vmatprep.subr.bf16.mxu1 %v13802_v41  ;;  %v13754_v25 = vcombine.high %v4374_v52, %v4378_v30  ;;  %v13625_v41 = vcombine.low %v4246_v28, %v4250_v46  ;;  %v13753_v38 = vcombine.low %v4374_v52, %v4378_v30  ;;  %v8209_v46 = vld [vmem:[#allocation13 + $0x560] sm:$0xff] }
 0x50e   :  { %7588 = vmatpush2.bf16.msra.mxu0 %v13673_v56 }
 0x50f   :  { %7629 = vmatpush2.bf16.msra.mxu1 %v13801_v24  ;;  %7589 = vmatprep.subr.bf16.mxu0 %v13666_v36 }
 0x510   :  { %7630 = vmatprep.subr.bf16.mxu1 %v13794_v15 }
 0x512   :  { %7590 = vmatpush2.bf16.msra.mxu0 %v13665_v55 }
 0x513   :  { %7631 = vmatpush2.bf16.msra.mxu1 %v13793_v35  ;;  %7591 = vmatprep.subr.bf16.mxu0 %v13658_v61 }
 0x514   :  { %7632 = vmatprep.subr.bf16.mxu1 %v13786_v62 }
 0x516   :  { %7592 = vmatpush2.bf16.msra.mxu0 %v13657_v3 }
 0x517   :  { %7633 = vmatpush2.bf16.msra.mxu1 %v13785_v13  ;;  %7593 = vmatprep.subr.bf16.mxu0 %v13650_v14  ;;  %v8093_v13 = vld [vmem:[#allocation13 + $0x1c0] sm:$0xff] }
 0x518   :  { %7634 = vmatprep.subr.bf16.mxu1 %v13778_v33  ;;  %v8097_v14 = vld [vmem:[#allocation13 + $0x1e0] sm:$0xff] }
 0x519   :  { %v8221_v33 = vld [vmem:[#allocation13 + $0x5c0] sm:$0xff]  ;;  %v13868_v18 = vcombine.high %v8093_v13, %v8097_v14  ;;  %v13867_v6 = vcombine.low %v8093_v13, %v8097_v14 }
 0x51a   :  { %7594 = vmatpush2.bf16.msra.mxu0 %v13649_v9  ;;  %v13995_v8 = vcombine.low %v8221_v33, %v8225_v22  ;;  %v13996_v9 = vcombine.high %v8221_v33, %v8225_v22  ;;  %v8049_v13 = vld [vmem:[#allocation13 + $0x60] sm:$0xff] }
 0x51b   :  { %7635 = vmatpush2.bf16.msra.mxu1 %v13777_v10  ;;  %7595 = vmatprep.subr.bf16.mxu0 %v13642_v11  ;;  %v8085_v10 = vld [vmem:[#allocation13 + $0x180] sm:$0xff] }
 0x51c   :  { %7636 = vmatprep.subr.bf16.mxu1 %v13770_v4  ;;  %v8089_v11 = vld [vmem:[#allocation13 + $0x1a0] sm:$0xff] }
 0x51d   :  { %v8213_v4 = vld [vmem:[#allocation13 + $0x580] sm:$0xff]  ;;  %v13860_v19 = vcombine.high %v8085_v10, %v8089_v11  ;;  %v13859_v21 = vcombine.low %v8085_v10, %v8089_v11 }
 0x51e   :  { %7596 = vmatpush2.bf16.msra.mxu0 %v13641_v12  ;;  %v13987_v39 = vcombine.low %v8213_v4, %v8217_v48  ;;  %v13988_v12 = vcombine.high %v8213_v4, %v8217_v48  ;;  %v8173_v14 = vld [vmem:[#allocation13 + $0x440] sm:$0xff] }
 0x51f   :  { %7637 = vmatpush2.bf16.msra.mxu1 %v13769_v44  ;;  %7597 = vmatprep.subr.bf16.mxu0 %v13634_v50  ;;  %v8077_v44 = vld [vmem:[#allocation13 + $0x140] sm:$0xff] }
 0x520   :  { %7638 = vmatprep.subr.bf16.mxu1 %v13762_v51  ;;  %v8081_v50 = vld [vmem:[#allocation13 + $0x160] sm:$0xff] }
 0x521   :  { %v8205_v51 = vld [vmem:[#allocation13 + $0x540] sm:$0xff]  ;;  %v13852_v28 = vcombine.high %v8077_v44, %v8081_v50  ;;  %v13851_v52 = vcombine.low %v8077_v44, %v8081_v50 }
 0x522   :  { %7598 = vmatpush2.bf16.msra.mxu0 %v13633_v47  ;;  %v13979_v30 = vcombine.low %v8205_v51, %v8209_v46  ;;  %v13980_v47 = vcombine.high %v8205_v51, %v8209_v46  ;;  %v8041_v10 = vld [vmem:[#allocation13 + $0x20] sm:$0xff] }
 0x523   :  { %7639 = vmatpush2.bf16.msra.mxu1 %v13761_v29  ;;  %7599 = vmatprep.subr.bf16.mxu0 %v13626_v5  ;;  %v8069_v29 = vld [vmem:[#allocation13 + $0x100] sm:$0xff] }
 0x524   :  { %7640 = vmatprep.subr.bf16.mxu1 %v13754_v25  ;;  %v8073_v5 = vld [vmem:[#allocation13 + $0x120] sm:$0xff] }
 0x525   :  { %v8197_v25 = vld [vmem:[#allocation13 + $0x500] sm:$0xff] }
 0x526   :  { %7600 = vmatpush2.bf16.msra.mxu0 %v13625_v41  ;;  %v13844_v41 = vcombine.high %v8069_v29, %v8073_v5  ;;  %v8165_v11 = vld [vmem:[#allocation13 + $0x400] sm:$0xff] }
 0x527   :  { %7641 = vmatpush2.bf16.msra.mxu1 %v13753_v38  ;;  %11109 = vmatprep.subr.bf16.mxu0 %v13868_v18  ;;  %v8201_v38 = vld [vmem:[#allocation13 + $0x520] sm:$0xff] }
 0x528   :  { %11150 = vmatprep.subr.bf16.mxu1 %v13996_v9  ;;  %v8177_v18 = vld [vmem:[#allocation13 + $0x460] sm:$0xff] }
 0x529   :  { %v7357_v53 = vpop.f32.mrf.mxu0  ;;  %7602 = vmatmul.mubr.bf16.vlgmr.msra.gmra.mxu0 %v15254_v43  ;;  %v8037_v9 = vld [vmem:[#allocation13] sm:$0xff] }
 0x52a   :  { %v7398_v58 = vpop.f32.mrf.mxu1  ;;  %7643 = vmatmul.mubr.bf16.vlgmr.msra.gmra.mxu1 %v15256_v45  ;;  %11110 = vmatpush1.bf16.msra.mxu0 %v13867_v6  ;;  %v13947_v6 = vcombine.low %v8173_v14, %v8177_v18  ;;  %v13812_v4 = vcombine.high %v8037_v9, %v8041_v10  ;;  %v13811_v48 = vcombine.low %v8037_v9, %v8041_v10  ;;  %v8161_v44 = vld [vmem:[#allocation13 + $0x3e0] sm:$0xff] }
 0x52b   :  { %v7399_v54 = vadd.f32 %v7398_v58, %v7357_v53  ;;  %v7359_v56 = vpop.f32.mrf.mxu0  ;;  %11151 = vmatpush1.bf16.msra.mxu1 %v13995_v8  ;;  %11111 = vmatprep.subr.bf16.mxu0 %v13860_v19  ;;  %v13843_v53 = vcombine.low %v8069_v29, %v8073_v5  ;;  %v13971_v58 = vcombine.low %v8197_v25, %v8201_v38  ;;  %v8169_v19 = vld [vmem:[#allocation13 + $0x420] sm:$0xff] }
 0x52c   :  { %v7400_v24 = vpop.f32.mrf.mxu1  ;;  %11152 = vmatprep.subr.bf16.mxu1 %v13988_v12  ;;  %v13948_v8 = vcombine.high %v8173_v14, %v8177_v18  ;;  %v8157_v12 = vld [vmem:[#allocation13 + $0x3c0] sm:$0xff] }
 0x52d   :  { %v7401_v36 = vadd.f32 %v7400_v24, %v7359_v56  ;;  %v7361_v15 = vpop.f32.mrf.mxu0  ;;  %v8061_v56 = vld [vmem:[#allocation13 + $0xc0] sm:$0xff]  ;;  %v13932_v51 = vcombine.high %v8157_v12, %v8161_v44  ;;  %v13931_v46 = vcombine.low %v8157_v12, %v8161_v44 }
 0x52e   :  { %v7402_v23 = vpop.f32.mrf.mxu1  ;;  %11112 = vmatpush1.bf16.msra.mxu0 %v13859_v21  ;;  %v8065_v24 = vld [vmem:[#allocation13 + $0xe0] sm:$0xff]  ;;  %v13939_v21 = vcombine.low %v8165_v11, %v8169_v19 }
 0x52f   :  { %v7362_v16 = vpop.f32.mrf.mxu0  ;;  %11153 = vmatpush1.bf16.msra.mxu1 %v13987_v39  ;;  %11113 = vmatprep.subr.bf16.mxu0 %v13852_v28  ;;  %v13836_v15 = vcombine.high %v8061_v56, %v8065_v24  ;;  %v8193_v23 = vld [vmem:[#allocation13 + $0x4e0] sm:$0xff]  ;;  %v13940_v39 = vcombine.high %v8165_v11, %v8169_v19 }
 0x530   :  { %v7403_v49 = vpop.f32.mrf.mxu1  ;;  %11154 = vmatprep.subr.bf16.mxu1 %v13980_v47  ;;  %v13835_v16 = vcombine.low %v8061_v56, %v8065_v24  ;;  %v8285_v50 = vld [vmem:[#allocation13 + $0x7c0] sm:$0xff] }
 0x531   :  { %v8289_v28 = vld [vmem:[#allocation13 + $0x7e0] sm:$0xff] }
 0x532   :  { %11114 = vmatpush1.bf16.msra.mxu0 %v13851_v52  ;;  %v14059_v52 = vcombine.low %v8285_v50, %v8289_v28  ;;  %v8149_v47 = vld [vmem:[#allocation13 + $0x380] sm:$0xff] }
 0x533   :  { %11155 = vmatpush1.bf16.msra.mxu1 %v13979_v30  ;;  %11115 = vmatprep.subr.bf16.mxu0 %v13844_v41  ;;  %v14060_v30 = vcombine.high %v8285_v50, %v8289_v28  ;;  %v8153_v29 = vld [vmem:[#allocation13 + $0x3a0] sm:$0xff] }
 0x534   :  { %v8277_v5 = vld [vmem:[#allocation13 + $0x780] sm:$0xff] }
 0x535   :  { %v8281_v41 = vld [vmem:[#allocation13 + $0x7a0] sm:$0xff] }
 0x536   :  { %11116 = vmatpush1.bf16.msra.mxu0 %v13843_v53  ;;  %v13923_v53 = vcombine.low %v8149_v47, %v8153_v29  ;;  %v8265_v18 = vld [vmem:[#allocation13 + $0x720] sm:$0xff] }
 0x537   :  { %11117 = vmatprep.subr.bf16.mxu0 %v13836_v15  ;;  %v8141_v15 = vld [vmem:[#allocation13 + $0x340] sm:$0xff] }
 0x538   :  { %v8125_v9 = vld [vmem:[#allocation13 + $0x2c0] sm:$0xff] }
 0x539   :  { %v8129_v10 = vld [vmem:[#allocation13 + $0x2e0] sm:$0xff] }
 0x53a   :  { %11118 = vmatpush1.bf16.msra.mxu0 %v13835_v16  ;;  %v8269_v16 = vld [vmem:[#allocation13 + $0x740] sm:$0xff] }
 0x53b   :  { %v8253_v11 = vld [vmem:[#allocation13 + $0x6c0] sm:$0xff] }
 0x53c   :  { %v8257_v19 = vld [vmem:[#allocation13 + $0x6e0] sm:$0xff] }
 0x53d   :  { %v8117_v12 = vld [vmem:[#allocation13 + $0x280] sm:$0xff] }
 0x53e   :  { %v8121_v44 = vld [vmem:[#allocation13 + $0x2a0] sm:$0xff] }
 0x53f   :  { %v8245_v50 = vld [vmem:[#allocation13 + $0x680] sm:$0xff]  ;;  %v13892_v28 = vcombine.high %v8117_v12, %v8121_v44 }
 0x569   :  { %v7439_v27 = vpop.f32.mrf.mxu0 }
 0x56a   :  { %v7440_v55 = vadd.f32 %v7439_v27, %v7399_v54  ;;  %v7480_v35 = vpop.f32.mrf.mxu1  ;;  %v13972_v54 = vcombine.high %v8197_v25, %v8201_v38  ;;  %v13924_v25 = vcombine.high %v8149_v47, %v8153_v29 }
 0x56b   :  { %v7441_v61 = vpop.f32.mrf.mxu0 }
 0x56c   :  { %v15304_v62 = vadd.f32 %v7480_v35, %v7440_v55  ;;  %v7442_v63 = vadd.f32 %v7441_v61, %v7401_v36  ;;  %v7482_v2 = vpop.f32.mrf.mxu1  ;;  %11156 = vmatprep.subr.bf16.mxu1 %v13972_v54  ;;  %v8189_v36 = vld [vmem:[#allocation13 + $0x4c0] sm:$0xff]  ;;  %v14052_v54 = vcombine.high %v8277_v5, %v8281_v41 }
 0x56d   :  { %v7443_v43 = vpop.f32.mrf.mxu0  ;;  %11157 = vmatpush1.bf16.msra.mxu1 %v13971_v58  ;;  %v13963_v49 = vcombine.low %v8189_v36, %v8193_v23  ;;  %v13964_v27 = vcombine.high %v8189_v36, %v8193_v23  ;;  %v8053_v55 = vld [vmem:[#allocation13 + $0x80] sm:$0xff]  ;;  %v14051_v58 = vcombine.low %v8277_v5, %v8281_v41 }
 0x56e   :  { %v15306_v0 = vadd.f32 %v7482_v2, %v7442_v63  ;;  %v7484_v45 = vpop.f32.mrf.mxu1  ;;  %v8057_v35 = vld [vmem:[#allocation13 + $0xa0] sm:$0xff] }
 0x56f   :  { %v7444_v1 = vpop.f32.mrf.mxu0  ;;  %11158 = vmatprep.subr.bf16.mxu1 %v13964_v27  ;;  %v8181_v61 = vld [vmem:[#allocation13 + $0x480] sm:$0xff]  ;;  %v13828_v63 = vcombine.high %v8053_v55, %v8057_v35  ;;  %v13827_v43 = vcombine.low %v8053_v55, %v8057_v35 }
 0x570   :  { %v7485_v3 = vpop.f32.mrf.mxu1  ;;  %v8185_v2 = vld [vmem:[#allocation13 + $0x4a0] sm:$0xff] }
 0x571   :  { %11159 = vmatpush1.bf16.msra.mxu1 %v13963_v49  ;;  %v13955_v45 = vcombine.low %v8181_v61, %v8185_v2  ;;  %v13956_v1 = vcombine.high %v8181_v61, %v8185_v2  ;;  %11119 = vmatprep.subr.bf16.mxu0 %v13828_v63  ;;  %v8045_v3 = vld [vmem:[#allocation13 + $0x40] sm:$0xff] }
 0x572   :  { %11120 = vmatpush1.bf16.msra.mxu0 %v13827_v43  ;;  %v13820_v33 = vcombine.high %v8045_v3, %v8049_v13  ;;  %v13819_v22 = vcombine.low %v8045_v3, %v8049_v13  ;;  %v8145_v23 = vld [vmem:[#allocation13 + $0x360] sm:$0xff] }
 0x573   :  { %11160 = vmatprep.subr.bf16.mxu1 %v13956_v1  ;;  %v13916_v27 = vcombine.high %v8141_v15, %v8145_v23  ;;  %v8273_v55 = vld [vmem:[#allocation13 + $0x760] sm:$0xff]  ;;  %v13915_v61 = vcombine.low %v8141_v15, %v8145_v23 }
 0x574   :  { %11121 = vmatprep.subr.bf16.mxu0 %v13820_v33  ;;  %v14043_v63 = vcombine.low %v8269_v16, %v8273_v55  ;;  %v14044_v2 = vcombine.high %v8269_v16, %v8273_v55  ;;  %v8133_v1 = vld [vmem:[#allocation13 + $0x300] sm:$0xff] }
 0x575   :  { %11161 = vmatpush1.bf16.msra.mxu1 %v13955_v45  ;;  %v8137_v3 = vld [vmem:[#allocation13 + $0x320] sm:$0xff] }
 0x576   :  { %11162 = vmatprep.subr.bf16.mxu1 %v13948_v8  ;;  %11122 = vmatpush1.bf16.msra.mxu0 %v13819_v22  ;;  %v8261_v13 = vld [vmem:[#allocation13 + $0x700] sm:$0xff]  ;;  %v13908_v33 = vcombine.high %v8133_v1, %v8137_v3  ;;  %v13907_v22 = vcombine.low %v8133_v1, %v8137_v3  ;;  %v7669_v1 = vrot.slane %v15300_v7, 4 }
 0x577   :  { %11123 = vmatprep.subr.bf16.mxu0 %v13812_v4  ;;  %v14036_v8 = vcombine.high %v8261_v13, %v8265_v18  ;;  %v13900_v4 = vcombine.high %v8125_v9, %v8129_v10  ;;  %v8241_v41 = vld [vmem:[#allocation13 + $0x660] sm:$0xff] }
 0x579   :  { %11163 = vmatpush1.bf16.msra.mxu1 %v13947_v6  ;;  %v14035_v6 = vcombine.low %v8261_v13, %v8265_v18  ;;  %v7663_v18 = vrot.slane %v15296_v42, 4 }
 0x57a   :  { %11164 = vmatprep.subr.bf16.mxu1 %v13940_v39  ;;  %11124 = vmatpush1.bf16.msra.mxu0 %v13811_v48  ;;  %v13899_v48 = vcombine.low %v8125_v9, %v8129_v10  ;;  %v14028_v39 = vcombine.high %v8253_v11, %v8257_v19 }
 0x57b   :  { %11125 = vmatprep.subr.bf16.mxu0 %v13932_v51  ;;  %v13891_v51 = vcombine.low %v8117_v12, %v8121_v44  ;;  %v7664_v10 = vadd.f32 %v7663_v18, %v15296_v42 }
 0x57d   :  { %11165 = vmatpush1.bf16.msra.mxu1 %v13939_v21  ;;  %v14027_v21 = vcombine.low %v8253_v11, %v8257_v19  ;;  %v7675_v11 = vrot.slane %v15304_v62, 4 }
 0x57e   :  { %11166 = vmatprep.subr.bf16.mxu1 %v14060_v30  ;;  %11126 = vmatpush2.bf16.msra.mxu0 %v13931_v46  ;;  %v8249_v46 = vld [vmem:[#allocation13 + $0x6a0] sm:$0xff] }
 0x57f   :  { %11127 = vmatprep.subr.bf16.mxu0 %v13924_v25  ;;  %v8113_v30 = vld [vmem:[#allocation13 + $0x260] sm:$0xff]  ;;  %v14019_v47 = vcombine.low %v8245_v50, %v8249_v46  ;;  %v14020_v29 = vcombine.high %v8245_v50, %v8249_v46  ;;  %v7676_v12 = vadd.f32 %v7675_v11, %v15304_v62 }
 0x580   :  { %v8237_v25 = vld [vmem:[#allocation13 + $0x640] sm:$0xff] }
 0x581   :  { %11167 = vmatpush2.bf16.msra.mxu1 %v14059_v52  ;;  %v8109_v52 = vld [vmem:[#allocation13 + $0x240] sm:$0xff]  ;;  %v14011_v23 = vcombine.low %v8237_v25, %v8241_v41 }
 0x582   :  { %11168 = vmatprep.subr.bf16.mxu1 %v14052_v54  ;;  %11128 = vmatpush2.bf16.msra.mxu0 %v13923_v53  ;;  %v13884_v5 = vcombine.high %v8109_v52, %v8113_v30  ;;  %v8101_v53 = vld [vmem:[#allocation13 + $0x200] sm:$0xff]  ;;  %v13883_v15 = vcombine.low %v8109_v52, %v8113_v30  ;;  %v7677_v52 = vrot.slane %v7676_v12, 2 }
 0x583   :  { %11129 = vmatprep.subr.bf16.mxu0 %v13916_v27  ;;  %v8229_v54 = vld [vmem:[#allocation13 + $0x600] sm:$0xff] }
 0x585   :  { %11169 = vmatpush2.bf16.msra.mxu1 %v14051_v58  ;;  %v8105_v58 = vld [vmem:[#allocation13 + $0x220] sm:$0xff] }
 0x586   :  { %11170 = vmatprep.subr.bf16.mxu1 %v14044_v2  ;;  %11130 = vmatpush2.bf16.msra.mxu0 %v13915_v61  ;;  %v13876_v16 = vcombine.high %v8101_v53, %v8105_v58  ;;  %v13875_v55 = vcombine.low %v8101_v53, %v8105_v58  ;;  %v15314_v61 = vld [vmem:[#allocation13 + $0x9c0] sm:$0xff] }
 0x587   :  { %11131 = vmatprep.subr.bf16.mxu0 %v13908_v33  ;;  %v15318_v2 = vld [vmem:[#allocation13 + $0xdc0] sm:$0xff]  ;;  %v7657_v33 = vrot.slane %v15282_v17, 4 }
 0x589   :  { %11171 = vmatpush2.bf16.msra.mxu1 %v14043_v63  ;;  %v15316_v63 = vld [vmem:[#allocation13 + $0x9e0] sm:$0xff]  ;;  %v7658_v9 = vadd.f32 %v7657_v33, %v15282_v17 }
 0x58a   :  { %11172 = vmatprep.subr.bf16.mxu1 %v14036_v8  ;;  %11132 = vmatpush2.bf16.msra.mxu0 %v13907_v22  ;;  %v14123_v3 = vcombine.low %v15314_v61, %v15316_v63  ;;  %v7651_v22 = vrot.slane %v15278_v60, 4  ;;  %v7681_v8 = vrot.slane %v15306_v0, 4 }
 0x58b   :  { %11133 = vmatprep.subr.bf16.mxu0 %v13900_v4 }
 0x58c   :  { %v7652_v4 = vadd.f32 %v7651_v22, %v15278_v60 }
 0x58d   :  { %11173 = vmatpush2.bf16.msra.mxu1 %v14035_v6  ;;  %v7670_v6 = vadd.f32 %v7669_v1, %v15300_v7 }
 0x58e   :  { %11174 = vmatprep.subr.bf16.mxu1 %v14028_v39  ;;  %11134 = vmatpush2.bf16.msra.mxu0 %v13899_v48  ;;  %v7682_v48 = vadd.f32 %v7681_v8, %v15306_v0  ;;  %v7665_v39 = vrot.slane %v7664_v10, 2  ;;  %v7653_v44 = vrot.slane %v7652_v4, 2 }
 0x58f   :  { %11135 = vmatprep.subr.bf16.mxu0 %v13892_v28  ;;  %v7671_v19 = vrot.slane %v7670_v6, 2 }
 0x590   :  { %v7666_v46 = vadd.f32 %v7665_v39, %v7664_v10  ;;  %v7654_v30 = vadd.f32 %v7653_v44, %v7652_v4 }
 0x591   :  { %11175 = vmatpush2.bf16.msra.mxu1 %v14027_v21  ;;  %v7659_v21 = vrot.slane %v7658_v9, 2  ;;  %v7672_v50 = vadd.f32 %v7671_v19, %v7670_v6 }
 0x592   :  { %11176 = vmatprep.subr.bf16.mxu1 %v14020_v29  ;;  %11136 = vmatpush2.bf16.msra.mxu0 %v13891_v51  ;;  %v7683_v51 = vrot.slane %v7682_v48, 2 }
 0x593   :  { %11137 = vmatprep.subr.bf16.mxu0 %v13884_v5  ;;  %v7660_v28 = vadd.f32 %v7659_v21, %v7658_v9 }
 0x594   :  { %v7684_v29 = vadd.f32 %v7683_v51, %v7682_v48 }
 0x595   :  { %11177 = vmatpush2.bf16.msra.mxu1 %v14019_v47  ;;  %v7673_v47 = vrot.slane %v7672_v50, 1  ;;  %v7661_v5 = vrot.slane %v7660_v28, 1 }
 0x596   :  { %11138 = vmatpush2.bf16.msra.mxu0 %v13883_v15  ;;  %v7685_v58 = vrot.slane %v7684_v29, 1 }
 0x597   :  { %11139 = vmatprep.subr.bf16.mxu0 %v13876_v16  ;;  %v7674_v53 = vadd.f32 %v7673_v47, %v7672_v50 }
 0x599   :  { %v15342_v16 = vmul.f32 0.125, %v7674_v53 }
 0x59a   :  { %11140 = vmatpush2.bf16.msra.mxu0 %v13875_v55 }
 0x5a9   :  { %v7521_v38 = vpop.f32.mrf.mxu0 }
 0x5aa   :  { %v7562_v56 = vpop.f32.mrf.mxu1 }
 0x5ab   :  { %v15308_v24 = vadd.f32 %v7562_v56, %v7521_v38  ;;  %v15310_v36 = vpop.f32.mrf.mxu0  ;;  %v14012_v38 = vcombine.high %v8237_v25, %v8241_v41  ;;  %v8233_v56 = vld [vmem:[#allocation13 + $0x620] sm:$0xff]  ;;  %v7667_v25 = vrot.slane %v7666_v46, 1  ;;  %v7678_v41 = vadd.f32 %v7677_v52, %v7676_v12 }
 0x5ac   :  { %v15312_v49 = vpop.f32.mrf.mxu1  ;;  %v14004_v27 = vcombine.high %v8229_v54, %v8233_v56 }
 0x5ad   :  { %v7525_v35 = vpop.f32.mrf.mxu0  ;;  %11178 = vmatprep.subr.bf16.mxu1 %v14012_v38  ;;  %v7655_v38 = vrot.slane %v7654_v30, 1  ;;  %v7679_v15 = vrot.slane %v7678_v41, 1  ;;  %v7565_v44 = vadd.f32 %v15312_v49, %v15310_v36 }
 0x5ae   :  { %v7566_v43 = vpop.f32.mrf.mxu1  ;;  %11179 = vmatpush2.bf16.msra.mxu1 %v14011_v23  ;;  %v14003_v35 = vcombine.low %v8229_v54, %v8233_v56  ;;  %v7662_v54 = vadd.f32 %v7661_v5, %v7660_v28  ;;  %v7668_v56 = vadd.f32 %v7667_v25, %v7666_v46 }
 0x5af   :  { %v7526_v45 = vpop.f32.mrf.mxu0  ;;  %11180 = vmatprep.subr.bf16.mxu1 %v14004_v27  ;;  %v14124_v43 = vcombine.high %v15314_v61, %v15316_v63  ;;  %v7656_v23 = vadd.f32 %v7655_v38, %v7654_v30  ;;  %v7686_v27 = vadd.f32 %v7685_v58, %v7684_v29 }
 0x5b0   :  { %v7567_v14 = vpop.f32.mrf.mxu1  ;;  %v15322_v45 = vld [vmem:[#allocation13 + $0xde0] sm:$0xff]  ;;  %v15344_v55 = vmul.f32 0.125, %v7662_v54 }
 0x5b1   :  { %v14251_v13 = vcombine.low %v15318_v2, %v15322_v45  ;;  %v14252_v14 = vcombine.high %v15318_v2, %v15322_v45  ;;  %11191 = vmatprep.subr.bf16.mxu0 %v14124_v43  ;;  %v7680_v43 = vadd.f32 %v7679_v15, %v7678_v41  ;;  %v15348_v1 = vmul.f32 0.125, %v7656_v23 }
 0x5b2   :  { %11181 = vmatpush2.bf16.msra.mxu1 %v14003_v35  ;;  %v15346_v35 = vmul.f32 0.125, %v7668_v56  ;;  %v15352_v33 = vmul.f32 0.125, %v7686_v27  ;;  %v7708_v18 = vsub.f32 %v15282_v17, %v15344_v55 }
 0x5b3   :  { %11232 = vmatprep.subr.bf16.mxu1 %v14252_v14  ;;  %v7710_v14 = vsub.f32 %v15300_v7, %v15342_v16  ;;  %v15358_v6 = vmul.f32 0.125, %v7680_v43  ;;  %v7707_v8 = vsub.f32 %v15278_v60, %v15348_v1 }
 0x5b4   :  { %v7709_v22 = vsub.f32 %v15296_v42, %v15346_v35  ;;  %v7712_v10 = vsub.f32 %v15306_v0, %v15352_v33  ;;  %v7716_v11 = vmul.f32 %v7708_v18, %v7708_v18 }
 0x5b5   :  { %v7718_v9 = vmul.f32 %v7710_v14, %v7710_v14  ;;  %v7711_v19 = vsub.f32 %v15304_v62, %v15358_v6  ;;  %v7715_v48 = vmul.f32 %v7707_v8, %v7707_v8 }
 0x5b6   :  { %v7717_v4 = vmul.f32 %v7709_v22, %v7709_v22  ;;  %v7720_v12 = vmul.f32 %v7712_v10, %v7712_v10  ;;  %v7729_v28 = vrot.slane %v7716_v11, 4 }
 0x5b7   :  { %v7741_v39 = vrot.slane %v7718_v9, 4  ;;  %v7719_v30 = vmul.f32 %v7711_v19, %v7711_v19  ;;  %v7723_v25 = vrot.slane %v7715_v48, 4 }
 0x5b8   :  { %v7735_v52 = vrot.slane %v7717_v4, 4  ;;  %v7753_v53 = vrot.slane %v7720_v12, 4  ;;  %v7730_v49 = vadd.f32 %v7729_v28, %v7716_v11 }
 0x5b9   :  { %v7742_v38 = vadd.f32 %v7741_v39, %v7718_v9  ;;  %v7747_v15 = vrot.slane %v7719_v30, 4  ;;  %v7724_v14 = vadd.f32 %v7723_v25, %v7715_v48 }
 0x5ba   :  { %v7736_v56 = vadd.f32 %v7735_v52, %v7717_v4  ;;  %v7754_v22 = vadd.f32 %v7753_v53, %v7720_v12  ;;  %v7731_v10 = vrot.slane %v7730_v49, 2 }
 0x5bb   :  { %v7743_v18 = vrot.slane %v7742_v38, 2  ;;  %v7725_v11 = vrot.slane %v7724_v14, 2 }
 0x5bc   :  { %v7737_v19 = vrot.slane %v7736_v56, 2  ;;  %v7755_v4 = vrot.slane %v7754_v22, 2 }
 0x5bd   :  { %v7726_v25 = vadd.f32 %v7725_v11, %v7724_v14 }
 0x5be   :  { %v7738_v52 = vadd.f32 %v7737_v19, %v7736_v56 }
 0x5e9   :  { %v7603_v21 = vpop.f32.mrf.mxu0 }
 0x5ea   :  { %v7604_v50 = vadd.f32 %v7603_v21, %v15308_v24  ;;  %v7644_v51 = vpop.f32.mrf.mxu1  ;;  %v7748_v21 = vadd.f32 %v7747_v15, %v7719_v30  ;;  %v7739_v30 = vrot.slane %v7738_v52, 1 }
 0x5eb   :  { %v7605_v46 = vpop.f32.mrf.mxu0 }
 0x5ec   :  { %v15369_v47 = vadd.f32 %v7644_v51, %v7604_v50  ;;  %v7606_v29 = vadd.f32 %v7605_v46, %v7565_v44  ;;  %v7646_v5 = vpop.f32.mrf.mxu1  ;;  %v7744_v50 = vadd.f32 %v7743_v18, %v7742_v38  ;;  %v7732_v46 = vadd.f32 %v7731_v10, %v7730_v49 }
 0x5ed   :  { %v7607_v41 = vpop.f32.mrf.mxu0  ;;  %v7740_v18 = vadd.f32 %v7739_v30, %v7738_v52 }
 0x5ee   :  { %v7687_v58 = vrot.slane %v15369_v47, 4  ;;  %v15372_v54 = vadd.f32 %v7646_v5, %v7606_v29  ;;  %v7648_v36 = vpop.f32.mrf.mxu1  ;;  %v7749_v29 = vrot.slane %v7748_v21, 2  ;;  %v7745_v12 = vrot.slane %v7744_v50, 1 }
 0x5ef   :  { %v7608_v24 = vpop.f32.mrf.mxu0  ;;  %v7756_v41 = vadd.f32 %v7755_v4, %v7754_v22  ;;  %v7733_v36 = vrot.slane %v7732_v46, 1  ;;  %v7773_v4 = vmul.f32 0.125, %v7740_v18 }
 0x5f0   :  { %v7688_v23 = vadd.f32 %v7687_v58, %v15369_v47  ;;  %v7693_v27 = vrot.slane %v15372_v54, 4  ;;  %v7649_v43 = vpop.f32.mrf.mxu1  ;;  %v7750_v24 = vadd.f32 %v7749_v29, %v7748_v21  ;;  %v7746_v49 = vadd.f32 %v7745_v12, %v7744_v50 }
 0x5f1   :  { %v7757_v56 = vrot.slane %v7756_v41, 1  ;;  %v7734_v14 = vadd.f32 %v7733_v36, %v7732_v46  ;;  %v7782_v52 = vadd.f32 1e-05, %v7773_v4 }
 0x5f2   :  { %v7689_v8 = vrot.slane %v7688_v23, 2  ;;  %v7694_v9 = vadd.f32 %v7693_v27, %v15372_v54  ;;  %v7751_v22 = vrot.slane %v7750_v24, 1  ;;  %v7774_v19 = vmul.f32 0.125, %v7746_v49 }
 0x5f3   :  { %v7758_v21 = vadd.f32 %v7757_v56, %v7756_v41  ;;  %v7772_v11 = vmul.f32 0.125, %v7734_v14 }
 0x5f4   :  { %v7690_v39 = vadd.f32 %v7689_v8, %v7688_v23  ;;  %v7695_v44 = vrot.slane %v7694_v9, 2  ;;  %v7727_v23 = vrot.slane %v7726_v25, 1 }
 0x5f5   :  { %v7781_v46 = vadd.f32 1e-05, %v7772_v11 }
 0x5f6   :  { %v7691_v51 = vrot.slane %v7690_v39, 1  ;;  %v7696_v28 = vadd.f32 %v7695_v44, %v7694_v9  ;;  %v7728_v10 = vadd.f32 %v7727_v23, %v7726_v25 }
 0x5f8   :  { %v7692_v5 = vadd.f32 %v7691_v51, %v7690_v39  ;;  %v7697_v48 = vrot.slane %v7696_v28, 1  ;;  %v7752_v51 = vadd.f32 %v7751_v22, %v7750_v24  ;;  %v7771_v29 = vmul.f32 0.125, %v7728_v10 }
 0x5fa   :  { %v15377_v53 = vmul.f32 0.125, %v7692_v5  ;;  %v7698_v58 = vadd.f32 %v7697_v48, %v7696_v28  ;;  %v7783_v5 = vadd.f32 1e-05, %v7774_v19  ;;  %v7776_v48 = vmul.f32 0.125, %v7758_v21 }
 0x5fb   :  { %v7775_v36 = vmul.f32 0.125, %v7752_v51  ;;  %v7780_v25 = vadd.f32 1e-05, %v7771_v29 }
 0x5fc   :  { %v7713_v38 = vsub.f32 %v15369_v47, %v15377_v53  ;;  %v15381_v15 = vmul.f32 0.125, %v7698_v58  ;;  %14574 = vrsqrt.f32 %v7783_v5  ;;  %v7785_v41 = vadd.f32 1e-05, %v7776_v48 }
 0x5fd   :  { %14576 = vrsqrt.f32 %v7781_v46  ;;  %v7784_v24 = vadd.f32 1e-05, %v7775_v36  ;;  %v7779_v36 = vld [vmem:[#allocation10] sm:$0xff] }
 0x5fe   :  { %v7721_v27 = vmul.f32 %v7713_v38, %v7713_v38  ;;  %v7714_v43 = vsub.f32 %v15372_v54, %v15381_v15  ;;  %14578 = vrsqrt.f32 %v7782_v52 }
 0x5ff   :  { %14580 = vrsqrt.f32 %v7780_v25 }
 0x600   :  { %v7759_v8 = vrot.slane %v7721_v27, 4  ;;  %v7722_v9 = vmul.f32 %v7714_v43, %v7714_v43  ;;  %14582 = vrsqrt.f32 %v7785_v41 }
 0x601   :  { %14584 = vrsqrt.f32 %v7784_v24 }
 0x602   :  { %v7760_v39 = vadd.f32 %v7759_v8, %v7721_v27  ;;  %v7765_v44 = vrot.slane %v7722_v9, 4 }
 0x604   :  { %v7761_v28 = vrot.slane %v7760_v39, 2  ;;  %v7766_v50 = vadd.f32 %v7765_v44, %v7722_v9 }
 0x606   :  { %v7762_v12 = vadd.f32 %v7761_v28, %v7760_v39  ;;  %v7767_v58 = vrot.slane %v7766_v50, 2 }
 0x608   :  { %v7763_v30 = vrot.slane %v7762_v12, 1  ;;  %v7768_v38 = vadd.f32 %v7767_v58, %v7766_v50 }
 0x609   :  { %v14575_v22 = vpop.eup %14574 }
 0x60a   :  { %v7764_v23 = vadd.f32 %v7763_v30, %v7762_v12  ;;  %v7769_v49 = vrot.slane %v7768_v38, 1  ;;  %v14577_v8 = vpop.eup %14576 }
 0x60b   :  { %v14579_v9 = vpop.eup %14578 }
 0x60c   :  { %v7777_v56 = vmul.f32 0.125, %v7764_v23  ;;  %v7770_v27 = vadd.f32 %v7769_v49, %v7768_v38  ;;  %v14581_v10 = vpop.eup %14580  ;;  %v7805_v19 = vcombine.low %v14579_v9, %v14575_v22 }
 0x60d   :  { %v14583_v21 = vpop.eup %14582  ;;  %v7804_v39 = vcombine.low %v14581_v10, %v14577_v8 }
 0x60e   :  { %v7786_v43 = vadd.f32 1e-05, %v7777_v56  ;;  %v7778_v14 = vmul.f32 0.125, %v7770_v27  ;;  %v14585_v44 = vpop.eup %14584  ;;  %v7821_v4 = vrot.slane %v7805_v19, %v15162_v57 }
 0x60f   :  { %v7806_v51 = vcombine.low %v14585_v44, %v14583_v21  ;;  %v7814_v50 = vrot.slane %v7804_v39, %v15162_v57 }
 0x610   :  { %v7787_v18 = vadd.f32 1e-05, %v7778_v14  ;;  %14586 = vrsqrt.f32 %v7786_v43 }
 0x611   :  { %v7836_v5 = vcombine.low %v7814_v50, %v7821_v4  ;;  %v7828_v48 = vrot.slane %v7806_v51, %v15162_v57 }
 0x612   :  { %14588 = vrsqrt.f32 %v7787_v18 }
 0x613   :  { %v7844_v46 = vrot.slane %v7836_v5, %v15162_v57 }
 0x61d   :  { %v14587_v11 = vpop.eup %14586 }
 0x61f   :  { %v14589_v28 = vpop.eup %14588 }
 0x620   :  { %v7807_v29 = vcombine.low %v14587_v11, %v14589_v28  ;;  %v7855_v28 = vld [vmem:[#allocation11] sm:$0xff] }
 0x622   :  { %v7835_v12 = vrot.slane %v7807_v29, %v15162_v57 }
 0x624   :  { %v7837_v58 = vcombine.low %v7828_v48, %v7835_v12 }
 0x626   :  { %v7851_v52 = vrot.slane %v7837_v58, %v15162_v57 }
 0x628   :  { %v7852_v30 = vcombine.low %v7844_v46, %v7851_v52 }
 0x62a   :  { %v7854_v38 = vmul.f32 %v7852_v30, %v7779_v36 }
 0x62c   :  { %v7876_v25 = vrot.slane %v7854_v38, %v15170_v20  ;;  %v7880_v41 = vrot.slane %v7854_v38, %v15172_v26  ;;  %v7884_v23 = vrot.slane %v7854_v38, %v15174_v59  ;;  %v7888_v49 = vrot.slane %v7854_v38, %v15176_v31 }
 0x62d   :  { %v7860_v24 = vrot.slane %v7854_v38, %v15178_v32  ;;  %v7864_v56 = vrot.slane %v7854_v38, %v15180_v34  ;;  %v7868_v27 = vrot.slane %v7854_v38, %v15182_v37  ;;  %v7872_v43 = vrot.slane %v7854_v38, %v15184_v40 }
 0x62e   :  { %v7901_v14 = vmul.f32 %v7876_v25, %v15358_v6  ;;  %v7902_v18 = vmul.f32 %v7880_v41, %v15352_v33  ;;  %v7903_v22 = vmul.f32 %v7884_v23, %v15377_v53  ;;  %v7904_v8 = vmul.f32 %v7888_v49, %v15381_v15 }
 0x62f   :  { %v7971_v9 = vmul.f32 %v7888_v49, %v15372_v54  ;;  %v7897_v10 = vmul.f32 %v7860_v24, %v15348_v1  ;;  %v7898_v19 = vmul.f32 %v7864_v56, %v15344_v55  ;;  %v7899_v21 = vmul.f32 %v7868_v27, %v15346_v35 }
 0x630   :  { %v7915_v39 = vcombine.low %v7901_v14, %v7902_v18  ;;  %v7916_v44 = vcombine.low %v7903_v22, %v7904_v8  ;;  %v7900_v11 = vmul.f32 %v7872_v43, %v15342_v16  ;;  %v7965_v16 = vmul.f32 %v7864_v56, %v15282_v17  ;;  %v8341_v22 = vld [vmem:[#allocation13 + $0x980] sm:$0xff] }
 0x631   :  { %v7913_v4 = vcombine.low %v7897_v10, %v7898_v19  ;;  %v7967_v5 = vmul.f32 %v7872_v43, %v15300_v7  ;;  %v7964_v48 = vmul.f32 %v7860_v24, %v15278_v60  ;;  %v7966_v12 = vmul.f32 %v7868_v27, %v15296_v42  ;;  %v8345_v19 = vld [vmem:[#allocation13 + $0x9a0] sm:$0xff] }
 0x632   :  { %v7937_v6 = vrot.slane %v7915_v39, %v15162_v57  ;;  %v7944_v33 = vrot.slane %v7916_v44, %v15162_v57  ;;  %v7914_v53 = vcombine.low %v7899_v21, %v7900_v11  ;;  %v7969_v58 = vmul.f32 %v7880_v41, %v15306_v0  ;;  %v8469_v21 = vld [vmem:[#allocation13 + $0xd80] sm:$0xff] }
 0x633   :  { %v7923_v15 = vrot.slane %v7913_v4, %v15162_v57  ;;  %v7968_v46 = vmul.f32 %v7876_v25, %v15304_v62  ;;  %v7970_v52 = vmul.f32 %v7884_v23, %v15369_v47  ;;  %v8473_v39 = vld [vmem:[#allocation13 + $0xda0] sm:$0xff] }
 0x634   :  { %v7946_v51 = vcombine.low %v7937_v6, %v7944_v33  ;;  %v7930_v54 = vrot.slane %v7914_v53, %v15162_v57  ;;  %v8333_v6 = vld [vmem:[#allocation13 + $0x940] sm:$0xff]  ;;  %v14116_v33 = vcombine.high %v8341_v22, %v8345_v19  ;;  %v14244_v53 = vcombine.high %v8469_v21, %v8473_v39 }
 0x636   :  { %v7960_v1 = vrot.slane %v7946_v51, %v15162_v57  ;;  %v7945_v55 = vcombine.low %v7923_v15, %v7930_v54  ;;  %v8337_v15 = vld [vmem:[#allocation13 + $0x960] sm:$0xff] }
 0x637   :  { %v8461_v51 = vld [vmem:[#allocation13 + $0xd40] sm:$0xff]  ;;  %v14107_v61 = vcombine.low %v8333_v6, %v8337_v15 }
 0x638   :  { %v7953_v35 = vrot.slane %v7945_v55, %v15162_v57  ;;  %v8465_v54 = vld [vmem:[#allocation13 + $0xd60] sm:$0xff] }
 0x639   :  { %v14235_v63 = vcombine.low %v8461_v51, %v8465_v54 }
 0x63a   :  { %v7961_v50 = vcombine.low %v7953_v35, %v7960_v1  ;;  %v14115_v35 = vcombine.low %v8341_v22, %v8345_v19  ;;  %v8421_v19 = vld [vmem:[#allocation13 + $0xc00] sm:$0xff] }
 0x63c   :  { %v7963_v29 = vsub.f32 %v7855_v28, %v7961_v50  ;;  %v14243_v28 = vcombine.low %v8469_v21, %v8473_v39  ;;  %v14108_v50 = vcombine.high %v8333_v6, %v8337_v15  ;;  %v8425_v21 = vld [vmem:[#allocation13 + $0xc20] sm:$0xff] }
 0x63d   :  { %v8413_v15 = vld [vmem:[#allocation13 + $0xbc0] sm:$0xff] }
 0x63e   :  { %v7980_v36 = vrot.slane %v7963_v29, %v15180_v34  ;;  %v7988_v30 = vrot.slane %v7963_v29, %v15184_v40  ;;  %v7976_v38 = vrot.slane %v7963_v29, %v15178_v32  ;;  %v7984_v17 = vrot.slane %v7963_v29, %v15182_v37 }
 0x63f   :  { %v7996_v7 = vrot.slane %v7963_v29, %v15172_v26  ;;  %v8004_v60 = vrot.slane %v7963_v29, %v15176_v31  ;;  %v7992_v42 = vrot.slane %v7963_v29, %v15170_v20  ;;  %v8000_v0 = vrot.slane %v7963_v29, %v15174_v59 }
 0x640   :  { %v8014_v41 = vadd.f32 %v7980_v36, %v7965_v16  ;;  %v8016_v62 = vadd.f32 %v7988_v30, %v7967_v5  ;;  %v8013_v25 = vadd.f32 %v7976_v38, %v7964_v48  ;;  %v8015_v47 = vadd.f32 %v7984_v17, %v7966_v12  ;;  %v8325_v16 = vld [vmem:[#allocation13 + $0x900] sm:$0xff] }
 0x641   :  { %v8018_v23 = vadd.f32 %v7996_v7, %v7969_v58  ;;  %v8020_v49 = vadd.f32 %v8004_v60, %v7971_v9  ;;  %v15429_v24 = vadd.f32 %v7992_v42, %v7968_v46  ;;  %v15431_v56 = vadd.f32 %v8000_v0, %v7970_v52  ;;  %v8329_v5 = vld [vmem:[#allocation13 + $0x920] sm:$0xff] }
 0x642   :  { %v8022_v27 = vmax.f32 %v8014_v41, 0.0  ;;  %v8024_v43 = vmax.f32 %v8016_v62, 0.0  ;;  %v8021_v14 = vmax.f32 %v8013_v25, 0.0  ;;  %v8023_v18 = vmax.f32 %v8015_v47, 0.0  ;;  %v8453_v48 = vld [vmem:[#allocation13 + $0xd00] sm:$0xff] }
 0x643   :  { %v8026_v8 = vmax.f32 %v8018_v23, 0.0  ;;  %v8028_v10 = vmax.f32 %v8020_v49, 0.0  ;;  %v14236_v29 = vcombine.high %v8461_v51, %v8465_v54  ;;  %v8457_v12 = vld [vmem:[#allocation13 + $0xd20] sm:$0xff]  ;;  %v14100_v2 = vcombine.high %v8325_v16, %v8329_v5 }
 0x644   :  { %v15433_v44 = vpack.c.bf16 %v8022_v27, %v8022_v27  ;;  %v15435_v11 = vpack.c.bf16 %v8024_v43, %v8024_v43  ;;  %v15437_v4 = vpack.c.bf16 %v8021_v14, %v8021_v14  ;;  %v15439_v9 = vpack.c.bf16 %v8023_v18, %v8023_v18  ;;  %v8445_v58 = vld [vmem:[#allocation13 + $0xcc0] sm:$0xff] }
 0x645   :  { %v15445_v1 = vpack.c.bf16 %v8026_v8, %v8026_v8  ;;  %v15447_v55 = vpack.c.bf16 %v8028_v10, %v8028_v10  ;;  %v14228_v45 = vcombine.high %v8453_v48, %v8457_v12  ;;  %v8449_v46 = vld [vmem:[#allocation13 + $0xce0] sm:$0xff]  ;;  %v14099_v52 = vcombine.low %v8325_v16, %v8329_v5 }
 0x646   :  { %11141 = vmatprep.mubr.bf16.mxu0 %v15433_v44  ;;  %11182 = vmatprep.mubr.bf16.mxu1 %v15435_v11  ;;  %v14227_v36 = vcombine.low %v8453_v48, %v8457_v12  ;;  %v14220_v38 = vcombine.high %v8445_v58, %v8449_v46  ;;  %v8309_v17 = vld [vmem:[#allocation13 + $0x880] sm:$0xff]  ;;  %v14219_v41 = vcombine.low %v8445_v58, %v8449_v46 }
 0x647   :  { %11142 = vmatmul.mubr.bf16.vlgmr.msra.gmra.mxu0 %v15437_v4  ;;  %11183 = vmatmul.mubr.bf16.vlgmr.msra.gmra.mxu1 %v15439_v9  ;;  %v8313_v7 = vld [vmem:[#allocation13 + $0x8a0] sm:$0xff] }
 0x648   :  { %11192 = vmatpush1.bf16.msra.mxu0 %v14123_v3  ;;  %11233 = vmatpush1.bf16.msra.mxu1 %v14251_v13  ;;  %v8317_v3 = vld [vmem:[#allocation13 + $0x8c0] sm:$0xff]  ;;  %v14084_v62 = vcombine.high %v8309_v17, %v8313_v7  ;;  %v14083_v43 = vcombine.low %v8309_v17, %v8313_v7 }
 0x649   :  { %11223 = vmatprep.mubr.bf16.mxu0 %v15445_v1  ;;  %11264 = vmatprep.mubr.bf16.mxu1 %v15447_v55  ;;  %v8321_v13 = vld [vmem:[#allocation13 + $0x8e0] sm:$0xff] }
 0x64a   :  { %11193 = vmatprep.subr.bf16.mxu0 %v14116_v33  ;;  %11234 = vmatprep.subr.bf16.mxu1 %v14244_v53  ;;  %v14092_v30 = vcombine.high %v8317_v3, %v8321_v13  ;;  %v8437_v60 = vld [vmem:[#allocation13 + $0xc80] sm:$0xff]  ;;  %v14091_v0 = vcombine.low %v8317_v3, %v8321_v13  ;;  %v14196_v53 = vcombine.high %v8421_v19, %v8425_v21 }
 0x64b   :  { %v8441_v42 = vld [vmem:[#allocation13 + $0xca0] sm:$0xff] }
 0x64c   :  { %11194 = vmatpush1.bf16.msra.mxu0 %v14115_v35  ;;  %11235 = vmatpush1.bf16.msra.mxu1 %v14243_v28  ;;  %v14212_v25 = vcombine.high %v8437_v60, %v8441_v42  ;;  %v8301_v47 = vld [vmem:[#allocation13 + $0x840] sm:$0xff]  ;;  %v14211_v14 = vcombine.low %v8437_v60, %v8441_v42 }
 0x64d   :  { %11195 = vmatprep.subr.bf16.mxu0 %v14108_v50  ;;  %11236 = vmatprep.subr.bf16.mxu1 %v14236_v29  ;;  %v8305_v23 = vld [vmem:[#allocation13 + $0x860] sm:$0xff]  ;;  %v14195_v50 = vcombine.low %v8421_v19, %v8425_v21 }
 0x64e   :  { %v8429_v49 = vld [vmem:[#allocation13 + $0xc40] sm:$0xff]  ;;  %v14076_v18 = vcombine.high %v8301_v47, %v8305_v23  ;;  %v14075_v39 = vcombine.low %v8301_v47, %v8305_v23 }
 0x64f   :  { %v8433_v27 = vld [vmem:[#allocation13 + $0xc60] sm:$0xff] }
 0x650   :  { %11196 = vmatpush1.bf16.msra.mxu0 %v14107_v61  ;;  %11237 = vmatpush1.bf16.msra.mxu1 %v14235_v63  ;;  %v14204_v22 = vcombine.high %v8429_v49, %v8433_v27  ;;  %v8293_v8 = vld [vmem:[#allocation13 + $0x800] sm:$0xff]  ;;  %v14203_v6 = vcombine.low %v8429_v49, %v8433_v27 }
 0x651   :  { %11197 = vmatprep.subr.bf16.mxu0 %v14100_v2  ;;  %11238 = vmatprep.subr.bf16.mxu1 %v14228_v45  ;;  %v8297_v10 = vld [vmem:[#allocation13 + $0x820] sm:$0xff] }
 0x652   :  { %v14068_v33 = vcombine.high %v8293_v8, %v8297_v10  ;;  %v8417_v51 = vld [vmem:[#allocation13 + $0xbe0] sm:$0xff]  ;;  %v14067_v28 = vcombine.low %v8293_v8, %v8297_v10 }
 0x653   :  { %v8541_v54 = vld [vmem:[#allocation13 + $0xfc0] sm:$0xff]  ;;  %v14188_v29 = vcombine.high %v8413_v15, %v8417_v51  ;;  %v14187_v63 = vcombine.low %v8413_v15, %v8417_v51 }
 0x654   :  { %11198 = vmatpush1.bf16.msra.mxu0 %v14099_v52  ;;  %11239 = vmatpush1.bf16.msra.mxu1 %v14227_v36  ;;  %v8545_v35 = vld [vmem:[#allocation13 + $0xfe0] sm:$0xff] }
 0x655   :  { %11199 = vmatprep.subr.bf16.mxu0 %v14092_v30  ;;  %11240 = vmatprep.subr.bf16.mxu1 %v14220_v38  ;;  %v14316_v16 = vcombine.high %v8541_v54, %v8545_v35  ;;  %v8405_v5 = vld [vmem:[#allocation13 + $0xb80] sm:$0xff]  ;;  %v14315_v2 = vcombine.low %v8541_v54, %v8545_v35 }
 0x656   :  { %v8409_v48 = vld [vmem:[#allocation13 + $0xba0] sm:$0xff] }
 0x657   :  { %v8533_v12 = vld [vmem:[#allocation13 + $0xf80] sm:$0xff]  ;;  %v14180_v45 = vcombine.high %v8405_v5, %v8409_v48  ;;  %v14179_v36 = vcombine.low %v8405_v5, %v8409_v48 }
 0x658   :  { %11200 = vmatpush1.bf16.msra.mxu0 %v14091_v0  ;;  %11241 = vmatpush1.bf16.msra.mxu1 %v14219_v41  ;;  %v8537_v61 = vld [vmem:[#allocation13 + $0xfa0] sm:$0xff] }
 0x659   :  { %11201 = vmatprep.subr.bf16.mxu0 %v14084_v62  ;;  %11242 = vmatprep.subr.bf16.mxu1 %v14212_v25  ;;  %v14308_v3 = vcombine.high %v8533_v12, %v8537_v61  ;;  %v8397_v13 = vld [vmem:[#allocation13 + $0xb40] sm:$0xff]  ;;  %v14307_v30 = vcombine.low %v8533_v12, %v8537_v61 }
 0x65a   :  { %v8401_v58 = vld [vmem:[#allocation13 + $0xb60] sm:$0xff] }
 0x65b   :  { %v8525_v46 = vld [vmem:[#allocation13 + $0xf40] sm:$0xff]  ;;  %v14172_v38 = vcombine.high %v8397_v13, %v8401_v58  ;;  %v14171_v41 = vcombine.low %v8397_v13, %v8401_v58  ;;  %v8094_v58 = vld [vmem:[#allocation13 + $0x1c8] sm:$0xff] }
 0x65c   :  { %11202 = vmatpush1.bf16.msra.mxu0 %v14083_v43  ;;  %11243 = vmatpush1.bf16.msra.mxu1 %v14211_v14  ;;  %v8529_v52 = vld [vmem:[#allocation13 + $0xf60] sm:$0xff] }
 0x65d   :  { %11203 = vmatprep.subr.bf16.mxu0 %v14076_v18  ;;  %11244 = vmatprep.subr.bf16.mxu1 %v14204_v22  ;;  %v14300_v17 = vcombine.high %v8525_v46, %v8529_v52  ;;  %v8389_v7 = vld [vmem:[#allocation13 + $0xb00] sm:$0xff]  ;;  %v14299_v62 = vcombine.low %v8525_v46, %v8529_v52  ;;  %v8098_v46 = vld [vmem:[#allocation13 + $0x1e8] sm:$0xff] }
 0x65e   :  { %v8393_v60 = vld [vmem:[#allocation13 + $0xb20] sm:$0xff]  ;;  %v8222_v52 = vld [vmem:[#allocation13 + $0x5c8] sm:$0xff] }
 0x65f   :  { %v8517_v42 = vld [vmem:[#allocation13 + $0xf00] sm:$0xff]  ;;  %v14164_v25 = vcombine.high %v8389_v7, %v8393_v60  ;;  %v14163_v14 = vcombine.low %v8389_v7, %v8393_v60  ;;  %v8027_v7 = vmax.f32 %v15431_v56, 0.0  ;;  %v13870_v60 = vcombine.high %v8094_v58, %v8098_v46  ;;  %v8082_v56 = vld [vmem:[#allocation13 + $0x168] sm:$0xff] }
 0x660   :  { %11204 = vmatpush1.bf16.msra.mxu0 %v14075_v39  ;;  %11245 = vmatpush1.bf16.msra.mxu1 %v14203_v6  ;;  %v8521_v0 = vld [vmem:[#allocation13 + $0xf20] sm:$0xff] }
 0x661   :  { %11205 = vmatprep.subr.bf16.mxu0 %v14068_v33  ;;  %11246 = vmatprep.subr.bf16.mxu1 %v14196_v53  ;;  %v14292_v47 = vcombine.high %v8517_v42, %v8521_v0  ;;  %v8381_v23 = vld [vmem:[#allocation13 + $0xac0] sm:$0xff]  ;;  %v14291_v18 = vcombine.low %v8517_v42, %v8521_v0  ;;  %v8086_v0 = vld [vmem:[#allocation13 + $0x188] sm:$0xff] }
 0x662   :  { %v8385_v49 = vld [vmem:[#allocation13 + $0xae0] sm:$0xff] }
 0x663   :  { %v8509_v27 = vld [vmem:[#allocation13 + $0xec0] sm:$0xff]  ;;  %v14156_v22 = vcombine.high %v8381_v23, %v8385_v49  ;;  %v14155_v6 = vcombine.low %v8381_v23, %v8385_v49  ;;  %v15461_v49 = vpack.c.bf16 %v8027_v7, %v8027_v7 }
 0x664   :  { %11206 = vmatpush1.bf16.msra.mxu0 %v14067_v28  ;;  %11247 = vmatpush1.bf16.msra.mxu1 %v14195_v50  ;;  %v8513_v43 = vld [vmem:[#allocation13 + $0xee0] sm:$0xff] }
 0x665   :  { %11207 = vmatprep.subr.bf16.mxu0 %v14188_v29  ;;  %11248 = vmatprep.subr.bf16.mxu1 %v14316_v16  ;;  %v14284_v8 = vcombine.high %v8509_v27, %v8513_v43  ;;  %v8373_v10 = vld [vmem:[#allocation13 + $0xa80] sm:$0xff]  ;;  %v14283_v33 = vcombine.low %v8509_v27, %v8513_v43 }
 0x666   :  { %v8377_v19 = vld [vmem:[#allocation13 + $0xaa0] sm:$0xff] }
 0x667   :  { %v8501_v21 = vld [vmem:[#allocation13 + $0xe80] sm:$0xff]  ;;  %v14148_v53 = vcombine.high %v8373_v10, %v8377_v19  ;;  %v14147_v50 = vcombine.low %v8373_v10, %v8377_v19 }
 0x668   :  { %11208 = vmatpush2.bf16.msra.mxu0 %v14187_v63  ;;  %11249 = vmatpush2.bf16.msra.mxu1 %v14315_v2  ;;  %v8505_v39 = vld [vmem:[#allocation13 + $0xea0] sm:$0xff] }
 0x669   :  { %11209 = vmatprep.subr.bf16.mxu0 %v14180_v45  ;;  %11250 = vmatprep.subr.bf16.mxu1 %v14308_v3  ;;  %v14276_v15 = vcombine.high %v8501_v21, %v8505_v39  ;;  %v8365_v51 = vld [vmem:[#allocation13 + $0xa40] sm:$0xff]  ;;  %v14275_v29 = vcombine.low %v8501_v21, %v8505_v39  ;;  %v8070_v39 = vld [vmem:[#allocation13 + $0x108] sm:$0xff] }
 0x66a   :  { %v8369_v54 = vld [vmem:[#allocation13 + $0xa60] sm:$0xff] }
 0x66b   :  { %v8493_v35 = vld [vmem:[#allocation13 + $0xe40] sm:$0xff]  ;;  %v14140_v16 = vcombine.high %v8365_v51, %v8369_v54  ;;  %v14139_v2 = vcombine.low %v8365_v51, %v8369_v54 }
 0x66c   :  { %11210 = vmatpush2.bf16.msra.mxu0 %v14179_v36  ;;  %11251 = vmatpush2.bf16.msra.mxu1 %v14307_v30  ;;  %v8497_v28 = vld [vmem:[#allocation13 + $0xe60] sm:$0xff]  ;;  %v8226_v36 = vld [vmem:[#allocation13 + $0x5e8] sm:$0xff] }
 0x66d   :  { %11211 = vmatprep.subr.bf16.mxu0 %v14172_v38  ;;  %11252 = vmatprep.subr.bf16.mxu1 %v14300_v17  ;;  %v14268_v5 = vcombine.high %v8493_v35, %v8497_v28  ;;  %v8357_v48 = vld [vmem:[#allocation13 + $0xa00] sm:$0xff]  ;;  %v14267_v45 = vcombine.low %v8493_v35, %v8497_v28  ;;  %v8025_v17 = vmax.f32 %v15429_v24, 0.0  ;;  %v13998_v42 = vcombine.high %v8222_v52, %v8226_v36  ;;  %v8062_v28 = vld [vmem:[#allocation13 + $0xc8] sm:$0xff] }
 0x66e   :  { %v8361_v12 = vld [vmem:[#allocation13 + $0xa20] sm:$0xff]  ;;  %v13997_v27 = vcombine.low %v8222_v52, %v8226_v36  ;;  %v8046_v36 = vld [vmem:[#allocation13 + $0x48] sm:$0xff] }
 0x66f   :  { %v8485_v61 = vld [vmem:[#allocation13 + $0xe00] sm:$0xff]  ;;  %v14132_v3 = vcombine.high %v8357_v48, %v8361_v12  ;;  %v14131_v30 = vcombine.low %v8357_v48, %v8361_v12  ;;  %v15459_v23 = vpack.c.bf16 %v8025_v17, %v8025_v17  ;;  %v8178_v17 = vld [vmem:[#allocation13 + $0x468] sm:$0xff] }
 0x670   :  { %11212 = vmatpush2.bf16.msra.mxu0 %v14171_v41  ;;  %11253 = vmatpush2.bf16.msra.mxu1 %v14299_v62  ;;  %v8489_v63 = vld [vmem:[#allocation13 + $0xe20] sm:$0xff]  ;;  %v8090_v41 = vld [vmem:[#allocation13 + $0x1a8] sm:$0xff] }
 0x671   :  { %11213 = vmatprep.subr.bf16.mxu0 %v14164_v25  ;;  %11254 = vmatprep.subr.bf16.mxu1 %v14292_v47  ;;  %v14260_v13 = vcombine.high %v8485_v61, %v8489_v63  ;;  %v14259_v38 = vcombine.low %v8485_v61, %v8489_v63  ;;  %v8214_v62 = vld [vmem:[#allocation13 + $0x588] sm:$0xff]  ;;  %v13869_v47 = vcombine.low %v8094_v58, %v8098_v46 }
 0x672   :  { %v8218_v25 = vld [vmem:[#allocation13 + $0x5a8] sm:$0xff]  ;;  %v13862_v43 = vcombine.high %v8086_v0, %v8090_v41 }
 0x673   :  { %v13990_v24 = vcombine.high %v8214_v62, %v8218_v25  ;;  %v13989_v10 = vcombine.low %v8214_v62, %v8218_v25  ;;  %v8054_v63 = vld [vmem:[#allocation13 + $0x88] sm:$0xff] }
 0x674   :  { %11214 = vmatpush2.bf16.msra.mxu0 %v14163_v14  ;;  %11255 = vmatpush2.bf16.msra.mxu1 %v14291_v18  ;;  %v8078_v14 = vld [vmem:[#allocation13 + $0x148] sm:$0xff] }
 0x675   :  { %11215 = vmatprep.subr.bf16.mxu0 %v14156_v22  ;;  %11256 = vmatprep.subr.bf16.mxu1 %v14284_v8  ;;  %v8206_v18 = vld [vmem:[#allocation13 + $0x548] sm:$0xff]  ;;  %v13861_v8 = vcombine.low %v8086_v0, %v8090_v41  ;;  %v13854_v19 = vcombine.high %v8078_v14, %v8082_v56 }
 0x676   :  { %v8210_v22 = vld [vmem:[#allocation13 + $0x568] sm:$0xff] }
 0x677   :  { %v13982_v21 = vcombine.high %v8206_v18, %v8210_v22  ;;  %v13981_v51 = vcombine.low %v8206_v18, %v8210_v22  ;;  %v8038_v41 = vld [vmem:[#allocation13 + $0x8] sm:$0xff] }
 0x678   :  { %11216 = vmatpush2.bf16.msra.mxu0 %v14155_v6  ;;  %11257 = vmatpush2.bf16.msra.mxu1 %v14283_v33  ;;  %v8074_v6 = vld [vmem:[#allocation13 + $0x128] sm:$0xff] }
 0x679   :  { %11217 = vmatprep.subr.bf16.mxu0 %v14148_v53  ;;  %11258 = vmatprep.subr.bf16.mxu1 %v14276_v15  ;;  %v8198_v33 = vld [vmem:[#allocation13 + $0x508] sm:$0xff]  ;;  %v13853_v15 = vcombine.low %v8078_v14, %v8082_v56  ;;  %v13846_v54 = vcombine.high %v8070_v39, %v8074_v6 }
 0x67a   :  { %v8202_v53 = vld [vmem:[#allocation13 + $0x528] sm:$0xff] }
 0x67b   :  { %v13974_v35 = vcombine.high %v8198_v33, %v8202_v53  ;;  %v13973_v48 = vcombine.low %v8198_v33, %v8202_v53  ;;  %v8042_v62 = vld [vmem:[#allocation13 + $0x28] sm:$0xff] }
 0x67c   :  { %11218 = vmatpush2.bf16.msra.mxu0 %v14147_v50  ;;  %11259 = vmatpush2.bf16.msra.mxu1 %v14275_v29  ;;  %v8066_v50 = vld [vmem:[#allocation13 + $0xe8] sm:$0xff] }
 0x67d   :  { %11219 = vmatprep.subr.bf16.mxu0 %v14140_v16  ;;  %11260 = vmatprep.subr.bf16.mxu1 %v14268_v5  ;;  %v8190_v29 = vld [vmem:[#allocation13 + $0x4c8] sm:$0xff]  ;;  %v13845_v5 = vcombine.low %v8070_v39, %v8074_v6  ;;  %v13838_v12 = vcombine.high %v8062_v28, %v8066_v50 }
 0x67e   :  { %v8194_v16 = vld [vmem:[#allocation13 + $0x4e8] sm:$0xff] }
 0x67f   :  { %v13966_v61 = vcombine.high %v8190_v29, %v8194_v16  ;;  %v13965_v58 = vcombine.low %v8190_v29, %v8194_v16  ;;  %v8166_v25 = vld [vmem:[#allocation13 + $0x408] sm:$0xff] }
 0x680   :  { %11220 = vmatpush2.bf16.msra.mxu0 %v14139_v2  ;;  %11261 = vmatpush2.bf16.msra.mxu1 %v14267_v45  ;;  %v8058_v2 = vld [vmem:[#allocation13 + $0xa8] sm:$0xff] }
 0x681   :  { %11221 = vmatprep.subr.bf16.mxu0 %v14132_v3  ;;  %11262 = vmatprep.subr.bf16.mxu1 %v14260_v13  ;;  %v8182_v45 = vld [vmem:[#allocation13 + $0x488] sm:$0xff]  ;;  %v13837_v13 = vcombine.low %v8062_v28, %v8066_v50  ;;  %v13830_v46 = vcombine.high %v8054_v63, %v8058_v2  ;;  %v13829_v7 = vcombine.low %v8054_v63, %v8058_v2 }
 0x682   :  { %v8186_v3 = vld [vmem:[#allocation13 + $0x4a8] sm:$0xff] }
 0x683   :  { %v13958_v52 = vcombine.high %v8182_v45, %v8186_v3  ;;  %v8158_v56 = vld [vmem:[#allocation13 + $0x3c8] sm:$0xff] }
 0x684   :  { %11222 = vmatpush2.bf16.msra.mxu0 %v14131_v30  ;;  %11263 = vmatpush2.bf16.msra.mxu1 %v14259_v38  ;;  %v8050_v30 = vld [vmem:[#allocation13 + $0x68] sm:$0xff] }
 0x685   :  { %11273 = vmatprep.subr.bf16.mxu0 %v13870_v60  ;;  %11314 = vmatprep.subr.bf16.mxu1 %v13998_v42  ;;  %v8174_v38 = vld [vmem:[#allocation13 + $0x448] sm:$0xff]  ;;  %v13957_v60 = vcombine.low %v8182_v45, %v8186_v3  ;;  %v13822_v42 = vcombine.high %v8046_v36, %v8050_v30 }
 0x686   :  { %v13950_v0 = vcombine.high %v8174_v38, %v8178_v17  ;;  %v8162_v18 = vld [vmem:[#allocation13 + $0x3e8] sm:$0xff] }
 0x687   :  { %11224 = vmatmul.mubr.bf16.vlgmr.msra.gmra.mxu0 %v15459_v23  ;;  %11265 = vmatmul.mubr.bf16.vlgmr.msra.gmra.mxu1 %v15461_v49  ;;  %v8286_v22 = vld [vmem:[#allocation13 + $0x7c8] sm:$0xff] }
 0x688   :  { %11274 = vmatpush1.bf16.msra.mxu0 %v13869_v47  ;;  %11305 = vmatprep.mubr.bf16.mxu0 %v15433_v44  ;;  %v8170_v47 = vld [vmem:[#allocation13 + $0x428] sm:$0xff] }
 0x689   :  { %11315 = vmatpush1.bf16.msra.mxu1 %v13997_v27  ;;  %11346 = vmatprep.mubr.bf16.mxu1 %v15435_v11  ;;  %v13821_v27 = vcombine.low %v8046_v36, %v8050_v30  ;;  %v13942_v14 = vcombine.high %v8166_v25, %v8170_v47  ;;  %v8150_v6 = vld [vmem:[#allocation13 + $0x388] sm:$0xff] }
 0x68a   :  { %11275 = vmatprep.subr.bf16.mxu0 %v13862_v43  ;;  %11316 = vmatprep.subr.bf16.mxu1 %v13990_v24  ;;  %v13949_v43 = vcombine.low %v8174_v38, %v8178_v17  ;;  %v13814_v24 = vcombine.high %v8038_v41, %v8042_v62  ;;  %v8154_v33 = vld [vmem:[#allocation13 + $0x3a8] sm:$0xff] }
 0x68b   :  { %v8278_v53 = vld [vmem:[#allocation13 + $0x788] sm:$0xff] }
 0x68c   :  { %11276 = vmatpush1.bf16.msra.mxu0 %v13861_v8  ;;  %v8290_v8 = vld [vmem:[#allocation13 + $0x7e8] sm:$0xff] }
 0x68d   :  { %11317 = vmatpush1.bf16.msra.mxu1 %v13989_v10  ;;  %11277 = vmatprep.subr.bf16.mxu0 %v13854_v19  ;;  %v13813_v10 = vcombine.low %v8038_v41, %v8042_v62  ;;  %v13941_v19 = vcombine.low %v8166_v25, %v8170_v47  ;;  %v14062_v39 = vcombine.high %v8286_v22, %v8290_v8  ;;  %v8142_v50 = vld [vmem:[#allocation13 + $0x348] sm:$0xff] }
 0x68e   :  { %11318 = vmatprep.subr.bf16.mxu1 %v13982_v21  ;;  %v13934_v21 = vcombine.high %v8158_v56, %v8162_v18  ;;  %v8146_v29 = vld [vmem:[#allocation13 + $0x368] sm:$0xff] }
 0x68f   :  { %v8270_v16 = vld [vmem:[#allocation13 + $0x748] sm:$0xff] }
 0x690   :  { %11278 = vmatpush1.bf16.msra.mxu0 %v13853_v15  ;;  %v8282_v15 = vld [vmem:[#allocation13 + $0x7a8] sm:$0xff] }
 0x691   :  { %11319 = vmatpush1.bf16.msra.mxu1 %v13981_v51  ;;  %11279 = vmatprep.subr.bf16.mxu0 %v13846_v54  ;;  %v13933_v51 = vcombine.low %v8158_v56, %v8162_v18  ;;  %v14061_v54 = vcombine.low %v8286_v22, %v8290_v8  ;;  %v14054_v28 = vcombine.high %v8278_v53, %v8282_v15  ;;  %v8134_v2 = vld [vmem:[#allocation13 + $0x308] sm:$0xff] }
 0x692   :  { %11320 = vmatprep.subr.bf16.mxu1 %v13974_v35  ;;  %v13926_v35 = vcombine.high %v8150_v6, %v8154_v33  ;;  %v8138_v45 = vld [vmem:[#allocation13 + $0x328] sm:$0xff] }
 0x693   :  { %v8262_v3 = vld [vmem:[#allocation13 + $0x708] sm:$0xff] }
 0x694   :  { %11280 = vmatpush1.bf16.msra.mxu0 %v13845_v5  ;;  %v8274_v5 = vld [vmem:[#allocation13 + $0x768] sm:$0xff] }
 0x695   :  { %11321 = vmatpush1.bf16.msra.mxu1 %v13973_v48  ;;  %11281 = vmatprep.subr.bf16.mxu0 %v13838_v12  ;;  %v13925_v48 = vcombine.low %v8150_v6, %v8154_v33  ;;  %v14053_v12 = vcombine.low %v8278_v53, %v8282_v15  ;;  %v14046_v63 = vcombine.high %v8270_v16, %v8274_v5  ;;  %v8126_v30 = vld [vmem:[#allocation13 + $0x2c8] sm:$0xff] }
 0x696   :  { %11322 = vmatprep.subr.bf16.mxu1 %v13966_v61  ;;  %v13918_v61 = vcombine.high %v8142_v50, %v8146_v29  ;;  %v8130_v38 = vld [vmem:[#allocation13 + $0x2e8] sm:$0xff] }
 0x697   :  { %v8254_v17 = vld [vmem:[#allocation13 + $0x6c8] sm:$0xff] }
 0x698   :  { %11282 = vmatpush1.bf16.msra.mxu0 %v13837_v13  ;;  %v8266_v13 = vld [vmem:[#allocation13 + $0x728] sm:$0xff] }
 0x699   :  { %11323 = vmatpush1.bf16.msra.mxu1 %v13965_v58  ;;  %11283 = vmatprep.subr.bf16.mxu0 %v13830_v46  ;;  %v13917_v58 = vcombine.low %v8142_v50, %v8146_v29  ;;  %v14045_v46 = vcombine.low %v8270_v16, %v8274_v5  ;;  %v14038_v36 = vcombine.high %v8262_v3, %v8266_v13  ;;  %v8118_v62 = vld [vmem:[#allocation13 + $0x288] sm:$0xff] }
 0x69a   :  { %11324 = vmatprep.subr.bf16.mxu1 %v13958_v52  ;;  %v13910_v52 = vcombine.high %v8134_v2, %v8138_v45  ;;  %v8122_v25 = vld [vmem:[#allocation13 + $0x2a8] sm:$0xff] }
 0x69b   :  { %v8246_v47 = vld [vmem:[#allocation13 + $0x688] sm:$0xff] }
 0x69c   :  { %11284 = vmatpush1.bf16.msra.mxu0 %v13829_v7  ;;  %v8258_v7 = vld [vmem:[#allocation13 + $0x6e8] sm:$0xff] }
 0x69d   :  { %11325 = vmatpush1.bf16.msra.mxu1 %v13957_v60  ;;  %11285 = vmatprep.subr.bf16.mxu0 %v13822_v42  ;;  %v13909_v60 = vcombine.low %v8134_v2, %v8138_v45  ;;  %v14037_v42 = vcombine.low %v8262_v3, %v8266_v13  ;;  %v14030_v41 = vcombine.high %v8254_v17, %v8258_v7  ;;  %v8110_v18 = vld [vmem:[#allocation13 + $0x248] sm:$0xff] }
 0x69e   :  { %11326 = vmatprep.subr.bf16.mxu1 %v13950_v0  ;;  %v13902_v0 = vcombine.high %v8126_v30, %v8130_v38  ;;  %v8114_v22 = vld [vmem:[#allocation13 + $0x268] sm:$0xff] }
 0x69f   :  { %v8238_v8 = vld [vmem:[#allocation13 + $0x648] sm:$0xff] }
 0x6a0   :  { %11286 = vmatpush1.bf16.msra.mxu0 %v13821_v27  ;;  %v8250_v27 = vld [vmem:[#allocation13 + $0x6a8] sm:$0xff] }
 0x6a1   :  { %11327 = vmatpush1.bf16.msra.mxu1 %v13949_v43  ;;  %11287 = vmatprep.subr.bf16.mxu0 %v13814_v24  ;;  %v13901_v43 = vcombine.low %v8126_v30, %v8130_v38  ;;  %v14029_v24 = vcombine.low %v8254_v17, %v8258_v7  ;;  %v14022_v56 = vcombine.high %v8246_v47, %v8250_v27  ;;  %v8102_v33 = vld [vmem:[#allocation13 + $0x208] sm:$0xff] }
 0x6a2   :  { %11328 = vmatprep.subr.bf16.mxu1 %v13942_v14  ;;  %v13894_v14 = vcombine.high %v8118_v62, %v8122_v25  ;;  %v8106_v53 = vld [vmem:[#allocation13 + $0x228] sm:$0xff] }
 0x6a3   :  { %v8230_v15 = vld [vmem:[#allocation13 + $0x608] sm:$0xff] }
 0x6a4   :  { %11288 = vmatpush1.bf16.msra.mxu0 %v13813_v10  ;;  %v8242_v10 = vld [vmem:[#allocation13 + $0x668] sm:$0xff] }
 0x6a5   :  { %11329 = vmatpush1.bf16.msra.mxu1 %v13941_v19  ;;  %11289 = vmatprep.subr.bf16.mxu0 %v13934_v21  ;;  %v13893_v19 = vcombine.low %v8118_v62, %v8122_v25  ;;  %v14021_v21 = vcombine.low %v8246_v47, %v8250_v27  ;;  %v14014_v6 = vcombine.high %v8238_v8, %v8242_v10  ;;  %v8350_v29 = vld [vmem:[#allocation13 + $0x9c8] sm:$0xff] }
 0x6a6   :  { %11330 = vmatprep.subr.bf16.mxu1 %v14062_v39  ;;  %v13886_v39 = vcombine.high %v8110_v18, %v8114_v22  ;;  %v8354_v16 = vld [vmem:[#allocation13 + $0x9e8] sm:$0xff] }
 0x6a7   :  { %v8478_v5 = vld [vmem:[#allocation13 + $0xdc8] sm:$0xff]  ;;  %v14125_v13 = vcombine.low %v8350_v29, %v8354_v16 }
 0x6a8   :  { %11290 = vmatpush2.bf16.msra.mxu0 %v13933_v51  ;;  %v8234_v51 = vld [vmem:[#allocation13 + $0x628] sm:$0xff] }
 0x6a9   :  { %11331 = vmatpush2.bf16.msra.mxu1 %v14061_v54  ;;  %11291 = vmatprep.subr.bf16.mxu0 %v13926_v35  ;;  %v13885_v54 = vcombine.low %v8110_v18, %v8114_v22  ;;  %v14013_v35 = vcombine.low %v8238_v8, %v8242_v10  ;;  %v14006_v50 = vcombine.high %v8230_v15, %v8234_v51  ;;  %v8342_v45 = vld [vmem:[#allocation13 + $0x988] sm:$0xff] }
 0x6aa   :  { %11332 = vmatprep.subr.bf16.mxu1 %v14054_v28  ;;  %v13878_v28 = vcombine.high %v8102_v33, %v8106_v53  ;;  %v8346_v3 = vld [vmem:[#allocation13 + $0x9a8] sm:$0xff] }
 0x6ab   :  { %v8334_v30 = vld [vmem:[#allocation13 + $0x948] sm:$0xff] }
 0x6ac   :  { %11292 = vmatpush2.bf16.msra.mxu0 %v13925_v48  ;;  %v8482_v48 = vld [vmem:[#allocation13 + $0xde8] sm:$0xff] }
 0x6ad   :  { %11333 = vmatpush2.bf16.msra.mxu1 %v14053_v12  ;;  %11293 = vmatprep.subr.bf16.mxu0 %v13918_v61  ;;  %v13877_v12 = vcombine.low %v8102_v33, %v8106_v53  ;;  %v14005_v61 = vcombine.low %v8230_v15, %v8234_v51  ;;  %v14254_v2 = vcombine.high %v8478_v5, %v8482_v48  ;;  %v8338_v38 = vld [vmem:[#allocation13 + $0x968] sm:$0xff] }
 0x6ae   :  { %11334 = vmatprep.subr.bf16.mxu1 %v14046_v63  ;;  %v14126_v63 = vcombine.high %v8350_v29, %v8354_v16  ;;  %v8462_v7 = vld [vmem:[#allocation13 + $0xd48] sm:$0xff] }
 0x6af   :  { %v8326_v25 = vld [vmem:[#allocation13 + $0x908] sm:$0xff] }
 0x6b0   :  { %11294 = vmatpush2.bf16.msra.mxu0 %v13917_v58  ;;  %v8470_v58 = vld [vmem:[#allocation13 + $0xd88] sm:$0xff] }
 0x6b1   :  { %11335 = vmatpush2.bf16.msra.mxu1 %v14045_v46  ;;  %11295 = vmatprep.subr.bf16.mxu0 %v13910_v52  ;;  %v8474_v46 = vld [vmem:[#allocation13 + $0xda8] sm:$0xff]  ;;  %v14253_v52 = vcombine.low %v8478_v5, %v8482_v48 }
 0x6b2   :  { %11336 = vmatprep.subr.bf16.mxu1 %v14038_v36  ;;  %v14118_v36 = vcombine.high %v8342_v45, %v8346_v3  ;;  %v14246_v17 = vcombine.high %v8470_v58, %v8474_v46  ;;  %v8330_v47 = vld [vmem:[#allocation13 + $0x928] sm:$0xff] }
 0x6b3   :  { %v8454_v27 = vld [vmem:[#allocation13 + $0xd08] sm:$0xff] }
 0x6b4   :  { %11296 = vmatpush2.bf16.msra.mxu0 %v13909_v60  ;;  %v8466_v60 = vld [vmem:[#allocation13 + $0xd68] sm:$0xff] }
 0x6b5   :  { %11337 = vmatpush2.bf16.msra.mxu1 %v14037_v42  ;;  %11297 = vmatprep.subr.bf16.mxu0 %v13902_v0  ;;  %v14117_v42 = vcombine.low %v8342_v45, %v8346_v3  ;;  %v14245_v0 = vcombine.low %v8470_v58, %v8474_v46  ;;  %v14238_v62 = vcombine.high %v8462_v7, %v8466_v60  ;;  %v8318_v22 = vld [vmem:[#allocation13 + $0x8c8] sm:$0xff] }
 0x6b6   :  { %11338 = vmatprep.subr.bf16.mxu1 %v14030_v41  ;;  %v14110_v41 = vcombine.high %v8334_v30, %v8338_v38  ;;  %v8322_v8 = vld [vmem:[#allocation13 + $0x8e8] sm:$0xff] }
 0x6b7   :  { %v8446_v10 = vld [vmem:[#allocation13 + $0xcc8] sm:$0xff] }
 0x6b8   :  { %11298 = vmatpush2.bf16.msra.mxu0 %v13901_v43  ;;  %v8458_v43 = vld [vmem:[#allocation13 + $0xd28] sm:$0xff] }
 0x6b9   :  { %11339 = vmatpush2.bf16.msra.mxu1 %v14029_v24  ;;  %11299 = vmatprep.subr.bf16.mxu0 %v13894_v14  ;;  %v14109_v24 = vcombine.low %v8334_v30, %v8338_v38  ;;  %v14237_v14 = vcombine.low %v8462_v7, %v8466_v60  ;;  %v14230_v18 = vcombine.high %v8454_v27, %v8458_v43  ;;  %v8310_v53 = vld [vmem:[#allocation13 + $0x888] sm:$0xff] }
 0x6ba   :  { %11340 = vmatprep.subr.bf16.mxu1 %v14022_v56  ;;  %v14102_v56 = vcombine.high %v8326_v25, %v8330_v47  ;;  %v8314_v15 = vld [vmem:[#allocation13 + $0x8a8] sm:$0xff] }
 0x6bb   :  { %v8438_v51 = vld [vmem:[#allocation13 + $0xc88] sm:$0xff] }
 0x6bc   :  { %11300 = vmatpush2.bf16.msra.mxu0 %v13893_v19  ;;  %v8450_v19 = vld [vmem:[#allocation13 + $0xce8] sm:$0xff] }
 0x6bd   :  { %11341 = vmatpush2.bf16.msra.mxu1 %v14021_v21  ;;  %11301 = vmatprep.subr.bf16.mxu0 %v13886_v39  ;;  %v14101_v21 = vcombine.low %v8326_v25, %v8330_v47  ;;  %v14229_v39 = vcombine.low %v8454_v27, %v8458_v43  ;;  %v14222_v33 = vcombine.high %v8446_v10, %v8450_v19  ;;  %v8302_v16 = vld [vmem:[#allocation13 + $0x848] sm:$0xff] }
 0x6be   :  { %11342 = vmatprep.subr.bf16.mxu1 %v14014_v6  ;;  %v14094_v6 = vcombine.high %v8318_v22, %v8322_v8  ;;  %v8306_v5 = vld [vmem:[#allocation13 + $0x868] sm:$0xff] }
 0x6bf   :  { %v8430_v48 = vld [vmem:[#allocation13 + $0xc48] sm:$0xff] }
 0x6c0   :  { %11302 = vmatpush2.bf16.msra.mxu0 %v13885_v54  ;;  %v8442_v54 = vld [vmem:[#allocation13 + $0xca8] sm:$0xff] }
 0x6c1   :  { %11343 = vmatpush2.bf16.msra.mxu1 %v14013_v35  ;;  %11303 = vmatprep.subr.bf16.mxu0 %v13878_v28  ;;  %v14093_v35 = vcombine.low %v8318_v22, %v8322_v8  ;;  %v14221_v28 = vcombine.low %v8446_v10, %v8450_v19  ;;  %v14214_v29 = vcombine.high %v8438_v51, %v8442_v54  ;;  %v8294_v3 = vld [vmem:[#allocation13 + $0x808] sm:$0xff] }
 0x6c2   :  { %11344 = vmatprep.subr.bf16.mxu1 %v14006_v50  ;;  %v14086_v50 = vcombine.high %v8310_v53, %v8314_v15  ;;  %v8422_v58 = vld [vmem:[#allocation13 + $0xc08] sm:$0xff] }
 0x6c3   :  { %v8426_v46 = vld [vmem:[#allocation13 + $0xc28] sm:$0xff] }
 0x6c4   :  { %11304 = vmatpush2.bf16.msra.mxu0 %v13877_v12  ;;  %v8434_v12 = vld [vmem:[#allocation13 + $0xc68] sm:$0xff]  ;;  %v14198_v38 = vcombine.high %v8422_v58, %v8426_v46 }
 0x6c5   :  { %11345 = vmatpush2.bf16.msra.mxu1 %v14005_v61  ;;  %11355 = vmatprep.subr.bf16.mxu0 %v14126_v63  ;;  %v14085_v61 = vcombine.low %v8310_v53, %v8314_v15  ;;  %v14213_v63 = vcombine.low %v8438_v51, %v8442_v54  ;;  %v14206_v45 = vcombine.high %v8430_v48, %v8434_v12  ;;  %v8418_v7 = vld [vmem:[#allocation13 + $0xbe8] sm:$0xff] }
 0x6c6   :  { %11396 = vmatprep.subr.bf16.mxu1 %v14254_v2  ;;  %v14078_v2 = vcombine.high %v8302_v16, %v8306_v5  ;;  %v8542_v60 = vld [vmem:[#allocation13 + $0xfc8] sm:$0xff] }
 0x6c7   :  { %11306 = vmatmul.mubr.bf16.vlgmr.msra.gmra.mxu0 %v15437_v4  ;;  %v8406_v47 = vld [vmem:[#allocation13 + $0xb88] sm:$0xff] }
 0x6c8   :  { %11347 = vmatmul.mubr.bf16.vlgmr.msra.gmra.mxu1 %v15439_v9  ;;  %11356 = vmatpush1.bf16.msra.mxu0 %v14125_v13  ;;  %v8298_v13 = vld [vmem:[#allocation13 + $0x828] sm:$0xff] }
 0x6c9   :  { %11387 = vmatprep.mubr.bf16.mxu0 %v15445_v1  ;;  %11397 = vmatpush1.bf16.msra.mxu1 %v14253_v52  ;;  %v14077_v52 = vcombine.low %v8302_v16, %v8306_v5  ;;  %v14070_v30 = vcombine.high %v8294_v3, %v8298_v13  ;;  %v8410_v27 = vld [vmem:[#allocation13 + $0xba8] sm:$0xff] }
 0x6ca   :  { %11428 = vmatprep.mubr.bf16.mxu1 %v15447_v55  ;;  %11357 = vmatprep.subr.bf16.mxu0 %v14118_v36  ;;  %v14205_v36 = vcombine.low %v8430_v48, %v8434_v12  ;;  %v8534_v43 = vld [vmem:[#allocation13 + $0xf88] sm:$0xff] }
 0x6cb   :  { %11398 = vmatprep.subr.bf16.mxu1 %v14246_v17  ;;  %v8414_v17 = vld [vmem:[#allocation13 + $0xbc8] sm:$0xff] }
 0x6cc   :  { %11358 = vmatpush1.bf16.msra.mxu0 %v14117_v42  ;;  %v8546_v42 = vld [vmem:[#allocation13 + $0xfe8] sm:$0xff] }
 0x6cd   :  { %11399 = vmatpush1.bf16.msra.mxu1 %v14245_v0  ;;  %11359 = vmatprep.subr.bf16.mxu0 %v14110_v41  ;;  %v14069_v0 = vcombine.low %v8294_v3, %v8298_v13  ;;  %v14197_v41 = vcombine.low %v8422_v58, %v8426_v46  ;;  %v14318_v25 = vcombine.high %v8542_v60, %v8546_v42  ;;  %v8398_v8 = vld [vmem:[#allocation13 + $0xb48] sm:$0xff] }
 0x6ce   :  { %11400 = vmatprep.subr.bf16.mxu1 %v14238_v62  ;;  %v14190_v62 = vcombine.high %v8414_v17, %v8418_v7  ;;  %v8402_v10 = vld [vmem:[#allocation13 + $0xb68] sm:$0xff] }
 0x6cf   :  { %v8526_v19 = vld [vmem:[#allocation13 + $0xf48] sm:$0xff] }
 0x6d0   :  { %11360 = vmatpush1.bf16.msra.mxu0 %v14109_v24  ;;  %v8538_v24 = vld [vmem:[#allocation13 + $0xfa8] sm:$0xff] }
 0x6d1   :  { %11401 = vmatpush1.bf16.msra.mxu1 %v14237_v14  ;;  %11361 = vmatprep.subr.bf16.mxu0 %v14102_v56  ;;  %v14189_v14 = vcombine.low %v8414_v17, %v8418_v7  ;;  %v14317_v56 = vcombine.low %v8542_v60, %v8546_v42  ;;  %v14310_v22 = vcombine.high %v8534_v43, %v8538_v24  ;;  %v8390_v15 = vld [vmem:[#allocation13 + $0xb08] sm:$0xff] }
 0x6d2   :  { %11402 = vmatprep.subr.bf16.mxu1 %v14230_v18  ;;  %v14182_v18 = vcombine.high %v8406_v47, %v8410_v27  ;;  %v8394_v51 = vld [vmem:[#allocation13 + $0xb28] sm:$0xff] }
 0x6d3   :  { %v8518_v54 = vld [vmem:[#allocation13 + $0xf08] sm:$0xff] }
 0x6d4   :  { %11362 = vmatpush1.bf16.msra.mxu0 %v14101_v21  ;;  %v8530_v21 = vld [vmem:[#allocation13 + $0xf68] sm:$0xff] }
 0x6d5   :  { %11403 = vmatpush1.bf16.msra.mxu1 %v14229_v39  ;;  %11363 = vmatprep.subr.bf16.mxu0 %v14094_v6  ;;  %v14181_v39 = vcombine.low %v8406_v47, %v8410_v27  ;;  %v14309_v6 = vcombine.low %v8534_v43, %v8538_v24  ;;  %v14302_v53 = vcombine.high %v8526_v19, %v8530_v21  ;;  %v8382_v5 = vld [vmem:[#allocation13 + $0xac8] sm:$0xff] }
 0x6d6   :  { %11404 = vmatprep.subr.bf16.mxu1 %v14222_v33  ;;  %v14174_v33 = vcombine.high %v8398_v8, %v8402_v10  ;;  %v8386_v48 = vld [vmem:[#allocation13 + $0xae8] sm:$0xff] }
 0x6d7   :  { %v8510_v12 = vld [vmem:[#allocation13 + $0xec8] sm:$0xff] }
 0x6d8   :  { %11364 = vmatpush1.bf16.msra.mxu0 %v14093_v35  ;;  %v8522_v35 = vld [vmem:[#allocation13 + $0xf28] sm:$0xff] }
 0x6d9   :  { %11405 = vmatpush1.bf16.msra.mxu1 %v14221_v28  ;;  %11365 = vmatprep.subr.bf16.mxu0 %v14086_v50  ;;  %v14173_v28 = vcombine.low %v8398_v8, %v8402_v10  ;;  %v14301_v50 = vcombine.low %v8526_v19, %v8530_v21  ;;  %v14294_v16 = vcombine.high %v8518_v54, %v8522_v35  ;;  %v8374_v13 = vld [vmem:[#allocation13 + $0xa88] sm:$0xff]  ;;  %v8095_v10 = vld [vmem:[#allocation13 + $0x1d0] sm:$0xff] }
 0x6da   :  { %11406 = vmatprep.subr.bf16.mxu1 %v14214_v29  ;;  %v14166_v29 = vcombine.high %v8390_v15, %v8394_v51  ;;  %v8378_v58 = vld [vmem:[#allocation13 + $0xaa8] sm:$0xff]  ;;  %v8099_v19 = vld [vmem:[#allocation13 + $0x1f0] sm:$0xff] }
 0x6db   :  { %v8502_v46 = vld [vmem:[#allocation13 + $0xe88] sm:$0xff]  ;;  %v8223_v21 = vld [vmem:[#allocation13 + $0x5d0] sm:$0xff] }
 0x6dc   :  { %11366 = vmatpush1.bf16.msra.mxu0 %v14085_v61  ;;  %v8514_v61 = vld [vmem:[#allocation13 + $0xee8] sm:$0xff] }
 0x6dd   :  { %11407 = vmatpush1.bf16.msra.mxu1 %v14213_v63  ;;  %11367 = vmatprep.subr.bf16.mxu0 %v14078_v2  ;;  %v14165_v63 = vcombine.low %v8390_v15, %v8394_v51  ;;  %v14293_v2 = vcombine.low %v8518_v54, %v8522_v35  ;;  %v14286_v3 = vcombine.high %v8510_v12, %v8514_v61  ;;  %v8366_v7 = vld [vmem:[#allocation13 + $0xa48] sm:$0xff]  ;;  %v8087_v51 = vld [vmem:[#allocation13 + $0x190] sm:$0xff] }
 0x6de   :  { %11408 = vmatprep.subr.bf16.mxu1 %v14206_v45  ;;  %v14158_v45 = vcombine.high %v8382_v5, %v8386_v48  ;;  %v8370_v60 = vld [vmem:[#allocation13 + $0xa68] sm:$0xff]  ;;  %v8091_v54 = vld [vmem:[#allocation13 + $0x1b0] sm:$0xff]  ;;  %v13871_v35 = vcombine.low %v8095_v10, %v8099_v19 }
 0x6df   :  { %v8494_v42 = vld [vmem:[#allocation13 + $0xe48] sm:$0xff] }
 0x6e0   :  { %11368 = vmatpush1.bf16.msra.mxu0 %v14077_v52  ;;  %v8506_v52 = vld [vmem:[#allocation13 + $0xea8] sm:$0xff] }
 0x6e1   :  { %11409 = vmatpush1.bf16.msra.mxu1 %v14205_v36  ;;  %11369 = vmatprep.subr.bf16.mxu0 %v14070_v30  ;;  %v14157_v36 = vcombine.low %v8382_v5, %v8386_v48  ;;  %v14285_v30 = vcombine.low %v8510_v12, %v8514_v61  ;;  %v14278_v17 = vcombine.high %v8502_v46, %v8506_v52  ;;  %v8358_v27 = vld [vmem:[#allocation13 + $0xa08] sm:$0xff]  ;;  %v8079_v5 = vld [vmem:[#allocation13 + $0x150] sm:$0xff] }
 0x6e2   :  { %11410 = vmatprep.subr.bf16.mxu1 %v14198_v38  ;;  %v14150_v38 = vcombine.high %v8374_v13, %v8378_v58  ;;  %v8362_v43 = vld [vmem:[#allocation13 + $0xa28] sm:$0xff]  ;;  %v8083_v48 = vld [vmem:[#allocation13 + $0x170] sm:$0xff] }
 0x6e3   :  { %v8486_v24 = vld [vmem:[#allocation13 + $0xe08] sm:$0xff] }
 0x6e4   :  { %11370 = vmatpush1.bf16.msra.mxu0 %v14069_v0  ;;  %v8498_v0 = vld [vmem:[#allocation13 + $0xe68] sm:$0xff] }
 0x6e5   :  { %11411 = vmatpush1.bf16.msra.mxu1 %v14197_v41  ;;  %11371 = vmatprep.subr.bf16.mxu0 %v14190_v62  ;;  %v14149_v41 = vcombine.low %v8374_v13, %v8378_v58  ;;  %v14277_v62 = vcombine.low %v8502_v46, %v8506_v52  ;;  %v14270_v47 = vcombine.high %v8494_v42, %v8498_v0 }
 0x6e6   :  { %11412 = vmatprep.subr.bf16.mxu1 %v14318_v25  ;;  %v14142_v25 = vcombine.high %v8366_v7, %v8370_v60  ;;  %v13863_v13 = vcombine.low %v8087_v51, %v8091_v54 }
 0x6e8   :  { %11372 = vmatpush2.bf16.msra.mxu0 %v14189_v14  ;;  %v8490_v14 = vld [vmem:[#allocation13 + $0xe28] sm:$0xff] }
 0x6e9   :  { %11413 = vmatpush2.bf16.msra.mxu1 %v14317_v56  ;;  %11373 = vmatprep.subr.bf16.mxu0 %v14182_v18  ;;  %v14141_v56 = vcombine.low %v8366_v7, %v8370_v60  ;;  %v14269_v18 = vcombine.low %v8494_v42, %v8498_v0  ;;  %v14262_v8 = vcombine.high %v8486_v24, %v8490_v14  ;;  %v8075_v7 = vld [vmem:[#allocation13 + $0x130] sm:$0xff] }
 0x6ea   :  { %11414 = vmatprep.subr.bf16.mxu1 %v14310_v22  ;;  %v14134_v22 = vcombine.high %v8358_v27, %v8362_v43  ;;  %v8199_v0 = vld [vmem:[#allocation13 + $0x510] sm:$0xff] }
 0x6ec   :  { %11374 = vmatpush2.bf16.msra.mxu0 %v14181_v39  ;;  %v8227_v39 = vld [vmem:[#allocation13 + $0x5f0] sm:$0xff] }
 0x6ed   :  { %11415 = vmatpush2.bf16.msra.mxu1 %v14309_v6  ;;  %11375 = vmatprep.subr.bf16.mxu0 %v14174_v33  ;;  %v14133_v6 = vcombine.low %v8358_v27, %v8362_v43  ;;  %v14261_v33 = vcombine.low %v8486_v24, %v8490_v14  ;;  %v14000_v15 = vcombine.high %v8223_v21, %v8227_v39  ;;  %v8063_v14 = vld [vmem:[#allocation13 + $0xd0] sm:$0xff] }
 0x6ee   :  { %11416 = vmatprep.subr.bf16.mxu1 %v14302_v53  ;;  %v13872_v53 = vcombine.high %v8095_v10, %v8099_v19 }
 0x6f0   :  { %11376 = vmatpush2.bf16.msra.mxu0 %v14173_v28  ;;  %v8215_v28 = vld [vmem:[#allocation13 + $0x590] sm:$0xff] }
 0x6f1   :  { %11417 = vmatpush2.bf16.msra.mxu1 %v14301_v50  ;;  %11377 = vmatprep.subr.bf16.mxu0 %v14166_v29  ;;  %v8219_v50 = vld [vmem:[#allocation13 + $0x5b0] sm:$0xff]  ;;  %v13999_v29 = vcombine.low %v8223_v21, %v8227_v39 }
 0x6f2   :  { %11418 = vmatprep.subr.bf16.mxu1 %v14294_v16  ;;  %v13864_v16 = vcombine.high %v8087_v51, %v8091_v54  ;;  %v13991_v52 = vcombine.low %v8215_v28, %v8219_v50  ;;  %v8055_v39 = vld [vmem:[#allocation13 + $0x90] sm:$0xff] }
 0x6f4   :  { %11378 = vmatpush2.bf16.msra.mxu0 %v14165_v63  ;;  %v13992_v63 = vcombine.high %v8215_v28, %v8219_v50  ;;  %v8047_v28 = vld [vmem:[#allocation13 + $0x50] sm:$0xff] }
 0x6f5   :  { %11419 = vmatpush2.bf16.msra.mxu1 %v14293_v2  ;;  %11379 = vmatprep.subr.bf16.mxu0 %v14158_v45  ;;  %v8207_v2 = vld [vmem:[#allocation13 + $0x550] sm:$0xff] }
 0x6f6   :  { %11420 = vmatprep.subr.bf16.mxu1 %v14286_v3  ;;  %v8211_v45 = vld [vmem:[#allocation13 + $0x570] sm:$0xff] }
 0x6f7   :  { %v13983_v27 = vcombine.low %v8207_v2, %v8211_v45  ;;  %v8051_v50 = vld [vmem:[#allocation13 + $0x70] sm:$0xff] }
 0x6f8   :  { %11380 = vmatpush2.bf16.msra.mxu0 %v14157_v36  ;;  %v13856_v36 = vcombine.high %v8079_v5, %v8083_v48 }
 0x6f9   :  { %11421 = vmatpush2.bf16.msra.mxu1 %v14285_v30  ;;  %11381 = vmatprep.subr.bf16.mxu0 %v14150_v38  ;;  %v13984_v38 = vcombine.high %v8207_v2, %v8211_v45  ;;  %v8043_v2 = vld [vmem:[#allocation13 + $0x30] sm:$0xff] }
 0x6fa   :  { %11422 = vmatprep.subr.bf16.mxu1 %v14278_v17  ;;  %v8071_v17 = vld [vmem:[#allocation13 + $0x110] sm:$0xff] }
 0x6fb   :  { %v13848_v43 = vcombine.high %v8071_v17, %v8075_v7  ;;  %v8167_v45 = vld [vmem:[#allocation13 + $0x410] sm:$0xff] }
 0x6fc   :  { %11382 = vmatpush2.bf16.msra.mxu0 %v14149_v41  ;;  %v8203_v41 = vld [vmem:[#allocation13 + $0x530] sm:$0xff] }
 0x6fd   :  { %11423 = vmatpush2.bf16.msra.mxu1 %v14277_v62  ;;  %11383 = vmatprep.subr.bf16.mxu0 %v14142_v25  ;;  %v13855_v62 = vcombine.low %v8079_v5, %v8083_v48  ;;  %v13976_v24 = vcombine.high %v8199_v0, %v8203_v41  ;;  %v13975_v10 = vcombine.low %v8199_v0, %v8203_v41 }
 0x6fe   :  { %11424 = vmatprep.subr.bf16.mxu1 %v14270_v47 }
 0x700   :  { %11384 = vmatpush2.bf16.msra.mxu0 %v14141_v56  ;;  %v8067_v56 = vld [vmem:[#allocation13 + $0xf0] sm:$0xff] }
 0x701   :  { %11425 = vmatpush2.bf16.msra.mxu1 %v14269_v18  ;;  %11385 = vmatprep.subr.bf16.mxu0 %v14134_v22  ;;  %v8191_v18 = vld [vmem:[#allocation13 + $0x4d0] sm:$0xff]  ;;  %v13840_v19 = vcombine.high %v8063_v14, %v8067_v56 }
 0x702   :  { %11426 = vmatprep.subr.bf16.mxu1 %v14262_v8  ;;  %v8195_v22 = vld [vmem:[#allocation13 + $0x4f0] sm:$0xff]  ;;  %v13847_v8 = vcombine.low %v8071_v17, %v8075_v7 }
 0x703   :  { %v13968_v21 = vcombine.high %v8191_v18, %v8195_v22  ;;  %v13967_v51 = vcombine.low %v8191_v18, %v8195_v22  ;;  %v8163_v17 = vld [vmem:[#allocation13 + $0x3f0] sm:$0xff] }
 0x704   :  { %11386 = vmatpush2.bf16.msra.mxu0 %v14133_v6  ;;  %v8059_v6 = vld [vmem:[#allocation13 + $0xb0] sm:$0xff] }
 0x705   :  { %11427 = vmatpush2.bf16.msra.mxu1 %v14261_v33  ;;  %11437 = vmatprep.subr.bf16.mxu0 %v13872_v53  ;;  %v8183_v33 = vld [vmem:[#allocation13 + $0x490] sm:$0xff]  ;;  %v13832_v54 = vcombine.high %v8055_v39, %v8059_v6  ;;  %v13831_v5 = vcombine.low %v8055_v39, %v8059_v6 }
 0x706   :  { %11478 = vmatprep.subr.bf16.mxu1 %v14000_v15  ;;  %v8187_v53 = vld [vmem:[#allocation13 + $0x4b0] sm:$0xff]  ;;  %v13839_v15 = vcombine.low %v8063_v14, %v8067_v56 }
 0x707   :  { %11388 = vmatmul.mubr.bf16.vlgmr.msra.gmra.mxu0 %v15459_v23  ;;  %v11143_v12 = vpop.f32.mrf.mxu0  ;;  %v11184_v61 = vpop.f32.mrf.mxu1  ;;  %v13959_v48 = vcombine.low %v8183_v33, %v8187_v53  ;;  %v8287_v7 = vld [vmem:[#allocation13 + $0x7d0] sm:$0xff] }
 0x708   :  { %11429 = vmatmul.mubr.bf16.vlgmr.msra.gmra.mxu1 %v15461_v49  ;;  %v15473_v3 = vadd.f32 %v11184_v61, %v11143_v12  ;;  %11438 = vmatpush1.bf16.msra.mxu0 %v13871_v35  ;;  %v13960_v35 = vcombine.high %v8183_v33, %v8187_v53  ;;  %v13824_v12 = vcombine.high %v8047_v28, %v8051_v50  ;;  %v8143_v22 = vld [vmem:[#allocation13 + $0x350] sm:$0xff] }
 0x709   :  { %11469 = vmatprep.mubr.bf16.mxu0 %v15433_v44  ;;  %11479 = vmatpush1.bf16.msra.mxu1 %v13999_v29  ;;  %v11145_v58 = vpop.f32.mrf.mxu0  ;;  %v11186_v46 = vpop.f32.mrf.mxu1  ;;  %v8175_v29 = vld [vmem:[#allocation13 + $0x450] sm:$0xff] }
 0x70a   :  { %11510 = vmatprep.mubr.bf16.mxu1 %v15435_v11  ;;  %v15477_v30 = vadd.f32 %v11186_v46, %v11145_v58  ;;  %11439 = vmatprep.subr.bf16.mxu0 %v13864_v16  ;;  %v8179_v16 = vld [vmem:[#allocation13 + $0x470] sm:$0xff]  ;;  %v13823_v58 = vcombine.low %v8047_v28, %v8051_v50 }
 0x70b   :  { %11480 = vmatprep.subr.bf16.mxu1 %v13992_v63  ;;  %v11147_v60 = vpop.f32.mrf.mxu0  ;;  %v11188_v42 = vpop.f32.mrf.mxu1  ;;  %v13952_v61 = vcombine.high %v8175_v29, %v8179_v16  ;;  %v8039_v63 = vld [vmem:[#allocation13 + $0x10] sm:$0xff]  ;;  %v13951_v46 = vcombine.low %v8175_v29, %v8179_v16 }
 0x70c   :  { %11440 = vmatpush1.bf16.msra.mxu0 %v13863_v13  ;;  %v8171_v13 = vld [vmem:[#allocation13 + $0x430] sm:$0xff]  ;;  %v13815_v42 = vcombine.low %v8039_v63, %v8043_v2 }
 0x70d   :  { %11481 = vmatpush1.bf16.msra.mxu1 %v13991_v52  ;;  %v11148_v25 = vpop.f32.mrf.mxu0  ;;  %v11189_v47 = vpop.f32.mrf.mxu1  ;;  %11441 = vmatprep.subr.bf16.mxu0 %v13856_v36  ;;  %v13816_v52 = vcombine.high %v8039_v63, %v8043_v2  ;;  %v13944_v36 = vcombine.high %v8167_v45, %v8171_v13  ;;  %v8291_v60 = vld [vmem:[#allocation13 + $0x7f0] sm:$0xff]  ;;  %v13943_v0 = vcombine.low %v8167_v45, %v8171_v13 }
 0x70e   :  { %11482 = vmatprep.subr.bf16.mxu1 %v13984_v38  ;;  %v8159_v38 = vld [vmem:[#allocation13 + $0x3d0] sm:$0xff]  ;;  %v14063_v14 = vcombine.low %v8287_v7, %v8291_v60 }
 0x70f   :  { %v13936_v41 = vcombine.high %v8159_v38, %v8163_v17  ;;  %v8151_v25 = vld [vmem:[#allocation13 + $0x390] sm:$0xff] }
 0x710   :  { %11442 = vmatpush1.bf16.msra.mxu0 %v13855_v62  ;;  %v14064_v62 = vcombine.high %v8287_v7, %v8291_v60  ;;  %v8155_v47 = vld [vmem:[#allocation13 + $0x3b0] sm:$0xff] }
 0x711   :  { %11483 = vmatpush1.bf16.msra.mxu1 %v13983_v27  ;;  %11443 = vmatprep.subr.bf16.mxu0 %v13848_v43  ;;  %v8279_v27 = vld [vmem:[#allocation13 + $0x790] sm:$0xff]  ;;  %v13928_v56 = vcombine.high %v8151_v25, %v8155_v47 }
 0x712   :  { %11484 = vmatprep.subr.bf16.mxu1 %v13976_v24  ;;  %v8283_v43 = vld [vmem:[#allocation13 + $0x7b0] sm:$0xff]  ;;  %v13935_v24 = vcombine.low %v8159_v38, %v8163_v17 }
 0x713   :  { %v14056_v18 = vcombine.high %v8279_v27, %v8283_v43  ;;  %v14055_v39 = vcombine.low %v8279_v27, %v8283_v43  ;;  %v8135_v53 = vld [vmem:[#allocation13 + $0x310] sm:$0xff] }
 0x714   :  { %11444 = vmatpush1.bf16.msra.mxu0 %v13847_v8  ;;  %v8147_v8 = vld [vmem:[#allocation13 + $0x370] sm:$0xff] }
 0x715   :  { %11485 = vmatpush1.bf16.msra.mxu1 %v13975_v10  ;;  %11445 = vmatprep.subr.bf16.mxu0 %v13840_v19  ;;  %v8271_v10 = vld [vmem:[#allocation13 + $0x750] sm:$0xff]  ;;  %v13920_v6 = vcombine.high %v8143_v22, %v8147_v8 }
 0x716   :  { %11486 = vmatprep.subr.bf16.mxu1 %v13968_v21  ;;  %v8275_v19 = vld [vmem:[#allocation13 + $0x770] sm:$0xff]  ;;  %v13927_v21 = vcombine.low %v8151_v25, %v8155_v47 }
 0x717   :  { %v14048_v33 = vcombine.high %v8271_v10, %v8275_v19  ;;  %v14047_v28 = vcombine.low %v8271_v10, %v8275_v19  ;;  %v8127_v16 = vld [vmem:[#allocation13 + $0x2d0] sm:$0xff] }
 0x718   :  { %11446 = vmatpush1.bf16.msra.mxu0 %v13839_v15  ;;  %v8139_v15 = vld [vmem:[#allocation13 + $0x330] sm:$0xff] }
 0x719   :  { %11487 = vmatpush1.bf16.msra.mxu1 %v13967_v51  ;;  %11447 = vmatprep.subr.bf16.mxu0 %v13832_v54  ;;  %v8263_v51 = vld [vmem:[#allocation13 + $0x710] sm:$0xff]  ;;  %v13912_v50 = vcombine.high %v8135_v53, %v8139_v15 }
 0x71a   :  { %11488 = vmatprep.subr.bf16.mxu1 %v13960_v35  ;;  %v8267_v54 = vld [vmem:[#allocation13 + $0x730] sm:$0xff]  ;;  %v13919_v35 = vcombine.low %v8143_v22, %v8147_v8 }
 0x71b   :  { %v14040_v29 = vcombine.high %v8263_v51, %v8267_v54  ;;  %v14039_v63 = vcombine.low %v8263_v51, %v8267_v54  ;;  %v8119_v13 = vld [vmem:[#allocation13 + $0x290] sm:$0xff] }
 0x71c   :  { %11448 = vmatpush1.bf16.msra.mxu0 %v13831_v5  ;;  %v8131_v5 = vld [vmem:[#allocation13 + $0x2f0] sm:$0xff] }
 0x71d   :  { %11489 = vmatpush1.bf16.msra.mxu1 %v13959_v48  ;;  %11449 = vmatprep.subr.bf16.mxu0 %v13824_v12  ;;  %v8255_v48 = vld [vmem:[#allocation13 + $0x6d0] sm:$0xff]  ;;  %v13904_v2 = vcombine.high %v8127_v16, %v8131_v5 }
 0x71e   :  { %11490 = vmatprep.subr.bf16.mxu1 %v13952_v61  ;;  %v8259_v12 = vld [vmem:[#allocation13 + $0x6f0] sm:$0xff]  ;;  %v13911_v61 = vcombine.low %v8135_v53, %v8139_v15 }
 0x71f   :  { %v14032_v45 = vcombine.high %v8255_v48, %v8259_v12  ;;  %v14031_v38 = vcombine.low %v8255_v48, %v8259_v12  ;;  %v8111_v60 = vld [vmem:[#allocation13 + $0x250] sm:$0xff] }
 0x720   :  { %11450 = vmatpush1.bf16.msra.mxu0 %v13823_v58  ;;  %v8123_v58 = vld [vmem:[#allocation13 + $0x2b0] sm:$0xff] }
 0x721   :  { %11491 = vmatpush1.bf16.msra.mxu1 %v13951_v46  ;;  %11451 = vmatprep.subr.bf16.mxu0 %v13816_v52  ;;  %v8247_v46 = vld [vmem:[#allocation13 + $0x690] sm:$0xff]  ;;  %v13896_v17 = vcombine.high %v8119_v13, %v8123_v58 }
 0x722   :  { %11492 = vmatprep.subr.bf16.mxu1 %v13944_v36  ;;  %v8251_v52 = vld [vmem:[#allocation13 + $0x6b0] sm:$0xff]  ;;  %v13903_v36 = vcombine.low %v8127_v16, %v8131_v5 }
 0x723   :  { %v14024_v7 = vcombine.high %v8247_v46, %v8251_v52  ;;  %v14023_v25 = vcombine.low %v8247_v46, %v8251_v52  ;;  %v8103_v43 = vld [vmem:[#allocation13 + $0x210] sm:$0xff] }
 0x724   :  { %11452 = vmatpush1.bf16.msra.mxu0 %v13815_v42  ;;  %v8115_v42 = vld [vmem:[#allocation13 + $0x270] sm:$0xff] }
 0x725   :  { %11493 = vmatpush1.bf16.msra.mxu1 %v13943_v0  ;;  %11453 = vmatprep.subr.bf16.mxu0 %v13936_v41  ;;  %v8239_v0 = vld [vmem:[#allocation13 + $0x650] sm:$0xff]  ;;  %v13888_v47 = vcombine.high %v8111_v60, %v8115_v42 }
 0x726   :  { %11494 = vmatprep.subr.bf16.mxu1 %v14064_v62  ;;  %v8243_v41 = vld [vmem:[#allocation13 + $0x670] sm:$0xff]  ;;  %v13895_v62 = vcombine.low %v8119_v13, %v8123_v58 }
 0x727   :  { %v14016_v27 = vcombine.high %v8239_v0, %v8243_v41  ;;  %v14015_v22 = vcombine.low %v8239_v0, %v8243_v41  ;;  %v8351_v19 = vld [vmem:[#allocation13 + $0x9d0] sm:$0xff] }
 0x728   :  { %11454 = vmatpush2.bf16.msra.mxu0 %v13935_v24  ;;  %v8107_v24 = vld [vmem:[#allocation13 + $0x230] sm:$0xff] }
 0x729   :  { %11495 = vmatpush2.bf16.msra.mxu1 %v14063_v14  ;;  %11455 = vmatprep.subr.bf16.mxu0 %v13928_v56  ;;  %v8231_v14 = vld [vmem:[#allocation13 + $0x610] sm:$0xff]  ;;  %v13880_v8 = vcombine.high %v8103_v43, %v8107_v24 }
 0x72a   :  { %11496 = vmatprep.subr.bf16.mxu1 %v14056_v18  ;;  %v8235_v56 = vld [vmem:[#allocation13 + $0x630] sm:$0xff]  ;;  %v13887_v18 = vcombine.low %v8111_v60, %v8115_v42 }
 0x72b   :  { %v14008_v10 = vcombine.high %v8231_v14, %v8235_v56  ;;  %v14007_v53 = vcombine.low %v8231_v14, %v8235_v56  ;;  %v8343_v54 = vld [vmem:[#allocation13 + $0x990] sm:$0xff] }
 0x72c   :  { %11456 = vmatpush2.bf16.msra.mxu0 %v13927_v21  ;;  %v8355_v21 = vld [vmem:[#allocation13 + $0x9f0] sm:$0xff] }
 0x72d   :  { %11497 = vmatpush2.bf16.msra.mxu1 %v14055_v39  ;;  %11457 = vmatprep.subr.bf16.mxu0 %v13920_v6  ;;  %v8479_v39 = vld [vmem:[#allocation13 + $0xdd0] sm:$0xff]  ;;  %v14128_v15 = vcombine.high %v8351_v19, %v8355_v21 }
 0x72e   :  { %11498 = vmatprep.subr.bf16.mxu1 %v14048_v33  ;;  %v8483_v6 = vld [vmem:[#allocation13 + $0xdf0] sm:$0xff]  ;;  %v13879_v33 = vcombine.low %v8103_v43, %v8107_v24 }
 0x72f   :  { %v14256_v51 = vcombine.high %v8479_v39, %v8483_v6  ;;  %v14255_v16 = vcombine.low %v8479_v39, %v8483_v6  ;;  %v8335_v48 = vld [vmem:[#allocation13 + $0x950] sm:$0xff] }
 0x730   :  { %11458 = vmatpush2.bf16.msra.mxu0 %v13919_v35  ;;  %v8347_v35 = vld [vmem:[#allocation13 + $0x9b0] sm:$0xff] }
 0x731   :  { %11499 = vmatpush2.bf16.msra.mxu1 %v14047_v28  ;;  %11459 = vmatprep.subr.bf16.mxu0 %v13912_v50  ;;  %v14127_v28 = vcombine.low %v8351_v19, %v8355_v21  ;;  %v8471_v50 = vld [vmem:[#allocation13 + $0xd90] sm:$0xff]  ;;  %v14120_v5 = vcombine.high %v8343_v54, %v8347_v35  ;;  %v14119_v46 = vcombine.low %v8343_v54, %v8347_v35 }
 0x732   :  { %11500 = vmatprep.subr.bf16.mxu1 %v14040_v29  ;;  %v8475_v29 = vld [vmem:[#allocation13 + $0xdb0] sm:$0xff] }
 0x733   :  { %v8339_v12 = vld [vmem:[#allocation13 + $0x970] sm:$0xff] }
 0x734   :  { %11460 = vmatpush2.bf16.msra.mxu0 %v13911_v61  ;;  %v8467_v13 = vld [vmem:[#allocation13 + $0xd70] sm:$0xff]  ;;  %v14111_v43 = vcombine.low %v8335_v48, %v8339_v12 }
 0x735   :  { %11501 = vmatpush2.bf16.msra.mxu1 %v14039_v63  ;;  %11461 = vmatprep.subr.bf16.mxu0 %v13904_v2  ;;  %v14248_v2 = vcombine.high %v8471_v50, %v8475_v29  ;;  %v8331_v0 = vld [vmem:[#allocation13 + $0x930] sm:$0xff] }
 0x736   :  { %11502 = vmatprep.subr.bf16.mxu1 %v14032_v45  ;;  %v8463_v45 = vld [vmem:[#allocation13 + $0xd50] sm:$0xff] }
 0x737   :  { %v14240_v42 = vcombine.high %v8463_v45, %v8467_v13  ;;  %v14239_v56 = vcombine.low %v8463_v45, %v8467_v13  ;;  %v8451_v19 = vld [vmem:[#allocation13 + $0xcf0] sm:$0xff] }
 0x738   :  { %11462 = vmatpush2.bf16.msra.mxu0 %v13903_v36  ;;  %v8443_v54 = vld [vmem:[#allocation13 + $0xcb0] sm:$0xff] }
 0x739   :  { %11503 = vmatpush2.bf16.msra.mxu1 %v14031_v38  ;;  %11463 = vmatprep.subr.bf16.mxu0 %v13896_v17  ;;  %v14247_v38 = vcombine.low %v8471_v50, %v8475_v29  ;;  %v14112_v17 = vcombine.high %v8335_v48, %v8339_v12  ;;  %v8431_v48 = vld [vmem:[#allocation13 + $0xc50] sm:$0xff] }
 0x73a   :  { %11504 = vmatprep.subr.bf16.mxu1 %v14024_v7  ;;  %v8435_v12 = vld [vmem:[#allocation13 + $0xc70] sm:$0xff] }
 0x73b   :  { %v14208_v45 = vcombine.high %v8431_v48, %v8435_v12  ;;  %v8295_v13 = vld [vmem:[#allocation13 + $0x810] sm:$0xff] }
 0x73c   :  { %11464 = vmatpush2.bf16.msra.mxu0 %v13895_v62 }
 0x73d   :  { %11505 = vmatpush2.bf16.msra.mxu1 %v14023_v25  ;;  %11465 = vmatprep.subr.bf16.mxu0 %v13888_v47  ;;  %v8455_v25 = vld [vmem:[#allocation13 + $0xd10] sm:$0xff] }
 0x73e   :  { %11506 = vmatprep.subr.bf16.mxu1 %v14016_v27  ;;  %v8459_v47 = vld [vmem:[#allocation13 + $0xd30] sm:$0xff] }
 0x73f   :  { %v14231_v39 = vcombine.low %v8455_v25, %v8459_v47 }
 0x740   :  { %11466 = vmatpush2.bf16.msra.mxu0 %v13887_v18 }
 0x741   :  { %11507 = vmatpush2.bf16.msra.mxu1 %v14015_v22  ;;  %11467 = vmatprep.subr.bf16.mxu0 %v13880_v8  ;;  %v8319_v22 = vld [vmem:[#allocation13 + $0x8d0] sm:$0xff] }
 0x742   :  { %11508 = vmatprep.subr.bf16.mxu1 %v14008_v10  ;;  %v8323_v8 = vld [vmem:[#allocation13 + $0x8f0] sm:$0xff] }
 0x743   :  { %v8447_v10 = vld [vmem:[#allocation13 + $0xcd0] sm:$0xff]  ;;  %v14096_v6 = vcombine.high %v8319_v22, %v8323_v8  ;;  %v14095_v35 = vcombine.low %v8319_v22, %v8323_v8 }
 0x744   :  { %11468 = vmatpush2.bf16.msra.mxu0 %v13879_v33  ;;  %v14224_v33 = vcombine.high %v8447_v10, %v8451_v19 }
 0x745   :  { %11509 = vmatpush2.bf16.msra.mxu1 %v14007_v53  ;;  %11519 = vmatprep.subr.bf16.mxu0 %v14128_v15  ;;  %v8311_v53 = vld [vmem:[#allocation13 + $0x890] sm:$0xff] }
 0x746   :  { %11560 = vmatprep.subr.bf16.mxu1 %v14256_v51  ;;  %v8315_v15 = vld [vmem:[#allocation13 + $0x8b0] sm:$0xff] }
 0x747   :  { %v11225_v61 = vpop.f32.mrf.mxu0  ;;  %v11266_v63 = vpop.f32.mrf.mxu1  ;;  %11470 = vmatmul.mubr.bf16.vlgmr.msra.gmra.mxu0 %v15437_v4  ;;  %v8439_v51 = vld [vmem:[#allocation13 + $0xc90] sm:$0xff]  ;;  %v14088_v50 = vcombine.high %v8311_v53, %v8315_v15 }
 0x748   :  { %v11226_v58 = vadd.f32 %v11225_v61, %v15473_v3  ;;  %11511 = vmatmul.mubr.bf16.vlgmr.msra.gmra.mxu1 %v15439_v9  ;;  %11520 = vmatpush1.bf16.msra.mxu0 %v14127_v28  ;;  %v8327_v3 = vld [vmem:[#allocation13 + $0x910] sm:$0xff]  ;;  %v14223_v28 = vcombine.low %v8447_v10, %v8451_v19  ;;  %v14216_v29 = vcombine.high %v8439_v51, %v8443_v54 }
 0x749   :  { %11551 = vmatprep.mubr.bf16.mxu0 %v15445_v1  ;;  %11561 = vmatpush1.bf16.msra.mxu1 %v14255_v16  ;;  %v11227_v52 = vpop.f32.mrf.mxu0  ;;  %v11268_v36 = vpop.f32.mrf.mxu1  ;;  %v14104_v18 = vcombine.high %v8327_v3, %v8331_v0  ;;  %v14103_v21 = vcombine.low %v8327_v3, %v8331_v0  ;;  %v8303_v16 = vld [vmem:[#allocation13 + $0x850] sm:$0xff]  ;;  %v14087_v61 = vcombine.low %v8311_v53, %v8315_v15 }
 0x74a   :  { %v15483_v7 = vadd.f32 %v11266_v63, %v11226_v58  ;;  %11592 = vmatprep.mubr.bf16.mxu1 %v15447_v55  ;;  %v11228_v60 = vadd.f32 %v11227_v52, %v15477_v30  ;;  %11521 = vmatprep.subr.bf16.mxu0 %v14120_v5  ;;  %v14232_v30 = vcombine.high %v8455_v25, %v8459_v47  ;;  %v8307_v5 = vld [vmem:[#allocation13 + $0x870] sm:$0xff] }
 0x74b   :  { %v11229_v41 = vpop.f32.mrf.mxu0  ;;  %v11270_v62 = vpop.f32.mrf.mxu1  ;;  %11562 = vmatprep.subr.bf16.mxu1 %v14248_v2  ;;  %v14215_v63 = vcombine.low %v8439_v51, %v8443_v54  ;;  %v14080_v2 = vcombine.high %v8303_v16, %v8307_v5  ;;  %v8299_v58 = vld [vmem:[#allocation13 + $0x830] sm:$0xff] }
 0x74c   :  { %v15487_v27 = vadd.f32 %v11268_v36, %v11228_v60  ;;  %11522 = vmatpush1.bf16.msra.mxu0 %v14119_v46  ;;  %v8423_v46 = vld [vmem:[#allocation13 + $0xc10] sm:$0xff]  ;;  %v14079_v36 = vcombine.low %v8303_v16, %v8307_v5  ;;  %v14071_v62 = vcombine.low %v8295_v13, %v8299_v58 }
 0x74d   :  { %11563 = vmatpush1.bf16.msra.mxu1 %v14247_v38  ;;  %v11230_v24 = vpop.f32.mrf.mxu0  ;;  %v11271_v14 = vpop.f32.mrf.mxu1  ;;  %11523 = vmatprep.subr.bf16.mxu0 %v14112_v17  ;;  %v8427_v52 = vld [vmem:[#allocation13 + $0xc30] sm:$0xff]  ;;  %v14207_v38 = vcombine.low %v8431_v48, %v8435_v12  ;;  %v14072_v17 = vcombine.high %v8295_v13, %v8299_v58 }
 0x74e   :  { %11564 = vmatprep.subr.bf16.mxu1 %v14240_v42  ;;  %v14200_v60 = vcombine.high %v8423_v46, %v8427_v52  ;;  %v8415_v42 = vld [vmem:[#allocation13 + $0xbd0] sm:$0xff]  ;;  %v14199_v25 = vcombine.low %v8423_v46, %v8427_v52 }
 0x74f   :  { %v8419_v3 = vld [vmem:[#allocation13 + $0xbf0] sm:$0xff] }
 0x750   :  { %11524 = vmatpush1.bf16.msra.mxu0 %v14111_v43  ;;  %v8543_v0 = vld [vmem:[#allocation13 + $0xfd0] sm:$0xff]  ;;  %v14192_v47 = vcombine.high %v8415_v42, %v8419_v3 }
 0x751   :  { %11565 = vmatpush1.bf16.msra.mxu1 %v14239_v56  ;;  %11525 = vmatprep.subr.bf16.mxu0 %v14104_v18  ;;  %v8547_v41 = vld [vmem:[#allocation13 + $0xff0] sm:$0xff] }
 0x752   :  { %11566 = vmatprep.subr.bf16.mxu1 %v14232_v30  ;;  %v14320_v43 = vcombine.high %v8543_v0, %v8547_v41  ;;  %v8407_v24 = vld [vmem:[#allocation13 + $0xb90] sm:$0xff]  ;;  %v14191_v30 = vcombine.low %v8415_v42, %v8419_v3  ;;  %v14319_v22 = vcombine.low %v8543_v0, %v8547_v41 }
 0x753   :  { %v8411_v14 = vld [vmem:[#allocation13 + $0xbb0] sm:$0xff] }
 0x754   :  { %11526 = vmatpush1.bf16.msra.mxu0 %v14103_v21  ;;  %v8535_v56 = vld [vmem:[#allocation13 + $0xf90] sm:$0xff]  ;;  %v14184_v8 = vcombine.high %v8407_v24, %v8411_v14 }
 0x755   :  { %11567 = vmatpush1.bf16.msra.mxu1 %v14231_v39  ;;  %11527 = vmatprep.subr.bf16.mxu0 %v14096_v6  ;;  %v8539_v18 = vld [vmem:[#allocation13 + $0xfb0] sm:$0xff] }
 0x756   :  { %11568 = vmatprep.subr.bf16.mxu1 %v14224_v33  ;;  %v14312_v10 = vcombine.high %v8535_v56, %v8539_v18  ;;  %v8399_v19 = vld [vmem:[#allocation13 + $0xb50] sm:$0xff]  ;;  %v14183_v33 = vcombine.low %v8407_v24, %v8411_v14  ;;  %v14311_v53 = vcombine.low %v8535_v56, %v8539_v18 }
 0x757   :  { %v8403_v21 = vld [vmem:[#allocation13 + $0xb70] sm:$0xff] }
 0x758   :  { %11528 = vmatpush1.bf16.msra.mxu0 %v14095_v35  ;;  %v8527_v39 = vld [vmem:[#allocation13 + $0xf50] sm:$0xff]  ;;  %v14176_v15 = vcombine.high %v8399_v19, %v8403_v21 }
 0x759   :  { %11569 = vmatpush1.bf16.msra.mxu1 %v14223_v28  ;;  %11529 = vmatprep.subr.bf16.mxu0 %v14088_v50  ;;  %v8531_v6 = vld [vmem:[#allocation13 + $0xf70] sm:$0xff] }
 0x75a   :  { %11570 = vmatprep.subr.bf16.mxu1 %v14216_v29  ;;  %v14304_v51 = vcombine.high %v8527_v39, %v8531_v6  ;;  %v8391_v54 = vld [vmem:[#allocation13 + $0xb10] sm:$0xff]  ;;  %v14175_v29 = vcombine.low %v8399_v19, %v8403_v21  ;;  %v14303_v16 = vcombine.low %v8527_v39, %v8531_v6  ;;  %v8096_v6 = vld [vmem:[#allocation13 + $0x1d8] sm:$0xff] }
 0x75b   :  { %v8395_v35 = vld [vmem:[#allocation13 + $0xb30] sm:$0xff] }
 0x75c   :  { %11530 = vmatpush1.bf16.msra.mxu0 %v14087_v61  ;;  %v8519_v28 = vld [vmem:[#allocation13 + $0xf10] sm:$0xff]  ;;  %v14168_v5 = vcombine.high %v8391_v54, %v8395_v35 }
 0x75d   :  { %11571 = vmatpush1.bf16.msra.mxu1 %v14215_v63  ;;  %11531 = vmatprep.subr.bf16.mxu0 %v14080_v2  ;;  %v8523_v50 = vld [vmem:[#allocation13 + $0xf30] sm:$0xff] }
 0x75e   :  { %11572 = vmatprep.subr.bf16.mxu1 %v14208_v45  ;;  %v14296_v48 = vcombine.high %v8519_v28, %v8523_v50  ;;  %v8383_v12 = vld [vmem:[#allocation13 + $0xad0] sm:$0xff]  ;;  %v14167_v45 = vcombine.low %v8391_v54, %v8395_v35  ;;  %v14295_v13 = vcombine.low %v8519_v28, %v8523_v50  ;;  %v8088_v50 = vld [vmem:[#allocation13 + $0x198] sm:$0xff] }
 0x75f   :  { %v8387_v61 = vld [vmem:[#allocation13 + $0xaf0] sm:$0xff] }
 0x760   :  { %11532 = vmatpush1.bf16.msra.mxu0 %v14079_v36  ;;  %v8511_v63 = vld [vmem:[#allocation13 + $0xed0] sm:$0xff]  ;;  %v14160_v58 = vcombine.high %v8383_v12, %v8387_v61 }
 0x761   :  { %11573 = vmatpush1.bf16.msra.mxu1 %v14207_v38  ;;  %11533 = vmatprep.subr.bf16.mxu0 %v14072_v17  ;;  %v8515_v2 = vld [vmem:[#allocation13 + $0xef0] sm:$0xff] }
 0x762   :  { %11574 = vmatprep.subr.bf16.mxu1 %v14200_v60  ;;  %v14288_v46 = vcombine.high %v8511_v63, %v8515_v2  ;;  %v8375_v52 = vld [vmem:[#allocation13 + $0xa90] sm:$0xff]  ;;  %v14159_v60 = vcombine.low %v8383_v12, %v8387_v61  ;;  %v14287_v42 = vcombine.low %v8511_v63, %v8515_v2  ;;  %v8080_v63 = vld [vmem:[#allocation13 + $0x158] sm:$0xff] }
 0x763   :  { %v8379_v36 = vld [vmem:[#allocation13 + $0xab0] sm:$0xff]  ;;  %v8084_v2 = vld [vmem:[#allocation13 + $0x178] sm:$0xff] }
 0x764   :  { %11534 = vmatpush1.bf16.msra.mxu0 %v14071_v62  ;;  %v8503_v38 = vld [vmem:[#allocation13 + $0xe90] sm:$0xff]  ;;  %v14152_v3 = vcombine.high %v8375_v52, %v8379_v36 }
 0x765   :  { %11575 = vmatpush1.bf16.msra.mxu1 %v14199_v25  ;;  %11535 = vmatprep.subr.bf16.mxu0 %v14192_v47  ;;  %v8507_v17 = vld [vmem:[#allocation13 + $0xeb0] sm:$0xff] }
 0x766   :  { %11576 = vmatprep.subr.bf16.mxu1 %v14320_v43  ;;  %v14280_v0 = vcombine.high %v8503_v38, %v8507_v17  ;;  %v8367_v41 = vld [vmem:[#allocation13 + $0xa50] sm:$0xff]  ;;  %v14151_v43 = vcombine.low %v8375_v52, %v8379_v36  ;;  %v14279_v24 = vcombine.low %v8503_v38, %v8507_v17 }
 0x767   :  { %v8371_v62 = vld [vmem:[#allocation13 + $0xa70] sm:$0xff] }
 0x768   :  { %11536 = vmatpush2.bf16.msra.mxu0 %v14191_v30  ;;  %v8495_v25 = vld [vmem:[#allocation13 + $0xe50] sm:$0xff]  ;;  %v14144_v14 = vcombine.high %v8367_v41, %v8371_v62 }
 0x769   :  { %11577 = vmatpush2.bf16.msra.mxu1 %v14319_v22  ;;  %11537 = vmatprep.subr.bf16.mxu0 %v14184_v8  ;;  %v8499_v47 = vld [vmem:[#allocation13 + $0xe70] sm:$0xff] }
 0x76a   :  { %11578 = vmatprep.subr.bf16.mxu1 %v14312_v10  ;;  %v14272_v56 = vcombine.high %v8495_v25, %v8499_v47  ;;  %v8359_v18 = vld [vmem:[#allocation13 + $0xa10] sm:$0xff]  ;;  %v14143_v10 = vcombine.low %v8367_v41, %v8371_v62  ;;  %v14271_v19 = vcombine.low %v8495_v25, %v8499_v47  ;;  %v8072_v41 = vld [vmem:[#allocation13 + $0x118] sm:$0xff] }
 0x76b   :  { %v8363_v30 = vld [vmem:[#allocation13 + $0xa30] sm:$0xff]  ;;  %v8076_v62 = vld [vmem:[#allocation13 + $0x138] sm:$0xff] }
 0x76c   :  { %11538 = vmatpush2.bf16.msra.mxu0 %v14183_v33  ;;  %v8487_v22 = vld [vmem:[#allocation13 + $0xe10] sm:$0xff]  ;;  %v14136_v21 = vcombine.high %v8359_v18, %v8363_v30  ;;  %v8100_v33 = vld [vmem:[#allocation13 + $0x1f8] sm:$0xff] }
 0x76d   :  { %11579 = vmatpush2.bf16.msra.mxu1 %v14311_v53  ;;  %11539 = vmatprep.subr.bf16.mxu0 %v14176_v15  ;;  %v8491_v8 = vld [vmem:[#allocation13 + $0xe30] sm:$0xff]  ;;  %v8224_v53 = vld [vmem:[#allocation13 + $0x5d8] sm:$0xff]  ;;  %v13874_v35 = vcombine.high %v8096_v6, %v8100_v33 }
 0x76e   :  { %11580 = vmatprep.subr.bf16.mxu1 %v14304_v51  ;;  %v14264_v39 = vcombine.high %v8487_v22, %v8491_v8  ;;  %v8228_v15 = vld [vmem:[#allocation13 + $0x5f8] sm:$0xff]  ;;  %v14135_v51 = vcombine.low %v8359_v18, %v8363_v30  ;;  %v14263_v54 = vcombine.low %v8487_v22, %v8491_v8  ;;  %v13850_v30 = vcombine.high %v8072_v41, %v8076_v62 }
 0x76f   :  { %v14002_v28 = vcombine.high %v8224_v53, %v8228_v15  ;;  %v14001_v12 = vcombine.low %v8224_v53, %v8228_v15  ;;  %v8064_v8 = vld [vmem:[#allocation13 + $0xd8] sm:$0xff] }
 0x770   :  { %11540 = vmatpush2.bf16.msra.mxu0 %v14175_v29  ;;  %v8092_v29 = vld [vmem:[#allocation13 + $0x1b8] sm:$0xff] }
 0x771   :  { %11581 = vmatpush2.bf16.msra.mxu1 %v14303_v16  ;;  %11541 = vmatprep.subr.bf16.mxu0 %v14168_v5  ;;  %v13873_v16 = vcombine.low %v8096_v6, %v8100_v33  ;;  %v8216_v5 = vld [vmem:[#allocation13 + $0x598] sm:$0xff]  ;;  %v13866_v61 = vcombine.high %v8088_v50, %v8092_v29  ;;  %v13865_v36 = vcombine.low %v8088_v50, %v8092_v29 }
 0x772   :  { %11582 = vmatprep.subr.bf16.mxu1 %v14296_v48  ;;  %v8220_v48 = vld [vmem:[#allocation13 + $0x5b8] sm:$0xff] }
 0x773   :  { %v8056_v15 = vld [vmem:[#allocation13 + $0x98] sm:$0xff] }
 0x774   :  { %11542 = vmatpush2.bf16.msra.mxu0 %v14167_v45 }
 0x775   :  { %11583 = vmatpush2.bf16.msra.mxu1 %v14295_v13  ;;  %11543 = vmatprep.subr.bf16.mxu0 %v14160_v58  ;;  %v13994_v13 = vcombine.high %v8216_v5, %v8220_v48  ;;  %v8208_v58 = vld [vmem:[#allocation13 + $0x558] sm:$0xff] }
 0x776   :  { %11584 = vmatprep.subr.bf16.mxu1 %v14288_v46  ;;  %v8212_v46 = vld [vmem:[#allocation13 + $0x578] sm:$0xff] }
 0x777   :  { %v13985_v18 = vcombine.low %v8208_v58, %v8212_v46 }
 0x778   :  { %11544 = vmatpush2.bf16.msra.mxu0 %v14159_v60  ;;  %v13993_v60 = vcombine.low %v8216_v5, %v8220_v48  ;;  %v8048_v5 = vld [vmem:[#allocation13 + $0x58] sm:$0xff] }
 0x779   :  { %11585 = vmatpush2.bf16.msra.mxu1 %v14287_v42  ;;  %11545 = vmatprep.subr.bf16.mxu0 %v14152_v3  ;;  %v13858_v42 = vcombine.high %v8080_v63, %v8084_v2  ;;  %v8052_v48 = vld [vmem:[#allocation13 + $0x78] sm:$0xff] }
 0x77a   :  { %11586 = vmatprep.subr.bf16.mxu1 %v14280_v0  ;;  %v13986_v0 = vcombine.high %v8208_v58, %v8212_v46  ;;  %v8040_v58 = vld [vmem:[#allocation13 + $0x18] sm:$0xff] }
 0x77b   :  { %v8044_v46 = vld [vmem:[#allocation13 + $0x38] sm:$0xff] }
 0x77c   :  { %11546 = vmatpush2.bf16.msra.mxu0 %v14151_v43  ;;  %v8200_v43 = vld [vmem:[#allocation13 + $0x518] sm:$0xff] }
 0x77d   :  { %11587 = vmatpush2.bf16.msra.mxu1 %v14279_v24  ;;  %11547 = vmatprep.subr.bf16.mxu0 %v14144_v14  ;;  %v8204_v24 = vld [vmem:[#allocation13 + $0x538] sm:$0xff] }
 0x77e   :  { %11588 = vmatprep.subr.bf16.mxu1 %v14272_v56  ;;  %v13978_v22 = vcombine.high %v8200_v43, %v8204_v24  ;;  %v13977_v6 = vcombine.low %v8200_v43, %v8204_v24  ;;  %v13817_v43 = vcombine.low %v8040_v58, %v8044_v46 }
 0x780   :  { %11548 = vmatpush2.bf16.msra.mxu0 %v14143_v10  ;;  %v8068_v10 = vld [vmem:[#allocation13 + $0xf8] sm:$0xff] }
 0x781   :  { %11589 = vmatpush2.bf16.msra.mxu1 %v14271_v19  ;;  %11549 = vmatprep.subr.bf16.mxu0 %v14136_v21  ;;  %v8192_v19 = vld [vmem:[#allocation13 + $0x4d8] sm:$0xff]  ;;  %v13842_v33 = vcombine.high %v8064_v8, %v8068_v10 }
 0x782   :  { %11590 = vmatprep.subr.bf16.mxu1 %v14264_v39  ;;  %v8196_v21 = vld [vmem:[#allocation13 + $0x4f8] sm:$0xff]  ;;  %v13849_v39 = vcombine.low %v8072_v41, %v8076_v62 }
 0x783   :  { %v13970_v53 = vcombine.high %v8192_v19, %v8196_v21  ;;  %v13969_v50 = vcombine.low %v8192_v19, %v8196_v21  ;;  %v8164_v41 = vld [vmem:[#allocation13 + $0x3f8] sm:$0xff] }
 0x784   :  { %11550 = vmatpush2.bf16.msra.mxu0 %v14135_v51  ;;  %v8060_v51 = vld [vmem:[#allocation13 + $0xb8] sm:$0xff] }
 0x785   :  { %11591 = vmatpush2.bf16.msra.mxu1 %v14263_v54  ;;  %11601 = vmatprep.subr.bf16.mxu0 %v13874_v35  ;;  %v8184_v54 = vld [vmem:[#allocation13 + $0x498] sm:$0xff]  ;;  %v13834_v29 = vcombine.high %v8056_v15, %v8060_v51 }
 0x786   :  { %11642 = vmatprep.subr.bf16.mxu1 %v14002_v28  ;;  %v8188_v35 = vld [vmem:[#allocation13 + $0x4b8] sm:$0xff]  ;;  %v13841_v28 = vcombine.low %v8064_v8, %v8068_v10 }
 0x787   :  { %v11307_v45 = vpop.f32.mrf.mxu0  ;;  %11552 = vmatmul.mubr.bf16.vlgmr.msra.gmra.mxu0 %v15459_v23  ;;  %v8288_v62 = vld [vmem:[#allocation13 + $0x7d8] sm:$0xff] }
 0x788   :  { %v11348_v52 = vpop.f32.mrf.mxu1  ;;  %11593 = vmatmul.mubr.bf16.vlgmr.msra.gmra.mxu1 %v15461_v49  ;;  %11602 = vmatpush1.bf16.msra.mxu0 %v13873_v16  ;;  %v13962_v16 = vcombine.high %v8184_v54, %v8188_v35  ;;  %v8144_v21 = vld [vmem:[#allocation13 + $0x358] sm:$0xff] }
 0x789   :  { %v15491_v38 = vadd.f32 %v11348_v52, %v11307_v45  ;;  %11633 = vmatprep.mubr.bf16.mxu0 %v15433_v44  ;;  %11643 = vmatpush1.bf16.msra.mxu1 %v14001_v12  ;;  %v11309_v17 = vpop.f32.mrf.mxu0  ;;  %v13857_v44 = vcombine.low %v8080_v63, %v8084_v2  ;;  %v8176_v12 = vld [vmem:[#allocation13 + $0x458] sm:$0xff]  ;;  %v13833_v63 = vcombine.low %v8056_v15, %v8060_v51 }
 0x78a   :  { %11674 = vmatprep.mubr.bf16.mxu1 %v15435_v11  ;;  %v11350_v3 = vpop.f32.mrf.mxu1  ;;  %11603 = vmatprep.subr.bf16.mxu0 %v13866_v61  ;;  %v8180_v61 = vld [vmem:[#allocation13 + $0x478] sm:$0xff]  ;;  %v13961_v2 = vcombine.low %v8184_v54, %v8188_v35  ;;  %v13826_v45 = vcombine.high %v8048_v5, %v8052_v48 }
 0x78b   :  { %v15495_v25 = vadd.f32 %v11350_v3, %v11309_v17  ;;  %v11311_v47 = vpop.f32.mrf.mxu0  ;;  %11644 = vmatprep.subr.bf16.mxu1 %v13994_v13  ;;  %v13954_v13 = vcombine.high %v8176_v12, %v8180_v61  ;;  %v8168_v52 = vld [vmem:[#allocation13 + $0x418] sm:$0xff]  ;;  %v13825_v17 = vcombine.low %v8048_v5, %v8052_v48 }
 0x78c   :  { %v11352_v14 = vpop.f32.mrf.mxu1  ;;  %11604 = vmatpush1.bf16.msra.mxu0 %v13865_v36  ;;  %v8172_v36 = vld [vmem:[#allocation13 + $0x438] sm:$0xff] }
 0x78d   :  { %11645 = vmatpush1.bf16.msra.mxu1 %v13993_v60  ;;  %v11312_v56 = vpop.f32.mrf.mxu0  ;;  %11605 = vmatprep.subr.bf16.mxu0 %v13858_v42  ;;  %v13953_v60 = vcombine.low %v8176_v12, %v8180_v61  ;;  %v13818_v42 = vcombine.high %v8040_v58, %v8044_v46  ;;  %v13946_v3 = vcombine.high %v8168_v52, %v8172_v36  ;;  %v8292_v47 = vld [vmem:[#allocation13 + $0x7f8] sm:$0xff] }
 0x78e   :  { %v11353_v11 = vpop.f32.mrf.mxu1  ;;  %11646 = vmatprep.subr.bf16.mxu1 %v13986_v0  ;;  %v8160_v0 = vld [vmem:[#allocation13 + $0x3d8] sm:$0xff]  ;;  %v13945_v24 = vcombine.low %v8168_v52, %v8172_v36  ;;  %v14065_v8 = vcombine.low %v8288_v62, %v8292_v47 }
 0x78f   :  { %v13938_v14 = vcombine.high %v8160_v0, %v8164_v41  ;;  %v8152_v56 = vld [vmem:[#allocation13 + $0x398] sm:$0xff] }
 0x790   :  { %11606 = vmatpush1.bf16.msra.mxu0 %v13857_v44  ;;  %v14066_v44 = vcombine.high %v8288_v62, %v8292_v47  ;;  %v8284_v11 = vld [vmem:[#allocation13 + $0x7b8] sm:$0xff] }
 0x791   :  { %11647 = vmatpush1.bf16.msra.mxu1 %v13985_v18  ;;  %11607 = vmatprep.subr.bf16.mxu0 %v13850_v30  ;;  %v8156_v18 = vld [vmem:[#allocation13 + $0x3b8] sm:$0xff] }
 0x792   :  { %11648 = vmatprep.subr.bf16.mxu1 %v13978_v22  ;;  %v8280_v30 = vld [vmem:[#allocation13 + $0x798] sm:$0xff]  ;;  %v13937_v22 = vcombine.low %v8160_v0, %v8164_v41  ;;  %v13930_v10 = vcombine.high %v8152_v56, %v8156_v18 }
 0x793   :  { %v14058_v19 = vcombine.high %v8280_v30, %v8284_v11  ;;  %v14057_v15 = vcombine.low %v8280_v30, %v8284_v11  ;;  %v8136_v35 = vld [vmem:[#allocation13 + $0x318] sm:$0xff] }
 0x794   :  { %11608 = vmatpush1.bf16.msra.mxu0 %v13849_v39  ;;  %v8148_v39 = vld [vmem:[#allocation13 + $0x378] sm:$0xff] }
 0x795   :  { %11649 = vmatpush1.bf16.msra.mxu1 %v13977_v6  ;;  %11609 = vmatprep.subr.bf16.mxu0 %v13842_v33  ;;  %v8272_v6 = vld [vmem:[#allocation13 + $0x758] sm:$0xff]  ;;  %v13922_v51 = vcombine.high %v8144_v21, %v8148_v39 }
 0x796   :  { %11650 = vmatprep.subr.bf16.mxu1 %v13970_v53  ;;  %v8276_v33 = vld [vmem:[#allocation13 + $0x778] sm:$0xff]  ;;  %v13929_v53 = vcombine.low %v8152_v56, %v8156_v18 }
 0x797   :  { %v14050_v54 = vcombine.high %v8272_v6, %v8276_v33  ;;  %v14049_v5 = vcombine.low %v8272_v6, %v8276_v33  ;;  %v8128_v61 = vld [vmem:[#allocation13 + $0x2d8] sm:$0xff] }
 0x798   :  { %11610 = vmatpush1.bf16.msra.mxu0 %v13841_v28  ;;  %v8140_v28 = vld [vmem:[#allocation13 + $0x338] sm:$0xff] }
 0x799   :  { %11651 = vmatpush1.bf16.msra.mxu1 %v13969_v50  ;;  %11611 = vmatprep.subr.bf16.mxu0 %v13834_v29  ;;  %v8264_v50 = vld [vmem:[#allocation13 + $0x718] sm:$0xff]  ;;  %v13914_v48 = vcombine.high %v8136_v35, %v8140_v28 }
 0x79a   :  { %11652 = vmatprep.subr.bf16.mxu1 %v13962_v16  ;;  %v8268_v29 = vld [vmem:[#allocation13 + $0x738] sm:$0xff]  ;;  %v13921_v16 = vcombine.low %v8144_v21, %v8148_v39 }
 0x79b   :  { %v14042_v12 = vcombine.high %v8264_v50, %v8268_v29  ;;  %v14041_v58 = vcombine.low %v8264_v50, %v8268_v29  ;;  %v8120_v36 = vld [vmem:[#allocation13 + $0x298] sm:$0xff] }
 0x79c   :  { %11612 = vmatpush1.bf16.msra.mxu0 %v13833_v63  ;;  %v8132_v63 = vld [vmem:[#allocation13 + $0x2f8] sm:$0xff] }
 0x79d   :  { %11653 = vmatpush1.bf16.msra.mxu1 %v13961_v2  ;;  %11613 = vmatprep.subr.bf16.mxu0 %v13826_v45  ;;  %v8256_v2 = vld [vmem:[#allocation13 + $0x6d8] sm:$0xff]  ;;  %v13906_v46 = vcombine.high %v8128_v61, %v8132_v63 }
 0x79e   :  { %11654 = vmatprep.subr.bf16.mxu1 %v13954_v13  ;;  %v8260_v45 = vld [vmem:[#allocation13 + $0x6f8] sm:$0xff]  ;;  %v13913_v13 = vcombine.low %v8136_v35, %v8140_v28 }
 0x79f   :  { %v14034_v52 = vcombine.high %v8256_v2, %v8260_v45  ;;  %v14033_v0 = vcombine.low %v8256_v2, %v8260_v45  ;;  %v8112_v47 = vld [vmem:[#allocation13 + $0x258] sm:$0xff] }
 0x7a0   :  { %11614 = vmatpush1.bf16.msra.mxu0 %v13825_v17  ;;  %v8124_v17 = vld [vmem:[#allocation13 + $0x2b8] sm:$0xff] }
 0x7a1   :  { %11655 = vmatpush1.bf16.msra.mxu1 %v13953_v60  ;;  %11615 = vmatprep.subr.bf16.mxu0 %v13818_v42  ;;  %v8248_v60 = vld [vmem:[#allocation13 + $0x698] sm:$0xff]  ;;  %v13898_v41 = vcombine.high %v8120_v36, %v8124_v17 }
 0x7a2   :  { %11656 = vmatprep.subr.bf16.mxu1 %v13946_v3  ;;  %v8252_v42 = vld [vmem:[#allocation13 + $0x6b8] sm:$0xff]  ;;  %v13905_v3 = vcombine.low %v8128_v61, %v8132_v63 }
 0x7a3   :  { %v14026_v62 = vcombine.high %v8248_v60, %v8252_v42  ;;  %v14025_v56 = vcombine.low %v8248_v60, %v8252_v42  ;;  %v8104_v11 = vld [vmem:[#allocation13 + $0x218] sm:$0xff] }
 0x7a4   :  { %11616 = vmatpush1.bf16.msra.mxu0 %v13817_v43  ;;  %v8116_v43 = vld [vmem:[#allocation13 + $0x278] sm:$0xff] }
 0x7a5   :  { %11657 = vmatpush1.bf16.msra.mxu1 %v13945_v24  ;;  %11617 = vmatprep.subr.bf16.mxu0 %v13938_v14  ;;  %v8240_v24 = vld [vmem:[#allocation13 + $0x658] sm:$0xff]  ;;  %v13890_v18 = vcombine.high %v8112_v47, %v8116_v43 }
 0x7a6   :  { %11658 = vmatprep.subr.bf16.mxu1 %v14066_v44  ;;  %v8244_v14 = vld [vmem:[#allocation13 + $0x678] sm:$0xff]  ;;  %v13897_v44 = vcombine.low %v8120_v36, %v8124_v17 }
 0x7a7   :  { %v14018_v30 = vcombine.high %v8240_v24, %v8244_v14  ;;  %v14017_v21 = vcombine.low %v8240_v24, %v8244_v14  ;;  %v8352_v33 = vld [vmem:[#allocation13 + $0x9d8] sm:$0xff] }
 0x7a8   :  { %11618 = vmatpush2.bf16.msra.mxu0 %v13937_v22  ;;  %v8108_v22 = vld [vmem:[#allocation13 + $0x238] sm:$0xff] }
 0x7a9   :  { %11659 = vmatpush2.bf16.msra.mxu1 %v14065_v8  ;;  %11619 = vmatprep.subr.bf16.mxu0 %v13930_v10  ;;  %v8232_v8 = vld [vmem:[#allocation13 + $0x618] sm:$0xff]  ;;  %v13882_v39 = vcombine.high %v8104_v11, %v8108_v22 }
 0x7aa   :  { %11660 = vmatprep.subr.bf16.mxu1 %v14058_v19  ;;  %v8236_v10 = vld [vmem:[#allocation13 + $0x638] sm:$0xff]  ;;  %v13889_v19 = vcombine.low %v8112_v47, %v8116_v43 }
 0x7ab   :  { %v14010_v6 = vcombine.high %v8232_v8, %v8236_v10  ;;  %v14009_v35 = vcombine.low %v8232_v8, %v8236_v10  ;;  %v8344_v29 = vld [vmem:[#allocation13 + $0x998] sm:$0xff] }
 0x7ac   :  { %11620 = vmatpush2.bf16.msra.mxu0 %v13929_v53  ;;  %v8356_v53 = vld [vmem:[#allocation13 + $0x9f8] sm:$0xff] }
 0x7ad   :  { %11661 = vmatpush2.bf16.msra.mxu1 %v14057_v15  ;;  %11621 = vmatprep.subr.bf16.mxu0 %v13922_v51  ;;  %v8480_v15 = vld [vmem:[#allocation13 + $0xdd8] sm:$0xff]  ;;  %v14130_v28 = vcombine.high %v8352_v33, %v8356_v53 }
 0x7ae   :  { %11662 = vmatprep.subr.bf16.mxu1 %v14050_v54  ;;  %v8484_v51 = vld [vmem:[#allocation13 + $0xdf8] sm:$0xff]  ;;  %v13881_v54 = vcombine.low %v8104_v11, %v8108_v22 }
 0x7af   :  { %v14258_v50 = vcombine.high %v8480_v15, %v8484_v51  ;;  %v14257_v61 = vcombine.low %v8480_v15, %v8484_v51  ;;  %v8336_v2 = vld [vmem:[#allocation13 + $0x958] sm:$0xff] }
 0x7b0   :  { %11622 = vmatpush2.bf16.msra.mxu0 %v13921_v16  ;;  %v8348_v16 = vld [vmem:[#allocation13 + $0x9b8] sm:$0xff] }
 0x7b1   :  { %11663 = vmatpush2.bf16.msra.mxu1 %v14049_v5  ;;  %11623 = vmatprep.subr.bf16.mxu0 %v13914_v48  ;;  %v14129_v5 = vcombine.low %v8352_v33, %v8356_v53  ;;  %v8472_v48 = vld [vmem:[#allocation13 + $0xd98] sm:$0xff]  ;;  %v14122_v63 = vcombine.high %v8344_v29, %v8348_v16  ;;  %v14121_v60 = vcombine.low %v8344_v29, %v8348_v16 }
 0x7b2   :  { %11664 = vmatprep.subr.bf16.mxu1 %v14042_v12  ;;  %v8476_v12 = vld [vmem:[#allocation13 + $0xdb8] sm:$0xff] }
 0x7b3   :  { %v8340_v45 = vld [vmem:[#allocation13 + $0x978] sm:$0xff] }
 0x7b4   :  { %11624 = vmatpush2.bf16.msra.mxu0 %v13913_v13  ;;  %v8328_v47 = vld [vmem:[#allocation13 + $0x918] sm:$0xff] }
 0x7b5   :  { %11665 = vmatpush2.bf16.msra.mxu1 %v14041_v58  ;;  %11625 = vmatprep.subr.bf16.mxu0 %v13906_v46  ;;  %v14250_v58 = vcombine.high %v8472_v48, %v8476_v12  ;;  %v8464_v46 = vld [vmem:[#allocation13 + $0xd58] sm:$0xff] }
 0x7b6   :  { %11666 = vmatprep.subr.bf16.mxu1 %v14034_v52  ;;  %v8468_v52 = vld [vmem:[#allocation13 + $0xd78] sm:$0xff] }
 0x7b7   :  { %v8332_v43 = vld [vmem:[#allocation13 + $0x938] sm:$0xff] }
 0x7b8   :  { %11626 = vmatpush2.bf16.msra.mxu0 %v13905_v3  ;;  %v14249_v3 = vcombine.low %v8472_v48, %v8476_v12  ;;  %v8456_v24 = vld [vmem:[#allocation13 + $0xd18] sm:$0xff] }
 0x7b9   :  { %11667 = vmatpush2.bf16.msra.mxu1 %v14033_v0  ;;  %11627 = vmatprep.subr.bf16.mxu0 %v13898_v41  ;;  %v14114_v0 = vcombine.high %v8336_v2, %v8340_v45  ;;  %v8460_v14 = vld [vmem:[#allocation13 + $0xd38] sm:$0xff] }
 0x7ba   :  { %11668 = vmatprep.subr.bf16.mxu1 %v14026_v62  ;;  %v14234_v11 = vcombine.high %v8456_v24, %v8460_v14  ;;  %v8320_v22 = vld [vmem:[#allocation13 + $0x8d8] sm:$0xff] }
 0x7bb   :  { %v8324_v8 = vld [vmem:[#allocation13 + $0x8f8] sm:$0xff] }
 0x7bc   :  { %11628 = vmatpush2.bf16.msra.mxu0 %v13897_v44  ;;  %v8448_v10 = vld [vmem:[#allocation13 + $0xcd8] sm:$0xff] }
 0x7bd   :  { %11669 = vmatpush2.bf16.msra.mxu1 %v14025_v56  ;;  %11629 = vmatprep.subr.bf16.mxu0 %v13890_v18  ;;  %v14113_v56 = vcombine.low %v8336_v2, %v8340_v45  ;;  %v8312_v53 = vld [vmem:[#allocation13 + $0x898] sm:$0xff] }
 0x7be   :  { %11670 = vmatprep.subr.bf16.mxu1 %v14018_v30  ;;  %v14106_v30 = vcombine.high %v8328_v47, %v8332_v43  ;;  %v8316_v15 = vld [vmem:[#allocation13 + $0x8b8] sm:$0xff] }
 0x7bf   :  { %v8440_v51 = vld [vmem:[#allocation13 + $0xc98] sm:$0xff] }
 0x7c0   :  { %11630 = vmatpush2.bf16.msra.mxu0 %v13889_v19  ;;  %v8452_v19 = vld [vmem:[#allocation13 + $0xcf8] sm:$0xff] }
 0x7c1   :  { %11671 = vmatpush2.bf16.msra.mxu1 %v14017_v21  ;;  %11631 = vmatprep.subr.bf16.mxu0 %v13882_v39  ;;  %v14105_v21 = vcombine.low %v8328_v47, %v8332_v43  ;;  %v14233_v39 = vcombine.low %v8456_v24, %v8460_v14  ;;  %v14226_v33 = vcombine.high %v8448_v10, %v8452_v19  ;;  %v8304_v16 = vld [vmem:[#allocation13 + $0x858] sm:$0xff] }
 0x7c2   :  { %11672 = vmatprep.subr.bf16.mxu1 %v14010_v6  ;;  %v14098_v6 = vcombine.high %v8320_v22, %v8324_v8  ;;  %v8432_v48 = vld [vmem:[#allocation13 + $0xc58] sm:$0xff] }
 0x7c3   :  { %v8436_v12 = vld [vmem:[#allocation13 + $0xc78] sm:$0xff] }
 0x7c4   :  { %11632 = vmatpush2.bf16.msra.mxu0 %v13881_v54  ;;  %v8444_v54 = vld [vmem:[#allocation13 + $0xcb8] sm:$0xff]  ;;  %v14210_v45 = vcombine.high %v8432_v48, %v8436_v12 }
 0x7c5   :  { %11673 = vmatpush2.bf16.msra.mxu1 %v14009_v35  ;;  %11683 = vmatprep.subr.bf16.mxu0 %v14130_v28  ;;  %v14097_v35 = vcombine.low %v8320_v22, %v8324_v8  ;;  %v14225_v28 = vcombine.low %v8448_v10, %v8452_v19  ;;  %v14218_v29 = vcombine.high %v8440_v51, %v8444_v54  ;;  %v8408_v24 = vld [vmem:[#allocation13 + $0xb98] sm:$0xff] }
 0x7c6   :  { %11724 = vmatprep.subr.bf16.mxu1 %v14258_v50  ;;  %v14090_v50 = vcombine.high %v8312_v53, %v8316_v15  ;;  %v8412_v14 = vld [vmem:[#allocation13 + $0xbb8] sm:$0xff] }
 0x7c7   :  { %v11389_v13 = vpop.f32.mrf.mxu0  ;;  %11634 = vmatmul.mubr.bf16.vlgmr.msra.gmra.mxu0 %v15437_v4  ;;  %v8404_v22 = vld [vmem:[#allocation13 + $0xb78] sm:$0xff]  ;;  %v14185_v19 = vcombine.low %v8408_v24, %v8412_v14 }
 0x7c8   :  { %v11390_v36 = vadd.f32 %v11389_v13, %v15491_v38  ;;  %v11430_v17 = vpop.f32.mrf.mxu1  ;;  %11675 = vmatmul.mubr.bf16.vlgmr.msra.gmra.mxu1 %v15439_v9  ;;  %11684 = vmatpush1.bf16.msra.mxu0 %v14129_v5  ;;  %v14242_v38 = vcombine.high %v8464_v46, %v8468_v52  ;;  %v8308_v5 = vld [vmem:[#allocation13 + $0x878] sm:$0xff] }
 0x7c9   :  { %11715 = vmatprep.mubr.bf16.mxu0 %v15445_v1  ;;  %11725 = vmatpush1.bf16.msra.mxu1 %v14257_v61  ;;  %v11391_v42 = vpop.f32.mrf.mxu0  ;;  %v14089_v61 = vcombine.low %v8312_v53, %v8316_v15  ;;  %v14082_v2 = vcombine.high %v8304_v16, %v8308_v5  ;;  %v8296_v13 = vld [vmem:[#allocation13 + $0x818] sm:$0xff] }
 0x7ca   :  { %v15501_v41 = vadd.f32 %v11430_v17, %v11390_v36  ;;  %11756 = vmatprep.mubr.bf16.mxu1 %v15447_v55  ;;  %v11392_v4 = vadd.f32 %v11391_v42, %v15495_v25  ;;  %v11432_v62 = vpop.f32.mrf.mxu1  ;;  %11685 = vmatprep.subr.bf16.mxu0 %v14122_v63  ;;  %v14241_v55 = vcombine.low %v8464_v46, %v8468_v52  ;;  %v8424_v46 = vld [vmem:[#allocation13 + $0xc18] sm:$0xff] }
 0x7cb   :  { %v11393_v9 = vpop.f32.mrf.mxu0  ;;  %11726 = vmatprep.subr.bf16.mxu1 %v14250_v58  ;;  %v14217_v63 = vcombine.low %v8440_v51, %v8444_v54  ;;  %v8300_v58 = vld [vmem:[#allocation13 + $0x838] sm:$0xff]  ;;  %v14081_v36 = vcombine.low %v8304_v16, %v8308_v5  ;;  %v14209_v17 = vcombine.low %v8432_v48, %v8436_v12 }
 0x7cc   :  { %v15505_v1 = vadd.f32 %v11432_v62, %v11392_v4  ;;  %v11434_v44 = vpop.f32.mrf.mxu1  ;;  %11686 = vmatpush1.bf16.msra.mxu0 %v14121_v60  ;;  %v8428_v52 = vld [vmem:[#allocation13 + $0xc38] sm:$0xff]  ;;  %v14074_v60 = vcombine.high %v8296_v13, %v8300_v58 }
 0x7cd   :  { %11727 = vmatpush1.bf16.msra.mxu1 %v14249_v3  ;;  %v11394_v18 = vpop.f32.mrf.mxu0  ;;  %11687 = vmatprep.subr.bf16.mxu0 %v14114_v0  ;;  %v14202_v42 = vcombine.high %v8424_v46, %v8428_v52  ;;  %v8416_v3 = vld [vmem:[#allocation13 + $0xbd8] sm:$0xff]  ;;  %v14201_v47 = vcombine.low %v8424_v46, %v8428_v52 }
 0x7ce   :  { %v11435_v25 = vpop.f32.mrf.mxu1  ;;  %11728 = vmatprep.subr.bf16.mxu1 %v14242_v38  ;;  %v8420_v0 = vld [vmem:[#allocation13 + $0xbf8] sm:$0xff]  ;;  %v14073_v38 = vcombine.low %v8296_v13, %v8300_v58 }
 0x7cf   :  { %v8544_v4 = vld [vmem:[#allocation13 + $0xfd8] sm:$0xff]  ;;  %v14194_v43 = vcombine.high %v8416_v3, %v8420_v0  ;;  %v14193_v18 = vcombine.low %v8416_v3, %v8420_v0 }
 0x7d0   :  { %11688 = vmatpush1.bf16.msra.mxu0 %v14113_v56  ;;  %v8548_v62 = vld [vmem:[#allocation13 + $0xff8] sm:$0xff] }
 0x7d1   :  { %11729 = vmatpush1.bf16.msra.mxu1 %v14241_v55  ;;  %11689 = vmatprep.subr.bf16.mxu0 %v14106_v30  ;;  %v14322_v9 = vcombine.high %v8544_v4, %v8548_v62  ;;  %v8536_v44 = vld [vmem:[#allocation13 + $0xf98] sm:$0xff]  ;;  %v14321_v55 = vcombine.low %v8544_v4, %v8548_v62  ;;  %v14186_v30 = vcombine.high %v8408_v24, %v8412_v14 }
 0x7d2   :  { %11730 = vmatprep.subr.bf16.mxu1 %v14234_v11  ;;  %v8540_v56 = vld [vmem:[#allocation13 + $0xfb8] sm:$0xff] }
 0x7d3   :  { %v14314_v25 = vcombine.high %v8536_v44, %v8540_v56  ;;  %v8400_v11 = vld [vmem:[#allocation13 + $0xb58] sm:$0xff] }
 0x7d4   :  { %11690 = vmatpush1.bf16.msra.mxu0 %v14105_v21  ;;  %v8528_v8 = vld [vmem:[#allocation13 + $0xf58] sm:$0xff]  ;;  %v14313_v21 = vcombine.low %v8536_v44, %v8540_v56  ;;  %v14177_v54 = vcombine.low %v8400_v11, %v8404_v22 }
 0x7d5   :  { %11731 = vmatpush1.bf16.msra.mxu1 %v14233_v39  ;;  %11691 = vmatprep.subr.bf16.mxu0 %v14098_v6  ;;  %v8532_v10 = vld [vmem:[#allocation13 + $0xf78] sm:$0xff]  ;;  %v14178_v39 = vcombine.high %v8400_v11, %v8404_v22 }
 0x7d6   :  { %11732 = vmatprep.subr.bf16.mxu1 %v14226_v33  ;;  %v14306_v6 = vcombine.high %v8528_v8, %v8532_v10  ;;  %v8392_v33 = vld [vmem:[#allocation13 + $0xb18] sm:$0xff] }
 0x7d7   :  { %v8396_v53 = vld [vmem:[#allocation13 + $0xb38] sm:$0xff] }
 0x7d8   :  { %11692 = vmatpush1.bf16.msra.mxu0 %v14097_v35  ;;  %v8520_v15 = vld [vmem:[#allocation13 + $0xf18] sm:$0xff]  ;;  %v14305_v35 = vcombine.low %v8528_v8, %v8532_v10  ;;  %v14169_v12 = vcombine.low %v8392_v33, %v8396_v53 }
 0x7d9   :  { %11733 = vmatpush1.bf16.msra.mxu1 %v14225_v28  ;;  %11693 = vmatprep.subr.bf16.mxu0 %v14090_v50  ;;  %v8524_v51 = vld [vmem:[#allocation13 + $0xf38] sm:$0xff]  ;;  %v14170_v28 = vcombine.high %v8392_v33, %v8396_v53 }
 0x7da   :  { %11734 = vmatprep.subr.bf16.mxu1 %v14218_v29  ;;  %v14298_v50 = vcombine.high %v8520_v15, %v8524_v51  ;;  %v8384_v29 = vld [vmem:[#allocation13 + $0xad8] sm:$0xff] }
 0x7db   :  { %v8388_v16 = vld [vmem:[#allocation13 + $0xaf8] sm:$0xff] }
 0x7dc   :  { %11694 = vmatpush1.bf16.msra.mxu0 %v14089_v61  ;;  %v8512_v5 = vld [vmem:[#allocation13 + $0xed8] sm:$0xff]  ;;  %v14297_v61 = vcombine.low %v8520_v15, %v8524_v51  ;;  %v14161_v52 = vcombine.low %v8384_v29, %v8388_v16 }
 0x7dd   :  { %11735 = vmatpush1.bf16.msra.mxu1 %v14217_v63  ;;  %11695 = vmatprep.subr.bf16.mxu0 %v14082_v2  ;;  %v8516_v48 = vld [vmem:[#allocation13 + $0xef8] sm:$0xff]  ;;  %v14162_v63 = vcombine.high %v8384_v29, %v8388_v16 }
 0x7de   :  { %11736 = vmatprep.subr.bf16.mxu1 %v14210_v45  ;;  %v14290_v2 = vcombine.high %v8512_v5, %v8516_v48  ;;  %v8376_v45 = vld [vmem:[#allocation13 + $0xa98] sm:$0xff] }
 0x7df   :  { %v8380_v13 = vld [vmem:[#allocation13 + $0xab8] sm:$0xff] }
 0x7e0   :  { %11696 = vmatpush1.bf16.msra.mxu0 %v14081_v36  ;;  %v8504_v58 = vld [vmem:[#allocation13 + $0xe98] sm:$0xff]  ;;  %v14289_v36 = vcombine.low %v8512_v5, %v8516_v48  ;;  %v14153_v62 = vcombine.low %v8376_v45, %v8380_v13 }
 0x7e1   :  { %11737 = vmatpush1.bf16.msra.mxu1 %v14209_v17  ;;  %11697 = vmatprep.subr.bf16.mxu0 %v14074_v60  ;;  %v8508_v46 = vld [vmem:[#allocation13 + $0xeb8] sm:$0xff]  ;;  %v14154_v17 = vcombine.high %v8376_v45, %v8380_v13  ;;  %v14497_v45 = vld [vmem:[#allocation17 + $0xb8] sm:$0xff]   ;;  %v14498_v13 = vld [vmem:[#allocation17 + $0x70] sm:$0xff]  }
 0x7e2   :  { %11738 = vmatprep.subr.bf16.mxu1 %v14202_v42  ;;  %v14282_v60 = vcombine.high %v8504_v58, %v8508_v46  ;;  %v8368_v42 = vld [vmem:[#allocation13 + $0xa58] sm:$0xff] }
 0x7e3   :  { %v8372_v3 = vld [vmem:[#allocation13 + $0xa78] sm:$0xff] }
 0x7e4   :  { %11698 = vmatpush1.bf16.msra.mxu0 %v14073_v38  ;;  %v8496_v0 = vld [vmem:[#allocation13 + $0xe58] sm:$0xff]  ;;  %v14281_v38 = vcombine.low %v8504_v58, %v8508_v46  ;;  %v14145_v56 = vcombine.low %v8368_v42, %v8372_v3  ;;  %v14499_v58 = vld [vmem:[#allocation17 + $0xf0] sm:$0xff]  }
 0x7e5   :  { %11739 = vmatpush1.bf16.msra.mxu1 %v14201_v47  ;;  %11699 = vmatprep.subr.bf16.mxu0 %v14194_v43  ;;  %v8500_v4 = vld [vmem:[#allocation13 + $0xe78] sm:$0xff]  ;;  %v14146_v47 = vcombine.high %v8368_v42, %v8372_v3 }
 0x7e6   :  { %11740 = vmatprep.subr.bf16.mxu1 %v14322_v9  ;;  %v14274_v43 = vcombine.high %v8496_v0, %v8500_v4  ;;  %v8360_v9 = vld [vmem:[#allocation13 + $0xa18] sm:$0xff] }
 0x7e7   :  { %v8364_v24 = vld [vmem:[#allocation13 + $0xa38] sm:$0xff] }
 0x7e8   :  { %11700 = vmatpush2.bf16.msra.mxu0 %v14193_v18  ;;  %v8488_v14 = vld [vmem:[#allocation13 + $0xe18] sm:$0xff]  ;;  %v14273_v18 = vcombine.low %v8496_v0, %v8500_v4 }
 0x7e9   :  { %11741 = vmatpush2.bf16.msra.mxu1 %v14321_v55  ;;  %11701 = vmatprep.subr.bf16.mxu0 %v14186_v30  ;;  %v8492_v44 = vld [vmem:[#allocation13 + $0xe38] sm:$0xff]  ;;  %v14138_v55 = vcombine.high %v8360_v9, %v8364_v24 }
 0x7ea   :  { %11742 = vmatprep.subr.bf16.mxu1 %v14314_v25  ;;  %v14266_v30 = vcombine.high %v8488_v14, %v8492_v44  ;;  %v14137_v25 = vcombine.low %v8360_v9, %v8364_v24  ;;  %v14265_v11 = vcombine.low %v8488_v14, %v8492_v44  ;;  %v14502_v0 = vld [vmem:[#allocation17 + $0x68] sm:$0xff]   ;;  %v14506_v14 = vld [vmem:[#allocation17 + $0x60] sm:$0xff]  }
 0x7eb   :  { %v14503_v4 = vld [vmem:[#allocation17 + $0xe8] sm:$0xff]   ;;  %v14507_v44 = vld [vmem:[#allocation17 + $0xe0] sm:$0xff]  }
 0x7ec   :  { %11702 = vmatpush2.bf16.msra.mxu0 %v14185_v19 }
 0x7ed   :  { %11743 = vmatpush2.bf16.msra.mxu1 %v14313_v21  ;;  %11703 = vmatprep.subr.bf16.mxu0 %v14178_v39 }
 0x7ee   :  { %11744 = vmatprep.subr.bf16.mxu1 %v14306_v6 }
 0x7f0   :  { %11704 = vmatpush2.bf16.msra.mxu0 %v14177_v54 }
 0x7f1   :  { %11745 = vmatpush2.bf16.msra.mxu1 %v14305_v35  ;;  %11705 = vmatprep.subr.bf16.mxu0 %v14170_v28 }
 0x7f2   :  { %11746 = vmatprep.subr.bf16.mxu1 %v14298_v50 }
 0x7f4   :  { %11706 = vmatpush2.bf16.msra.mxu0 %v14169_v12 }
 0x7f5   :  { %11747 = vmatpush2.bf16.msra.mxu1 %v14297_v61  ;;  %11707 = vmatprep.subr.bf16.mxu0 %v14162_v63  ;;  %v14494_v61 = vld [vmem:[#allocation17 + $0x78] sm:$0xff]  }
 0x7f6   :  { %11748 = vmatprep.subr.bf16.mxu1 %v14290_v2  ;;  %v14495_v63 = vld [vmem:[#allocation17 + $0xf8] sm:$0xff]  }
 0x7f7   :  { %v14496_v2 = vld [vmem:[#allocation17 + $0x38] sm:$0xff]  }
 0x7f8   :  { %11708 = vmatpush2.bf16.msra.mxu0 %v14161_v52  ;;  %v14500_v52 = vld [vmem:[#allocation17 + $0x30] sm:$0xff]  }
 0x7f9   :  { %11749 = vmatpush2.bf16.msra.mxu1 %v14289_v36  ;;  %11709 = vmatprep.subr.bf16.mxu0 %v14154_v17  ;;  %v14501_v36 = vld [vmem:[#allocation17 + $0xb0] sm:$0xff]  }
 0x7fa   :  { %11750 = vmatprep.subr.bf16.mxu1 %v14282_v60 }
 0x7fc   :  { %11710 = vmatpush2.bf16.msra.mxu0 %v14153_v62 }
 0x7fd   :  { %11751 = vmatpush2.bf16.msra.mxu1 %v14281_v38  ;;  %11711 = vmatprep.subr.bf16.mxu0 %v14146_v47  ;;  %v14504_v38 = vld [vmem:[#allocation17 + $0x28] sm:$0xff]  }
 0x7fe   :  { %11752 = vmatprep.subr.bf16.mxu1 %v14274_v43  ;;  %v14505_v47 = vld [vmem:[#allocation17 + $0xa8] sm:$0xff]  }
 0x800   :  { %11712 = vmatpush2.bf16.msra.mxu0 %v14145_v56  ;;  %v14508_v56 = vld [vmem:[#allocation17 + $0x20] sm:$0xff]  }
 0x801   :  { %11753 = vmatpush2.bf16.msra.mxu1 %v14273_v18  ;;  %11713 = vmatprep.subr.bf16.mxu0 %v14138_v55  ;;  %v14509_v18 = vld [vmem:[#allocation17 + $0xa0] sm:$0xff]   ;;  %v14510_v55 = vld [vmem:[#allocation17 + $0x58] sm:$0xff]  }
 0x802   :  { %11754 = vmatprep.subr.bf16.mxu1 %v14266_v30  ;;  %v14511_v30 = vld [vmem:[#allocation17 + $0xd8] sm:$0xff]  }
 0x804   :  { %11714 = vmatpush2.bf16.msra.mxu0 %v14137_v25  ;;  %v14512_v25 = vld [vmem:[#allocation17 + $0x18] sm:$0xff]  }
 0x805   :  { %11755 = vmatpush2.bf16.msra.mxu1 %v14265_v11  ;;  %14388 = vmatprep.subr.bf16.mxu0 %v14494_v61  ;;  %v14513_v11 = vld [vmem:[#allocation17 + $0x98] sm:$0xff]  }
 0x806   :  { %14410 = vmatprep.subr.bf16.mxu1 %v14495_v63 }
 0x807   :  { %v11471_v22 = vpop.f32.mrf.mxu0  ;;  %11716 = vmatmul.mubr.bf16.vlgmr.msra.gmra.mxu0 %v15459_v23 }
 0x808   :  { %v11512_v8 = vpop.f32.mrf.mxu1  ;;  %11757 = vmatmul.mubr.bf16.vlgmr.msra.gmra.mxu1 %v15461_v49  ;;  %14389 = vmatpush3.bf16.msra.mxu0 %v14496_v2 }
 0x809   :  { %v11513_v10 = vadd.f32 %v11512_v8, %v11471_v22  ;;  %v11473_v19 = vpop.f32.mrf.mxu0  ;;  %14411 = vmatpush3.bf16.msra.mxu1 %v14497_v45  ;;  %14390 = vmatprep.subr.bf16.mxu0 %v14498_v13  ;;  %v14514_v22 = vld [vmem:[#allocation17 + $0x50] sm:$0xff]  }
 0x80a   :  { %v11514_v21 = vpop.f32.mrf.mxu1  ;;  %14412 = vmatprep.subr.bf16.mxu1 %v14499_v58  ;;  %v14515_v8 = vld [vmem:[#allocation17 + $0xd0] sm:$0xff]  }
 0x80b   :  { %v11515_v39 = vadd.f32 %v11514_v21, %v11473_v19  ;;  %v11475_v6 = vpop.f32.mrf.mxu0  ;;  %v14517_v19 = vld [vmem:[#allocation17 + $0x90] sm:$0xff]   ;;  %v14518_v21 = vld [vmem:[#allocation17 + $0x48] sm:$0xff]  }
 0x80c   :  { %v11516_v33 = vpop.f32.mrf.mxu1  ;;  %14391 = vmatpush3.bf16.msra.mxu0 %v14500_v52  ;;  %v14520_v6 = vld [vmem:[#allocation17 + $0x8] sm:$0xff]  }
 0x80d   :  { %v11476_v53 = vpop.f32.mrf.mxu0  ;;  %14413 = vmatpush3.bf16.msra.mxu1 %v14501_v36  ;;  %14392 = vmatprep.subr.bf16.mxu0 %v14502_v0  ;;  %v14521_v33 = vld [vmem:[#allocation17 + $0x88] sm:$0xff]  }
 0x80e   :  { %v11517_v15 = vpop.f32.mrf.mxu1  ;;  %14414 = vmatprep.subr.bf16.mxu1 %v14503_v4  ;;  %v14522_v53 = vld [vmem:[#allocation17 + $0x40] sm:$0xff]  }
 0x80f   :  { %v14523_v15 = vld [vmem:[#allocation17 + $0xc0] sm:$0xff]  }
 0x810   :  { %14393 = vmatpush3.bf16.msra.mxu0 %v14504_v38 }
 0x811   :  { %14415 = vmatpush3.bf16.msra.mxu1 %v14505_v47  ;;  %14394 = vmatprep.subr.bf16.mxu0 %v14506_v14 }
 0x812   :  { %14416 = vmatprep.subr.bf16.mxu1 %v14507_v44 }
 0x814   :  { %14395 = vmatpush3.bf16.msra.mxu0 %v14508_v56 }
 0x815   :  { %14417 = vmatpush3.bf16.msra.mxu1 %v14509_v18  ;;  %14396 = vmatprep.subr.bf16.mxu0 %v14510_v55 }
 0x816   :  { %14418 = vmatprep.subr.bf16.mxu1 %v14511_v30 }
 0x818   :  { %14397 = vmatpush3.bf16.msra.mxu0 %v14512_v25 }
 0x819   :  { %14419 = vmatpush3.bf16.msra.mxu1 %v14513_v11  ;;  %14398 = vmatprep.subr.bf16.mxu0 %v14514_v22 }
 0x81a   :  { %14420 = vmatprep.subr.bf16.mxu1 %v14515_v8 }
 0x81d   :  { %14421 = vmatpush3.bf16.msra.mxu1 %v14517_v19 }
 0x847   :  { %v11553_v51 = vpop.f32.mrf.mxu0 }
 0x848   :  { %v11554_v54 = vadd.f32 %v11553_v51, %v11513_v10  ;;  %v11594_v35 = vpop.f32.mrf.mxu1  ;;  %v14516_v10 = vld [vmem:[#allocation17 + $0x10] sm:$0xff]   ;;  %v14524_v51 = vld [vmem:[#allocation17] sm:$0xff]  }
 0x849   :  { %v11555_v28 = vpop.f32.mrf.mxu0  ;;  %14399 = vmatpush3.bf16.msra.mxu0 %v14516_v10 }
 0x84a   :  { %v15509_v50 = vadd.f32 %v11594_v35, %v11554_v54  ;;  %v11556_v29 = vadd.f32 %v11555_v28, %v11515_v39  ;;  %v11596_v16 = vpop.f32.mrf.mxu1  ;;  %v14519_v39 = vld [vmem:[#allocation17 + $0xc8] sm:$0xff]   ;;  %14400 = vmatprep.subr.bf16.mxu0 %v14518_v21  ;;  %v14525_v54 = vld [vmem:[#allocation17 + $0x80] sm:$0xff]   ;;  %v14526_v35 = vld [vmem:[#allocation17 + $0x178] sm:$0xff]  }
 0x84b   :  { %v11557_v23 = vpop.f32.mrf.mxu0  ;;  %14422 = vmatprep.subr.bf16.mxu1 %v14519_v39  ;;  %v14527_v28 = vld [vmem:[#allocation17 + $0x1f8] sm:$0xff]  }
 0x84c   :  { %v15511_v5 = vadd.f32 %v11596_v16, %v11556_v29  ;;  %v11598_v49 = vpop.f32.mrf.mxu1  ;;  %14423 = vmatpush3.bf16.msra.mxu1 %v14521_v33  ;;  %v11783_v29 = vrot.slane %v15505_v1, 4  ;;  %v11771_v16 = vrot.slane %v15487_v27, 4  ;;  %v11777_v23 = vrot.slane %v15501_v41, 4 }
 0x84d   :  { %v11558_v48 = vpop.f32.mrf.mxu0  ;;  %14401 = vmatpush3.bf16.msra.mxu0 %v14520_v6  ;;  %14424 = vmatprep.subr.bf16.mxu1 %v14523_v15  ;;  %v11765_v49 = vrot.slane %v15483_v7, 4  ;;  %v11789_v2 = vrot.slane %v15509_v50, 4 }
 0x84e   :  { %v11599_v12 = vpop.f32.mrf.mxu1  ;;  %14402 = vmatprep.subr.bf16.mxu0 %v14522_v53  ;;  %v11784_v48 = vadd.f32 %v11783_v29, %v15505_v1  ;;  %v11772_v61 = vadd.f32 %v11771_v16, %v15487_v27  ;;  %v11778_v63 = vadd.f32 %v11777_v23, %v15501_v41 }
 0x84f   :  { %v11795_v12 = vrot.slane %v15511_v5, 4  ;;  %v11766_v45 = vadd.f32 %v11765_v49, %v15483_v7  ;;  %v11790_v36 = vadd.f32 %v11789_v2, %v15509_v50 }
 0x850   :  { %14425 = vmatpush3.bf16.msra.mxu1 %v14525_v54  ;;  %v11785_v13 = vrot.slane %v11784_v48, 2  ;;  %v11779_v52 = vrot.slane %v11778_v63, 2 }
 0x851   :  { %14403 = vmatpush3.bf16.msra.mxu0 %v14524_v51  ;;  %14454 = vmatprep.subr.bf16.mxu1 %v14527_v28  ;;  %v11796_v58 = vadd.f32 %v11795_v12, %v15511_v5  ;;  %v11791_v47 = vrot.slane %v11790_v36, 2 }
 0x852   :  { %14432 = vmatprep.subr.bf16.mxu0 %v14526_v35  ;;  %v11786_v0 = vadd.f32 %v11785_v13, %v11784_v48  ;;  %v11780_v38 = vadd.f32 %v11779_v52, %v11778_v63 }
 0x853   :  { %v11797_v4 = vrot.slane %v11796_v58, 2  ;;  %v11792_v56 = vadd.f32 %v11791_v47, %v11790_v36 }
 0x854   :  { %v11781_v44 = vrot.slane %v11780_v38, 1 }
 0x855   :  { %v11793_v22 = vrot.slane %v11792_v56, 1 }
 0x856   :  { %v11782_v11 = vadd.f32 %v11781_v44, %v11780_v38 }
 0x857   :  { %v11794_v6 = vadd.f32 %v11793_v22, %v11792_v56 }
 0x858   :  { %v15535_v39 = vmul.f32 0.125, %v11782_v11 }
 0x859   :  { %v15547_v35 = vmul.f32 0.125, %v11794_v6 }
 0x85a   :  { %v11823_v54 = vsub.f32 %v15501_v41, %v15535_v39 }
 0x85b   :  { %v11825_v48 = vsub.f32 %v15509_v50, %v15547_v35 }
 0x85c   :  { %v11831_v49 = vmul.f32 %v11823_v54, %v11823_v54 }
 0x85e   :  { %v11849_v36 = vrot.slane %v11831_v49, 4 }
 0x860   :  { %v11850_v44 = vadd.f32 %v11849_v36, %v11831_v49 }
 0x887   :  { %v11635_v46 = vpop.f32.mrf.mxu0 }
 0x888   :  { %v11676_v17 = vpop.f32.mrf.mxu1 }
 0x889   :  { %v15513_v60 = vadd.f32 %v11676_v17, %v11635_v46  ;;  %v15515_v42 = vpop.f32.mrf.mxu0  ;;  %v11773_v46 = vrot.slane %v11772_v61, 2  ;;  %v11767_v17 = vrot.slane %v11766_v45, 2 }
 0x88a   :  { %v15517_v3 = vpop.f32.mrf.mxu1 }
 0x88b   :  { %v11639_v62 = vpop.f32.mrf.mxu0 }
 0x88c   :  { %v11680_v43 = vpop.f32.mrf.mxu1  ;;  %v11774_v62 = vadd.f32 %v11773_v46, %v11772_v61 }
 0x88d   :  { %v11640_v9 = vpop.f32.mrf.mxu0  ;;  %v11768_v43 = vadd.f32 %v11767_v17, %v11766_v45  ;;  %v11679_v45 = vadd.f32 %v15517_v3, %v15515_v42  ;;  %v11833_v17 = vmul.f32 %v11825_v48, %v11825_v48 }
 0x88e   :  { %v11681_v24 = vpop.f32.mrf.mxu1  ;;  %v11787_v9 = vrot.slane %v11786_v0, 1  ;;  %v11775_v14 = vrot.slane %v11774_v62, 1 }
 0x88f   :  { %v11798_v24 = vadd.f32 %v11797_v4, %v11796_v58  ;;  %v11769_v18 = vrot.slane %v11768_v43, 1  ;;  %v11861_v56 = vrot.slane %v11833_v17, 4 }
 0x890   :  { %v11788_v55 = vadd.f32 %v11787_v9, %v11786_v0  ;;  %v11776_v25 = vadd.f32 %v11775_v14, %v11774_v62 }
 0x891   :  { %v11799_v30 = vrot.slane %v11798_v24, 1  ;;  %v11770_v8 = vadd.f32 %v11769_v18, %v11768_v43 }
 0x892   :  { %v15531_v10 = vmul.f32 0.125, %v11788_v55  ;;  %v15533_v21 = vmul.f32 0.125, %v11776_v25 }
 0x893   :  { %v11800_v19 = vadd.f32 %v11799_v30, %v11798_v24  ;;  %v15537_v33 = vmul.f32 0.125, %v11770_v8 }
 0x894   :  { %v11824_v53 = vsub.f32 %v15505_v1, %v15531_v10  ;;  %v11822_v51 = vsub.f32 %v15487_v27, %v15533_v21 }
 0x895   :  { %v15541_v15 = vmul.f32 0.125, %v11800_v19  ;;  %v11821_v28 = vsub.f32 %v15483_v7, %v15537_v33 }
 0x896   :  { %v11832_v29 = vmul.f32 %v11824_v53, %v11824_v53  ;;  %v11830_v23 = vmul.f32 %v11822_v51, %v11822_v51  ;;  %v11851_v53 = vrot.slane %v11850_v44, 2  ;;  %v11862_v51 = vadd.f32 %v11861_v56, %v11833_v17 }
 0x897   :  { %v11826_v16 = vsub.f32 %v15511_v5, %v15541_v15  ;;  %v11829_v12 = vmul.f32 %v11821_v28, %v11821_v28 }
 0x898   :  { %v11855_v63 = vrot.slane %v11832_v29, 4  ;;  %v11843_v46 = vrot.slane %v11830_v23, 4 }
 0x899   :  { %v11834_v2 = vmul.f32 %v11826_v16, %v11826_v16  ;;  %v11837_v38 = vrot.slane %v11829_v12, 4 }
 0x89a   :  { %v11856_v43 = vadd.f32 %v11855_v63, %v11832_v29  ;;  %v11844_v3 = vadd.f32 %v11843_v46, %v11830_v23  ;;  %v11852_v63 = vadd.f32 %v11851_v53, %v11850_v44 }
 0x89b   :  { %v11867_v9 = vrot.slane %v11834_v2, 4  ;;  %v11838_v25 = vadd.f32 %v11837_v38, %v11829_v12 }
 0x89c   :  { %v11857_v11 = vrot.slane %v11856_v43, 2  ;;  %v11845_v6 = vrot.slane %v11844_v3, 2  ;;  %v11853_v17 = vrot.slane %v11852_v63, 1 }
 0x89d   :  { %v11868_v22 = vadd.f32 %v11867_v9, %v11834_v2  ;;  %v11839_v29 = vrot.slane %v11838_v25, 2 }
 0x89e   :  { %v11858_v16 = vadd.f32 %v11857_v11, %v11856_v43  ;;  %v11854_v44 = vadd.f32 %v11853_v17, %v11852_v63 }
 0x89f   :  { %v11869_v23 = vrot.slane %v11868_v22, 2 }
 0x8a0   :  { %v11859_v2 = vrot.slane %v11858_v16, 1 }
 0x8a1   :  { %v11870_v46 = vadd.f32 %v11869_v23, %v11868_v22 }
 0x8a2   :  { %v11860_v9 = vadd.f32 %v11859_v2, %v11858_v16 }
 0x8c7   :  { %v11717_v61 = vpop.f32.mrf.mxu0 }
 0x8c8   :  { %v11718_v13 = vadd.f32 %v11717_v61, %v15513_v60  ;;  %v11758_v58 = vpop.f32.mrf.mxu1  ;;  %v11846_v61 = vadd.f32 %v11845_v6, %v11844_v3  ;;  %v11887_v6 = vmul.f32 0.125, %v11854_v44 }
 0x8c9   :  { %v11719_v52 = vpop.f32.mrf.mxu0 }
 0x8ca   :  { %v15558_v0 = vadd.f32 %v11758_v58, %v11718_v13  ;;  %v11720_v4 = vadd.f32 %v11719_v52, %v11679_v45  ;;  %v11760_v62 = vpop.f32.mrf.mxu1  ;;  %v11863_v45 = vrot.slane %v11862_v51, 2  ;;  %v11840_v58 = vadd.f32 %v11839_v29, %v11838_v25 }
 0x8cb   :  { %v11721_v47 = vpop.f32.mrf.mxu0  ;;  %v11888_v25 = vmul.f32 0.125, %v11860_v9 }
 0x8cc   :  { %v11801_v24 = vrot.slane %v15558_v0, 4  ;;  %v15561_v14 = vadd.f32 %v11760_v62, %v11720_v4  ;;  %v11762_v42 = vpop.f32.mrf.mxu1  ;;  %v11847_v4 = vrot.slane %v11846_v61, 1  ;;  %v11864_v62 = vadd.f32 %v11863_v45, %v11862_v51 }
 0x8cd   :  { %v11722_v60 = vpop.f32.mrf.mxu0  ;;  %v11841_v43 = vrot.slane %v11840_v58, 1  ;;  %v11897_v29 = vadd.f32 1e-05, %v11888_v25 }
 0x8ce   :  { %v11802_v18 = vadd.f32 %v11801_v24, %v15558_v0  ;;  %v11807_v55 = vrot.slane %v15561_v14, 4  ;;  %v11763_v30 = vpop.f32.mrf.mxu1  ;;  %v11871_v24 = vrot.slane %v11870_v46, 1  ;;  %v11848_v60 = vadd.f32 %v11847_v4, %v11846_v61 }
 0x8cf   :  { %v11865_v56 = vrot.slane %v11864_v62, 1  ;;  %v11842_v30 = vadd.f32 %v11841_v43, %v11840_v58  ;;  %v11896_v61 = vadd.f32 1e-05, %v11887_v6  ;;  %14590 = vrsqrt.f32 %v11897_v29  ;;  %v11893_v29 = vld [vmem:[#allocation14] sm:$0xff] }
 0x8d0   :  { %v11803_v8 = vrot.slane %v11802_v18, 2  ;;  %v11808_v19 = vadd.f32 %v11807_v55, %v15561_v14  ;;  %v11872_v11 = vadd.f32 %v11871_v24, %v11870_v46 }
 0x8d1   :  { %v11866_v53 = vadd.f32 %v11865_v56, %v11864_v62 }
 0x8d2   :  { %v11804_v54 = vadd.f32 %v11803_v8, %v11802_v18  ;;  %v11809_v28 = vrot.slane %v11808_v19, 2  ;;  %v11890_v16 = vmul.f32 0.125, %v11872_v11 }
 0x8d3   :  { %v11889_v63 = vmul.f32 0.125, %v11866_v53 }
 0x8d4   :  { %v11805_v49 = vrot.slane %v11804_v54, 1  ;;  %v11810_v48 = vadd.f32 %v11809_v28, %v11808_v19  ;;  %v11886_v19 = vmul.f32 0.125, %v11848_v60  ;;  %v11885_v28 = vmul.f32 0.125, %v11842_v30 }
 0x8d5   :  { %v11899_v58 = vadd.f32 1e-05, %v11890_v16 }
 0x8d6   :  { %v11806_v13 = vadd.f32 %v11805_v49, %v11804_v54  ;;  %v11811_v12 = vrot.slane %v11810_v48, 1 }
 0x8d8   :  { %v15566_v52 = vmul.f32 0.125, %v11806_v13  ;;  %v11812_v36 = vadd.f32 %v11811_v12, %v11810_v48  ;;  %v11895_v48 = vadd.f32 1e-05, %v11886_v19  ;;  %v11894_v12 = vadd.f32 1e-05, %v11885_v28 }
 0x8da   :  { %v11827_v38 = vsub.f32 %v15558_v0, %v15566_v52  ;;  %v15570_v47 = vmul.f32 0.125, %v11812_v36  ;;  %14592 = vrsqrt.f32 %v11895_v48  ;;  %v11898_v36 = vadd.f32 1e-05, %v11889_v63 }
 0x8db   :  { %14594 = vrsqrt.f32 %v11896_v61 }
 0x8dc   :  { %v11835_v42 = vmul.f32 %v11827_v38, %v11827_v38  ;;  %v11828_v3 = vsub.f32 %v15561_v14, %v15570_v47  ;;  %14596 = vrsqrt.f32 %v11894_v12  ;;  %v14591_v9 = vpop.eup %14590 }
 0x8dd   :  { %14598 = vrsqrt.f32 %v11899_v58 }
 0x8de   :  { %v11873_v18 = vrot.slane %v11835_v42, 4  ;;  %v11836_v55 = vmul.f32 %v11828_v3, %v11828_v3  ;;  %14600 = vrsqrt.f32 %v11898_v36 }
 0x8e0   :  { %v11874_v22 = vadd.f32 %v11873_v18, %v11835_v42  ;;  %v11879_v8 = vrot.slane %v11836_v55, 4 }
 0x8e2   :  { %v11875_v51 = vrot.slane %v11874_v22, 2  ;;  %v11880_v54 = vadd.f32 %v11879_v8, %v11836_v55 }
 0x8e4   :  { %v11876_v23 = vadd.f32 %v11875_v51, %v11874_v22  ;;  %v11881_v49 = vrot.slane %v11880_v54, 2 }
 0x8e6   :  { %v11877_v45 = vrot.slane %v11876_v23, 1  ;;  %v11882_v13 = vadd.f32 %v11881_v49, %v11880_v54 }
 0x8e7   :  { %v14593_v24 = vpop.eup %14592 }
 0x8e8   :  { %v11878_v2 = vadd.f32 %v11877_v45, %v11876_v23  ;;  %v11883_v46 = vrot.slane %v11882_v13, 1  ;;  %v14595_v42 = vpop.eup %14594 }
 0x8e9   :  { %v14597_v3 = vpop.eup %14596  ;;  %v11919_v60 = vcombine.low %v14595_v42, %v14591_v9 }
 0x8ea   :  { %v11891_v4 = vmul.f32 0.125, %v11878_v2  ;;  %v11884_v17 = vadd.f32 %v11883_v46, %v11882_v13  ;;  %v14599_v44 = vpop.eup %14598  ;;  %v11918_v56 = vcombine.low %v14597_v3, %v14593_v24 }
 0x8eb   :  { %v14601_v18 = vpop.eup %14600  ;;  %v11935_v30 = vrot.slane %v11919_v60, %v15162_v57 }
 0x8ec   :  { %v11900_v62 = vadd.f32 1e-05, %v11891_v4  ;;  %v11892_v38 = vmul.f32 0.125, %v11884_v17  ;;  %v11920_v25 = vcombine.low %v14601_v18, %v14599_v44  ;;  %v11928_v22 = vrot.slane %v11918_v56, %v15162_v57  ;;  %v11969_v44 = vld [vmem:[#allocation16] sm:$0xff] }
 0x8ee   :  { %v11901_v43 = vadd.f32 1e-05, %v11892_v38  ;;  %14602 = vrsqrt.f32 %v11900_v62  ;;  %v11950_v19 = vcombine.low %v11928_v22, %v11935_v30  ;;  %v11942_v6 = vrot.slane %v11920_v25, %v15162_v57 }
 0x8f0   :  { %14604 = vrsqrt.f32 %v11901_v43  ;;  %v11958_v54 = vrot.slane %v11950_v19, %v15162_v57 }
 0x8fb   :  { %v14603_v55 = vpop.eup %14602 }
 0x8fd   :  { %v14605_v11 = vpop.eup %14604 }
 0x8fe   :  { %v11921_v8 = vcombine.low %v14603_v55, %v14605_v11 }
 0x900   :  { %v11949_v53 = vrot.slane %v11921_v8, %v15162_v57 }
 0x902   :  { %v11951_v51 = vcombine.low %v11942_v6, %v11949_v53 }
 0x904   :  { %v11965_v28 = vrot.slane %v11951_v51, %v15162_v57 }
 0x906   :  { %v11966_v16 = vcombine.low %v11958_v54, %v11965_v28 }
 0x908   :  { %v11968_v23 = vmul.f32 %v11966_v16, %v11893_v29 }
 0x90a   :  { %v15581_v49 = vrot.slane %v11968_v23, %v15170_v20  ;;  %v11994_v48 = vrot.slane %v11968_v23, %v15172_v26  ;;  %v15585_v61 = vrot.slane %v11968_v23, %v15174_v59  ;;  %v12002_v63 = vrot.slane %v11968_v23, %v15176_v31 }
 0x90b   :  { %v11974_v45 = vrot.slane %v11968_v23, %v15178_v32  ;;  %v11978_v13 = vrot.slane %v11968_v23, %v15180_v34  ;;  %v11982_v12 = vrot.slane %v11968_v23, %v15182_v37  ;;  %v11986_v58 = vrot.slane %v11968_v23, %v15184_v40 }
 0x90c   :  { %v12015_v2 = vmul.f32 %v15581_v49, %v15547_v35  ;;  %v12016_v46 = vmul.f32 %v11994_v48, %v15541_v15  ;;  %v12017_v36 = vmul.f32 %v15585_v61, %v15566_v52  ;;  %v12018_v4 = vmul.f32 %v12002_v63, %v15570_v47 }
 0x90d   :  { %v12011_v17 = vmul.f32 %v11974_v45, %v15537_v33  ;;  %v12012_v62 = vmul.f32 %v11978_v13, %v15533_v21  ;;  %v12013_v38 = vmul.f32 %v11982_v12, %v15535_v39  ;;  %v12014_v43 = vmul.f32 %v11986_v58, %v15531_v10 }
 0x90e   :  { %v12029_v9 = vcombine.low %v12015_v2, %v12016_v46  ;;  %v12030_v24 = vcombine.low %v12017_v36, %v12018_v4  ;;  %v12079_v18 = vmul.f32 %v11978_v13, %v15487_v27  ;;  %v12081_v55 = vmul.f32 %v11986_v58, %v15505_v1  ;;  %v14532_v58 = vld [vmem:[#allocation17 + $0x130] sm:$0xff]   ;;  %v14534_v46 = vld [vmem:[#allocation17 + $0x168] sm:$0xff]  }
 0x90f   :  { %v12027_v42 = vcombine.low %v12011_v17, %v12012_v62  ;;  %v12028_v3 = vcombine.low %v12013_v38, %v12014_v43  ;;  %v12078_v30 = vmul.f32 %v11974_v45, %v15483_v7  ;;  %v12080_v25 = vmul.f32 %v11982_v12, %v15501_v41  ;;  %v14531_v45 = vld [vmem:[#allocation17 + $0x1f0] sm:$0xff]   ;;  %v14535_v36 = vld [vmem:[#allocation17 + $0x1e8] sm:$0xff]   ;;  %v14538_v62 = vld [vmem:[#allocation17 + $0x160] sm:$0xff]  }
 0x910   :  { %v12051_v35 = vrot.slane %v12029_v9, %v15162_v57  ;;  %v12058_v15 = vrot.slane %v12030_v24, %v15162_v57  ;;  %v12083_v27 = vmul.f32 %v11994_v48, %v15511_v5  ;;  %v12085_v7 = vmul.f32 %v12002_v63, %v15561_v14  ;;  %v14528_v14 = vld [vmem:[#allocation17 + $0x138] sm:$0xff]   ;;  %v14533_v2 = vld [vmem:[#allocation17 + $0x1b0] sm:$0xff]   ;;  %v14536_v4 = vld [vmem:[#allocation17 + $0x128] sm:$0xff]  }
 0x911   :  { %v12037_v52 = vrot.slane %v12027_v42, %v15162_v57  ;;  %v12044_v47 = vrot.slane %v12028_v3, %v15162_v57  ;;  %v14529_v63 = vld [vmem:[#allocation17 + $0x1b8] sm:$0xff]   ;;  %v14537_v17 = vld [vmem:[#allocation17 + $0x1a8] sm:$0xff]   ;;  %v14539_v38 = vld [vmem:[#allocation17 + $0x1e0] sm:$0xff]  }
 0x912   :  { %v12060_v60 = vcombine.low %v12051_v35, %v12058_v15  ;;  %v14540_v43 = vld [vmem:[#allocation17 + $0x120] sm:$0xff]   ;;  %v14542_v24 = vld [vmem:[#allocation17 + $0x158] sm:$0xff]   ;;  %v14546_v15 = vld [vmem:[#allocation17 + $0x150] sm:$0xff]  }
 0x913   :  { %v12059_v33 = vcombine.low %v12037_v52, %v12044_v47  ;;  %v14541_v9 = vld [vmem:[#allocation17 + $0x1a0] sm:$0xff]   ;;  %v14543_v42 = vld [vmem:[#allocation17 + $0x1d8] sm:$0xff]   ;;  %v14547_v52 = vld [vmem:[#allocation17 + $0x1d0] sm:$0xff]  }
 0x914   :  { %v12074_v21 = vrot.slane %v12060_v60, %v15162_v57  ;;  %v14544_v3 = vld [vmem:[#allocation17 + $0x118] sm:$0xff]   ;;  %v14548_v47 = vld [vmem:[#allocation17 + $0x110] sm:$0xff]  }
 0x915   :  { %v12067_v39 = vrot.slane %v12059_v33, %v15162_v57  ;;  %v14545_v35 = vld [vmem:[#allocation17 + $0x198] sm:$0xff]   ;;  %v14549_v60 = vld [vmem:[#allocation17 + $0x190] sm:$0xff]   ;;  %v14550_v33 = vld [vmem:[#allocation17 + $0x148] sm:$0xff]  }
 0x917   :  { %v12075_v10 = vcombine.low %v12067_v39, %v12074_v21  ;;  %v14551_v21 = vld [vmem:[#allocation17 + $0x1c8] sm:$0xff]  }
 0x919   :  { %v15608_v56 = vsub.f32 %v11969_v44, %v12075_v10  ;;  %v12082_v10 = vmul.f32 %v15581_v49, %v15509_v50 }
 0x91b   :  { %v12094_v11 = vrot.slane %v15608_v56, %v15180_v34  ;;  %v12102_v22 = vrot.slane %v15608_v56, %v15184_v40  ;;  %v12090_v57 = vrot.slane %v15608_v56, %v15178_v32  ;;  %v12098_v8 = vrot.slane %v15608_v56, %v15182_v37 }
 0x91c   :  { %v12110_v1 = vrot.slane %v15608_v56, %v15172_v26  ;;  %v12118_v41 = vrot.slane %v15608_v56, %v15176_v31  ;;  %v14530_v31 = vld [vmem:[#allocation17 + $0x170] sm:$0xff]   ;;  %v12106_v39 = vrot.slane %v15608_v56, %v15170_v20  ;;  %v12114_v44 = vrot.slane %v15608_v56, %v15174_v59  ;;  %v14556_v20 = vld [vmem:[#allocation17 + $0x100] sm:$0xff]  }
 0x91d   :  { %v12128_v34 = vadd.f32 %v12094_v11, %v12079_v18  ;;  %v12130_v19 = vadd.f32 %v12102_v22, %v12081_v55  ;;  %v12127_v6 = vadd.f32 %v12090_v57, %v12078_v30  ;;  %v12129_v40 = vadd.f32 %v12098_v8, %v12080_v25  ;;  %v14552_v55 = vld [vmem:[#allocation17 + $0x108] sm:$0xff]   ;;  %v14554_v25 = vld [vmem:[#allocation17 + $0x140] sm:$0xff]  }
 0x91e   :  { %v12132_v53 = vadd.f32 %v12110_v1, %v12083_v27  ;;  %v12134_v51 = vadd.f32 %v12118_v41, %v12085_v7  ;;  %v12084_v18 = vmul.f32 %v15585_v61, %v15558_v0  ;;  %v14553_v30 = vld [vmem:[#allocation17 + $0x188] sm:$0xff]   ;;  %v14555_v11 = vld [vmem:[#allocation17 + $0x1c0] sm:$0xff]   ;;  %v12131_v22 = vadd.f32 %v12106_v39, %v12082_v10 }
 0x91f   :  { %v12136_v32 = vmax.f32 %v12128_v34, 0.0  ;;  %v12138_v54 = vmax.f32 %v12130_v19, 0.0  ;;  %v12135_v28 = vmax.f32 %v12127_v6, 0.0  ;;  %v12137_v37 = vmax.f32 %v12129_v40, 0.0  ;;  %v14557_v59 = vld [vmem:[#allocation17 + $0x180] sm:$0xff]  }
 0x920   :  { %v12140_v29 = vmax.f32 %v12132_v53, 0.0  ;;  %v12142_v5 = vmax.f32 %v12134_v51, 0.0  ;;  %v12133_v57 = vadd.f32 %v12114_v44, %v12084_v18  ;;  %v12139_v50 = vmax.f32 %v12131_v22, 0.0  ;;  %v14323_v40 = vld [vmem:[#allocation19] ss:$0 sm:$0xff] }
 0x921   :  { %v12144_v16 = vpack.c.bf16 %v12136_v32, %v12136_v32  ;;  %v12146_v23 = vpack.c.bf16 %v12138_v54, %v12138_v54  ;;  %v12143_v26 = vpack.c.bf16 %v12135_v28, %v12135_v28  ;;  %v12145_v48 = vpack.c.bf16 %v12137_v37, %v12137_v37 }
 0x922   :  { %v12148_v13 = vpack.c.bf16 %v12140_v29, %v12140_v29  ;;  %v12150_v12 = vpack.c.bf16 %v12142_v5, %v12142_v5  ;;  %v12141_v49 = vmax.f32 %v12133_v57, 0.0  ;;  %v12147_v0 = vpack.c.bf16 %v12139_v50, %v12139_v50 }
 0x923   :  { %12702 = vmatprep.mubr.bf16.mxu0 %v12144_v16  ;;  %12742 = vmatprep.mubr.bf16.mxu1 %v12146_v23 }
 0x924   :  { %12703 = vmatmul.mubr.bf16.vlgmr.msra.gmra.mxu0 %v12143_v26  ;;  %12743 = vmatmul.mubr.bf16.vlgmr.msra.gmra.mxu1 %v12145_v48  ;;  %v12149_v61 = vpack.c.bf16 %v12141_v49, %v12141_v49 }
 0x925   :  { %14433 = vmatpush3.bf16.msra.mxu0 %v14528_v14  ;;  %14455 = vmatpush3.bf16.msra.mxu1 %v14529_v63 }
 0x926   :  { %12782 = vmatprep.mubr.bf16.mxu0 %v12148_v13  ;;  %12822 = vmatprep.mubr.bf16.mxu1 %v12150_v12 }
 0x927   :  { %14434 = vmatprep.subr.bf16.mxu0 %v14530_v31  ;;  %14456 = vmatprep.subr.bf16.mxu1 %v14531_v45 }
 0x929   :  { %14435 = vmatpush3.bf16.msra.mxu0 %v14532_v58  ;;  %14457 = vmatpush3.bf16.msra.mxu1 %v14533_v2 }
 0x92a   :  { %14436 = vmatprep.subr.bf16.mxu0 %v14534_v46  ;;  %14458 = vmatprep.subr.bf16.mxu1 %v14535_v36 }
 0x92d   :  { %14437 = vmatpush3.bf16.msra.mxu0 %v14536_v4  ;;  %14459 = vmatpush3.bf16.msra.mxu1 %v14537_v17 }
 0x92e   :  { %14438 = vmatprep.subr.bf16.mxu0 %v14538_v62  ;;  %14460 = vmatprep.subr.bf16.mxu1 %v14539_v38 }
 0x931   :  { %14439 = vmatpush3.bf16.msra.mxu0 %v14540_v43  ;;  %14461 = vmatpush3.bf16.msra.mxu1 %v14541_v9 }
 0x932   :  { %14440 = vmatprep.subr.bf16.mxu0 %v14542_v24  ;;  %14462 = vmatprep.subr.bf16.mxu1 %v14543_v42 }
 0x935   :  { %14441 = vmatpush3.bf16.msra.mxu0 %v14544_v3  ;;  %14463 = vmatpush3.bf16.msra.mxu1 %v14545_v35 }
 0x936   :  { %14442 = vmatprep.subr.bf16.mxu0 %v14546_v15  ;;  %14464 = vmatprep.subr.bf16.mxu1 %v14547_v52 }
 0x939   :  { %14443 = vmatpush3.bf16.msra.mxu0 %v14548_v47  ;;  %14465 = vmatpush3.bf16.msra.mxu1 %v14549_v60 }
 0x93a   :  { %14444 = vmatprep.subr.bf16.mxu0 %v14550_v33  ;;  %14466 = vmatprep.subr.bf16.mxu1 %v14551_v21 }
 0x93d   :  { %14445 = vmatpush3.bf16.msra.mxu0 %v14552_v55  ;;  %14467 = vmatpush3.bf16.msra.mxu1 %v14553_v30 }
 0x93e   :  { %14446 = vmatprep.subr.bf16.mxu0 %v14554_v25  ;;  %14468 = vmatprep.subr.bf16.mxu1 %v14555_v11 }
 0x941   :  { %14447 = vmatpush3.bf16.msra.mxu0 %v14556_v20  ;;  %14469 = vmatpush3.bf16.msra.mxu1 %v14557_v59 }
 0x944   :  { %12783 = vmatmul.mubr.bf16.vlgmr.msra.gmra.mxu0 %v12147_v0  ;;  %12823 = vmatmul.mubr.bf16.vlgmr.msra.gmra.mxu1 %v12149_v61 }
 0x9e4   :  { %v14404_v56 = vpop.f32.mrf.mxu0  ;;  %v14426_v8 = vpop.f32.mrf.mxu1 }
 0x9e6   :  { %v14405_v27 = vpop.f32.mrf.mxu0  ;;  %v14427_v1 = vpop.f32.mrf.mxu1 }
 0x9e7   :  { %v14406_v6 = vadd.f32 %v14405_v27, %v14404_v56  ;;  %v14428_v54 = vadd.f32 %v14427_v1, %v14426_v8 }
 0x9e8   :  { %v14407_v7 = vpop.f32.mrf.mxu0  ;;  %v14429_v41 = vpop.f32.mrf.mxu1 }
 0x9e9   :  { %v12705_v53 = vadd.f32 %v14406_v6, %v14323_v40 }
 0x9ea   :  { %v14408_v34 = vpop.f32.mrf.mxu0  ;;  %v14430_v19 = vpop.f32.mrf.mxu1 }
 0x9eb   :  { %v12745_v29 = vadd.f32 %v14428_v54, %v12705_v53 }
 0xa04   :  { %v14448_v51 = vpop.f32.mrf.mxu0  ;;  %v14470_v32 = vpop.f32.mrf.mxu1 }
 0xa06   :  { %v14449_v28 = vpop.f32.mrf.mxu0  ;;  %v14471_v37 = vpop.f32.mrf.mxu1 }
 0xa07   :  { %v14450_v5 = vadd.f32 %v14449_v28, %v14448_v51  ;;  %v14472_v48 = vadd.f32 %v14471_v37, %v14470_v32 }
 0xa08   :  { %v14451_v16 = vpop.f32.mrf.mxu0  ;;  %v14473_v23 = vpop.f32.mrf.mxu1 }
 0xa09   :  { %v12785_v26 = vadd.f32 %v14450_v5, %v12745_v29 }
 0xa0a   :  { %v14452_v14 = vpop.f32.mrf.mxu0  ;;  %v14474_v63 = vpop.f32.mrf.mxu1 }
 0xa0b   :  { %v12825_v31 = vadd.f32 %v14472_v48, %v12785_v26 }
 0xa0d   :  { %12830 = vst [vmem:[#allocation20] sm:$0xff] %v12825_v31 }
 0xa0e   :  { %14837 = shalt.err (!%p14834_p3)
}
 0xa0f   :  { %12840 = dma.vmem_to_hbm [thread:$0]  %s12838_s24, 128, %s15651_s12, [#allocation4]  }
 0xa10   :  { %14858 = dma.done.wait [#allocation4], 128  }
 0xa11   :  { %14859 = vsyncadd [#allocation4], 4294967168 }
 0xa12   :  { %12844 = vsyncpa [#allocation3], 1 }
 0xa13   :  { %12845 = vsyncpa [#allocation6], 1 }
 0xa14   :  { %12846 = vsyncpa [#allocation9], 1 }
 0xa15   :  { %12847 = vsyncpa [#allocation12], 1 }
 0xa16   :  { %12848 = vsyncpa [#allocation15], 1 }
 0xa17   :  { %12849 = vsyncpa [#allocation18], 1 }
 0xa18   :  { %12850 = vsyncpa [#allocation4], 1 }

</bundles_post_ra>
